<compile_context>
chip_gen: v7x
topology: tpu7x:2x2x1
jax: 0.10.0
libtpu: 0.0.40
codegen_flags: <defaults>
</compile_context>

<pallas_src>
import functools

import jax
import jax.numpy as jnp
from jax.experimental import pallas as pl
from jax.experimental.pallas import tpu as pltpu


# ----------------------------- fused kernel ---------------------------------


def _basic_block_kernel(x_ref, w1_ref, b1_ref, w2_ref, b2_ref, o_ref,
                        xpad_ref, h1pad_ref, col_ref, *, H, W):
    B, _, _, Cin = x_ref.shape
    P = o_ref.shape[-1]            # padded output channels (multiple of 128)
    HW = H * W
    K1 = 9 * Cin                   # conv1 im2col depth
    K2 = 9 * P + Cin               # conv2 im2col depth + fused shortcut cols
    f32 = jnp.float32
    cdt = xpad_ref.dtype           # MXU operand dtype (bf16 by default)

    def zero_halo(pad_ref, C):
        # Zero only the 4 border strips; the interior is overwritten below.
        pad_ref[:, 0:1, :, :] = jnp.zeros((B, 1, W + 2, C), cdt)
        pad_ref[:, H + 1:H + 2, :, :] = jnp.zeros((B, 1, W + 2, C), cdt)
        pad_ref[:, :, 0:1, :] = jnp.zeros((B, H + 2, 1, C), cdt)
        pad_ref[:, :, W + 1:W + 2, :] = jnp.zeros((B, H + 2, 1, C), cdt)

    def im2col(pad_ref, C, with_shortcut):
        # Fill the shared col buffer: 9 tap blocks of width C per image, plus
        # (optionally) Cin shortcut columns holding the original x.
        def one_image(b, row_start):
            rows = pl.ds(row_start, HW)
            for t in range(9):
                dy, dx = divmod(t, 3)
                col_ref[rows, t * C:(t + 1) * C] = (
                    pad_ref[b, dy:dy + H, dx:dx + W, :].reshape(HW, C))
            if with_shortcut:
                col_ref[rows, 9 * P:9 * P + Cin] = (
                    x_ref[b].reshape(HW, Cin).astype(cdt))

        if B == 1:
            one_image(0, 0)
        else:
            def body(b, carry):
                one_image(b, pl.multiple_of(b * HW, HW))
                return carry
            jax.lax.fori_loop(0, B, body, 0)

    # ---- conv1: zero-padded scratch -> im2col (K = 9*Cin) -> one MXU matmul,
    #      folded-BN bias + ReLU fused. ----
    zero_halo(xpad_ref, Cin)
    xpad_ref[:, 1:H + 1, 1:W + 1, :] = x_ref[...].astype(cdt)
    im2col(xpad_ref, Cin, with_shortcut=False)
    h1 = jnp.dot(col_ref[:, :K1], w1_ref[...], preferred_element_type=f32)
    h1 = jnp.maximum(h1 + b1_ref[...].astype(f32), 0.0)          # (B*HW, P)

    # ---- conv2 + fused shortcut (x appended as extra K-columns), reusing the
    #      same col buffer; residual add comes out of the matmul itself. ----
    zero_halo(h1pad_ref, P)
    h1pad_ref[:, 1:H + 1, 1:W + 1, :] = h1.reshape(B, H, W, P).astype(cdt)
    im2col(h1pad_ref, P, with_shortcut=True)
    out = jnp.dot(col_ref[:, :K2], w2_ref[...], preferred_element_type=f32)
    out = jnp.maximum(out + b2_ref[...].astype(f32), 0.0)
    o_ref[...] = out.reshape(B, HW, P).astype(o_ref.dtype)


# ----------------------------- wrapper ---------------------------------------


def _round_up(x, m):
    return ((x + m - 1) // m) * m


def basic_block_forward(params, x_nchw, in_planes, planes, stride=1, *,
                        batch_block=1, compute_dtype=jnp.bfloat16,
                        lane_multiple=128):
    """Fused BasicBlock forward.  NCHW in / NCHW out like the PyTorch module.

    batch_block: images per grid step.  Keep scratch under ~48 MiB and
    grid = N/batch_block >= 2 on v7x (64 MiB VMEM, 2 TensorCores); raise it on
    v6e (128 MiB, single TC) so matmul row counts stay >= 512.
    """
    assert stride == 1  # TODO(synk): strided conv not implemented.
    N, Cin, H, W = x_nchw.shape
    assert Cin == in_planes and N % batch_block == 0
    has_proj = (in_planes != planes)            # stride==1, expansion==1
    B, HW = batch_block, H * W
    P_pad = _round_up(planes, lane_multiple)    # lane-dense output channels
    pc = P_pad - planes
    f32 = jnp.float32

    x = jnp.transpose(x_nchw, (0, 2, 3, 1))     # NCHW -> NHWC (glue)

    # Fold BN scale into conv weights, pad output channels to P_pad, and fuse
    # the shortcut (projection 1x1 or identity matrix) into w2/b2.
    w1 = params["conv1_w"] * params["bn1_scale"]                 # (3,3,Cin,pl)
    w1 = jnp.pad(w1, ((0, 0), (0, 0), (0, 0), (0, pc)))
    w1 = w1.reshape(9 * Cin, P_pad).astype(compute_dtype)
    b1 = jnp.pad(params["bn1_bias"], (0, pc)).reshape(1, P_pad).astype(f32)

    w2 = params["conv2_w"] * params["bn2_scale"]                 # (3,3,pl,pl)
    w2 = jnp.pad(w2, ((0, 0), (0, 0), (0, pc), (0, pc))).reshape(9 * P_pad, P_pad)
    if has_proj:
        wsc = params["sc_w"] * params["bnsc_scale"]              # (Cin, planes)
        bsc = params["bnsc_bias"]
    else:
        wsc = jnp.eye(Cin, planes, dtype=f32)                    # identity
        bsc = jnp.zeros((planes,), f32)
    wsc = jnp.pad(wsc, ((0, 0), (0, pc)))
    w2 = jnp.concatenate([w2, wsc], axis=0).astype(compute_dtype)  # (9P+Cin,P)
    b2 = jnp.pad(params["bn2_bias"] + bsc, (0, pc)).reshape(1, P_pad).astype(f32)

    K_max = max(9 * Cin, 9 * P_pad + Cin)

    # VMEM budget: scratch + double-buffered blocks + weights + f32 temps.
    cb = jnp.dtype(compute_dtype).itemsize
    xb = jnp.dtype(x.dtype).itemsize
    need = ((B * (H + 2) * (W + 2) * (Cin + P_pad) + B * HW * K_max) * cb
            + 2 * B * H * W * Cin * xb            # input blocks (2x buffered)
            + 2 * B * HW * P_pad * xb             # output blocks (2x buffered)
            + 2 * ((9 * Cin + 9 * P_pad + Cin) * P_pad * cb + 2 * P_pad * 4)
            + 2 * B * HW * P_pad * 4)             # f32 h1 / out live values
    vmem_limit = int(min(max(1.5 * need + (8 << 20), 32 << 20), 110 << 20))

    out_flat = pl.pallas_call(
        functools.partial(_basic_block_kernel, H=H, W=W),
        out_shape=jax.ShapeDtypeStruct((N, HW, P_pad), x.dtype),
        grid=(N // B,),
        in_specs=[
            pl.BlockSpec((B, H, W, Cin), lambda n: (n, 0, 0, 0)),
            pl.BlockSpec((9 * Cin, P_pad), lambda n: (0, 0)),
            pl.BlockSpec((1, P_pad), lambda n: (0, 0)),
            pl.BlockSpec((9 * P_pad + Cin, P_pad), lambda n: (0, 0)),
            pl.BlockSpec((1, P_pad), lambda n: (0, 0)),
        ],
        out_specs=pl.BlockSpec((B, HW, P_pad), lambda n: (n, 0, 0)),
        scratch_shapes=[
            pltpu.VMEM((B, H + 2, W + 2, Cin), compute_dtype),    # padded x
            pltpu.VMEM((B, H + 2, W + 2, P_pad), compute_dtype),  # padded h1
            pltpu.VMEM((B * HW, K_max), compute_dtype),           # shared im2col
        ],
        compiler_params=pltpu.CompilerParams(
            dimension_semantics=("parallel",),
            vmem_limit_bytes=vmem_limit),
    )(x, w1, b1, w2, b2)

    out = out_flat[:, :, :planes].reshape(N, H, W, planes)
    return jnp.transpose(out, (0, 3, 1, 2))      # back to NCHW


# ----------------------------- params / reference ----------------------------


def _fold_bn(gamma, beta, mean, var, eps=1e-5):
    scale = gamma / jnp.sqrt(var + eps)
    return scale, beta - mean * scale


def init_basic_block_params(key, in_planes, planes):
    ks = jax.random.split(key, 8)

    def bn(k, c):
        k1, k2, k3, k4 = jax.random.split(k, 4)
        gamma = 1.0 + 0.1 * jax.random.normal(k1, (c,), jnp.float32)
        beta = 0.1 * jax.random.normal(k2, (c,), jnp.float32)
        mean = 0.1 * jax.random.normal(k3, (c,), jnp.float32)
        var = jnp.abs(jax.random.normal(k4, (c,), jnp.float32)) + 0.5
        return _fold_bn(gamma, beta, mean, var)

    p = {}
    p["conv1_w"] = 0.2 * jax.random.normal(ks[0], (3, 3, in_planes, planes),
                                           jnp.float32)  # HWIO
    p["bn1_scale"], p["bn1_bias"] = bn(ks[1], planes)
    p["conv2_w"] = 0.2 * jax.random.normal(ks[2], (3, 3, planes, planes),
                                           jnp.float32)
    p["bn2_scale"], p["bn2_bias"] = bn(ks[3], planes)
    if in_planes != planes:  # stride==1, expansion==1
        p["sc_w"] = 0.2 * jax.random.normal(ks[4], (in_planes, planes),
                                            jnp.float32)
        p["bnsc_scale"], p["bnsc_bias"] = bn(ks[5], planes)
    return p


def _ref_forward(params, x_nchw, in_planes, planes):
    x = jnp.transpose(x_nchw, (0, 2, 3, 1))

    def conv3(x, w):
        return jax.lax.conv_general_dilated(
            x, w, window_strides=(1, 1), padding=[(1, 1), (1, 1)],
            dimension_numbers=("NHWC", "HWIO", "NHWC"))

    out = conv3(x, params["conv1_w"]) * params["bn1_scale"] + params["bn1_bias"]
    out = jnp.maximum(out, 0.0)
    out = conv3(out, params["conv2_w"]) * params["bn2_scale"] + params["bn2_bias"]
    if in_planes != planes:
        sc = jnp.einsum("nhwc,cd->nhwd", x, params["sc_w"])
        sc = sc * params["bnsc_scale"] + params["bnsc_bias"]
    else:
        sc = x
    out = jnp.maximum(out + sc, 0.0)
    return jnp.transpose(out, (0, 3, 1, 2))


# ----------------------------- main ------------------------------------------


if __name__ == "__main__":
    key = jax.random.PRNGKey(0)
    k1, k2, k3, k4 = jax.random.split(key, 4)

    # Case 1: projection shortcut, default bf16 MXU operands, 1 image per grid
    # step (grid=2 so both v7x TensorCores would be used).
    N, in_planes, planes, H, W = 2, 4, 8, 16, 16
    x = jax.random.normal(k1, (N, in_planes, H, W), jnp.float32)
    params = init_basic_block_params(k2, in_planes, planes)
    out = basic_block_forward(params, x, in_planes, planes, batch_block=1)
    out = jax.block_until_ready(out)
    assert out.shape == (N, planes, H, W)
    ref = _ref_forward(params, x, in_planes, planes)
    err = float(jnp.max(jnp.abs(out - ref)))
    tol = 2.5e-2 * float(jnp.max(jnp.abs(ref))) + 2.5e-2   # bf16 operands
    assert err < tol, f"proj-shortcut (bf16) mismatch: {err} >= {tol}"

    # Case 2: identity shortcut, f32 operands (tight tolerance), whole batch in
    # one grid step (exercises the fori_loop im2col path and shared col reuse).
    in_planes2 = planes2 = 8
    x2 = jax.random.normal(k3, (N, in_planes2, H, W), jnp.float32)
    params2 = init_basic_block_params(k4, in_planes2, planes2)
    out2 = basic_block_forward(params2, x2, in_planes2, planes2,
                               batch_block=N, compute_dtype=jnp.float32)
    out2 = jax.block_until_ready(out2)
    err2 = float(jnp.max(jnp.abs(out2 - _ref_forward(params2, x2,
                                                     in_planes2, planes2))))
    assert err2 < 5e-4, f"identity-shortcut mismatch: max abs err = {err2}"

    print("KERNEL_OK")
</pallas_src>

<mosaic_0001>
module attributes {stable_mosaic.version = 11 : i64} {
  func.func @_basic_block_kernel(%arg0: i32, %arg1: memref<1x16x16x4xf32, #tpu.memory_space<vmem>>, %arg2: memref<36x128xbf16, #tpu.memory_space<vmem>>, %arg3: memref<1x128xf32, #tpu.memory_space<vmem>>, %arg4: memref<1156x128xbf16, #tpu.memory_space<vmem>>, %arg5: memref<1x128xf32, #tpu.memory_space<vmem>>, %arg6: memref<1x256x128xf32, #tpu.memory_space<vmem>>, %arg7: memref<1x18x18x4xbf16, #tpu.memory_space<vmem>>, %arg8: memref<1x18x18x128xbf16, #tpu.memory_space<vmem>>, %arg9: memref<256x1156xbf16, #tpu.memory_space<vmem>>) attributes {dimension_semantics = [#tpu.dimension_semantics<parallel>], iteration_bounds = array<i64: 2>, scalar_prefetch = 0 : i64, scratch_operands = 3 : i64, tpu.core_type = #tpu.core_type<tc>, window_params = [{transform_indices = @transform_0, window_bounds = array<i64: 1, 16, 16, 4>}, {pipeline_mode = #tpu.pipeline_mode<synchronous>, transform_indices = @transform_1, window_bounds = array<i64: 36, 128>}, {pipeline_mode = #tpu.pipeline_mode<synchronous>, transform_indices = @transform_2, window_bounds = array<i64: 1, 128>}, {pipeline_mode = #tpu.pipeline_mode<synchronous>, transform_indices = @transform_3, window_bounds = array<i64: 1156, 128>}, {pipeline_mode = #tpu.pipeline_mode<synchronous>, transform_indices = @transform_4, window_bounds = array<i64: 1, 128>}, {transform_indices = @transform_5, window_bounds = array<i64: 1, 256, 128>}]} {
    %cst = arith.constant 0.000000e+00 : bf16
    %0 = vector.broadcast %cst : bf16 to vector<1x1x18x4xbf16>
    %c0 = arith.constant 0 : index
    %c0_0 = arith.constant 0 : index
    %c0_1 = arith.constant 0 : index
    %c0_2 = arith.constant 0 : index
    %1 = vector.load %arg7[%c0, %c0_0, %c0_1, %c0_2] : memref<1x18x18x4xbf16, #tpu.memory_space<vmem>>, vector<1x1x18x4xbf16>
    tpu.vector_store %arg7[%c0, %c0_0, %c0_1, %c0_2], %0 {strides = array<i32>} : memref<1x18x18x4xbf16, #tpu.memory_space<vmem>>, vector<1x1x18x4xbf16>,
    %cst_3 = arith.constant 0.000000e+00 : bf16
    %2 = vector.broadcast %cst_3 : bf16 to vector<1x1x18x4xbf16>
    %c0_4 = arith.constant 0 : index
    %c17 = arith.constant 17 : index
    %c0_5 = arith.constant 0 : index
    %c0_6 = arith.constant 0 : index
    %3 = vector.load %arg7[%c0_4, %c17, %c0_5, %c0_6] : memref<1x18x18x4xbf16, #tpu.memory_space<vmem>>, vector<1x1x18x4xbf16>
    tpu.vector_store %arg7[%c0_4, %c17, %c0_5, %c0_6], %2 {strides = array<i32>} : memref<1x18x18x4xbf16, #tpu.memory_space<vmem>>, vector<1x1x18x4xbf16>,
    %cst_7 = arith.constant 0.000000e+00 : bf16
    %4 = vector.broadcast %cst_7 : bf16 to vector<1x18x1x4xbf16>
    %c0_8 = arith.constant 0 : index
    %c0_9 = arith.constant 0 : index
    %c0_10 = arith.constant 0 : index
    %c0_11 = arith.constant 0 : index
    %5 = vector.load %arg7[%c0_8, %c0_9, %c0_10, %c0_11] : memref<1x18x18x4xbf16, #tpu.memory_space<vmem>>, vector<1x18x1x4xbf16>
    tpu.vector_store %arg7[%c0_8, %c0_9, %c0_10, %c0_11], %4 {strides = array<i32>} : memref<1x18x18x4xbf16, #tpu.memory_space<vmem>>, vector<1x18x1x4xbf16>,
    %cst_12 = arith.constant 0.000000e+00 : bf16
    %6 = vector.broadcast %cst_12 : bf16 to vector<1x18x1x4xbf16>
    %c0_13 = arith.constant 0 : index
    %c0_14 = arith.constant 0 : index
    %c17_15 = arith.constant 17 : index
    %c0_16 = arith.constant 0 : index
    %7 = vector.load %arg7[%c0_13, %c0_14, %c17_15, %c0_16] : memref<1x18x18x4xbf16, #tpu.memory_space<vmem>>, vector<1x18x1x4xbf16>
    tpu.vector_store %arg7[%c0_13, %c0_14, %c17_15, %c0_16], %6 {strides = array<i32>} : memref<1x18x18x4xbf16, #tpu.memory_space<vmem>>, vector<1x18x1x4xbf16>,
    %c0_17 = arith.constant 0 : index
    %c0_18 = arith.constant 0 : index
    %c0_19 = arith.constant 0 : index
    %c0_20 = arith.constant 0 : index
    %8 = vector.load %arg1[%c0_17, %c0_18, %c0_19, %c0_20] : memref<1x16x16x4xf32, #tpu.memory_space<vmem>>, vector<1x16x16x4xf32>
    %9 = arith.truncf %8 : vector<1x16x16x4xf32> to vector<1x16x16x4xbf16>
    %c0_21 = arith.constant 0 : index
    %c1 = arith.constant 1 : index
    %c1_22 = arith.constant 1 : index
    %c0_23 = arith.constant 0 : index
    %10 = vector.load %arg7[%c0_21, %c1, %c1_22, %c0_23] : memref<1x18x18x4xbf16, #tpu.memory_space<vmem>>, vector<1x16x16x4xbf16>
    tpu.vector_store %arg7[%c0_21, %c1, %c1_22, %c0_23], %9 {strides = array<i32>} : memref<1x18x18x4xbf16, #tpu.memory_space<vmem>>, vector<1x16x16x4xbf16>,
    %c0_24 = arith.constant 0 : index
    %c0_25 = arith.constant 0 : index
    %c0_26 = arith.constant 0 : index
    %c0_27 = arith.constant 0 : index
    %11 = vector.load %arg7[%c0_24, %c0_25, %c0_26, %c0_27] : memref<1x18x18x4xbf16, #tpu.memory_space<vmem>>, vector<1x16x16x4xbf16>
    %12 = vector.shape_cast %11 : vector<1x16x16x4xbf16> to vector<16x16x4xbf16>
    %13 = vector.shape_cast %12 : vector<16x16x4xbf16> to vector<256x4xbf16>
    %c0_28 = arith.constant 0 : index
    %c0_29 = arith.constant 0 : index
    %14 = vector.load %arg9[%c0_28, %c0_29] : memref<256x1156xbf16, #tpu.memory_space<vmem>>, vector<256x4xbf16>
    tpu.vector_store %arg9[%c0_28, %c0_29], %13 {strides = array<i32>} : memref<256x1156xbf16, #tpu.memory_space<vmem>>, vector<256x4xbf16>,
    %c0_30 = arith.constant 0 : index
    %c0_31 = arith.constant 0 : index
    %c1_32 = arith.constant 1 : index
    %c0_33 = arith.constant 0 : index
    %15 = vector.load %arg7[%c0_30, %c0_31, %c1_32, %c0_33] : memref<1x18x18x4xbf16, #tpu.memory_space<vmem>>, vector<1x16x16x4xbf16>
    %16 = vector.shape_cast %15 : vector<1x16x16x4xbf16> to vector<16x16x4xbf16>
    %17 = vector.shape_cast %16 : vector<16x16x4xbf16> to vector<256x4xbf16>
    %c0_34 = arith.constant 0 : index
    %c4 = arith.constant 4 : index
    %18 = vector.load %arg9[%c0_34, %c4] : memref<256x1156xbf16, #tpu.memory_space<vmem>>, vector<256x4xbf16>
    tpu.vector_store %arg9[%c0_34, %c4], %17 {strides = array<i32>} : memref<256x1156xbf16, #tpu.memory_space<vmem>>, vector<256x4xbf16>,
    %c0_35 = arith.constant 0 : index
    %c0_36 = arith.constant 0 : index
    %c2 = arith.constant 2 : index
    %c0_37 = arith.constant 0 : index
    %19 = vector.load %arg7[%c0_35, %c0_36, %c2, %c0_37] : memref<1x18x18x4xbf16, #tpu.memory_space<vmem>>, vector<1x16x16x4xbf16>
    %20 = vector.shape_cast %19 : vector<1x16x16x4xbf16> to vector<16x16x4xbf16>
    %21 = vector.shape_cast %20 : vector<16x16x4xbf16> to vector<256x4xbf16>
    %c0_38 = arith.constant 0 : index
    %c8 = arith.constant 8 : index
    %22 = vector.load %arg9[%c0_38, %c8] : memref<256x1156xbf16, #tpu.memory_space<vmem>>, vector<256x4xbf16>
    tpu.vector_store %arg9[%c0_38, %c8], %21 {strides = array<i32>} : memref<256x1156xbf16, #tpu.memory_space<vmem>>, vector<256x4xbf16>,
    %c0_39 = arith.constant 0 : index
    %c1_40 = arith.constant 1 : index
    %c0_41 = arith.constant 0 : index
    %c0_42 = arith.constant 0 : index
    %23 = vector.load %arg7[%c0_39, %c1_40, %c0_41, %c0_42] : memref<1x18x18x4xbf16, #tpu.memory_space<vmem>>, vector<1x16x16x4xbf16>
    %24 = vector.shape_cast %23 : vector<1x16x16x4xbf16> to vector<16x16x4xbf16>
    %25 = vector.shape_cast %24 : vector<16x16x4xbf16> to vector<256x4xbf16>
    %c0_43 = arith.constant 0 : index
    %c12 = arith.constant 12 : index
    %26 = vector.load %arg9[%c0_43, %c12] : memref<256x1156xbf16, #tpu.memory_space<vmem>>, vector<256x4xbf16>
    tpu.vector_store %arg9[%c0_43, %c12], %25 {strides = array<i32>} : memref<256x1156xbf16, #tpu.memory_space<vmem>>, vector<256x4xbf16>,
    %c0_44 = arith.constant 0 : index
    %c1_45 = arith.constant 1 : index
    %c1_46 = arith.constant 1 : index
    %c0_47 = arith.constant 0 : index
    %27 = vector.load %arg7[%c0_44, %c1_45, %c1_46, %c0_47] : memref<1x18x18x4xbf16, #tpu.memory_space<vmem>>, vector<1x16x16x4xbf16>
    %28 = vector.shape_cast %27 : vector<1x16x16x4xbf16> to vector<16x16x4xbf16>
    %29 = vector.shape_cast %28 : vector<16x16x4xbf16> to vector<256x4xbf16>
    %c0_48 = arith.constant 0 : index
    %c16 = arith.constant 16 : index
    %30 = vector.load %arg9[%c0_48, %c16] : memref<256x1156xbf16, #tpu.memory_space<vmem>>, vector<256x4xbf16>
    tpu.vector_store %arg9[%c0_48, %c16], %29 {strides = array<i32>} : memref<256x1156xbf16, #tpu.memory_space<vmem>>, vector<256x4xbf16>,
    %c0_49 = arith.constant 0 : index
    %c1_50 = arith.constant 1 : index
    %c2_51 = arith.constant 2 : index
    %c0_52 = arith.constant 0 : index
    %31 = vector.load %arg7[%c0_49, %c1_50, %c2_51, %c0_52] : memref<1x18x18x4xbf16, #tpu.memory_space<vmem>>, vector<1x16x16x4xbf16>
    %32 = vector.shape_cast %31 : vector<1x16x16x4xbf16> to vector<16x16x4xbf16>
    %33 = vector.shape_cast %32 : vector<16x16x4xbf16> to vector<256x4xbf16>
    %c0_53 = arith.constant 0 : index
    %c20 = arith.constant 20 : index
    %34 = vector.load %arg9[%c0_53, %c20] : memref<256x1156xbf16, #tpu.memory_space<vmem>>, vector<256x4xbf16>
    tpu.vector_store %arg9[%c0_53, %c20], %33 {strides = array<i32>} : memref<256x1156xbf16, #tpu.memory_space<vmem>>, vector<256x4xbf16>,
    %c0_54 = arith.constant 0 : index
    %c2_55 = arith.constant 2 : index
    %c0_56 = arith.constant 0 : index
    %c0_57 = arith.constant 0 : index
    %35 = vector.load %arg7[%c0_54, %c2_55, %c0_56, %c0_57] : memref<1x18x18x4xbf16, #tpu.memory_space<vmem>>, vector<1x16x16x4xbf16>
    %36 = vector.shape_cast %35 : vector<1x16x16x4xbf16> to vector<16x16x4xbf16>
    %37 = vector.shape_cast %36 : vector<16x16x4xbf16> to vector<256x4xbf16>
    %c0_58 = arith.constant 0 : index
    %c24 = arith.constant 24 : index
    %38 = vector.load %arg9[%c0_58, %c24] : memref<256x1156xbf16, #tpu.memory_space<vmem>>, vector<256x4xbf16>
    tpu.vector_store %arg9[%c0_58, %c24], %37 {strides = array<i32>} : memref<256x1156xbf16, #tpu.memory_space<vmem>>, vector<256x4xbf16>,
    %c0_59 = arith.constant 0 : index
    %c2_60 = arith.constant 2 : index
    %c1_61 = arith.constant 1 : index
    %c0_62 = arith.constant 0 : index
    %39 = vector.load %arg7[%c0_59, %c2_60, %c1_61, %c0_62] : memref<1x18x18x4xbf16, #tpu.memory_space<vmem>>, vector<1x16x16x4xbf16>
    %40 = vector.shape_cast %39 : vector<1x16x16x4xbf16> to vector<16x16x4xbf16>
    %41 = vector.shape_cast %40 : vector<16x16x4xbf16> to vector<256x4xbf16>
    %c0_63 = arith.constant 0 : index
    %c28 = arith.constant 28 : index
    %42 = vector.load %arg9[%c0_63, %c28] : memref<256x1156xbf16, #tpu.memory_space<vmem>>, vector<256x4xbf16>
    tpu.vector_store %arg9[%c0_63, %c28], %41 {strides = array<i32>} : memref<256x1156xbf16, #tpu.memory_space<vmem>>, vector<256x4xbf16>,
    %c0_64 = arith.constant 0 : index
    %c2_65 = arith.constant 2 : index
    %c2_66 = arith.constant 2 : index
    %c0_67 = arith.constant 0 : index
    %43 = vector.load %arg7[%c0_64, %c2_65, %c2_66, %c0_67] : memref<1x18x18x4xbf16, #tpu.memory_space<vmem>>, vector<1x16x16x4xbf16>
    %44 = vector.shape_cast %43 : vector<1x16x16x4xbf16> to vector<16x16x4xbf16>
    %45 = vector.shape_cast %44 : vector<16x16x4xbf16> to vector<256x4xbf16>
    %c0_68 = arith.constant 0 : index
    %c32 = arith.constant 32 : index
    %46 = vector.load %arg9[%c0_68, %c32] : memref<256x1156xbf16, #tpu.memory_space<vmem>>, vector<256x4xbf16>
    tpu.vector_store %arg9[%c0_68, %c32], %45 {strides = array<i32>} : memref<256x1156xbf16, #tpu.memory_space<vmem>>, vector<256x4xbf16>,
    %c0_69 = arith.constant 0 : index
    %c0_70 = arith.constant 0 : index
    %47 = vector.load %arg9[%c0_69, %c0_70] : memref<256x1156xbf16, #tpu.memory_space<vmem>>, vector<256x36xbf16>
    %c0_71 = arith.constant 0 : index
    %c0_72 = arith.constant 0 : index
    %48 = vector.load %arg2[%c0_71, %c0_72] : memref<36x128xbf16, #tpu.memory_space<vmem>>, vector<36x128xbf16>
    %cst_73 = arith.constant dense<0.000000e+00> : vector<256x128xf32>
    %49 = tpu.matmul %47, %48, %cst_73 {dimension_numbers = #tpu.dot_dimension_numbers<[1], [0], [0], [1], [0, 0, 1, 1], [], []>} : vector<256x36xbf16>, vector<36x128xbf16>, vector<256x128xf32> -> vector<256x128xf32>
    %c0_74 = arith.constant 0 : index
    %c0_75 = arith.constant 0 : index
    %50 = vector.load %arg3[%c0_74, %c0_75] : memref<1x128xf32, #tpu.memory_space<vmem>>, vector<1x128xf32>
    %51 = vector.broadcast %50 : vector<1x128xf32> to vector<256x128xf32>
    %52 = arith.addf %49, %51 : vector<256x128xf32>
    %cst_76 = arith.constant 0.000000e+00 : f32
    %53 = vector.broadcast %cst_76 : f32 to vector<256x128xf32>
    %54 = arith.maximumf %52, %53 : vector<256x128xf32>
    %cst_77 = arith.constant 0.000000e+00 : bf16
    %55 = vector.broadcast %cst_77 : bf16 to vector<1x1x18x128xbf16>
    %c0_78 = arith.constant 0 : index
    %c0_79 = arith.constant 0 : index
    %c0_80 = arith.constant 0 : index
    %c0_81 = arith.constant 0 : index
    %56 = vector.load %arg8[%c0_78, %c0_79, %c0_80, %c0_81] : memref<1x18x18x128xbf16, #tpu.memory_space<vmem>>, vector<1x1x18x128xbf16>
    tpu.vector_store %arg8[%c0_78, %c0_79, %c0_80, %c0_81], %55 {strides = array<i32>} : memref<1x18x18x128xbf16, #tpu.memory_space<vmem>>, vector<1x1x18x128xbf16>,
    %cst_82 = arith.constant 0.000000e+00 : bf16
    %57 = vector.broadcast %cst_82 : bf16 to vector<1x1x18x128xbf16>
    %c0_83 = arith.constant 0 : index
    %c17_84 = arith.constant 17 : index
    %c0_85 = arith.constant 0 : index
    %c0_86 = arith.constant 0 : index
    %58 = vector.load %arg8[%c0_83, %c17_84, %c0_85, %c0_86] : memref<1x18x18x128xbf16, #tpu.memory_space<vmem>>, vector<1x1x18x128xbf16>
    tpu.vector_store %arg8[%c0_83, %c17_84, %c0_85, %c0_86], %57 {strides = array<i32>} : memref<1x18x18x128xbf16, #tpu.memory_space<vmem>>, vector<1x1x18x128xbf16>,
    %cst_87 = arith.constant 0.000000e+00 : bf16
    %59 = vector.broadcast %cst_87 : bf16 to vector<1x18x1x128xbf16>
    %c0_88 = arith.constant 0 : index
    %c0_89 = arith.constant 0 : index
    %c0_90 = arith.constant 0 : index
    %c0_91 = arith.constant 0 : index
    %60 = vector.load %arg8[%c0_88, %c0_89, %c0_90, %c0_91] : memref<1x18x18x128xbf16, #tpu.memory_space<vmem>>, vector<1x18x1x128xbf16>
    tpu.vector_store %arg8[%c0_88, %c0_89, %c0_90, %c0_91], %59 {strides = array<i32>} : memref<1x18x18x128xbf16, #tpu.memory_space<vmem>>, vector<1x18x1x128xbf16>,
    %cst_92 = arith.constant 0.000000e+00 : bf16
    %61 = vector.broadcast %cst_92 : bf16 to vector<1x18x1x128xbf16>
    %c0_93 = arith.constant 0 : index
    %c0_94 = arith.constant 0 : index
    %c17_95 = arith.constant 17 : index
    %c0_96 = arith.constant 0 : index
    %62 = vector.load %arg8[%c0_93, %c0_94, %c17_95, %c0_96] : memref<1x18x18x128xbf16, #tpu.memory_space<vmem>>, vector<1x18x1x128xbf16>
    tpu.vector_store %arg8[%c0_93, %c0_94, %c17_95, %c0_96], %61 {strides = array<i32>} : memref<1x18x18x128xbf16, #tpu.memory_space<vmem>>, vector<1x18x1x128xbf16>,
    %63 = vector.shape_cast %54 : vector<256x128xf32> to vector<1x16x16x128xf32>
    %64 = arith.truncf %63 : vector<1x16x16x128xf32> to vector<1x16x16x128xbf16>
    %c0_97 = arith.constant 0 : index
    %c1_98 = arith.constant 1 : index
    %c1_99 = arith.constant 1 : index
    %c0_100 = arith.constant 0 : index
    %65 = vector.load %arg8[%c0_97, %c1_98, %c1_99, %c0_100] : memref<1x18x18x128xbf16, #tpu.memory_space<vmem>>, vector<1x16x16x128xbf16>
    tpu.vector_store %arg8[%c0_97, %c1_98, %c1_99, %c0_100], %64 {strides = array<i32>} : memref<1x18x18x128xbf16, #tpu.memory_space<vmem>>, vector<1x16x16x128xbf16>,
    %c0_101 = arith.constant 0 : index
    %c0_102 = arith.constant 0 : index
    %c0_103 = arith.constant 0 : index
    %c0_104 = arith.constant 0 : index
    %66 = vector.load %arg8[%c0_101, %c0_102, %c0_103, %c0_104] : memref<1x18x18x128xbf16, #tpu.memory_space<vmem>>, vector<1x16x16x128xbf16>
    %67 = vector.shape_cast %66 : vector<1x16x16x128xbf16> to vector<16x16x128xbf16>
    %68 = vector.shape_cast %67 : vector<16x16x128xbf16> to vector<256x128xbf16>
    %c0_105 = arith.constant 0 : index
    %c0_106 = arith.constant 0 : index
    %69 = vector.load %arg9[%c0_105, %c0_106] : memref<256x1156xbf16, #tpu.memory_space<vmem>>, vector<256x128xbf16>
    tpu.vector_store %arg9[%c0_105, %c0_106], %68 {strides = array<i32>} : memref<256x1156xbf16, #tpu.memory_space<vmem>>, vector<256x128xbf16>,
    %c0_107 = arith.constant 0 : index
    %c0_108 = arith.constant 0 : index
    %c1_109 = arith.constant 1 : index
    %c0_110 = arith.constant 0 : index
    %70 = vector.load %arg8[%c0_107, %c0_108, %c1_109, %c0_110] : memref<1x18x18x128xbf16, #tpu.memory_space<vmem>>, vector<1x16x16x128xbf16>
    %71 = vector.shape_cast %70 : vector<1x16x16x128xbf16> to vector<16x16x128xbf16>
    %72 = vector.shape_cast %71 : vector<16x16x128xbf16> to vector<256x128xbf16>
    %c0_111 = arith.constant 0 : index
    %c128 = arith.constant 128 : index
    %73 = vector.load %arg9[%c0_111, %c128] : memref<256x1156xbf16, #tpu.memory_space<vmem>>, vector<256x128xbf16>
    tpu.vector_store %arg9[%c0_111, %c128], %72 {strides = array<i32>} : memref<256x1156xbf16, #tpu.memory_space<vmem>>, vector<256x128xbf16>,
    %c0_112 = arith.constant 0 : index
    %c0_113 = arith.constant 0 : index
    %c2_114 = arith.constant 2 : index
    %c0_115 = arith.constant 0 : index
    %74 = vector.load %arg8[%c0_112, %c0_113, %c2_114, %c0_115] : memref<1x18x18x128xbf16, #tpu.memory_space<vmem>>, vector<1x16x16x128xbf16>
    %75 = vector.shape_cast %74 : vector<1x16x16x128xbf16> to vector<16x16x128xbf16>
    %76 = vector.shape_cast %75 : vector<16x16x128xbf16> to vector<256x128xbf16>
    %c0_116 = arith.constant 0 : index
    %c256 = arith.constant 256 : index
    %77 = vector.load %arg9[%c0_116, %c256] : memref<256x1156xbf16, #tpu.memory_space<vmem>>, vector<256x128xbf16>
    tpu.vector_store %arg9[%c0_116, %c256], %76 {strides = array<i32>} : memref<256x1156xbf16, #tpu.memory_space<vmem>>, vector<256x128xbf16>,
    %c0_117 = arith.constant 0 : index
    %c1_118 = arith.constant 1 : index
    %c0_119 = arith.constant 0 : index
    %c0_120 = arith.constant 0 : index
    %78 = vector.load %arg8[%c0_117, %c1_118, %c0_119, %c0_120] : memref<1x18x18x128xbf16, #tpu.memory_space<vmem>>, vector<1x16x16x128xbf16>
    %79 = vector.shape_cast %78 : vector<1x16x16x128xbf16> to vector<16x16x128xbf16>
    %80 = vector.shape_cast %79 : vector<16x16x128xbf16> to vector<256x128xbf16>
    %c0_121 = arith.constant 0 : index
    %c384 = arith.constant 384 : index
    %81 = vector.load %arg9[%c0_121, %c384] : memref<256x1156xbf16, #tpu.memory_space<vmem>>, vector<256x128xbf16>
    tpu.vector_store %arg9[%c0_121, %c384], %80 {strides = array<i32>} : memref<256x1156xbf16, #tpu.memory_space<vmem>>, vector<256x128xbf16>,
    %c0_122 = arith.constant 0 : index
    %c1_123 = arith.constant 1 : index
    %c1_124 = arith.constant 1 : index
    %c0_125 = arith.constant 0 : index
    %82 = vector.load %arg8[%c0_122, %c1_123, %c1_124, %c0_125] : memref<1x18x18x128xbf16, #tpu.memory_space<vmem>>, vector<1x16x16x128xbf16>
    %83 = vector.shape_cast %82 : vector<1x16x16x128xbf16> to vector<16x16x128xbf16>
    %84 = vector.shape_cast %83 : vector<16x16x128xbf16> to vector<256x128xbf16>
    %c0_126 = arith.constant 0 : index
    %c512 = arith.constant 512 : index
    %85 = vector.load %arg9[%c0_126, %c512] : memref<256x1156xbf16, #tpu.memory_space<vmem>>, vector<256x128xbf16>
    tpu.vector_store %arg9[%c0_126, %c512], %84 {strides = array<i32>} : memref<256x1156xbf16, #tpu.memory_space<vmem>>, vector<256x128xbf16>,
    %c0_127 = arith.constant 0 : index
    %c1_128 = arith.constant 1 : index
    %c2_129 = arith.constant 2 : index
    %c0_130 = arith.constant 0 : index
    %86 = vector.load %arg8[%c0_127, %c1_128, %c2_129, %c0_130] : memref<1x18x18x128xbf16, #tpu.memory_space<vmem>>, vector<1x16x16x128xbf16>
    %87 = vector.shape_cast %86 : vector<1x16x16x128xbf16> to vector<16x16x128xbf16>
    %88 = vector.shape_cast %87 : vector<16x16x128xbf16> to vector<256x128xbf16>
    %c0_131 = arith.constant 0 : index
    %c640 = arith.constant 640 : index
    %89 = vector.load %arg9[%c0_131, %c640] : memref<256x1156xbf16, #tpu.memory_space<vmem>>, vector<256x128xbf16>
    tpu.vector_store %arg9[%c0_131, %c640], %88 {strides = array<i32>} : memref<256x1156xbf16, #tpu.memory_space<vmem>>, vector<256x128xbf16>,
    %c0_132 = arith.constant 0 : index
    %c2_133 = arith.constant 2 : index
    %c0_134 = arith.constant 0 : index
    %c0_135 = arith.constant 0 : index
    %90 = vector.load %arg8[%c0_132, %c2_133, %c0_134, %c0_135] : memref<1x18x18x128xbf16, #tpu.memory_space<vmem>>, vector<1x16x16x128xbf16>
    %91 = vector.shape_cast %90 : vector<1x16x16x128xbf16> to vector<16x16x128xbf16>
    %92 = vector.shape_cast %91 : vector<16x16x128xbf16> to vector<256x128xbf16>
    %c0_136 = arith.constant 0 : index
    %c768 = arith.constant 768 : index
    %93 = vector.load %arg9[%c0_136, %c768] : memref<256x1156xbf16, #tpu.memory_space<vmem>>, vector<256x128xbf16>
    tpu.vector_store %arg9[%c0_136, %c768], %92 {strides = array<i32>} : memref<256x1156xbf16, #tpu.memory_space<vmem>>, vector<256x128xbf16>,
    %c0_137 = arith.constant 0 : index
    %c2_138 = arith.constant 2 : index
    %c1_139 = arith.constant 1 : index
    %c0_140 = arith.constant 0 : index
    %94 = vector.load %arg8[%c0_137, %c2_138, %c1_139, %c0_140] : memref<1x18x18x128xbf16, #tpu.memory_space<vmem>>, vector<1x16x16x128xbf16>
    %95 = vector.shape_cast %94 : vector<1x16x16x128xbf16> to vector<16x16x128xbf16>
    %96 = vector.shape_cast %95 : vector<16x16x128xbf16> to vector<256x128xbf16>
    %c0_141 = arith.constant 0 : index
    %c896 = arith.constant 896 : index
    %97 = vector.load %arg9[%c0_141, %c896] : memref<256x1156xbf16, #tpu.memory_space<vmem>>, vector<256x128xbf16>
    tpu.vector_store %arg9[%c0_141, %c896], %96 {strides = array<i32>} : memref<256x1156xbf16, #tpu.memory_space<vmem>>, vector<256x128xbf16>,
    %c0_142 = arith.constant 0 : index
    %c2_143 = arith.constant 2 : index
    %c2_144 = arith.constant 2 : index
    %c0_145 = arith.constant 0 : index
    %98 = vector.load %arg8[%c0_142, %c2_143, %c2_144, %c0_145] : memref<1x18x18x128xbf16, #tpu.memory_space<vmem>>, vector<1x16x16x128xbf16>
    %99 = vector.shape_cast %98 : vector<1x16x16x128xbf16> to vector<16x16x128xbf16>
    %100 = vector.shape_cast %99 : vector<16x16x128xbf16> to vector<256x128xbf16>
    %c0_146 = arith.constant 0 : index
    %c1024 = arith.constant 1024 : index
    %101 = vector.load %arg9[%c0_146, %c1024] : memref<256x1156xbf16, #tpu.memory_space<vmem>>, vector<256x128xbf16>
    tpu.vector_store %arg9[%c0_146, %c1024], %100 {strides = array<i32>} : memref<256x1156xbf16, #tpu.memory_space<vmem>>, vector<256x128xbf16>,
    %c0_147 = arith.constant 0 : index
    %c0_148 = arith.constant 0 : index
    %c0_149 = arith.constant 0 : index
    %c0_150 = arith.constant 0 : index
    %102 = vector.load %arg1[%c0_147, %c0_148, %c0_149, %c0_150] : memref<1x16x16x4xf32, #tpu.memory_space<vmem>>, vector<1x16x16x4xf32>
    %103 = vector.shape_cast %102 : vector<1x16x16x4xf32> to vector<16x16x4xf32>
    %104 = vector.shape_cast %103 : vector<16x16x4xf32> to vector<256x4xf32>
    %105 = arith.truncf %104 : vector<256x4xf32> to vector<256x4xbf16>
    %c0_151 = arith.constant 0 : index
    %c1152 = arith.constant 1152 : index
    %106 = vector.load %arg9[%c0_151, %c1152] : memref<256x1156xbf16, #tpu.memory_space<vmem>>, vector<256x4xbf16>
    tpu.vector_store %arg9[%c0_151, %c1152], %105 {strides = array<i32>} : memref<256x1156xbf16, #tpu.memory_space<vmem>>, vector<256x4xbf16>,
    %c0_152 = arith.constant 0 : index
    %c0_153 = arith.constant 0 : index
    %107 = vector.load %arg9[%c0_152, %c0_153] : memref<256x1156xbf16, #tpu.memory_space<vmem>>, vector<256x1156xbf16>
    %c0_154 = arith.constant 0 : index
    %c0_155 = arith.constant 0 : index
    %108 = vector.load %arg4[%c0_154, %c0_155] : memref<1156x128xbf16, #tpu.memory_space<vmem>>, vector<1156x128xbf16>
    %cst_156 = arith.constant dense<0.000000e+00> : vector<256x128xf32>
    %109 = tpu.matmul %107, %108, %cst_156 {dimension_numbers = #tpu.dot_dimension_numbers<[1], [0], [0], [1], [0, 0, 1, 1], [], []>} : vector<256x1156xbf16>, vector<1156x128xbf16>, vector<256x128xf32> -> vector<256x128xf32>
    %c0_157 = arith.constant 0 : index
    %c0_158 = arith.constant 0 : index
    %110 = vector.load %arg5[%c0_157, %c0_158] : memref<1x128xf32, #tpu.memory_space<vmem>>, vector<1x128xf32>
    %111 = vector.broadcast %110 : vector<1x128xf32> to vector<256x128xf32>
    %112 = arith.addf %109, %111 : vector<256x128xf32>
    %cst_159 = arith.constant 0.000000e+00 : f32
    %113 = vector.broadcast %cst_159 : f32 to vector<256x128xf32>
    %114 = arith.maximumf %112, %113 : vector<256x128xf32>
    %115 = vector.shape_cast %114 : vector<256x128xf32> to vector<1x256x128xf32>
    %c0_160 = arith.constant 0 : index
    %c0_161 = arith.constant 0 : index
    %c0_162 = arith.constant 0 : index
    %116 = vector.load %arg6[%c0_160, %c0_161, %c0_162] : memref<1x256x128xf32, #tpu.memory_space<vmem>>, vector<1x256x128xf32>
    tpu.vector_store %arg6[%c0_160, %c0_161, %c0_162], %115 {strides = array<i32>} : memref<1x256x128xf32, #tpu.memory_space<vmem>>, vector<1x256x128xf32>,
    return
  }
  func.func @transform_0(%arg0: i32) -> (i32, i32, i32, i32) {
    %c0_i32 = arith.constant 0 : i32
    %c0_i32_0 = arith.constant 0 : i32
    %c0_i32_1 = arith.constant 0 : i32
    %c0_i32_2 = arith.constant 0 : i32
    return %arg0, %c0_i32, %c0_i32_0, %c0_i32_1 : i32, i32, i32, i32
  }
  func.func @transform_1(%arg0: i32) -> (i32, i32) {
    %c0_i32 = arith.constant 0 : i32
    %c0_i32_0 = arith.constant 0 : i32
    %c0_i32_1 = arith.constant 0 : i32
    return %c0_i32, %c0_i32_0 : i32, i32
  }
  func.func @transform_2(%arg0: i32) -> (i32, i32) {
    %c0_i32 = arith.constant 0 : i32
    %c0_i32_0 = arith.constant 0 : i32
    %c0_i32_1 = arith.constant 0 : i32
    return %c0_i32, %c0_i32_0 : i32, i32
  }
  func.func @transform_3(%arg0: i32) -> (i32, i32) {
    %c0_i32 = arith.constant 0 : i32
    %c0_i32_0 = arith.constant 0 : i32
    %c0_i32_1 = arith.constant 0 : i32
    return %c0_i32, %c0_i32_0 : i32, i32
  }
  func.func @transform_4(%arg0: i32) -> (i32, i32) {
    %c0_i32 = arith.constant 0 : i32
    %c0_i32_0 = arith.constant 0 : i32
    %c0_i32_1 = arith.constant 0 : i32
    return %c0_i32, %c0_i32_0 : i32, i32
  }
  func.func @transform_5(%arg0: i32) -> (i32, i32, i32) {
    %c0_i32 = arith.constant 0 : i32
    %c0_i32_0 = arith.constant 0 : i32
    %c0_i32_1 = arith.constant 0 : i32
    return %arg0, %c0_i32, %c0_i32_0 : i32, i32, i32
  }
}

</mosaic_0001>

<bundles_post_ra>
// kernel: tpu_custom_call.1
= control target key start
LH: loop header
LB: loop body
LE: loop exit
PB: predicated region body
PF: predicated region fallthrough
CT: control target
= control target key end

     0   :  { %10 = vsyncpa [#allocation6], 0  ;;  %s14408_s0 = inlined_call_operand.vmem [shape: f32[2,16,16,4], index: 0, kind: input, shape index: {}]   ;;  %s14409_s1 = inlined_call_operand.vmem [shape: bf16[36,128], index: 1, kind: input, shape index: {}]   ;;  %s14410_s2 = inlined_call_operand.vmem [shape: f32[1,128], index: 2, kind: input, shape index: {}]   ;;  %s14411_s3 = inlined_call_operand.vmem [shape: bf16[1156,128], index: 3, kind: input, shape index: {}]   ;;  %s14412_s4 = inlined_call_operand.vmem [shape: f32[1,128], index: 4, kind: input, shape index: {}]   ;;  %s14413_s5 = inlined_call_operand.hbm [shape: f32[2,256,128], index: 5, kind: output, shape index: {}]  }
   0x1   :  { %12 = vsyncpa [#allocation6 + $0x1], 0  ;;  %s11144_s18 = smov 0   ;;  %s11146_s19 = smov 0  }
   0x2   :  { %s11148_s20 = smov 0   ;;  %s11150_s21 = smov 0  }
   0x3 LB: > { %s11165_s22 = sadd.s32 4294967295, %s11101_s21   ;;  %s9593_s23 = sadd.s32 4294967294, %s11101_s21   ;;  %s11101_s21 = sphi %s11150_s21, %s14571_s21   ;;  %s11097_s20 = sphi %s11148_s20, %s14570_s20   ;;  %s11093_s19 = sphi %s11146_s19, %s14569_s19   ;;  %s11089_s18 = sphi %s11144_s18, %s14568_s18  }
   0x4   : > { %s11169_s24 = sadd.s32 1, %s11101_s21   ;;  %s135_s25 = sadd.s32 1, %s11097_s20 }
   0x5   : > { %s132_s26 = ssub.s32 %s11101_s21, %s11169_s24  ;;  %p145_p0 = scmp.ne.s32.totalorder %s11097_s20, %s11093_s19 }
   0x6   : > { %p133_p1 = scmp.eq.s32.totalorder %s132_s26, 0  ;;  %p146_p2 = scmp.eq.s32.totalorder %s11165_s22, 1 }
   0x7   : > { %p151_p3 = scmp.ne.s32.totalorder %s11093_s19, %s11089_s18  ;;  %p152_p4 = scmp.eq.s32.totalorder %s9593_s23, 1 }
   0x8   : > { %s11180_s27 = scalar_select %p133_p1, %s11097_s20, %s135_s25  }
   0x9   : > { %p11182_p5 = por %p146_p2, %p145_p0  ;;  %p11186_p6 = por %p152_p4, %p151_p3 }
   0xa   : > { %p9596_p7 = scmp.ge.s32.totalorder %s11101_s21, 1  ;;  %p190_p8 = scmp.lt.s32.totalorder %s11101_s21, 3 }
   0xc   : > { %p191_p9 = pnand %p9596_p7, %p190_p8 }
   0xe   : > { %194 = sbr.rel (%p191_p9) target bundleno = 1290 (0x50a), region = 40 }
  0x15   : > { %p218_p10 = scmp.lt.s32.totalorder %s11165_s22, 1  ;;  %vm14422_vm0 = vcmask 27648   ;;  %vm227_vm1 = vcmask 24576   ;;  %vm14415_vm2 = vsmask.f32 256  ;;  %v11103_v3 = vmov 0  }
  0x16   : > { %vm11195_vm3 = vmand %vm227_vm1, %vm14415_vm2  ;;  %v239_v1 = vld [vmem:[#allocation2 + $0xc] sm:$0x1]  ;;  %vm14414_vm4 = vsmask.f32 7938  ;;  %225 = vst.msk [vmem:[#allocation2] sm:$0xf] %vm14422_vm0, %v11103_v3 }
  0x17   : > { %s219_s30 = scalar_select %p218_p10, %s11165_s22, 1  ;;  %v240_v2 = vsel %vm11195_vm3, 0, %v239_v1  ;;  %226 = vst.msk [vmem:[#allocation2 + $0x4] sm:$0xf] %vm14422_vm0, %v11103_v3  ;;  %230 = vst.msk [vmem:[#allocation2 + $0xcc] sm:$0xf] %vm14422_vm0, %v11103_v3 }
  0x18   : > { %241 = vst [vmem:[#allocation2 + $0xc] sm:$0x1] %v240_v2  ;;  %228 = vst.msk [vmem:[#allocation2 + $0x8] sm:$0x1] %vm227_vm1, %v11103_v3  ;;  %v242_v4 = vld [vmem:[#allocation2 + $0x18] sm:$0x1] }
  0x19   : > { %231 = vst.msk [vmem:[#allocation2 + $0xd0] sm:$0xf] %vm14422_vm0, %v11103_v3  ;;  %4304 = vst [vmem:[#allocation3] sm:$0xf] %v11103_v3  ;;  %s10163_s6 = sshll.u32 %s219_s30, 8  ;;  %v243_v5 = vsel %vm11195_vm3, 0, %v242_v4 }
  0x1a   : > { %232 = vst.msk [vmem:[#allocation2 + $0xd4] sm:$0x1] %vm227_vm1, %v11103_v3  ;;  %4305 = vst [vmem:[#allocation3 + $0x4] sm:$0xf] %v11103_v3  ;;  %s11225_s9 = scalar_lea.vmem %s14408_s0, %s10163_s6  ;;  %v245_v7 = vld [vmem:[#allocation2 + $0x24] sm:$0x1] }
  0x1b   : > { %4306 = vst [vmem:[#allocation3 + $0x8] sm:$0x1] %v11103_v3  ;;  %4308 = vst [vmem:[#allocation3 + $0xcc] sm:$0xf] %v11103_v3  ;;  %v295_v8 = vld [vmem:[#allocation2 + $0x14] sm:$0x1] }
  0x1c   : > { %4309 = vst [vmem:[#allocation3 + $0xd0] sm:$0xf] %v11103_v3  ;;  %4310 = vst [vmem:[#allocation3 + $0xd4] sm:$0x1] %v11103_v3  ;;  %v346_v9 = vld [vmem:[%s11225_s9] sm:$0xff]  ;;  %v347_v10 = vld [vmem:[%s11225_s9 + $0x8] sm:$0xff] }
  0x1d   : > { %vm11229_vm5 = vmand %vm227_vm1, %vm14414_vm4  ;;  %244 = vst [vmem:[#allocation2 + $0x18] sm:$0x1] %v243_v5  ;;  %v348_v11 = vld [vmem:[%s11225_s9 + $0x10] sm:$0xff]  ;;  %v246_v12 = vsel %vm11195_vm3, 0, %v245_v7  ;;  %v10164_v14 = vpack.c.bf16 %v346_v9, %v346_v9  ;;  %v10165_v15 = vpack.c.bf16 %v347_v10, %v347_v10  ;;  %vm474_vm6 = vsmask.f32 4368 }
  0x1e   : > { %v296_v13 = vsel %vm11229_vm5, 0, %v295_v8  ;;  %v349_v16 = vld [vmem:[%s11225_s9 + $0x18] sm:$0xff]  ;;  %247 = vst [vmem:[#allocation2 + $0x24] sm:$0x1] %v246_v12  ;;  %v350_v17 = vld [vmem:[%s11225_s9 + $0x20] sm:$0xff]  ;;  %vm1700_vm7 = vcmask 1042432   ;;  %v10166_v18 = vpack.c.bf16 %v348_v11, %v348_v11  ;;  %vm11244_vm9 = vmor %vm14415_vm2, %vm474_vm6 }
  0x1f   : > { %297 = vst [vmem:[#allocation2 + $0x14] sm:$0x1] %v296_v13  ;;  %vm1701_vm8 = vcmask 1046532   ;;  %v10167_v19 = vpack.c.bf16 %v349_v16, %v349_v16  ;;  %v351_v20 = vld [vmem:[%s11225_s9 + $0x28] sm:$0xff]  ;;  %v477_v21 = vshrl.u32 %v10164_v14, 16  ;;  %v480_v22 = vshll.u32 %v10164_v14, 16  ;;  %vm11262_vm11 = vmand %vm14422_vm0, %vm14414_vm4 }
  0x20   : > { %v485_v23 = vshrl.u32 %v10165_v15, 16  ;;  %v488_v24 = vshll.u32 %v10165_v15, 16  ;;  %v292_v26 = vld [vmem:[#allocation2 + $0x8] sm:$0x1]  ;;  %v1604_v27 = vld [vmem:[#allocation2] sm:$0xe]  ;;  %v11248_v28 = vpack.c.bf16 %v350_v17, %v350_v17  ;;  %v11250_v29 = vpack.c.bf16 %v351_v20, %v351_v20  ;;  %vm11256_vm10 = vmor %vm1700_vm7, %vm1701_vm8 }
  0x21   : > { %v479_v30 = vrot.slane %v477_v21, 7  ;;  %v293_v32 = vsel %vm11229_vm5, 0, %v292_v26  ;;  %v1605_v33 = vld [vmem:[#allocation2 + $0x4] sm:$0xf]  ;;  %v9664_v35 = vrot.slane %v1604_v27, 9  ;;  %v494_v39 = vshrl.u32 %v10166_v18, 16 }
  0x22   : > { %v487_v31 = vrot.slane %v485_v23, 7  ;;  %v799_v37 = vld [vmem:[#allocation2 + $0xc] sm:$0xf]  ;;  %294 = vst [vmem:[#allocation2 + $0x8] sm:$0x1] %v293_v32  ;;  %v1705_v38 = vrot.slane %v1605_v33, 5 }
  0x23   : > { %v497_v40 = vshll.u32 %v10166_v18, 16  ;;  %v502_v41 = vshrl.u32 %v10167_v19, 16  ;;  %v482_v42 = vor.u32 %v480_v22, %v479_v30  ;;  %v483_v43 = vrot.slane %v479_v30, 4  ;;  %v236_v46 = vld [vmem:[#allocation2] sm:$0x1]  ;;  %s11104_s10 = smov 12  }
  0x24   : > { %v490_v44 = vor.u32 %v488_v24, %v487_v31  ;;  %v492_v45 = vrot.slane %v487_v31, 4  ;;  %v1057_v47 = vld [vmem:[#allocation2 + $0x4] sm:$0xf]  ;;  %v11268_v48 = vsel %vm11256_vm10, %v9664_v35, %v1705_v38  ;;  %v1707_v49 = vrot.slane %v1705_v38, 4  ;;  %v806_v55 = vld [vmem:[#allocation2 + $0x18] sm:$0xf] }
  0x25   : > { %v496_v50 = vrot.slane %v494_v39, 7  ;;  %v11270_v51 = vrot.slane %v502_v41, 7  ;;  %v800_v53 = vsel %vm11262_vm11, %v482_v42, %v799_v37  ;;  %v505_v54 = vshll.u32 %v10167_v19, 16  ;;  %v298_v4 = vld [vmem:[#allocation2 + $0x20] sm:$0x1]  ;;  %v352_v31 = vld [vmem:[%s11225_s9 + $0x30] sm:$0xff] }
  0x26   : > { %v491_v52 = vsel %vm11244_vm9, %v483_v43, %v490_v44  ;;  %v237_v56 = vsel %vm11195_vm3, 0, %v236_v46  ;;  %801 = vst [vmem:[#allocation2 + $0xc] sm:$0xf] %v800_v53  ;;  %v1117_v60 = vshll.u32 %v1057_v47, 16  ;;  %v803_v61 = vld [vmem:[#allocation2 + $0x14] sm:$0x1] }
  0x27   : > { %802 = vst.msk [vmem:[#allocation2 + $0x10] sm:$0xf] %vm14422_vm0, %v491_v52  ;;  %v499_v57 = vor.u32 %v497_v40, %v496_v50  ;;  %v500_v58 = vrot.slane %v496_v50, 4  ;;  %v509_v59 = vrot.slane %v11270_v51, 4  ;;  %238 = vst [vmem:[#allocation2] sm:$0x1] %v237_v56  ;;  %v507_v62 = vor.u32 %v505_v54, %v11270_v51 }
  0x28   : > { %vm1104_vm12 = vsmask.f32 3328  ;;  %vm1105_vm13 = vsmask.f32 7440  ;;  %v1121_v63 = vshrl.u32 %v1057_v47, 16  ;;  %v511_v1 = vshrl.u32 %v11248_v28, 16 }
  0x29   : > { %v514_v2 = vshll.u32 %v11248_v28, 16  ;;  %v807_v5 = vsel %vm11262_vm11, %v499_v57, %v806_v55  ;;  %v11285_v7 = vrot.slane %v1117_v60, 5  ;;  %v519_v8 = vshrl.u32 %v11250_v29, 16  ;;  %v301_v10 = vld [vmem:[#allocation2 + $0x2c] sm:$0x1]  ;;  %s11105_s11 = smov 8   ;;  %vm11322_vm14 = vmor %vm1104_vm12, %vm1105_vm13 }
  0x2a   : > { %v522_v9 = vshll.u32 %v11250_v29, 16  ;;  %v1606_v11 = vld [vmem:[#allocation2 + $0x8] sm:$0x1]  ;;  %v508_v12 = vsel %vm11244_vm9, %v500_v58, %v507_v62  ;;  %808 = vst [vmem:[#allocation2 + $0x18] sm:$0xf] %v807_v5  ;;  %v1123_v14 = vrot.slane %v1121_v63, 4  ;;  %v804_v16 = vsel %vm11195_vm3, %v492_v45, %v803_v61 }
  0x2b   : > { %v1058_v13 = vld [vmem:[#allocation2 + $0x8] sm:$0x1]  ;;  %v513_v15 = vrot.slane %v511_v1, 7  ;;  %v1708_v17 = vrot.slane %v1606_v11, 5  ;;  %809 = vst.msk [vmem:[#allocation2 + $0x1c] sm:$0xf] %vm14422_vm0, %v508_v12  ;;  %v11318_v47 = vpack.c.bf16 %v352_v31, %v352_v31 }
  0x2c   : > { %v1127_v18 = vshll.u32 %v1058_v13, 16  ;;  %v11294_v19 = vrot.slane %v519_v8, 7  ;;  %v813_v20 = vld [vmem:[#allocation2 + $0x24] sm:$0xf]  ;;  %805 = vst [vmem:[#allocation2 + $0x14] sm:$0x1] %v804_v16  ;;  %v1124_v22 = vor.u32 %v1123_v14, %v11285_v7 }
  0x2d   : > { %v299_v21 = vsel %vm11229_vm5, 0, %v298_v4  ;;  %v516_v23 = vor.u32 %v514_v2, %v513_v15  ;;  %v517_v24 = vrot.slane %v513_v15, 4  ;;  %v302_v26 = vsel %vm11229_vm5, 0, %v301_v10  ;;  %v248_v38 = vld [vmem:[#allocation2 + $0x30] sm:$0x1]  ;;  %s11106_s12 = smov 24  }
  0x2e   : > { %300 = vst [vmem:[#allocation2 + $0x20] sm:$0x1] %v299_v21  ;;  %v1709_v27 = vsel %vm11256_vm10, %v1707_v49, %v1708_v17  ;;  %v11303_v28 = vrot.slane %v1127_v18, 5  ;;  %v524_v29 = vor.u32 %v522_v9, %v11294_v19  ;;  %v526_v30 = vrot.slane %v11294_v19, 4  ;;  %303 = vst [vmem:[#allocation2 + $0x2c] sm:$0x1] %v302_v26 }
  0x2f   : > { %v10800_v32 = vld [vmem:[#allocation2 + $0xc] sm:$0xff]   ;;  %v9680_v33 = vcombine.low %v11268_v48, %v1709_v27  ;;  %v11309_v35 = vrot.slane %v1124_v22, 4  ;;  %v814_v37 = vsel %vm11262_vm11, %v516_v23, %v813_v20  ;;  %v1056_v39 = vld [vmem:[#allocation2] sm:$0xf]  ;;  %v249_v58 = vsel %vm11195_vm3, 0, %v248_v38  ;;  %s11107_s13 = smov 4  }
  0x30   : > { %v525_v40 = vsel %vm11244_vm9, %v517_v24, %v524_v29  ;;  %815 = vst [vmem:[#allocation2 + $0x24] sm:$0xf] %v814_v37  ;;  %v2650_v41 = vld [vmem:[#allocation2 + $0xc] sm:$0xe]  ;;  %v2651_v42 = vld [vmem:[#allocation2 + $0x10] sm:$0xf]  ;;  %2040 = vrot.lane.b32.xlu0 %v10800_v32, %s11104_s10 }
  0x31   : > { %1863 = vrot.lane.b32.xlu1 %v9680_v33, %s11105_s11  ;;  %v1108_v43 = vshrl.u32 %v1056_v39, 16  ;;  %v1111_v44 = vshll.u32 %v1056_v39, 16  ;;  %816 = vst.msk [vmem:[#allocation2 + $0x28] sm:$0xf] %vm14422_vm0, %v525_v40  ;;  %v9728_v45 = vrot.slane %v2650_v41, 9  ;;  %v2748_v48 = vrot.slane %v2651_v42, 5 }
  0x32   : > { %v1607_v46 = vld [vmem:[#allocation2 + $0xc] sm:$0xe]  ;;  %v10801_v50 = vld [vmem:[#allocation2 + $0x18] sm:$0xff]   ;;  %v353_v60 = vld [vmem:[%s11225_s9 + $0x38] sm:$0xff]  ;;  %250 = vst [vmem:[#allocation2 + $0x30] sm:$0x1] %v249_v58  ;;  %v1130_v11 = vsel %vm11322_vm14, %v11309_v35, %v11303_v28 }
  0x33   : > { %v9665_v49 = vrot.slane %v1607_v46, 9  ;;  %v1110_v52 = vrot.slane %v1108_v43, 4  ;;  %v10802_v53 = vld [vmem:[#allocation2 + $0x18] sm:$0xff]   ;;  %v1113_v55 = vrot.slane %v1111_v44, 5  ;;  %v2652_v56 = vld [vmem:[#allocation2 + $0x14] sm:$0x1]  ;;  %v11334_v4 = vsel %vm11256_vm10, %v9728_v45, %v2748_v48 }
  0x34   : > { %v2750_v57 = vrot.slane %v2748_v48, 4  ;;  %3084 = vrot.lane.b32.xlu0 %v10801_v50, %s11106_s12  ;;  %v2751_v61 = vrot.slane %v2652_v56, 5  ;;  %v1608_v62 = vld [vmem:[#allocation2 + $0x10] sm:$0xf]  ;;  %v1609_v63 = vld [vmem:[#allocation2 + $0x14] sm:$0x1]  ;;  %v11351_v51 = vpack.c.bf16 %v353_v60, %v353_v60 }
  0x35   : > { %v528_v1 = vshrl.u32 %v11318_v47, 16  ;;  %2042 = vrot.lane.b32.xlu1 %v10802_v53, %s11104_s10  ;;  %v1114_v2 = vor.u32 %v1113_v55, %v1110_v52  ;;  %v1712_v5 = vrot.slane %v1608_v62, 5  ;;  %v1715_v8 = vrot.slane %v1609_v63, 5  ;;  %v810_v9 = vld [vmem:[#allocation2 + $0x20] sm:$0x1]  ;;  %s11108_s14 = smov 20  }
  0x36   : > { %v3694_v10 = vld [vmem:[#allocation2 + $0x18] sm:$0xe]  ;;  %v2752_v12 = vsel %vm11256_vm10, %v2750_v57, %v2751_v61  ;;  %v811_v13 = vsel %vm11195_vm3, %v509_v59, %v810_v9  ;;  %v3695_v14 = vld [vmem:[#allocation2 + $0x1c] sm:$0xf]  ;;  %v531_v59 = vshll.u32 %v11318_v47, 16  ;;  %s11109_s15 = smov 32  }
  0x37   : > { %v9792_v15 = vrot.slane %v3694_v10, 9  ;;  %v1115_v16 = vrot.slane %v1114_v2, 4  ;;  %v1713_v18 = vsel %vm11256_vm10, %v9665_v49, %v1712_v5  ;;  %v1714_v20 = vrot.slane %v1712_v5, 4  ;;  %812 = vst [vmem:[#allocation2 + $0x20] sm:$0x1] %v811_v13  ;;  %s11110_s16 = smov 16  }
  0x38   : > { %v10803_v17 = vld [vmem:[#allocation2 + $0x24] sm:$0xff]   ;;  %v11348_v21 = vrot.slane %v528_v1, 7  ;;  %v9744_v22 = vcombine.low %v11334_v4, %v2752_v12  ;;  %v3792_v23 = vrot.slane %v3695_v14, 5  ;;  %v2653_v24 = vld [vmem:[#allocation2 + $0x18] sm:$0xe]  ;;  %s11111_s17 = smov 28  }
  0x39   : > { %v2654_v26 = vld [vmem:[#allocation2 + $0x1c] sm:$0xf]  ;;  %v1120_v27 = vsel %vm11322_vm14, %v1115_v16, %v11285_v7  ;;  %3086 = vrot.lane.b32.xlu1 %v10803_v17, %s11106_s12  ;;  %v1716_v28 = vsel %vm11256_vm10, %v1714_v20, %v1715_v8  ;;  %v9729_v29 = vrot.slane %v2653_v24, 9  ;;  %v817_v32 = vld [vmem:[#allocation2 + $0x2c] sm:$0x1]  ;;  %vm14416_vm15 = vcmask 31744  }
  0x3a   : > { %v2755_v31 = vrot.slane %v2654_v26, 5  ;;  %v3697_v33 = vld [vmem:[#allocation2 + $0x24] sm:$0xe]  ;;  %v9648_v35 = vcombine.low %v1120_v27, %v1130_v11  ;;  %v9681_v37 = vcombine.low %v1713_v18, %v1716_v28  ;;  %v3793_v38 = vsel %vm11256_vm10, %v9792_v15, %v3792_v23  ;;  %v3698_v40 = vld [vmem:[#allocation2 + $0x28] sm:$0xf] }
  0x3b   : > { %v3794_v39 = vrot.slane %v3792_v23, 4  ;;  %v2108_v41 = vld [vmem:[#allocation2 + $0x18] sm:$0xf]  ;;  %v818_v43 = vsel %vm11195_vm3, %v526_v30, %v817_v32  ;;  %v9793_v44 = vrot.slane %v3697_v33, 9  ;;  %v2109_v45 = vld [vmem:[#allocation2 + $0x1c] sm:$0xf]  ;;  %v11373_v62 = vor.u32 %v531_v59, %v11348_v21 }
  0x3c   : > { %v2756_v7 = vsel %vm11256_vm10, %v9729_v29, %v2755_v31  ;;  %v2757_v42 = vrot.slane %v2755_v31, 4  ;;  %v1059_v46 = vld [vmem:[#allocation2 + $0xc] sm:$0xf]  ;;  %1539 = vrot.lane.b32.xlu0 %v9648_v35, %s11107_s13  ;;  %819 = vst [vmem:[#allocation2 + $0x2c] sm:$0x1] %v818_v43  ;;  %v3799_v47 = vrot.slane %v3698_v40, 5 }
  0x3d   : > { %v2178_v48 = vshrl.u32 %v2108_v41, 16  ;;  %v2181_v49 = vshll.u32 %v2108_v41, 16  ;;  %v2187_v50 = vshll.u32 %v2109_v45, 16  ;;  %v1060_v52 = vld [vmem:[#allocation2 + $0x10] sm:$0xf]  ;;  %1865 = vrot.lane.b32.xlu1 %v9681_v37, %s11105_s11  ;;  %v2191_v53 = vshrl.u32 %v2109_v45, 16 }
  0x3e   : > { %v1132_v55 = vshrl.u32 %v1059_v46, 16  ;;  %v1135_v19 = vshll.u32 %v1059_v46, 16  ;;  %v1141_v56 = vshll.u32 %v1060_v52, 16  ;;  %v3696_v57 = vld [vmem:[#allocation2 + $0x20] sm:$0x1]  ;;  %v3800_v58 = vsel %vm11256_vm10, %v9793_v44, %v3799_v47 }
  0x3f   : > { %v2655_v30 = vld [vmem:[#allocation2 + $0x20] sm:$0x1]  ;;  %v3801_v60 = vrot.slane %v3799_v47, 4  ;;  %v2180_v61 = vrot.slane %v2178_v48, 4  ;;  %v3795_v63 = vrot.slane %v3696_v57, 5  ;;  %v2183_v4 = vrot.slane %v2181_v49, 5 }
  0x40   : > { %v2758_v1 = vrot.slane %v2655_v30, 5  ;;  %v2110_v2 = vld [vmem:[#allocation2 + $0x20] sm:$0x1]  ;;  %v2189_v5 = vrot.slane %v2187_v50, 5  ;;  %2906 = vrot.lane.b32.xlu0 %v9744_v22, %s11108_s14  ;;  %v2193_v8 = vrot.slane %v2191_v53, 4  ;;  %v1134_v11 = vrot.slane %v1132_v55, 4 }
  0x41   : > { %v2197_v9 = vshll.u32 %v2110_v2, 16  ;;  %v1061_v10 = vld [vmem:[#allocation2 + $0x14] sm:$0x1]  ;;  %v1137_v12 = vrot.slane %v1135_v19, 5  ;;  %v3796_v13 = vsel %vm11256_vm10, %v3794_v39, %v3795_v63  ;;  %v2184_v15 = vor.u32 %v2183_v4, %v2180_v61  ;;  %v3152_v17 = vld [vmem:[#allocation2 + $0x24] sm:$0xf] }
  0x42   : > { %v2759_v14 = vsel %vm11256_vm10, %v2757_v42, %v2758_v1  ;;  %v1143_v16 = vrot.slane %v1141_v56, 5  ;;  %v9808_v18 = vcombine.low %v3793_v38, %v3796_v13  ;;  %v2194_v23 = vor.u32 %v2193_v8, %v2189_v5  ;;  %v3153_v32 = vld [vmem:[#allocation2 + $0x28] sm:$0xf]  ;;  %v2105_v45 = vld [vmem:[#allocation2 + $0xc] sm:$0xf] }
  0x43   : > { %v9745_v20 = vcombine.low %v2756_v7, %v2759_v14  ;;  %v2199_v24 = vrot.slane %v2197_v9, 5  ;;  %v3699_v26 = vld [vmem:[#allocation2 + $0x2c] sm:$0x1]  ;;  %v2185_v22 = vrot.slane %v2184_v15, 4  ;;  %v1138_v59 = vor.u32 %v1137_v12, %v1134_v11  ;;  %v2106_v46 = vld [vmem:[#allocation2 + $0x10] sm:$0xf] }
  0x44   : > { %v1145_v27 = vshrl.u32 %v1060_v52, 16  ;;  %v1151_v28 = vshll.u32 %v1061_v10, 16  ;;  %3950 = vrot.lane.b32.xlu0 %v9808_v18, %s11109_s15  ;;  %v3802_v29 = vrot.slane %v3699_v26, 5  ;;  %v2195_v31 = vrot.slane %v2194_v23, 4  ;;  %v3154_v41 = vld [vmem:[#allocation2 + $0x2c] sm:$0x1] }
  0x45   : > { %2908 = vrot.lane.b32.xlu1 %v9745_v20, %s11108_s14  ;;  %v3222_v33 = vshrl.u32 %v3152_v17, 16  ;;  %v3225_v35 = vshll.u32 %v3152_v17, 16  ;;  %v2190_v37 = vsel %vm11322_vm14, %v2185_v22, %v2189_v5  ;;  %v1139_v38 = vrot.slane %v1138_v59, 4  ;;  %v2107_v57 = vld [vmem:[#allocation2 + $0x14] sm:$0x1] }
  0x46   : > { %v1147_v39 = vrot.slane %v1145_v27, 4  ;;  %v1153_v40 = vrot.slane %v1151_v28, 5  ;;  %v3803_v7 = vsel %vm11256_vm10, %v3801_v60, %v3802_v29  ;;  %v2200_v42 = vsel %vm11322_vm14, %v2195_v31, %v2199_v24  ;;  %v1062_v4 = vld [vmem:[#allocation2 + $0x18] sm:$0xf]  ;;  %v1063_v11 = vld [vmem:[#allocation2 + $0x1c] sm:$0xf] }
  0x47   : > { %v3224_v43 = vrot.slane %v3222_v33, 4  ;;  %v3227_v44 = vrot.slane %v3225_v35, 5  ;;  %v9809_v47 = vcombine.low %v3800_v58, %v3803_v7  ;;  %v9713_v48 = vcombine.low %v2190_v37, %v2200_v42  ;;  %v1064_v18 = vld [vmem:[#allocation2 + $0x20] sm:$0x1]  ;;  %v3149_v27 = vld [vmem:[#allocation2 + $0x18] sm:$0xf] }
  0x48   : > { %v1144_v49 = vsel %vm11322_vm14, %v1139_v38, %v1143_v16  ;;  %v1148_v50 = vor.u32 %v1147_v39, %v1143_v16  ;;  %v3231_v53 = vshll.u32 %v3153_v32, 16  ;;  %v3235_v55 = vshrl.u32 %v3153_v32, 16  ;;  %v3150_v33 = vld [vmem:[#allocation2 + $0x1c] sm:$0xf] }
  0x49   : > { %v3228_v52 = vor.u32 %v3227_v44, %v3224_v43  ;;  %v3241_v19 = vshll.u32 %v3154_v41, 16  ;;  %3952 = vrot.lane.b32.xlu0 %v9809_v47, %s11109_s15  ;;  %2587 = vrot.lane.b32.xlu1 %v9713_v48, %s11110_s16  ;;  %v2154_v30 = vshrl.u32 %v2105_v45, 16  ;;  %v2157_v60 = vshll.u32 %v2105_v45, 16  ;;  %v3151_v45 = vld [vmem:[#allocation2 + $0x20] sm:$0x1] }
  0x4a   : > { %v1149_v56 = vrot.slane %v1148_v50, 4  ;;  %v2163_v61 = vshll.u32 %v2106_v46, 16  ;;  %v3233_v63 = vrot.slane %v3231_v53, 5  ;;  %v3237_v1 = vrot.slane %v3235_v55, 4  ;;  %v1065_v53 = vld [vmem:[#allocation2 + $0x24] sm:$0xf] }
  0x4b   : > { %v3229_v58 = vrot.slane %v3228_v52, 4  ;;  %v3243_v2 = vrot.slane %v3241_v19, 5  ;;  %v2156_v8 = vrot.slane %v2154_v30, 4  ;;  %v2159_v9 = vrot.slane %v2157_v60, 5  ;;  %v1066_v30 = vld [vmem:[#allocation2 + $0x28] sm:$0xf] }
  0x4c   : > { %v1154_v5 = vsel %vm11322_vm14, %v1149_v56, %v1153_v40  ;;  %v2165_v10 = vrot.slane %v2163_v61, 5  ;;  %v3238_v14 = vor.u32 %v3237_v1, %v3233_v63  ;;  %v2167_v15 = vshrl.u32 %v2106_v46, 16 }
  0x4d   : > { %v9649_v12 = vcombine.low %v1144_v49, %v1154_v5  ;;  %v3234_v13 = vsel %vm11322_vm14, %v3229_v58, %v3233_v63  ;;  %v2160_v16 = vor.u32 %v2159_v9, %v2156_v8  ;;  %v2173_v17 = vshll.u32 %v2107_v57, 16  ;;  %v1067_v5 = vld [vmem:[#allocation2 + $0x2c] sm:$0x1]  ;;  %v1610_v9 = vld [vmem:[#allocation2 + $0x18] sm:$0xe] }
  0x4e   : > { %v1156_v20 = vshrl.u32 %v1062_v4, 16  ;;  %v1159_v23 = vshll.u32 %v1062_v4, 16  ;;  %v3239_v24 = vrot.slane %v3238_v14, 4  ;;  %v2169_v26 = vrot.slane %v2167_v15, 4  ;;  %v1611_v14 = vld [vmem:[#allocation2 + $0x1c] sm:$0xf] }
  0x4f   : > { %1541 = vrot.lane.b32.xlu0 %v9649_v12, %s11107_s13  ;;  %v1165_v22 = vshll.u32 %v1063_v11, 16  ;;  %v1169_v59 = vshrl.u32 %v1063_v11, 16  ;;  %v2161_v28 = vrot.slane %v2160_v16, 4  ;;  %v2175_v29 = vrot.slane %v2173_v17, 5  ;;  %v1612_v15 = vld [vmem:[#allocation2 + $0x20] sm:$0x1] }
  0x50   : > { %v1158_v31 = vrot.slane %v1156_v20, 4  ;;  %v1161_v32 = vrot.slane %v1159_v23, 5  ;;  %v3244_v35 = vsel %vm11322_vm14, %v3239_v24, %v3243_v2  ;;  %v2170_v37 = vor.u32 %v2169_v26, %v2165_v10  ;;  %v1613_v23 = vld [vmem:[#allocation2 + $0x24] sm:$0xe]  ;;  %v1614_v24 = vld [vmem:[#allocation2 + $0x28] sm:$0xf] }
  0x51   : > { %v1167_v38 = vrot.slane %v1165_v22, 5  ;;  %v1171_v39 = vrot.slane %v1169_v59, 4  ;;  %v9777_v40 = vcombine.low %v3234_v13, %v3244_v35  ;;  %v2166_v41 = vsel %vm11322_vm14, %v2161_v28, %v2165_v10  ;;  %v1615_v26 = vld [vmem:[#allocation2 + $0x2c] sm:$0x1] }
  0x52   : > { %v1162_v7 = vor.u32 %v1161_v32, %v1158_v31  ;;  %v1175_v42 = vshll.u32 %v1064_v18, 16  ;;  %v2171_v43 = vrot.slane %v2170_v37, 4  ;;  %v3198_v46 = vshrl.u32 %v3149_v27, 16 }
  0x53   : > { %v1172_v44 = vor.u32 %v1171_v39, %v1167_v38  ;;  %v3201_v47 = vshll.u32 %v3149_v27, 16  ;;  %3631 = vrot.lane.b32.xlu1 %v9777_v40, %s11111_s17  ;;  %v3207_v50 = vshll.u32 %v3150_v33, 16  ;;  %v3211_v52 = vshrl.u32 %v3150_v33, 16  ;;  %v820_v40 = vld [vmem:[#allocation2 + $0x30] sm:$0xf] }
  0x54   : > { %v1163_v48 = vrot.slane %v1162_v7, 4  ;;  %v1177_v49 = vrot.slane %v1175_v42, 5  ;;  %v2176_v55 = vsel %vm11322_vm14, %v2171_v43, %v2175_v29  ;;  %v3200_v56 = vrot.slane %v3198_v46, 4 }
  0x55   : > { %v1173_v19 = vrot.slane %v1172_v44, 4  ;;  %v3203_v57 = vrot.slane %v3201_v47, 5  ;;  %v9712_v60 = vcombine.low %v2166_v41, %v2176_v55  ;;  %v3209_v58 = vrot.slane %v3207_v50, 5  ;;  %v2111_v44 = vld [vmem:[#allocation2 + $0x24] sm:$0xf] }
  0x56   : > { %v1168_v61 = vsel %vm11322_vm14, %v1163_v48, %v1167_v38  ;;  %v3213_v63 = vrot.slane %v3211_v52, 4  ;;  %v3217_v4 = vshll.u32 %v3151_v45, 16  ;;  %v1180_v8 = vshrl.u32 %v1065_v53, 16 }
  0x57   : > { %v1178_v1 = vsel %vm11322_vm14, %v1173_v19, %v1177_v49  ;;  %v3204_v2 = vor.u32 %v3203_v57, %v3200_v56  ;;  %2585 = vrot.lane.b32.xlu0 %v9712_v60, %s11110_s16  ;;  %v1183_v12 = vshll.u32 %v1065_v53, 16  ;;  %v1189_v13 = vshll.u32 %v1066_v30, 16  ;;  %v2112_v49 = vld [vmem:[#allocation2 + $0x28] sm:$0xf]  ;;  %v2113_v19 = vld [vmem:[#allocation2 + $0x2c] sm:$0x1] }
  0x58   : > { %v9650_v10 = vcombine.low %v1168_v61, %v1178_v1  ;;  %v3214_v11 = vor.u32 %v3213_v63, %v3209_v58  ;;  %v3219_v17 = vrot.slane %v3217_v4, 5  ;;  %v1182_v18 = vrot.slane %v1180_v8, 4  ;;  %v354_v56 = vld [vmem:[%s11225_s9 + $0x40] sm:$0xff]  ;;  %v355_v63 = vld [vmem:[%s11225_s9 + $0x48] sm:$0xff]  ;;  %v2657_v8 = vld [vmem:[#allocation2 + $0x28] sm:$0xf] }
  0x59   : > { %v3205_v16 = vrot.slane %v3204_v2, 4  ;;  %v1193_v20 = vshrl.u32 %v1066_v30, 16  ;;  %v1185_v59 = vrot.slane %v1183_v12, 5  ;;  %v1191_v27 = vrot.slane %v1189_v13, 5  ;;  %v2658_v13 = vld [vmem:[#allocation2 + $0x2c] sm:$0x1] }
  0x5a   : > { %1543 = vrot.lane.b32.xlu1 %v9650_v10, %s11107_s13  ;;  %v3215_v22 = vrot.slane %v3214_v11, 4  ;;  %v1199_v28 = vshll.u32 %v1067_v5, 16  ;;  %v9666_v32 = vrot.slane %v1610_v9, 9  ;;  %v1719_v33 = vrot.slane %v1611_v14, 5  ;;  %v2656_v5 = vld [vmem:[#allocation2 + $0x24] sm:$0xe] }
  0x5b   : > { %v3210_v29 = vsel %vm11322_vm14, %v3205_v16, %v3209_v58  ;;  %v1195_v31 = vrot.slane %v1193_v20, 4  ;;  %v1186_v37 = vor.u32 %v1185_v59, %v1182_v18  ;;  %v1722_v39 = vrot.slane %v1612_v15, 5  ;;  %v304_v58 = vld [vmem:[#allocation2 + $0x38] sm:$0x1]  ;;  %v251_v14 = vld [vmem:[#allocation2 + $0x3c] sm:$0x1] }
  0x5c   : > { %v3220_v35 = vsel %vm11322_vm14, %v3215_v22, %v3219_v17  ;;  %v1201_v38 = vrot.slane %v1199_v28, 5  ;;  %v1720_v42 = vsel %vm11256_vm10, %v9666_v32, %v1719_v33  ;;  %v1721_v43 = vrot.slane %v1719_v33, 4  ;;  %v10804_v16 = vld [vmem:[#allocation2 + $0x24] sm:$0xff]  }
  0x5d   : > { %v9776_v41 = vcombine.low %v3210_v29, %v3220_v35  ;;  %v1196_v7 = vor.u32 %v1195_v31, %v1191_v27  ;;  %v1187_v45 = vrot.slane %v1186_v37, 4  ;;  %v9667_v46 = vrot.slane %v1613_v23, 9 }
  0x5e   : > { %v1726_v47 = vrot.slane %v1614_v24, 5  ;;  %v1729_v48 = vrot.slane %v1615_v26, 5  ;;  %v1723_v52 = vsel %vm11256_vm10, %v1721_v43, %v1722_v39  ;;  %v534_v53 = vrot.slane %v11348_v21, 4 }
  0x5f   : > { %3629 = vrot.lane.b32.xlu0 %v9776_v41, %s11111_s17  ;;  %v1197_v50 = vrot.slane %v1196_v7, 4  ;;  %v536_v55 = vshrl.u32 %v11351_v51, 16  ;;  %v1192_v57 = vsel %vm11322_vm14, %v1187_v45, %v1191_v27  ;;  %v9682_v30 = vcombine.low %v1720_v42, %v1723_v52 }
  0x60   : > { %v1727_v60 = vsel %vm11256_vm10, %v9667_v46, %v1726_v47  ;;  %v1728_v61 = vrot.slane %v1726_v47, 4  ;;  %v539_v21 = vshll.u32 %v11351_v51, 16  ;;  %v821_v4 = vsel %vm11262_vm11, %v11373_v62, %v820_v40 }
  0x61   : > { %v1202_v1 = vsel %vm11322_vm14, %v1197_v50, %v1201_v38  ;;  %v11429_v2 = vrot.slane %v536_v55, 7  ;;  %822 = vst [vmem:[#allocation2 + $0x30] sm:$0xf] %v821_v4  ;;  %v2202_v11 = vshrl.u32 %v2111_v44, 16  ;;  %v2205_v12 = vshll.u32 %v2111_v44, 16 }
  0x62   : > { %v9651_v9 = vcombine.low %v1192_v57, %v1202_v1  ;;  %v1730_v10 = vsel %vm11256_vm10, %v1728_v61, %v1729_v48  ;;  %v2211_v17 = vshll.u32 %v2112_v49, 16  ;;  %v10172_v18 = vpack.c.bf16 %v354_v56, %v354_v56 }
  0x63   : > { %1867 = vrot.lane.b32.xlu0 %v9682_v30, %s11105_s11  ;;  %v9683_v15 = vcombine.low %v1727_v60, %v1730_v10  ;;  %v541_v51 = vor.u32 %v539_v21, %v11429_v2  ;;  %v2204_v62 = vrot.slane %v2202_v11, 4  ;;  %v2207_v20 = vrot.slane %v2205_v12, 5 }
  0x64   : > { %1545 = vrot.lane.b32.xlu1 %v9651_v9, %s11107_s13  ;;  %v2215_v23 = vshrl.u32 %v2112_v49, 16  ;;  %v2221_v24 = vshll.u32 %v2113_v19, 16  ;;  %v2213_v22 = vrot.slane %v2211_v17, 5  ;;  %v305_v59 = vsel %vm11229_vm5, 0, %v304_v58 }
  0x65   : > { %v542_v26 = vsel %vm11244_vm9, %v534_v53, %v541_v51  ;;  %v10173_v27 = vpack.c.bf16 %v355_v63, %v355_v63  ;;  %v2208_v28 = vor.u32 %v2207_v20, %v2204_v62  ;;  %306 = vst [vmem:[#allocation2 + $0x38] sm:$0x1] %v305_v59  ;;  %v9730_v31 = vrot.slane %v2656_v5, 9 }
  0x66   : > { %823 = vst.msk [vmem:[#allocation2 + $0x34] sm:$0xf] %vm14422_vm0, %v542_v26  ;;  %v2217_v29 = vrot.slane %v2215_v23, 4  ;;  %v2762_v32 = vrot.slane %v2657_v8, 5  ;;  %v2223_v33 = vrot.slane %v2221_v24, 5  ;;  %v2765_v35 = vrot.slane %v2658_v13, 5 }
  0x67   : > { %2044 = vrot.lane.b32.xlu0 %v10804_v16, %s11104_s10  ;;  %v252_v37 = vsel %vm11195_vm3, 0, %v251_v14  ;;  %v545_v38 = vshrl.u32 %v10172_v18, 16  ;;  %v2209_v39 = vrot.slane %v2208_v28, 4  ;;  %v543_v7 = vrot.slane %v11429_v2, 4 }
  0x68   : > { %1869 = vrot.lane.b32.xlu1 %v9683_v15, %s11105_s11  ;;  %v2218_v40 = vor.u32 %v2217_v29, %v2213_v22  ;;  %v2764_v41 = vrot.slane %v2762_v32, 4  ;;  %253 = vst [vmem:[#allocation2 + $0x3c] sm:$0x1] %v252_v37  ;;  %v2114_v42 = vld [vmem:[#allocation2 + $0x30] sm:$0xf]  ;;  %v548_v43 = vshll.u32 %v10172_v18, 16  ;;  %v2763_v48 = vsel %vm11256_vm10, %v9730_v31, %v2762_v32 }
  0x69   : > { %v2214_v44 = vsel %vm11322_vm14, %v2209_v39, %v2213_v22  ;;  %v2226_v46 = vshrl.u32 %v2114_v42, 16  ;;  %v2229_v47 = vshll.u32 %v2114_v42, 16  ;;  %v547_v50 = vrot.slane %v545_v38, 7  ;;  %v2659_v56 = vld [vmem:[#allocation2 + $0x30] sm:$0xe] }
  0x6a   : > { %v2219_v45 = vrot.slane %v2218_v40, 4  ;;  %v2766_v49 = vsel %vm11256_vm10, %v2764_v41, %v2765_v35  ;;  %v553_v52 = vshrl.u32 %v10173_v27, 16  ;;  %v3155_v10 = vld [vmem:[#allocation2 + $0x30] sm:$0xf]  ;;  %v556_v12 = vshll.u32 %v10173_v27, 16 }
  0x6b   : > { %v2228_v55 = vrot.slane %v2226_v46, 4  ;;  %v2231_v19 = vrot.slane %v2229_v47, 5  ;;  %v9746_v1 = vcombine.low %v2763_v48, %v2766_v49  ;;  %v550_v21 = vor.u32 %v548_v43, %v547_v50  ;;  %v307_v18 = vld [vmem:[#allocation2 + $0x44] sm:$0x1]  ;;  %v3700_v26 = vld [vmem:[#allocation2 + $0x30] sm:$0xe] }
  0x6c   : > { %v2224_v53 = vsel %vm11322_vm14, %v2219_v45, %v2223_v33  ;;  %v824_v60 = vld [vmem:[#allocation2 + $0x38] sm:$0x1]  ;;  %v11462_v9 = vrot.slane %v553_v52, 7  ;;  %v551_v11 = vrot.slane %v547_v50, 4  ;;  %v9731_v17 = vrot.slane %v2659_v56, 9 }
  0x6d   : > { %v10805_v57 = vld [vmem:[#allocation2 + $0x30] sm:$0xff]   ;;  %v9714_v30 = vcombine.low %v2214_v44, %v2224_v53  ;;  %v825_v61 = vsel %vm11195_vm3, %v543_v7, %v824_v60  ;;  %v2232_v63 = vor.u32 %v2231_v19, %v2228_v55  ;;  %v3246_v24 = vshrl.u32 %v3155_v10, 16  ;;  %v356_v53 = vld [vmem:[%s11225_s9 + $0x50] sm:$0xff] }
  0x6e   : > { %v2115_v58 = vld [vmem:[#allocation2 + $0x34] sm:$0xf]  ;;  %2046 = vrot.lane.b32.xlu1 %v10805_v57, %s11104_s10  ;;  %826 = vst [vmem:[#allocation2 + $0x38] sm:$0x1] %v825_v61  ;;  %v558_v20 = vor.u32 %v556_v12, %v11462_v9  ;;  %v560_v27 = vrot.slane %v11462_v9, 4  ;;  %v3249_v28 = vshll.u32 %v3155_v10, 16 }
  0x6f   : > { %v2660_v2 = vld [vmem:[#allocation2 + $0x34] sm:$0xf]  ;;  %2589 = vrot.lane.b32.xlu0 %v9714_v30, %s11110_s16  ;;  %v2235_v4 = vshll.u32 %v2115_v58, 16  ;;  %v2239_v5 = vshrl.u32 %v2115_v58, 16  ;;  %v827_v13 = vld [vmem:[#allocation2 + $0x3c] sm:$0xf] }
  0x70   : > { %v2769_v8 = vrot.slane %v2660_v2, 5  ;;  %v3156_v14 = vld [vmem:[#allocation2 + $0x34] sm:$0xf]  ;;  %v2233_v15 = vrot.slane %v2232_v63, 4  ;;  %v828_v23 = vsel %vm11262_vm11, %v550_v21, %v827_v13  ;;  %v11469_v32 = vld [vmem:[#allocation2 + $0x30] sm:$0xf]  ;;  %v559_v33 = vsel %vm11244_vm9, %v551_v11, %v558_v20 }
  0x71   : > { %v2237_v16 = vrot.slane %v2235_v4, 5  ;;  %v2241_v51 = vrot.slane %v2239_v5, 4  ;;  %v10806_v59 = vld [vmem:[#allocation2 + $0x30] sm:$0xff]   ;;  %829 = vst [vmem:[#allocation2 + $0x3c] sm:$0xf] %v828_v23  ;;  %v3255_v29 = vshll.u32 %v3156_v14, 16  ;;  %v11487_v4 = vpack.c.bf16 %v356_v53, %v356_v53 }
  0x72   : > { %v2771_v62 = vrot.slane %v2769_v8, 4  ;;  %v3701_v31 = vld [vmem:[#allocation2 + $0x34] sm:$0xf]  ;;  %v3248_v35 = vrot.slane %v3246_v24, 4  ;;  %v3259_v37 = vshrl.u32 %v3156_v14, 16  ;;  %v308_v38 = vsel %vm11229_vm5, 0, %v307_v18 }
  0x73   : > { %v2242_v22 = vor.u32 %v2241_v51, %v2237_v16  ;;  %2910 = vrot.lane.b32.xlu0 %v9746_v1, %s11108_s14  ;;  %830 = vst.msk [vmem:[#allocation2 + $0x40] sm:$0xf] %vm14422_vm0, %v559_v33  ;;  %v3251_v40 = vrot.slane %v3249_v28, 5  ;;  %v3257_v41 = vrot.slane %v3255_v29, 5  ;;  %309 = vst [vmem:[#allocation2 + $0x44] sm:$0x1] %v308_v38  ;;  %v2238_v43 = vsel %vm11322_vm14, %v2233_v15, %v2237_v16 }
  0x74   : > { %v9794_v7 = vrot.slane %v3700_v26, 9  ;;  %v2770_v45 = vsel %vm11256_vm10, %v9731_v17, %v2769_v8  ;;  %v3261_v50 = vrot.slane %v3259_v37, 4  ;;  %v3806_v19 = vrot.slane %v3701_v31, 5  ;;  %v1069_v11 = vld [vmem:[#allocation2 + $0x34] sm:$0xf] }
  0x75   : > { %v2243_v39 = vrot.slane %v2242_v22, 4  ;;  %v2116_v42 = vld [vmem:[#allocation2 + $0x38] sm:$0x1]  ;;  %v3252_v49 = vor.u32 %v3251_v40, %v3248_v35  ;;  %v1204_v57 = vshrl.u32 %v11469_v32, 16  ;;  %v1207_v31 = vshll.u32 %v11469_v32, 16  ;;  %v357_v37 = vld [vmem:[%s11225_s9 + $0x58] sm:$0xff] }
  0x76   : > { %v2661_v44 = vld [vmem:[#allocation2 + $0x38] sm:$0x1]  ;;  %v2245_v47 = vshll.u32 %v2116_v42, 16  ;;  %v3262_v58 = vor.u32 %v3261_v50, %v3257_v41  ;;  %v3807_v2 = vsel %vm11256_vm10, %v9794_v7, %v3806_v19  ;;  %v3808_v21 = vrot.slane %v3806_v19, 4 }
  0x77   : > { %v3157_v46 = vld [vmem:[#allocation2 + $0x38] sm:$0x1]  ;;  %v2772_v48 = vrot.slane %v2661_v44, 5  ;;  %3088 = vrot.lane.b32.xlu0 %v10806_v59, %s11106_s12  ;;  %v3253_v61 = vrot.slane %v3252_v49, 4  ;;  %v1206_v29 = vrot.slane %v1204_v57, 4  ;;  %v1213_v33 = vshll.u32 %v1069_v11, 16 }
  0x78   : > { %v3702_v52 = vld [vmem:[#allocation2 + $0x38] sm:$0x1]  ;;  %v3265_v55 = vshll.u32 %v3157_v46, 16  ;;  %v2247_v30 = vrot.slane %v2245_v47, 5  ;;  %v3158_v1 = vld [vmem:[#allocation2 + $0x3c] sm:$0xf] }
  0x79   : > { %v3809_v56 = vrot.slane %v3702_v52, 5  ;;  %v2773_v60 = vsel %vm11256_vm10, %v2771_v62, %v2772_v48  ;;  %v3258_v8 = vsel %vm11322_vm14, %v3253_v61, %v3257_v41  ;;  %v3263_v9 = vrot.slane %v3262_v58, 4  ;;  %v1070_v23 = vld [vmem:[#allocation2 + $0x38] sm:$0x1]  ;;  %v3703_v28 = vld [vmem:[#allocation2 + $0x3c] sm:$0xe] }
  0x7a   : > { %v3267_v63 = vrot.slane %v3265_v55, 5  ;;  %v2248_v5 = vsel %vm11322_vm14, %v2243_v39, %v2247_v30  ;;  %v3270_v10 = vshrl.u32 %v3158_v1, 16  ;;  %v9747_v13 = vcombine.low %v2770_v45, %v2773_v60  ;;  %v831_v14 = vld [vmem:[#allocation2 + $0x44] sm:$0x1]  ;;  %v3159_v18 = vld [vmem:[#allocation2 + $0x40] sm:$0xf] }
  0x7b   : > { %v9715_v12 = vcombine.low %v2238_v43, %v2248_v5  ;;  %v3273_v15 = vshll.u32 %v3158_v1, 16  ;;  %v3810_v16 = vsel %vm11256_vm10, %v3808_v21, %v3809_v56  ;;  %v832_v17 = vsel %vm11195_vm3, %v560_v27, %v831_v14  ;;  %v3704_v27 = vld [vmem:[#allocation2 + $0x40] sm:$0xf]  ;;  %v1071_v7 = vld [vmem:[#allocation2 + $0x3c] sm:$0xf] }
  0x7c   : > { %v3268_v51 = vsel %vm11322_vm14, %v3263_v9, %v3267_v63  ;;  %v3272_v62 = vrot.slane %v3270_v10, 4  ;;  %v9810_v20 = vcombine.low %v3807_v2, %v3810_v16  ;;  %833 = vst [vmem:[#allocation2 + $0x44] sm:$0x1] %v832_v17  ;;  %v3279_v22 = vshll.u32 %v3159_v18, 16  ;;  %v358_v42 = vld [vmem:[%s11225_s9 + $0x60] sm:$0xff] }
  0x7d   : > { %2591 = vrot.lane.b32.xlu1 %v9715_v12, %s11110_s16  ;;  %v9778_v24 = vcombine.low %v3258_v8, %v3268_v51  ;;  %v3275_v26 = vrot.slane %v3273_v15, 5  ;;  %v3283_v59 = vshrl.u32 %v3159_v18, 16  ;;  %v1217_v35 = vshrl.u32 %v1069_v11, 16  ;;  %v10807_v47 = vld [vmem:[#allocation2 + $0x3c] sm:$0xff]   ;;  %v1616_v8 = vld [vmem:[#allocation2 + $0x30] sm:$0xe] }
  0x7e   : > { %v3281_v39 = vrot.slane %v3279_v22, 5  ;;  %v1223_v41 = vshll.u32 %v1070_v23, 16  ;;  %v1209_v43 = vrot.slane %v1207_v31, 5  ;;  %v1215_v44 = vrot.slane %v1213_v33, 5  ;;  %v1072_v30 = vld [vmem:[#allocation2 + $0x40] sm:$0xf] }
  0x7f   : > { %3633 = vrot.lane.b32.xlu0 %v9778_v24, %s11111_s17  ;;  %v3276_v38 = vor.u32 %v3275_v26, %v3272_v62  ;;  %v3285_v40 = vrot.slane %v3283_v59, 4  ;;  %v1219_v45 = vrot.slane %v1217_v35, 4  ;;  %v9795_v46 = vrot.slane %v3703_v28, 9  ;;  %v1617_v9 = vld [vmem:[#allocation2 + $0x34] sm:$0xf] }
  0x80   : > { %v1225_v49 = vrot.slane %v1223_v41, 5  ;;  %v3813_v50 = vrot.slane %v3704_v27, 5  ;;  %v1210_v52 = vor.u32 %v1209_v43, %v1206_v29  ;;  %v1228_v55 = vshrl.u32 %v1071_v7, 16  ;;  %v1618_v18 = vld [vmem:[#allocation2 + $0x38] sm:$0x1] }
  0x81   : > { %2912 = vrot.lane.b32.xlu1 %v9747_v13, %s11108_s14  ;;  %v3277_v32 = vrot.slane %v3276_v38, 4  ;;  %v3286_v48 = vor.u32 %v3285_v40, %v3281_v39  ;;  %v1220_v53 = vor.u32 %v1219_v45, %v1215_v44  ;;  %v1231_v19 = vshll.u32 %v1071_v7, 16  ;;  %v1619_v62 = vld [vmem:[#allocation2 + $0x3c] sm:$0xe]  ;;  %v1620_v22 = vld [vmem:[#allocation2 + $0x40] sm:$0xf] }
  0x82   : > { %v3815_v57 = vrot.slane %v3813_v50, 4  ;;  %v11506_v60 = vpack.c.bf16 %v357_v37, %v357_v37  ;;  %v11508_v61 = vpack.c.bf16 %v358_v42, %v358_v42  ;;  %v1211_v1 = vrot.slane %v1210_v52, 4  ;;  %v254_v28 = vld [vmem:[#allocation2 + $0x48] sm:$0x1]  ;;  %v10821_v43 = vld [vmem:[%s14409_s1] sm:$0xff]  }
  0x83   : > { %v3287_v56 = vrot.slane %v3286_v48, 4  ;;  %3954 = vrot.lane.b32.xlu0 %v9810_v20, %s11109_s15  ;;  %v3160_v58 = vld [vmem:[#allocation2 + $0x44] sm:$0x1]  ;;  %v3282_v63 = vsel %vm11322_vm14, %v3277_v32, %v3281_v39  ;;  %v1221_v2 = vrot.slane %v1220_v53, 4  ;;  %v3814_v5 = vsel %vm11256_vm10, %v9795_v46, %v3813_v50  ;;  %v2117_v32 = vld [vmem:[#allocation2 + $0x3c] sm:$0xf]  ;;  %10696 = vmatprep.subr.bf16.mxu0 %v10821_v43 }
  0x84   : > { %v3705_v21 = vld [vmem:[#allocation2 + $0x44] sm:$0x1]  ;;  %v3289_v10 = vshll.u32 %v3160_v58, 16  ;;  %v1230_v13 = vrot.slane %v1228_v55, 4  ;;  %v1233_v14 = vrot.slane %v1231_v19, 5  ;;  %v1216_v15 = vsel %vm11322_vm14, %v1211_v1, %v1215_v44  ;;  %10697 = vmatpush3.bf16.msra.mxu0 %v10821_v43 }
  0x85   : > { %3090 = vrot.lane.b32.xlu1 %v10807_v47, %s11106_s12  ;;  %v3816_v11 = vrot.slane %v3705_v21, 5  ;;  %v1073_v12 = vld [vmem:[#allocation2 + $0x44] sm:$0x1]  ;;  %v1226_v16 = vsel %vm11322_vm14, %v1221_v2, %v1225_v49  ;;  %v1237_v51 = vshll.u32 %v1072_v30, 16  ;;  %v1241_v17 = vshrl.u32 %v1072_v30, 16 }
  0x86   : > { %v3291_v20 = vrot.slane %v3289_v10, 5  ;;  %v9652_v23 = vcombine.low %v1216_v15, %v1226_v16  ;;  %v1234_v26 = vor.u32 %v1233_v14, %v1230_v13  ;;  %v1621_v59 = vld [vmem:[#allocation2 + $0x44] sm:$0x1]  ;;  %v1247_v35 = vshll.u32 %v1073_v12, 16  ;;  %v2662_v12 = vld [vmem:[#allocation2 + $0x3c] sm:$0xe] }
  0x87   : > { %v3817_v24 = vsel %vm11256_vm10, %v3815_v57, %v3816_v11  ;;  %v1239_v31 = vrot.slane %v1237_v51, 5  ;;  %v1243_v33 = vrot.slane %v1241_v17, 4  ;;  %v9668_v38 = vrot.slane %v1616_v8, 9  ;;  %v2118_v57 = vld [vmem:[#allocation2 + $0x40] sm:$0xf] }
  0x88   : > { %v9811_v29 = vcombine.low %v3814_v5, %v3817_v24  ;;  %v3292_v27 = vsel %vm11322_vm14, %v3287_v56, %v3291_v20  ;;  %v1235_v37 = vrot.slane %v1234_v26, 4  ;;  %v1733_v39 = vrot.slane %v1617_v9, 5  ;;  %v359_v30 = vld [vmem:[%s11225_s9 + $0x68] sm:$0xff]  ;;  %v310_v5 = vld [vmem:[#allocation2 + $0x50] sm:$0x1] }
  0x89   : > { %v9779_v40 = vcombine.low %v3282_v63, %v3292_v27  ;;  %v1244_v41 = vor.u32 %v1243_v33, %v1239_v31  ;;  %v1249_v7 = vrot.slane %v1247_v35, 5  ;;  %v1736_v42 = vrot.slane %v1618_v18, 5  ;;  %v2119_v21 = vld [vmem:[#allocation2 + $0x44] sm:$0x1]  ;;  %v2663_v13 = vld [vmem:[#allocation2 + $0x40] sm:$0xf] }
  0x8a   : > { %3956 = vrot.lane.b32.xlu0 %v9811_v29, %s11109_s15  ;;  %v1240_v44 = vsel %vm11322_vm14, %v1235_v37, %v1239_v31  ;;  %v1734_v45 = vsel %vm11256_vm10, %v9668_v38, %v1733_v39  ;;  %v1735_v46 = vrot.slane %v1733_v39, 4  ;;  %v9669_v47 = vrot.slane %v1619_v62, 9  ;;  %v10824_v8 = vld [vmem:[%s14409_s1 + $0x8] sm:$0xff]   ;;  %v257_v62 = vld [vmem:[#allocation2 + $0x54] sm:$0x1] }
  0x8b   : > { %3635 = vrot.lane.b32.xlu1 %v9779_v40, %s11111_s17  ;;  %v1245_v48 = vrot.slane %v1244_v41, 4  ;;  %v1740_v49 = vrot.slane %v1620_v22, 5  ;;  %v1743_v50 = vrot.slane %v1621_v59, 5  ;;  %v255_v52 = vsel %vm11195_vm3, 0, %v254_v28  ;;  %v10808_v15 = vld [vmem:[#allocation2 + $0x3c] sm:$0xff]   ;;  %10698 = vmatprep.subr.bf16.mxu0 %v10824_v8 }
  0x8c   : > { %v1737_v53 = vsel %vm11256_vm10, %v1735_v46, %v1736_v42  ;;  %256 = vst [vmem:[#allocation2 + $0x48] sm:$0x1] %v255_v52  ;;  %v562_v55 = vshrl.u32 %v11487_v4, 16  ;;  %v565_v19 = vshll.u32 %v11487_v4, 16  ;;  %v570_v56 = vshrl.u32 %v11506_v60, 16  ;;  %10699 = vmatpush3.bf16.msra.mxu0 %v10824_v8 }
  0x8d   : > { %v1250_v58 = vsel %vm11322_vm14, %v1245_v48, %v1249_v7  ;;  %v9684_v63 = vcombine.low %v1734_v45, %v1737_v53  ;;  %v1741_v1 = vsel %vm11256_vm10, %v9669_v47, %v1740_v49  ;;  %v1742_v2 = vrot.slane %v1740_v49, 4  ;;  %v2664_v18 = vld [vmem:[#allocation2 + $0x44] sm:$0x1]  ;;  %v313_v27 = vld [vmem:[#allocation2 + $0x5c] sm:$0x1] }
  0x8e   : > { %v9653_v4 = vcombine.low %v1240_v44, %v1250_v58  ;;  %v564_v9 = vrot.slane %v562_v55, 7  ;;  %v11547_v10 = vrot.slane %v570_v56, 7  ;;  %v573_v11 = vshll.u32 %v11506_v60, 16  ;;  %v260_v48 = vld [vmem:[#allocation2 + $0x60] sm:$0x1]  ;;  %v360_v55 = vld [vmem:[%s11225_s9 + $0x70] sm:$0xff] }
  0x8f   : > { %1547 = vrot.lane.b32.xlu1 %v9652_v23, %s11107_s13  ;;  %1871 = vrot.lane.b32.xlu0 %v9684_v63, %s11105_s11  ;;  %v1744_v14 = vsel %vm11256_vm10, %v1742_v2, %v1743_v50  ;;  %v2250_v16 = vshrl.u32 %v2117_v32, 16  ;;  %v2253_v51 = vshll.u32 %v2117_v32, 16  ;;  %v2259_v17 = vshll.u32 %v2118_v57, 16 }
  0x90   : > { %v567_v20 = vor.u32 %v565_v19, %v564_v9  ;;  %v568_v24 = vrot.slane %v564_v9, 4  ;;  %v575_v26 = vor.u32 %v573_v11, %v11547_v10  ;;  %v10177_v60 = vpack.c.bf16 %v359_v30, %v359_v30 }
  0x91   : > { %v9685_v22 = vcombine.low %v1741_v1, %v1744_v14  ;;  %v2252_v59 = vrot.slane %v2250_v16, 4  ;;  %v2255_v23 = vrot.slane %v2253_v51, 5  ;;  %v2261_v28 = vrot.slane %v2259_v17, 5 }
  0x92   : > { %v576_v29 = vsel %vm11244_vm9, %v568_v24, %v575_v26  ;;  %v2263_v31 = vshrl.u32 %v2118_v57, 16  ;;  %v2269_v33 = vshll.u32 %v2119_v21, 16  ;;  %v311_v35 = vsel %vm11229_vm5, 0, %v310_v5 }
  0x93   : > { %1549 = vrot.lane.b32.xlu1 %v9653_v4, %s11107_s13  ;;  %2048 = vrot.lane.b32.xlu0 %v10808_v15, %s11104_s10  ;;  %v577_v37 = vrot.slane %v11547_v10, 4  ;;  %v834_v38 = vld [vmem:[#allocation2 + $0x48] sm:$0xf]  ;;  %837 = vst.msk [vmem:[#allocation2 + $0x4c] sm:$0xf] %vm14422_vm0, %v576_v29  ;;  %v2256_v39 = vor.u32 %v2255_v23, %v2252_v59  ;;  %v9732_v40 = vrot.slane %v2662_v12, 9  ;;  %v11583_v9 = vpack.c.bf16 %v360_v55, %v360_v55 }
  0x94   : > { %312 = vst [vmem:[#allocation2 + $0x50] sm:$0x1] %v311_v35  ;;  %v2776_v41 = vrot.slane %v2663_v13, 5  ;;  %v835_v7 = vsel %vm11262_vm11, %v567_v20, %v834_v38  ;;  %v2265_v42 = vrot.slane %v2263_v31, 4  ;;  %v2779_v43 = vrot.slane %v2664_v18, 5 }
  0x95   : > { %v258_v44 = vsel %vm11195_vm3, 0, %v257_v62  ;;  %836 = vst [vmem:[#allocation2 + $0x48] sm:$0xf] %v835_v7  ;;  %v2257_v45 = vrot.slane %v2256_v39, 4  ;;  %v2271_v46 = vrot.slane %v2269_v33, 5  ;;  %v579_v32 = vshrl.u32 %v11508_v61, 16 }
  0x96   : > { %v2778_v47 = vrot.slane %v2776_v41, 4  ;;  %259 = vst [vmem:[#allocation2 + $0x54] sm:$0x1] %v258_v44  ;;  %v2266_v49 = vor.u32 %v2265_v42, %v2261_v28  ;;  %v582_v50 = vshll.u32 %v11508_v61, 16  ;;  %v587_v52 = vshrl.u32 %v10177_v60, 16 }
  0x97   : > { %v590_v53 = vshll.u32 %v10177_v60, 16  ;;  %1873 = vrot.lane.b32.xlu1 %v9685_v22, %s11105_s11  ;;  %v581_v19 = vrot.slane %v579_v32, 7  ;;  %v314_v56 = vsel %vm11229_vm5, 0, %v313_v27  ;;  %v2262_v57 = vsel %vm11322_vm14, %v2257_v45, %v2261_v28  ;;  %v361_v28 = vld [vmem:[%s11225_s9 + $0x78] sm:$0xff] }
  0x98   : > { %v2267_v30 = vrot.slane %v2266_v49, 4  ;;  %v589_v58 = vrot.slane %v587_v52, 7  ;;  %315 = vst [vmem:[#allocation2 + $0x5c] sm:$0x1] %v314_v56  ;;  %v261_v63 = vsel %vm11195_vm3, 0, %v260_v48  ;;  %v2777_v61 = vsel %vm11256_vm10, %v9732_v40, %v2776_v41  ;;  %v362_v48 = vld [vmem:[%s11225_s9 + $0x80] sm:$0xff] }
  0x99   : > { %v2780_v1 = vsel %vm11256_vm10, %v2778_v47, %v2779_v43  ;;  %v585_v2 = vrot.slane %v581_v19, 4  ;;  %262 = vst [vmem:[#allocation2 + $0x60] sm:$0x1] %v261_v63  ;;  %v584_v18 = vor.u32 %v582_v50, %v581_v19  ;;  %v596_v29 = vshrl.u32 %v11583_v9, 16 }
  0x9a   : > { %v2272_v21 = vsel %vm11322_vm14, %v2267_v30, %v2271_v46  ;;  %v2121_v8 = vld [vmem:[#allocation2 + $0x4c] sm:$0xf]  ;;  %v592_v4 = vor.u32 %v590_v53, %v589_v58  ;;  %v9748_v51 = vcombine.low %v2777_v61, %v2780_v1  ;;  %v594_v23 = vrot.slane %v589_v58, 4 }
  0x9b   : > { %v838_v5 = vld [vmem:[#allocation2 + $0x50] sm:$0x1]  ;;  %v9716_v10 = vcombine.low %v2262_v57, %v2272_v21  ;;  %v2283_v12 = vshll.u32 %v2121_v8, 16  ;;  %v2287_v13 = vshrl.u32 %v2121_v8, 16  ;;  %v2666_v14 = vld [vmem:[#allocation2 + $0x4c] sm:$0xf]  ;;  %v11606_v58 = vpack.c.bf16 %v361_v28, %v361_v28 }
  0x9c   : > { %v839_v11 = vsel %vm11195_vm3, %v577_v37, %v838_v5  ;;  %v10809_v15 = vld [vmem:[#allocation2 + $0x48] sm:$0xff]   ;;  %v2783_v17 = vrot.slane %v2666_v14, 5  ;;  %v593_v62 = vsel %vm11244_vm9, %v585_v2, %v592_v4  ;;  %v599_v31 = vshll.u32 %v11583_v9, 16 }
  0x9d   : > { %840 = vst [vmem:[#allocation2 + $0x50] sm:$0x1] %v839_v11  ;;  %v2120_v16 = vld [vmem:[#allocation2 + $0x48] sm:$0xf]  ;;  %2593 = vrot.lane.b32.xlu0 %v9716_v10, %s11110_s16  ;;  %v11590_v26 = vrot.slane %v2283_v12, 5  ;;  %v2289_v60 = vrot.slane %v2287_v13, 4  ;;  %2050 = vrot.lane.b32.xlu1 %v10809_v15, %s11104_s10  ;;  %v11610_v5 = vpack.c.bf16 %v362_v48, %v362_v48 }
  0x9e   : > { %v2274_v20 = vshrl.u32 %v2120_v16, 16  ;;  %v2277_v24 = vshll.u32 %v2120_v16, 16  ;;  %v2665_v22 = vld [vmem:[#allocation2 + $0x48] sm:$0xe]  ;;  %844 = vst.msk [vmem:[#allocation2 + $0x58] sm:$0xf] %vm14422_vm0, %v593_v62 }
  0x9f   : > { %v9733_v59 = vrot.slane %v2665_v22, 9  ;;  %v2290_v27 = vor.u32 %v2289_v60, %v11590_v26  ;;  %v841_v37 = vld [vmem:[#allocation2 + $0x54] sm:$0xf]  ;;  %v3161_v38 = vld [vmem:[#allocation2 + $0x48] sm:$0xf]  ;;  %v2785_v44 = vrot.slane %v2783_v17, 4 }
  0xa0   : > { %v2276_v33 = vrot.slane %v2274_v20, 4  ;;  %v2279_v35 = vrot.slane %v2277_v24, 5  ;;  %v842_v39 = vsel %vm11262_vm11, %v584_v18, %v841_v37  ;;  %v3162_v40 = vld [vmem:[#allocation2 + $0x4c] sm:$0xf]  ;;  %v3294_v41 = vshrl.u32 %v3161_v38, 16 }
  0xa1   : > { %v3297_v7 = vshll.u32 %v3161_v38, 16  ;;  %v845_v42 = vld [vmem:[#allocation2 + $0x5c] sm:$0x1]  ;;  %2914 = vrot.lane.b32.xlu0 %v9748_v51, %s11108_s14  ;;  %v10810_v45 = vld [vmem:[#allocation2 + $0x48] sm:$0xff]   ;;  %843 = vst [vmem:[#allocation2 + $0x54] sm:$0xf] %v842_v39  ;;  %v2784_v4 = vsel %vm11256_vm10, %v9733_v59, %v2783_v17 }
  0xa2   : > { %v2280_v43 = vor.u32 %v2279_v35, %v2276_v33  ;;  %v3303_v46 = vshll.u32 %v3162_v40, 16  ;;  %v3307_v47 = vshrl.u32 %v3162_v40, 16  ;;  %v11601_v32 = vpop.permute.xlu0 %2040  ;;  %v2291_v49 = vrot.slane %v2290_v27, 4  ;;  %v3706_v55 = vld [vmem:[#allocation2 + $0x48] sm:$0xe] }
  0xa3   : > { %v3296_v50 = vrot.slane %v3294_v41, 4  ;;  %v3299_v52 = vrot.slane %v3297_v7, 5  ;;  %v846_v53 = vsel %vm11195_vm3, %v594_v23, %v845_v42  ;;  %v11608_v21 = vpop.permute.xlu1 %1863  ;;  %v3707_v51 = vld [vmem:[#allocation2 + $0x4c] sm:$0xf]  ;;  %v1074_v40 = vld [vmem:[#allocation2 + $0x48] sm:$0xf] }
  0xa4   : > { %v2122_v19 = vld [vmem:[#allocation2 + $0x50] sm:$0x1]  ;;  %v2281_v56 = vrot.slane %v2280_v43, 4  ;;  %v3305_v30 = vrot.slane %v3303_v46, 5  ;;  %847 = vst [vmem:[#allocation2 + $0x5c] sm:$0x1] %v846_v53 }
  0xa5   : > { %v2667_v57 = vld [vmem:[#allocation2 + $0x50] sm:$0x1]  ;;  %v2293_v63 = vshll.u32 %v2122_v19, 16  ;;  %v3300_v2 = vor.u32 %v3299_v52, %v3296_v50  ;;  %3092 = vrot.lane.b32.xlu0 %v10810_v45, %s11106_s12  ;;  %v3309_v10 = vrot.slane %v3307_v47, 4  ;;  %v3165_v12 = vld [vmem:[#allocation2 + $0x58] sm:$0xf] }
  0xa6   : > { %v2786_v61 = vrot.slane %v2667_v57, 5  ;;  %v3163_v1 = vld [vmem:[#allocation2 + $0x50] sm:$0x1]  ;;  %v2286_v8 = vsel %vm11322_vm14, %v2281_v56, %v11590_v26  ;;  %v3327_v16 = vshll.u32 %v3165_v12, 16  ;;  %v3331_v20 = vshrl.u32 %v3165_v12, 16  ;;  %v11620_v60 = vpop.permute.xlu0 %3084 }
  0xa7   : > { %v3313_v11 = vshll.u32 %v3163_v1, 16  ;;  %v2295_v13 = vrot.slane %v2293_v63, 5  ;;  %v3301_v15 = vrot.slane %v3300_v2, 4  ;;  %v3310_v18 = vor.u32 %v3309_v10, %v3305_v30  ;;  %v3708_v24 = vld [vmem:[#allocation2 + $0x50] sm:$0x1]  ;;  %v11626_v45 = vpop.permute.xlu1 %2042 }
  0xa8   : > { %v2787_v14 = vsel %vm11256_vm10, %v2785_v44, %v2786_v61  ;;  %v9796_v26 = vrot.slane %v3706_v55, 9  ;;  %v3164_v23 = vld [vmem:[#allocation2 + $0x54] sm:$0xf]  ;;  %v3329_v28 = vrot.slane %v3327_v16, 5  ;;  %v3710_v33 = vld [vmem:[#allocation2 + $0x58] sm:$0xf] }
  0xa9   : > { %v3315_v62 = vrot.slane %v3313_v11, 5  ;;  %v2296_v17 = vsel %vm11322_vm14, %v2291_v49, %v2295_v13  ;;  %v9749_v22 = vcombine.low %v2784_v4, %v2787_v14  ;;  %v3306_v59 = vsel %vm11322_vm14, %v3301_v15, %v3305_v30  ;;  %v3709_v39 = vld [vmem:[#allocation2 + $0x54] sm:$0xe]  ;;  %v1075_v61 = vld [vmem:[#allocation2 + $0x4c] sm:$0xf] }
  0xaa   : > { %v9717_v35 = vcombine.low %v2286_v8, %v2296_v17  ;;  %v3311_v27 = vrot.slane %v3310_v18, 4  ;;  %v3318_v37 = vshrl.u32 %v3164_v23, 16  ;;  %v3321_v38 = vshll.u32 %v3164_v23, 16  ;;  %v1076_v4 = vld [vmem:[#allocation2 + $0x50] sm:$0x1]  ;;  %v10811_v12 = vld [vmem:[#allocation2 + $0x54] sm:$0xff]  }
  0xab   : > { %v3166_v41 = vld [vmem:[#allocation2 + $0x5c] sm:$0x1]  ;;  %v3333_v7 = vrot.slane %v3331_v20, 4  ;;  %v3820_v42 = vrot.slane %v3707_v51, 5  ;;  %v3823_v43 = vrot.slane %v3708_v24, 5  ;;  %v9797_v44 = vrot.slane %v3709_v39, 9  ;;  %v11645_v17 = vpop.permute.xlu1 %3086 }
  0xac   : > { %2595 = vrot.lane.b32.xlu1 %v9717_v35, %s11110_s16  ;;  %v3316_v46 = vsel %vm11322_vm14, %v3311_v27, %v3315_v62  ;;  %v3320_v47 = vrot.slane %v3318_v37, 4  ;;  %v3323_v48 = vrot.slane %v3321_v38, 5  ;;  %v3337_v49 = vshll.u32 %v3166_v41, 16  ;;  %v3711_v50 = vld [vmem:[#allocation2 + $0x5c] sm:$0x1] }
  0xad   : > { %v9780_v52 = vcombine.low %v3306_v59, %v3316_v46  ;;  %v3334_v53 = vor.u32 %v3333_v7, %v3329_v28  ;;  %v3821_v55 = vsel %vm11256_vm10, %v9796_v26, %v3820_v42  ;;  %v3822_v19 = vrot.slane %v3820_v42, 4  ;;  %v1077_v51 = vld [vmem:[#allocation2 + $0x54] sm:$0xf]  ;;  %v1078_v26 = vld [vmem:[#allocation2 + $0x58] sm:$0xf] }
  0xae   : > { %v3324_v56 = vor.u32 %v3323_v48, %v3320_v47  ;;  %v3339_v57 = vrot.slane %v3337_v49, 5  ;;  %v3827_v30 = vrot.slane %v3710_v33, 5  ;;  %v3830_v63 = vrot.slane %v3711_v50, 5  ;;  %v11633_v1 = vpop.permute.xlu0 %1539  ;;  %v1079_v35 = vld [vmem:[#allocation2 + $0x5c] sm:$0x1] }
  0xaf   : > { %3637 = vrot.lane.b32.xlu0 %v9780_v52, %s11111_s17  ;;  %v3335_v2 = vrot.slane %v3334_v53, 4  ;;  %v3824_v8 = vsel %vm11256_vm10, %v3822_v19, %v3823_v43  ;;  %v1252_v10 = vshrl.u32 %v1074_v40, 16  ;;  %v1255_v11 = vshll.u32 %v1074_v40, 16  ;;  %v1622_v27 = vld [vmem:[#allocation2 + $0x48] sm:$0xe] }
  0xb0   : > { %2916 = vrot.lane.b32.xlu1 %v9749_v22, %s11108_s14  ;;  %v3325_v13 = vrot.slane %v3324_v56, 4  ;;  %v9812_v14 = vcombine.low %v3821_v55, %v3824_v8  ;;  %v11641_v15 = vsel %vm11256_vm10, %v9797_v44, %v3827_v30  ;;  %v3829_v16 = vrot.slane %v3827_v30, 4  ;;  %v1623_v7 = vld [vmem:[#allocation2 + $0x4c] sm:$0xf]  ;;  %v1624_v42 = vld [vmem:[#allocation2 + $0x50] sm:$0x1] }
  0xb1   : > { %v3340_v18 = vsel %vm11322_vm14, %v3335_v2, %v3339_v57  ;;  %v1254_v62 = vrot.slane %v1252_v10, 4  ;;  %v1257_v20 = vrot.slane %v1255_v11, 5  ;;  %v1261_v24 = vshll.u32 %v1075_v61, 16  ;;  %v1625_v47 = vld [vmem:[#allocation2 + $0x54] sm:$0xe] }
  0xb2   : > { %v3330_v22 = vsel %vm11322_vm14, %v3325_v13, %v3329_v28  ;;  %v3831_v59 = vsel %vm11256_vm10, %v3829_v16, %v3830_v63  ;;  %v1265_v23 = vshrl.u32 %v1075_v61, 16  ;;  %v1271_v33 = vshll.u32 %v1076_v4, 16  ;;  %v11651_v37 = vpop.permute.xlu0 %2906  ;;  %v1626_v53 = vld [vmem:[#allocation2 + $0x58] sm:$0xf]  ;;  %v1627_v30 = vld [vmem:[#allocation2 + $0x5c] sm:$0x1]  ;;  %v11658_v4 = vpop.permute.xlu1 %1865 }
  0xb3   : > { %v9781_v38 = vcombine.low %v3330_v22, %v3340_v18  ;;  %3958 = vrot.lane.b32.xlu0 %v9812_v14, %s11109_s15  ;;  %v9813_v39 = vcombine.low %v11641_v15, %v3831_v59  ;;  %v1258_v40 = vor.u32 %v1257_v20, %v1254_v62  ;;  %v1263_v41 = vrot.slane %v1261_v24, 5 }
  0xb4   : > { %3094 = vrot.lane.b32.xlu1 %v10811_v12, %s11106_s12  ;;  %v1267_v28 = vrot.slane %v1265_v23, 4  ;;  %v1273_v43 = vrot.slane %v1271_v33, 5  ;;  %v1276_v44 = vshrl.u32 %v1077_v51, 16  ;;  %v1279_v46 = vshll.u32 %v1077_v51, 16 }
  0xb5   : > { %v1259_v48 = vrot.slane %v1258_v40, 4  ;;  %v1285_v49 = vshll.u32 %v1078_v26, 16  ;;  %v1289_v50 = vshrl.u32 %v1078_v26, 16  ;;  %v1295_v52 = vshll.u32 %v1079_v35, 16  ;;  %v848_v35 = vld [vmem:[#allocation2 + $0x60] sm:$0xf] }
  0xb6   : > { %v1268_v55 = vor.u32 %v1267_v28, %v1263_v41  ;;  %v1278_v19 = vrot.slane %v1276_v44, 4  ;;  %v1281_v56 = vrot.slane %v1279_v46, 5  ;;  %v9670_v57 = vrot.slane %v1622_v27, 9  ;;  %v11661_v14 = vpop.permute.xlu0 %3950  ;;  %v2123_v27 = vld [vmem:[#allocation2 + $0x54] sm:$0xf] }
  0xb7   : > { %v1264_v63 = vsel %vm11322_vm14, %v1259_v48, %v1263_v41  ;;  %v1287_v61 = vrot.slane %v1285_v49, 5  ;;  %v1291_v2 = vrot.slane %v1289_v50, 4  ;;  %v1297_v8 = vrot.slane %v1295_v52, 5  ;;  %v2124_v28 = vld [vmem:[#allocation2 + $0x58] sm:$0xf]  ;;  %v11685_v49 = vpop.permute.xlu1 %2908 }
  0xb8   : > { %3639 = vrot.lane.b32.xlu1 %v9781_v38, %s11111_s17  ;;  %v1269_v10 = vrot.slane %v1268_v55, 4  ;;  %v1282_v11 = vor.u32 %v1281_v56, %v1278_v19  ;;  %v1747_v12 = vrot.slane %v1623_v7, 5  ;;  %v1750_v13 = vrot.slane %v1624_v42, 5  ;;  %v316_v38 = vld [vmem:[#allocation2 + $0x68] sm:$0x1]  ;;  %v363_v19 = vld [vmem:[%s11225_s9 + $0x88] sm:$0xff] }
  0xb9   : > { %v1292_v15 = vor.u32 %v1291_v2, %v1287_v61  ;;  %v9671_v16 = vrot.slane %v1625_v47, 9  ;;  %v1754_v51 = vrot.slane %v1626_v53, 5  ;;  %v1757_v18 = vrot.slane %v1627_v30, 5  ;;  %v11683_v48 = vld [vmem:[#allocation2 + $0x54] sm:$0xe] }
  0xba   : > { %v1274_v62 = vsel %vm11322_vm14, %v1269_v10, %v1273_v43  ;;  %v1283_v20 = vrot.slane %v1282_v11, 4  ;;  %v1748_v24 = vsel %vm11256_vm10, %v9670_v57, %v1747_v12  ;;  %v1749_v26 = vrot.slane %v1747_v12, 4  ;;  %v2125_v43 = vld [vmem:[#allocation2 + $0x5c] sm:$0x1]  ;;  %v11689_v55 = vld [vmem:[#allocation2 + $0x58] sm:$0xf] }
  0xbb   : > { %v9654_v22 = vcombine.low %v1264_v63, %v1274_v62  ;;  %v1293_v59 = vrot.slane %v1292_v15, 4  ;;  %v1755_v23 = vsel %vm11256_vm10, %v9671_v16, %v1754_v51  ;;  %v1756_v33 = vrot.slane %v1754_v51, 4  ;;  %v11692_v56 = vpop.permute.xlu0 %3952  ;;  %v263_v2 = vld [vmem:[#allocation2 + $0x6c] sm:$0x1]  ;;  %v10812_v11 = vld [vmem:[#allocation2 + $0x54] sm:$0xff]  }
  0xbc   : > { %3960 = vrot.lane.b32.xlu1 %v9813_v39, %s11109_s15  ;;  %v1288_v40 = vsel %vm11322_vm14, %v1283_v20, %v1287_v61  ;;  %v1751_v41 = vsel %vm11256_vm10, %v1749_v26, %v1750_v13  ;;  %v598_v7 = vrot.slane %v596_v29, 7  ;;  %v604_v42 = vshrl.u32 %v11606_v58, 16  ;;  %v2670_v61 = vld [vmem:[#allocation2 + $0x5c] sm:$0x1]  ;;  %v319_v51 = vld [vmem:[#allocation2 + $0x74] sm:$0x1] }
  0xbd   : > { %1551 = vrot.lane.b32.xlu0 %v9654_v22, %s11107_s13  ;;  %v1298_v44 = vsel %vm11322_vm14, %v1293_v59, %v1297_v8  ;;  %v9686_v39 = vcombine.low %v1748_v24, %v1751_v41  ;;  %v1758_v46 = vsel %vm11256_vm10, %v1756_v33, %v1757_v18  ;;  %v607_v47 = vshll.u32 %v11606_v58, 16  ;;  %v10816_v26 = vld [vmem:[#allocation2] sm:$0xff]   ;;  %v10819_v22 = vld [vmem:[#allocation2 + $0xc] sm:$0xff]   ;;  %v10820_v59 = vld [vmem:[#allocation2 + $0x18] sm:$0xff]   ;;  %v11707_v41 = vpop.permute.xlu1 %2587 }
  0xbe   : > { %v9655_v29 = vcombine.low %v1288_v40, %v1298_v44  ;;  %v9687_v50 = vcombine.low %v1755_v23, %v1758_v46  ;;  %v601_v52 = vor.u32 %v599_v31, %v598_v7  ;;  %v602_v53 = vrot.slane %v598_v7, 4  ;;  %v10822_v23 = vld [vmem:[#allocation2 + $0x24] sm:$0xff]   ;;  %v10830_v33 = vld [vmem:[#allocation2 + $0x30] sm:$0xff]   ;;  %1040 = vst.msk [vmem:[#allocation4] sm:$0xff] %vm14416_vm15, %v10816_v26  ;;  %1041 = vst.msk [vmem:[#allocation4 + $0x50] sm:$0xff] %vm14416_vm15, %v10819_v22 }
  0xbf   : > { %v11694_v57 = vrot.slane %v604_v42, 7  ;;  %v2298_v30 = vshrl.u32 %v2123_v27, 16  ;;  %v2301_v63 = vshll.u32 %v2123_v27, 16  ;;  %v2307_v58 = vshll.u32 %v2124_v28, 16  ;;  %1042 = vst.msk [vmem:[#allocation4 + $0xa0] sm:$0xff] %vm14416_vm15, %v10820_v59  ;;  %1043 = vst.msk [vmem:[#allocation4 + $0xf0] sm:$0xff] %vm14416_vm15, %v10822_v23 }
  0xc0   : > { %1553 = vrot.lane.b32.xlu1 %v9655_v29, %s11107_s13  ;;  %v849_v8 = vsel %vm11262_vm11, %v601_v52, %v848_v35  ;;  %v2311_v9 = vshrl.u32 %v2124_v28, 16  ;;  %v2317_v31 = vshll.u32 %v2125_v43, 16  ;;  %v317_v10 = vsel %vm11229_vm5, 0, %v316_v38  ;;  %1044 = vst.msk [vmem:[#allocation4 + $0x140] sm:$0xff] %vm14416_vm15, %v10830_v33 }
  0xc1   : > { %1875 = vrot.lane.b32.xlu0 %v9686_v39, %s11105_s11  ;;  %v609_v12 = vor.u32 %v607_v47, %v11694_v57  ;;  %850 = vst [vmem:[#allocation2 + $0x60] sm:$0xf] %v849_v8  ;;  %v2300_v13 = vrot.slane %v2298_v30, 4  ;;  %v2303_v15 = vrot.slane %v2301_v63, 5  ;;  %318 = vst [vmem:[#allocation2 + $0x68] sm:$0x1] %v317_v10  ;;  %v10181_v16 = vpack.c.bf16 %v363_v19, %v363_v19  ;;  %v11715_v44 = vpop.permute.xlu0 %1541 }
  0xc2   : > { %v2309_v18 = vrot.slane %v2307_v58, 5  ;;  %v2313_v62 = vrot.slane %v2311_v9, 4  ;;  %v2319_v20 = vrot.slane %v2317_v31, 5  ;;  %v9734_v24 = vrot.slane %v11683_v48, 9  ;;  %v10831_v39 = vld [vmem:[#allocation2 + $0x3c] sm:$0xff]  }
  0xc3   : > { %v610_v35 = vsel %vm11244_vm9, %v602_v53, %v609_v12  ;;  %v2304_v27 = vor.u32 %v2303_v15, %v2300_v13  ;;  %v2790_v38 = vrot.slane %v11689_v55, 5  ;;  %v2793_v40 = vrot.slane %v2670_v61, 5  ;;  %1045 = vst.msk [vmem:[#allocation4 + $0x190] sm:$0xff] %vm14416_vm15, %v10831_v39 }
  0xc4   : > { %1877 = vrot.lane.b32.xlu1 %v9687_v50, %s11105_s11  ;;  %851 = vst.msk [vmem:[#allocation2 + $0x64] sm:$0xf] %vm14422_vm0, %v610_v35  ;;  %v2314_v7 = vor.u32 %v2313_v62, %v2309_v18  ;;  %v264_v42 = vsel %vm11195_vm3, 0, %v263_v2  ;;  %v613_v28 = vshrl.u32 %v11610_v5, 16  ;;  %v616_v43 = vshll.u32 %v11610_v5, 16 }
  0xc5   : > { %2052 = vrot.lane.b32.xlu0 %v10812_v11, %s11104_s10  ;;  %v611_v46 = vrot.slane %v11694_v57, 4  ;;  %v2305_v47 = vrot.slane %v2304_v27, 4  ;;  %v2792_v48 = vrot.slane %v2790_v38, 4  ;;  %265 = vst [vmem:[#allocation2 + $0x6c] sm:$0x1] %v264_v42  ;;  %v621_v29 = vshrl.u32 %v10181_v16, 16  ;;  %v11739_v12 = vpop.permute.xlu1 %3631 }
  0xc6   : > { %v2315_v50 = vrot.slane %v2314_v7, 4  ;;  %v615_v52 = vrot.slane %v613_v28, 7  ;;  %v624_v53 = vshll.u32 %v10181_v16, 16  ;;  %v320_v55 = vsel %vm11229_vm5, 0, %v319_v51 }
  0xc7   : > { %v2310_v5 = vsel %vm11322_vm14, %v2305_v47, %v2309_v18  ;;  %v11723_v19 = vrot.slane %v621_v29, 7  ;;  %321 = vst [vmem:[#allocation2 + $0x74] sm:$0x1] %v320_v55  ;;  %v2791_v58 = vsel %vm11256_vm10, %v9734_v24, %v2790_v38  ;;  %v2794_v61 = vsel %vm11256_vm10, %v2792_v48, %v2793_v40  ;;  %v364_v38 = vld [vmem:[%s11225_s9 + $0x90] sm:$0xff]  ;;  %v365_v40 = vld [vmem:[%s11225_s9 + $0x98] sm:$0xff] }
  0xc8   : > { %v2320_v57 = vsel %vm11322_vm14, %v2315_v50, %v2319_v20  ;;  %v852_v30 = vld [vmem:[#allocation2 + $0x68] sm:$0x1]  ;;  %v2126_v63 = vld [vmem:[#allocation2 + $0x60] sm:$0xf]  ;;  %v618_v2 = vor.u32 %v616_v43, %v615_v52  ;;  %v619_v15 = vrot.slane %v615_v52, 4  ;;  %v9750_v22 = vcombine.low %v2791_v58, %v2794_v61 }
  0xc9   : > { %v9718_v8 = vcombine.low %v2310_v5, %v2320_v57  ;;  %v853_v9 = vsel %vm11195_vm3, %v611_v46, %v852_v30  ;;  %v2322_v31 = vshrl.u32 %v2126_v63, 16  ;;  %v2325_v10 = vshll.u32 %v2126_v63, 16  ;;  %v2671_v11 = vld [vmem:[#allocation2 + $0x60] sm:$0xe]  ;;  %v11743_v62 = vpop.permute.xlu0 %2585 }
  0xca   : > { %854 = vst [vmem:[#allocation2 + $0x68] sm:$0x1] %v853_v9  ;;  %v9735_v13 = vrot.slane %v2671_v11, 9  ;;  %v626_v16 = vor.u32 %v624_v53, %v11723_v19  ;;  %v628_v51 = vrot.slane %v11723_v19, 4  ;;  %v3167_v18 = vld [vmem:[#allocation2 + $0x60] sm:$0xf] }
  0xcb   : > { %v10813_v20 = vld [vmem:[#allocation2 + $0x60] sm:$0xff]   ;;  %2597 = vrot.lane.b32.xlu0 %v9718_v8, %s11110_s16  ;;  %v2324_v26 = vrot.slane %v2322_v31, 4  ;;  %v2327_v59 = vrot.slane %v2325_v10, 5  ;;  %v3342_v28 = vshrl.u32 %v3167_v18, 16  ;;  %v3345_v55 = vshll.u32 %v3167_v18, 16 }
  0xcc   : > { %v2127_v24 = vld [vmem:[#allocation2 + $0x64] sm:$0xf]  ;;  %v627_v27 = vsel %vm11244_vm9, %v619_v15, %v626_v16  ;;  %2054 = vrot.lane.b32.xlu1 %v10813_v20, %s11104_s10  ;;  %v855_v42 = vld [vmem:[#allocation2 + $0x6c] sm:$0xf]  ;;  %v1544_v5 = vpop.permute.xlu1 %1543  ;;  %v11759_v31 = vpack.c.bf16 %v364_v38, %v364_v38  ;;  %v11761_v10 = vpack.c.bf16 %v365_v40, %v365_v40  ;;  %v366_v20 = vld [vmem:[%s11225_s9 + $0xa0] sm:$0xff]  ;;  %vm14419_vm1 = vcmask 64544  }
  0xcd   : > { %v2331_v23 = vshll.u32 %v2127_v24, 16  ;;  %v2335_v33 = vshrl.u32 %v2127_v24, 16  ;;  %v2672_v35 = vld [vmem:[#allocation2 + $0x64] sm:$0xf]  ;;  %858 = vst.msk [vmem:[#allocation2 + $0x70] sm:$0xf] %vm14422_vm0, %v627_v27  ;;  %v2328_v43 = vor.u32 %v2327_v59, %v2324_v26  ;;  %v856_v47 = vsel %vm11262_vm11, %v618_v2, %v855_v42 }
  0xce   : > { %v2797_v7 = vrot.slane %v2672_v35, 5  ;;  %v3168_v48 = vld [vmem:[#allocation2 + $0x64] sm:$0xf]  ;;  %v859_v29 = vld [vmem:[#allocation2 + $0x74] sm:$0x1]  ;;  %v3344_v53 = vrot.slane %v3342_v28, 4 }
  0xcf   : > { %v2333_v39 = vrot.slane %v2331_v23, 5  ;;  %v2337_v46 = vrot.slane %v2335_v33, 4  ;;  %2918 = vrot.lane.b32.xlu0 %v9750_v22, %s11108_s14  ;;  %v10814_v52 = vld [vmem:[#allocation2 + $0x60] sm:$0xff]   ;;  %857 = vst [vmem:[#allocation2 + $0x6c] sm:$0xf] %v856_v47  ;;  %v2329_v19 = vrot.slane %v2328_v43, 4  ;;  %v860_v9 = vsel %vm11195_vm3, %v628_v51, %v859_v29 }
  0xd0   : > { %v2799_v50 = vrot.slane %v2797_v7, 4  ;;  %v3351_v30 = vshll.u32 %v3168_v48, 16  ;;  %v3355_v63 = vshrl.u32 %v3168_v48, 16  ;;  %v11765_v16 = vsel %vm11256_vm10, %v9735_v13, %v2797_v7  ;;  %861 = vst [vmem:[#allocation2 + $0x74] sm:$0x1] %v860_v9  ;;  %v367_v51 = vld [vmem:[%s11225_s9 + $0xa8] sm:$0xff] }
  0xd1   : > { %v2338_v57 = vor.u32 %v2337_v46, %v2333_v39  ;;  %v11755_v58 = vpop.permute.xlu0 %3629  ;;  %v2128_v61 = vld [vmem:[#allocation2 + $0x68] sm:$0x1]  ;;  %v3347_v24 = vrot.slane %v3345_v55, 5  ;;  %v2334_v23 = vsel %vm11322_vm14, %v2329_v19, %v2333_v39  ;;  %1588 = vst.msk [vmem:[#allocation4] sm:$0xff] %vm14419_vm1, %v11633_v1  ;;  %v3712_v42 = vld [vmem:[#allocation2 + $0x60] sm:$0xe]  ;;  %v11779_v43 = vpack.c.bf16 %v366_v20, %v366_v20 }
  0xd2   : > { %v2673_v8 = vld [vmem:[#allocation2 + $0x68] sm:$0x1]  ;;  %v2341_v15 = vshll.u32 %v2128_v61, 16  ;;  %v3353_v26 = vrot.slane %v3351_v30, 5  ;;  %v3357_v22 = vrot.slane %v3355_v63, 4  ;;  %1589 = vst.msk [vmem:[#allocation4 + $0x50] sm:$0xff] %vm14419_vm1, %v11715_v44  ;;  %v11785_v1 = vpack.c.bf16 %v367_v51, %v367_v51 }
  0xd3   : > { %v3169_v2 = vld [vmem:[#allocation2 + $0x68] sm:$0x1]  ;;  %v2339_v11 = vrot.slane %v2338_v57, 4  ;;  %v2800_v18 = vrot.slane %v2673_v8, 5  ;;  %3096 = vrot.lane.b32.xlu0 %v10814_v52, %s11106_s12  ;;  %v3348_v38 = vor.u32 %v3347_v24, %v3344_v53  ;;  %1590 = vst.msk [vmem:[#allocation4 + $0xa0] sm:$0xff] %vm14419_vm1, %v1544_v5  ;;  %vm1911_vm6 = vcmask 97344  }
  0xd4   : > { %v3361_v59 = vshll.u32 %v3169_v2, 16  ;;  %v2343_v33 = vrot.slane %v2341_v15, 5  ;;  %v3171_v27 = vld [vmem:[#allocation2 + $0x70] sm:$0xf]  ;;  %v3358_v40 = vor.u32 %v3357_v22, %v3353_v26  ;;  %v3713_v29 = vld [vmem:[#allocation2 + $0x64] sm:$0xf] }
  0xd5   : > { %v2801_v35 = vsel %vm11256_vm10, %v2799_v50, %v2800_v18  ;;  %v1868_v13 = vpop.permute.xlu0 %1867  ;;  %v3375_v48 = vshll.u32 %v3171_v27, 16  ;;  %v3714_v50 = vld [vmem:[#allocation2 + $0x68] sm:$0x1]  ;;  %v3349_v44 = vrot.slane %v3348_v38, 4  ;;  %v3716_v5 = vld [vmem:[#allocation2 + $0x70] sm:$0xf] }
  0xd6   : > { %v3363_v7 = vrot.slane %v3361_v59, 5  ;;  %v1546_v28 = vpop.permute.xlu1 %1545  ;;  %v2344_v39 = vsel %vm11322_vm14, %v2339_v11, %v2343_v33  ;;  %v9751_v46 = vcombine.low %v11765_v16, %v2801_v35  ;;  %v3170_v47 = vld [vmem:[#allocation2 + $0x6c] sm:$0xf]  ;;  %v3359_v53 = vrot.slane %v3358_v40, 4  ;;  %1912 = vst.msk [vmem:[#allocation4] sm:$0xff] %vm1911_vm6, %v11608_v21  ;;  %1913 = vst.msk [vmem:[#allocation4 + $0x50] sm:$0xff] %vm1911_vm6, %v11658_v4 }
  0xd7   : > { %1591 = vst.msk [vmem:[#allocation4 + $0xf0] sm:$0xff] %vm14419_vm1, %v1546_v28  ;;  %v9719_v52 = vcombine.low %v2334_v23, %v2344_v39  ;;  %v3366_v55 = vshrl.u32 %v3170_v47, 16  ;;  %v3369_v19 = vshll.u32 %v3170_v47, 16  ;;  %v3377_v57 = vrot.slane %v3375_v48, 5  ;;  %v3715_v63 = vld [vmem:[#allocation2 + $0x6c] sm:$0xe] }
  0xd8   : > { %v3379_v30 = vshrl.u32 %v3171_v27, 16  ;;  %v3354_v61 = vsel %vm11322_vm14, %v3349_v44, %v3353_v26  ;;  %v3364_v8 = vsel %vm11322_vm14, %v3359_v53, %v3363_v7  ;;  %v3172_v2 = vld [vmem:[#allocation2 + $0x74] sm:$0x1]  ;;  %v9798_v11 = vrot.slane %v3712_v42, 9  ;;  %1914 = vst.msk [vmem:[#allocation4 + $0xa0] sm:$0xff] %vm1911_vm6, %v1868_v13  ;;  %v10815_v40 = vld [vmem:[#allocation2 + $0x6c] sm:$0xff]  }
  0xd9   : > { %2599 = vrot.lane.b32.xlu1 %v9719_v52, %s11110_s16  ;;  %v3368_v9 = vrot.slane %v3366_v55, 4  ;;  %v3717_v15 = vld [vmem:[#allocation2 + $0x74] sm:$0x1]  ;;  %v9782_v18 = vcombine.low %v3354_v61, %v3364_v8  ;;  %v3371_v20 = vrot.slane %v3369_v19, 5  ;;  %v3385_v26 = vshll.u32 %v3172_v2, 16  ;;  %v11798_v22 = vpop.permute.xlu0 %2044 }
  0xda   : > { %v1870_v16 = vpop.permute.xlu1 %1869  ;;  %v3381_v24 = vrot.slane %v3379_v30, 4  ;;  %v3834_v59 = vrot.slane %v3713_v29, 5  ;;  %v3837_v51 = vrot.slane %v3714_v50, 5  ;;  %v9799_v23 = vrot.slane %v3715_v63, 9  ;;  %v1080_v33 = vld [vmem:[#allocation2 + $0x60] sm:$0xf] }
  0xdb   : > { %1915 = vst.msk [vmem:[#allocation4 + $0xf0] sm:$0xff] %vm1911_vm6, %v1870_v16  ;;  %v3841_v21 = vrot.slane %v3716_v5, 5  ;;  %3641 = vrot.lane.b32.xlu0 %v9782_v18, %s11111_s17  ;;  %v3372_v35 = vor.u32 %v3371_v20, %v3368_v9  ;;  %v3387_v27 = vrot.slane %v3385_v26, 5  ;;  %v3844_v13 = vrot.slane %v3717_v15, 5  ;;  %v1081_v38 = vld [vmem:[#allocation2 + $0x64] sm:$0xf] }
  0xdc   : > { %v3382_v4 = vor.u32 %v3381_v24, %v3377_v57  ;;  %v3835_v7 = vsel %vm11256_vm10, %v9798_v11, %v3834_v59  ;;  %v3836_v42 = vrot.slane %v3834_v59, 4  ;;  %v1082_v29 = vld [vmem:[#allocation2 + $0x68] sm:$0x1]  ;;  %v1300_v50 = vshrl.u32 %v1080_v33, 16  ;;  %v1083_v5 = vld [vmem:[#allocation2 + $0x6c] sm:$0xf] }
  0xdd   : > { %2920 = vrot.lane.b32.xlu1 %v9751_v46, %s11108_s14  ;;  %v3842_v28 = vsel %vm11256_vm10, %v9799_v23, %v3841_v21  ;;  %v3843_v39 = vrot.slane %v3841_v21, 4  ;;  %v3373_v47 = vrot.slane %v3372_v35, 4  ;;  %v1303_v52 = vshll.u32 %v1080_v33, 16  ;;  %v1084_v19 = vld [vmem:[#allocation2 + $0x70] sm:$0xf] }
  0xde   : > { %v3383_v48 = vrot.slane %v3382_v4, 4  ;;  %v3838_v44 = vsel %vm11256_vm10, %v3836_v42, %v3837_v51  ;;  %v1309_v53 = vshll.u32 %v1081_v38, 16  ;;  %v1313_v55 = vshrl.u32 %v1081_v38, 16  ;;  %v1085_v2 = vld [vmem:[#allocation2 + $0x74] sm:$0x1] }
  0xdf   : > { %v3845_v46 = vsel %vm11256_vm10, %v3843_v39, %v3844_v13  ;;  %v3378_v30 = vsel %vm11322_vm14, %v3373_v47, %v3377_v57  ;;  %v9814_v61 = vcombine.low %v3835_v7, %v3838_v44  ;;  %v1302_v15 = vrot.slane %v1300_v50, 4  ;;  %v1628_v20 = vld [vmem:[#allocation2 + $0x60] sm:$0xe]  ;;  %v1629_v51 = vld [vmem:[#allocation2 + $0x64] sm:$0xf] }
  0xe0   : > { %v3388_v63 = vsel %vm11322_vm14, %v3383_v48, %v3387_v27  ;;  %v9815_v8 = vcombine.low %v3842_v28, %v3845_v46  ;;  %v1305_v16 = vrot.slane %v1303_v52, 5  ;;  %v1311_v18 = vrot.slane %v1309_v53, 5  ;;  %v1630_v4 = vld [vmem:[#allocation2 + $0x68] sm:$0x1]  ;;  %v1631_v7 = vld [vmem:[#allocation2 + $0x6c] sm:$0xe] }
  0xe1   : > { %v11814_v9 = vpop.permute.xlu0 %2589  ;;  %3098 = vrot.lane.b32.xlu1 %v10815_v40, %s11106_s12  ;;  %v9783_v11 = vcombine.low %v3378_v30, %v3388_v63  ;;  %3962 = vrot.lane.b32.xlu0 %v9814_v61, %s11109_s15  ;;  %v1315_v24 = vrot.slane %v1313_v55, 4  ;;  %v1319_v26 = vshll.u32 %v1082_v29, 16  ;;  %v1324_v57 = vshrl.u32 %v1083_v5, 16  ;;  %v1632_v48 = vld [vmem:[#allocation2 + $0x70] sm:$0xf] }
  0xe2   : > { %v1327_v59 = vshll.u32 %v1083_v5, 16  ;;  %v1306_v23 = vor.u32 %v1305_v16, %v1302_v15  ;;  %v1333_v21 = vshll.u32 %v1084_v19, 16  ;;  %v1337_v33 = vshrl.u32 %v1084_v19, 16  ;;  %v1633_v53 = vld [vmem:[#allocation2 + $0x74] sm:$0x1] }
  0xe3   : > { %v1343_v35 = vshll.u32 %v1085_v2, 16  ;;  %v1316_v27 = vor.u32 %v1315_v24, %v1311_v18  ;;  %v1321_v13 = vrot.slane %v1319_v26, 5  ;;  %v1326_v38 = vrot.slane %v1324_v57, 4  ;;  %v266_v63 = vld [vmem:[#allocation2 + $0x78] sm:$0x1]  ;;  %v2047_v57 = vpop.permute.xlu1 %2046 }
  0xe4   : > { %v1329_v40 = vrot.slane %v1327_v59, 5  ;;  %v1307_v42 = vrot.slane %v1306_v23, 4  ;;  %v1335_v28 = vrot.slane %v1333_v21, 5  ;;  %v1339_v39 = vrot.slane %v1337_v33, 4 }
  0xe5   : > { %3643 = vrot.lane.b32.xlu1 %v9783_v11, %s11111_s17  ;;  %v1345_v47 = vrot.slane %v1343_v35, 5  ;;  %v11819_v29 = vpop.permute.xlu0 %2910  ;;  %v1317_v50 = vrot.slane %v1316_v27, 4  ;;  %v9672_v44 = vrot.slane %v1628_v20, 9  ;;  %v1761_v46 = vrot.slane %v1629_v51, 5 }
  0xe6   : > { %v1330_v52 = vor.u32 %v1329_v40, %v1326_v38  ;;  %v1312_v55 = vsel %vm11322_vm14, %v1307_v42, %v1311_v18  ;;  %v1340_v5 = vor.u32 %v1339_v39, %v1335_v28  ;;  %v1764_v19 = vrot.slane %v1630_v4, 5  ;;  %v2129_v4 = vld [vmem:[#allocation2 + $0x6c] sm:$0xf]  ;;  %v11842_v42 = vld [vmem:[#allocation2 + $0x70] sm:$0xf] }
  0xe7   : > { %v9673_v30 = vrot.slane %v1631_v7, 9  ;;  %v1322_v61 = vsel %vm11322_vm14, %v1317_v50, %v1321_v13  ;;  %v1762_v11 = vsel %vm11256_vm10, %v9672_v44, %v1761_v46  ;;  %v1763_v15 = vrot.slane %v1761_v46, 4  ;;  %v322_v39 = vld [vmem:[#allocation2 + $0x80] sm:$0x1]  ;;  %v10817_v50 = vld [vmem:[#allocation2 + $0x6c] sm:$0xff]   ;;  %v10837_v46 = vld [vmem:[#allocation2 + $0x54] sm:$0xff]  }
  0xe8   : > { %v1331_v2 = vrot.slane %v1330_v52, 4  ;;  %v9656_v16 = vcombine.low %v1312_v55, %v1322_v61  ;;  %v1341_v20 = vrot.slane %v1340_v5, 4  ;;  %v1768_v24 = vrot.slane %v1632_v48, 5  ;;  %v11849_v44 = vld [vmem:[#allocation2 + $0x6c] sm:$0xe]  ;;  %1047 = vst.msk [vmem:[#allocation4 + $0x230] sm:$0xff] %vm14416_vm15, %v10837_v46 }
  0xe9   : > { %3964 = vrot.lane.b32.xlu1 %v9815_v8, %s11109_s15  ;;  %v1771_v26 = vrot.slane %v1633_v53, 5  ;;  %v1765_v59 = vsel %vm11256_vm10, %v1763_v15, %v1764_v19  ;;  %v267_v51 = vsel %vm11195_vm3, 0, %v266_v63  ;;  %v630_v23 = vshrl.u32 %v11759_v31, 16  ;;  %v3089_v27 = vpop.permute.xlu0 %3088 }
  0xea   : > { %v1336_v18 = vsel %vm11322_vm14, %v1331_v2, %v1335_v28  ;;  %1555 = vrot.lane.b32.xlu0 %v9656_v16, %s11107_s13  ;;  %v1346_v8 = vsel %vm11322_vm14, %v1341_v20, %v1345_v47  ;;  %v9688_v21 = vcombine.low %v1762_v11, %v1765_v59  ;;  %v1769_v33 = vsel %vm11256_vm10, %v9673_v30, %v1768_v24  ;;  %v11844_v28 = vld [vmem:[#allocation2 + $0x74] sm:$0x1]  ;;  %v10836_v47 = vld [vmem:[#allocation2 + $0x48] sm:$0xff]  }
  0xeb   : > { %v1770_v35 = vrot.slane %v1768_v24, 4  ;;  %268 = vst [vmem:[#allocation2 + $0x78] sm:$0x1] %v267_v51  ;;  %v9657_v13 = vcombine.low %v1336_v18, %v1346_v8  ;;  %v632_v38 = vrot.slane %v630_v23, 7  ;;  %v633_v40 = vshll.u32 %v11759_v31, 16  ;;  %1046 = vst.msk [vmem:[#allocation4 + $0x1e0] sm:$0xff] %vm14416_vm15, %v10836_v47 }
  0xec   : > { %v638_v7 = vshrl.u32 %v11761_v10, 16  ;;  %v641_v52 = vshll.u32 %v11761_v10, 16  ;;  %vm2088_vm7 = vcmask 130144   ;;  %vm2633_vm8 = vcmask 162944   ;;  %v269_v10 = vld [vmem:[#allocation2 + $0x84] sm:$0x1] }
  0xed   : > { %v1772_v48 = vsel %vm11256_vm10, %v1770_v35, %v1771_v26  ;;  %1557 = vrot.lane.b32.xlu1 %v9657_v13, %s11107_s13  ;;  %v635_v53 = vor.u32 %v633_v40, %v632_v38  ;;  %v636_v55 = vrot.slane %v632_v38, 4  ;;  %2090 = vst.msk [vmem:[#allocation4 + $0x50] sm:$0xff] %vm2088_vm7, %v11626_v45  ;;  %2089 = vst.msk [vmem:[#allocation4] sm:$0xff] %vm2088_vm7, %v11601_v32  ;;  %vm2954_vm12 = vcmask 195744   ;;  %v2675_v32 = vld [vmem:[#allocation2 + $0x70] sm:$0xf] }
  0xee   : > { %v9689_v31 = vcombine.low %v1769_v33, %v1772_v48  ;;  %v11852_v5 = vrot.slane %v638_v7, 7  ;;  %2091 = vst.msk [vmem:[#allocation4 + $0xa0] sm:$0xff] %vm2088_vm7, %v11798_v22  ;;  %2092 = vst.msk [vmem:[#allocation4 + $0xf0] sm:$0xff] %vm2088_vm7, %v2047_v57  ;;  %1879 = vrot.lane.b32.xlu0 %v9688_v21, %s11105_s11  ;;  %vm3132_vm13 = vcmask 228544   ;;  %vm3677_vm4 = vcmask 261344  }
  0xef   : > { %vm14420_vm2 = vcmask 294144   ;;  %2635 = vst.msk [vmem:[#allocation4 + $0x50] sm:$0xff] %vm2633_vm8, %v11707_v41  ;;  %2634 = vst.msk [vmem:[#allocation4] sm:$0xff] %vm2633_vm8, %v11743_v62  ;;  %v11867_v45 = vld [vmem:[#allocation2 + $0x74] sm:$0x1]  ;;  %v2592_v22 = vpop.permute.xlu1 %2591  ;;  %v2346_v41 = vshrl.u32 %v2129_v4, 16 }
  0xf0   : > { %2636 = vst.msk [vmem:[#allocation4 + $0xa0] sm:$0xff] %vm2633_vm8, %v11814_v9  ;;  %v643_v19 = vor.u32 %v641_v52, %v11852_v5  ;;  %v645_v30 = vrot.slane %v11852_v5, 4  ;;  %v2349_v63 = vshll.u32 %v2129_v4, 16  ;;  %2637 = vst.msk [vmem:[#allocation4 + $0xf0] sm:$0xff] %vm2633_vm8, %v2592_v22  ;;  %v2355_v62 = vshll.u32 %v11842_v42, 16 }
  0xf1   : > { %2956 = vst.msk [vmem:[#allocation4 + $0x50] sm:$0xff] %vm2954_vm12, %v11685_v49  ;;  %2955 = vst.msk [vmem:[#allocation4] sm:$0xff] %vm2954_vm12, %v11651_v37  ;;  %v2359_v9 = vshrl.u32 %v11842_v42, 16  ;;  %v2365_v61 = vshll.u32 %v11844_v28, 16  ;;  %v323_v49 = vsel %vm11229_vm5, 0, %v322_v39  ;;  %v3634_v37 = vpop.permute.xlu0 %3633  ;;  %1881 = vrot.lane.b32.xlu1 %v9689_v31, %s11105_s11  ;;  %v2348_v2 = vrot.slane %v2346_v41, 4 }
  0xf2   : > { %2957 = vst.msk [vmem:[#allocation4 + $0xa0] sm:$0xff] %vm2954_vm12, %v11819_v29  ;;  %v862_v29 = vld [vmem:[#allocation2 + $0x78] sm:$0xf]  ;;  %v2351_v11 = vrot.slane %v2349_v63, 5  ;;  %324 = vst [vmem:[#allocation2 + $0x80] sm:$0x1] %v323_v49  ;;  %2056 = vrot.lane.b32.xlu0 %v10817_v50, %s11104_s10 }
  0xf3   : > { %3134 = vst.msk [vmem:[#allocation4 + $0x50] sm:$0xff] %vm3132_vm13, %v11645_v17  ;;  %3133 = vst.msk [vmem:[#allocation4] sm:$0xff] %vm3132_vm13, %v11620_v60  ;;  %v644_v17 = vsel %vm11244_vm9, %v636_v55, %v643_v19  ;;  %v9736_v15 = vrot.slane %v11849_v44, 9  ;;  %v10826_v60 = vld [vmem:[%s14409_s1 + $0x10] ss:$0 sps:$4 sm:$0x33]   ;;  %v863_v16 = vsel %vm11262_vm11, %v635_v53, %v862_v29  ;;  %v2913_v26 = vpop.permute.xlu1 %2912 }
  0xf4   : > { %3135 = vst.msk [vmem:[#allocation4 + $0xa0] sm:$0xff] %vm3132_vm13, %v3089_v27  ;;  %v2361_v20 = vrot.slane %v2359_v9, 4  ;;  %v2367_v24 = vrot.slane %v2365_v61, 5  ;;  %864 = vst [vmem:[#allocation2 + $0x78] sm:$0xf] %v863_v16  ;;  %v2352_v57 = vor.u32 %v2351_v11, %v2348_v2  ;;  %v2804_v18 = vrot.slane %v2675_v32, 5 }
  0xf5   : > { %3679 = vst.msk [vmem:[#allocation4 + $0x50] sm:$0xff] %vm3677_vm4, %v11739_v12  ;;  %3678 = vst.msk [vmem:[#allocation4] sm:$0xff] %vm3677_vm4, %v11755_v58  ;;  %v2357_v12 = vrot.slane %v2355_v62, 5  ;;  %v325_v58 = vld [vmem:[#allocation2 + $0x8c] sm:$0x1]  ;;  %v2807_v59 = vrot.slane %v11867_v45, 5  ;;  %v3955_v21 = vpop.permute.xlu0 %3954 }
  0xf6   : > { %3680 = vst.msk [vmem:[#allocation4 + $0xa0] sm:$0xff] %vm3677_vm4, %v3634_v37  ;;  %v270_v51 = vsel %vm11195_vm3, 0, %v269_v10  ;;  %v650_v8 = vshll.u32 %v11779_v43, 16  ;;  %v2353_v33 = vrot.slane %v2352_v57, 4  ;;  %v2805_v35 = vsel %vm11256_vm10, %v9736_v15, %v2804_v18  ;;  %v368_v49 = vld [vmem:[%s11225_s9 + $0xb0] sm:$0xff] }
  0xf7   : > { %865 = vst.msk [vmem:[#allocation2 + $0x7c] sm:$0xf] %vm14422_vm0, %v644_v17  ;;  %v2362_v23 = vor.u32 %v2361_v20, %v2357_v12  ;;  %271 = vst [vmem:[#allocation2 + $0x84] sm:$0x1] %v270_v51  ;;  %v2806_v4 = vrot.slane %v2804_v18, 4  ;;  %v658_v27 = vshll.u32 %v11785_v1, 16  ;;  %v3091_v7 = vpop.permute.xlu1 %3090 }
  0xf8   : > { %4000 = vst.msk [vmem:[#allocation4 + $0x50] sm:$0xff] %vm14420_vm2, %v11692_v56  ;;  %3999 = vst.msk [vmem:[#allocation4] sm:$0xff] %vm14420_vm2, %v11661_v14  ;;  %v647_v56 = vshrl.u32 %v11779_v43, 16  ;;  %v655_v14 = vshrl.u32 %v11785_v1, 16  ;;  %vm14417_vm15 = vcmask 1041408   ;;  %v2358_v43 = vsel %vm11322_vm14, %v2353_v33, %v2357_v12 }
  0xf9   : > { %2958 = vst.msk [vmem:[#allocation4 + $0xf0] sm:$0xff] %vm2954_vm12, %v2913_v26  ;;  %v2363_v13 = vrot.slane %v2362_v23, 4  ;;  %v2808_v42 = vsel %vm11256_vm10, %v2806_v4, %v2807_v59  ;;  %10750 = vmatprep.subr.msk.bf16.mxu0 %vm14417_vm15, %v10826_v60  ;;  %v326_v28 = vsel %vm11229_vm5, 0, %v325_v58  ;;  %v4109_v1 = vsel %vm14417_vm15, %v10826_v60, 0  ;;  %v866_v47 = vld [vmem:[#allocation2 + $0x80] sm:$0x1] }
  0xfa   : > { %4001 = vst.msk [vmem:[#allocation4 + $0xa0] sm:$0xff] %vm14420_vm2, %v3955_v21  ;;  %v649_v38 = vrot.slane %v647_v56, 7  ;;  %v11922_v40 = vrot.slane %v655_v14, 7  ;;  %327 = vst [vmem:[#allocation2 + $0x8c] sm:$0x1] %v326_v28  ;;  %10701 = vmatpush3.bf16.msra.mxu0 %v4109_v1  ;;  %v867_v52 = vsel %vm11195_vm3, %v645_v30, %v866_v47  ;;  %v9752_v45 = vcombine.low %v2805_v35, %v2808_v42 }
  0xfb   : > { %3136 = vst.msk [vmem:[#allocation4 + $0xf0] sm:$0xff] %vm3132_vm13, %v3091_v7  ;;  %v2368_v39 = vsel %vm11322_vm14, %v2363_v13, %v2367_v24  ;;  %868 = vst [vmem:[#allocation2 + $0x80] sm:$0x1] %v867_v52  ;;  %v2132_v55 = vld [vmem:[#allocation2 + $0x78] sm:$0xf]  ;;  %vm14418_vm15 = vcmask 293888  }
  0xfc   : > { %v653_v48 = vrot.slane %v649_v38, 4  ;;  %v9720_v50 = vcombine.low %v2358_v43, %v2368_v39  ;;  %v660_v31 = vor.u32 %v658_v27, %v11922_v40  ;;  %v652_v10 = vor.u32 %v650_v8, %v649_v38  ;;  %v2677_v41 = vld [vmem:[#allocation2 + $0x78] sm:$0xe]  ;;  %v3957_v63 = vpop.permute.xlu0 %3956 }
  0xfd   : > { %v2370_v22 = vshrl.u32 %v2132_v55, 16  ;;  %v2373_v19 = vshll.u32 %v2132_v55, 16  ;;  %v9737_v9 = vrot.slane %v2677_v41, 9  ;;  %v3636_v60 = vpop.permute.xlu1 %3635  ;;  %v662_v16 = vrot.slane %v11922_v40, 4  ;;  %v3173_v20 = vld [vmem:[#allocation2 + $0x78] sm:$0xf] }
  0xfe   : > { %v2133_v44 = vld [vmem:[#allocation2 + $0x7c] sm:$0xf]  ;;  %2601 = vrot.lane.b32.xlu0 %v9720_v50, %s11110_s16  ;;  %v661_v61 = vsel %vm11244_vm9, %v653_v48, %v660_v31  ;;  %v869_v12 = vld [vmem:[#allocation2 + $0x84] sm:$0xf]  ;;  %3681 = vst.msk [vmem:[#allocation4 + $0xf0] sm:$0xff] %vm3677_vm4, %v3636_v60  ;;  %v3390_v18 = vshrl.u32 %v3173_v20, 16  ;;  %v11964_v38 = vpack.c.bf16 %v368_v49, %v368_v49 }
  0xff   : > { %v11939_v46 = vld [vmem:[#allocation2 + $0x7c] sm:$0xf]  ;;  %v2379_v32 = vshll.u32 %v2133_v44, 16  ;;  %v2383_v5 = vshrl.u32 %v2133_v44, 16  ;;  %v2372_v37 = vrot.slane %v2370_v22, 4  ;;  %v2375_v17 = vrot.slane %v2373_v19, 5 }
 0x100   : > { %v10818_v53 = vld [vmem:[#allocation2 + $0x78] sm:$0xff]   ;;  %v2811_v30 = vrot.slane %v11939_v46, 5  ;;  %872 = vst.msk [vmem:[#allocation2 + $0x88] sm:$0xf] %vm14422_vm0, %v661_v61  ;;  %v4015_v15 = vld [vmem:[#allocation4] sm:$0xff]  ;;  %v870_v26 = vsel %vm11262_vm11, %v652_v10, %v869_v12  ;;  %v4016_v51 = vld [vmem:[#allocation4 + $0x50] sm:$0xff] }
 0x101   : > { %2058 = vrot.lane.b32.xlu1 %v10818_v53, %s11104_s10  ;;  %v11945_v62 = vrot.slane %v2379_v32, 5  ;;  %v2385_v29 = vrot.slane %v2383_v5, 4  ;;  %v10823_v11 = vld [vmem:[#allocation2 + $0x78] sm:$0xff]   ;;  %v2376_v24 = vor.u32 %v2375_v17, %v2372_v37  ;;  %v873_v59 = vld [vmem:[#allocation2 + $0x8c] sm:$0x1]  ;;  %10702 = vmatprep.mubr.msk.bf16.mxu0 %vm14418_vm15, %v4015_v15  ;;  %4002 = vst.msk [vmem:[#allocation4 + $0xf0] sm:$0xff] %vm14420_vm2, %v3957_v63  ;;  %v1548_v40 = vpop.permute.xlu1 %1547  ;;  %v1872_v7 = vpop.permute.xlu0 %1871 }
 0x102   : > { %v2813_v2 = vrot.slane %v2811_v30, 4  ;;  %2922 = vrot.lane.b32.xlu0 %v9752_v45, %s11108_s14  ;;  %v3174_v57 = vld [vmem:[#allocation2 + $0x7c] sm:$0xf]  ;;  %871 = vst [vmem:[#allocation2 + $0x84] sm:$0xf] %v870_v26  ;;  %v3393_v23 = vshll.u32 %v3173_v20, 16  ;;  %v874_v14 = vsel %vm11195_vm3, %v662_v16, %v873_v59  ;;  %10703 = vmatmul.mubr.msk.bf16.vlgmr.msra.gmra.mrb[0].mxu0 %vm14418_vm15, %v4016_v51  ;;  %v11970_v47 = vsel %vm11256_vm10, %v9737_v9, %v2811_v30 }
 0x103   : > { %v2386_v58 = vor.u32 %v2385_v29, %v11945_v62  ;;  %v3399_v56 = vshll.u32 %v3174_v57, 16  ;;  %v3403_v8 = vshrl.u32 %v3174_v57, 16  ;;  %v11961_v21 = vld [vmem:[#allocation2 + $0x78] sm:$0xe]  ;;  %v4017_v33 = vld [vmem:[#allocation4 + $0xa0] sm:$0xff]  ;;  %v2377_v4 = vrot.slane %v2376_v24, 4 }
 0x104   : > { %v2134_v35 = vld [vmem:[#allocation2 + $0x80] sm:$0x1]  ;;  %875 = vst [vmem:[#allocation2 + $0x8c] sm:$0x1] %v874_v14  ;;  %10706 = vmatprep.mubr.msk.bf16.mxu0 %vm14418_vm15, %v4017_v33  ;;  %v3392_v1 = vrot.slane %v3390_v18, 4  ;;  %v3395_v39 = vrot.slane %v3393_v23, 5 }
 0x105   : > { %v2387_v27 = vrot.slane %v2386_v58, 4  ;;  %v2679_v13 = vld [vmem:[#allocation2 + $0x80] sm:$0x1]  ;;  %v2389_v43 = vshll.u32 %v2134_v35, 16  ;;  %1592 = vst.msk [vmem:[#allocation4 + $0x140] sm:$0xff] %vm14419_vm1, %v1548_v40  ;;  %v3401_v48 = vrot.slane %v3399_v56, 5  ;;  %v2382_v46 = vsel %vm11322_vm14, %v2377_v4, %v11945_v62  ;;  %v1550_v41 = vpop.permute.xlu1 %1549  ;;  %v2049_v30 = vpop.permute.xlu0 %2048 }
 0x106   : > { %v2814_v42 = vrot.slane %v2679_v13, 5  ;;  %v3175_v28 = vld [vmem:[#allocation2 + $0x80] sm:$0x1]  ;;  %3100 = vrot.lane.b32.xlu0 %v10823_v11, %s11106_s12  ;;  %v3405_v50 = vrot.slane %v3403_v8, 4  ;;  %v3719_v44 = vld [vmem:[#allocation2 + $0x7c] sm:$0xf]  ;;  %v3396_v55 = vor.u32 %v3395_v39, %v3392_v1 }
 0x107   : > { %v3409_v52 = vshll.u32 %v3175_v28, 16  ;;  %1916 = vst.msk [vmem:[#allocation4 + $0x140] sm:$0xff] %vm1911_vm6, %v1872_v7  ;;  %v2391_v31 = vrot.slane %v2389_v43, 5  ;;  %v3177_v32 = vld [vmem:[#allocation2 + $0x88] sm:$0xf]  ;;  %v369_v45 = vld [vmem:[%s11225_s9 + $0xb8] sm:$0xff] }
 0x108   : > { %v2815_v53 = vsel %vm11256_vm10, %v2813_v2, %v2814_v42  ;;  %v3406_v10 = vor.u32 %v3405_v50, %v3401_v48  ;;  %v3423_v19 = vshll.u32 %v3177_v32, 16  ;;  %v9800_v5 = vrot.slane %v11961_v21, 9  ;;  %v3720_v62 = vld [vmem:[#allocation2 + $0x80] sm:$0x1]  ;;  %1593 = vst.msk [vmem:[#allocation4 + $0x190] sm:$0xff] %vm14419_vm1, %v1550_v41  ;;  %v370_v7 = vld [vmem:[%s11225_s9 + $0xc0] sm:$0xff] }
 0x109   : > { %v3411_v22 = vrot.slane %v3409_v52, 5  ;;  %v2392_v63 = vsel %vm11322_vm14, %v2387_v27, %v2391_v31  ;;  %v3397_v9 = vrot.slane %v3396_v55, 4  ;;  %v3427_v61 = vshrl.u32 %v3177_v32, 16  ;;  %2093 = vst.msk [vmem:[#allocation4 + $0x140] sm:$0xff] %vm2088_vm7, %v2049_v30  ;;  %v4018_v37 = vld [vmem:[#allocation4 + $0xf0] sm:$0xff]  ;;  %v1874_v8 = vpop.permute.xlu1 %1873 }
 0x10a   : > { %v3848_v49 = vrot.slane %v3719_v44, 5  ;;  %v9721_v17 = vcombine.low %v2382_v46, %v2392_v63  ;;  %v9753_v29 = vcombine.low %v11970_v47, %v2815_v53  ;;  %v3407_v2 = vrot.slane %v3406_v10, 4  ;;  %v3176_v11 = vld [vmem:[#allocation2 + $0x84] sm:$0xf]  ;;  %v3722_v15 = vld [vmem:[#allocation2 + $0x88] sm:$0xf]  ;;  %10707 = vmatmul.mubr.msk.bf16.gmra.mrb[4].mxu0 %vm14418_vm15, %v4018_v37 }
 0x10b   : > { %v11986_v60 = vpack.c.bf16 %v369_v45, %v369_v45  ;;  %v3402_v16 = vsel %vm11322_vm14, %v3397_v9, %v3401_v48  ;;  %v3178_v12 = vld [vmem:[#allocation2 + $0x8c] sm:$0x1]  ;;  %v3414_v20 = vshrl.u32 %v3176_v11, 16  ;;  %v3417_v24 = vshll.u32 %v3176_v11, 16  ;;  %v4313_v26 = vld [vmem:[#allocation3] sm:$0x1] }
 0x10c   : > { %v3425_v58 = vrot.slane %v3423_v19, 5  ;;  %2603 = vrot.lane.b32.xlu1 %v9721_v17, %s11110_s16  ;;  %v3412_v57 = vsel %vm11322_vm14, %v3407_v2, %v3411_v22  ;;  %v3429_v18 = vrot.slane %v3427_v61, 4  ;;  %v3433_v59 = vshll.u32 %v3178_v12, 16  ;;  %v3721_v23 = vld [vmem:[#allocation2 + $0x84] sm:$0xe]  ;;  %1917 = vst.msk [vmem:[#allocation4 + $0x190] sm:$0xff] %vm1911_vm6, %v1874_v8 }
 0x10d   : > { %v3849_v51 = vsel %vm11256_vm10, %v9800_v5, %v3848_v49  ;;  %v3723_v56 = vld [vmem:[#allocation2 + $0x8c] sm:$0x1]  ;;  %v9784_v14 = vcombine.low %v3402_v16, %v3412_v57  ;;  %v3416_v21 = vrot.slane %v3414_v20, 4  ;;  %v3419_v33 = vrot.slane %v3417_v24, 5  ;;  %v1086_v4 = vld [vmem:[#allocation2 + $0x78] sm:$0xf] }
 0x10e   : > { %v3850_v35 = vrot.slane %v3848_v49, 4  ;;  %v3430_v27 = vor.u32 %v3429_v18, %v3425_v58  ;;  %v3435_v13 = vrot.slane %v3433_v59, 5  ;;  %v3851_v40 = vrot.slane %v3720_v62, 5  ;;  %v1087_v47 = vld [vmem:[#allocation2 + $0x7c] sm:$0xf]  ;;  %v10825_v48 = vld [vmem:[#allocation2 + $0x84] sm:$0xff]  }
 0x10f   : > { %vm14421_vm15 = vcmask 1040384   ;;  %3645 = vrot.lane.b32.xlu0 %v9784_v14, %s11111_s17  ;;  %v3420_v43 = vor.u32 %v3419_v33, %v3416_v21  ;;  %vm14438_vm1 = vsmask.f32 256  ;;  %v9801_v28 = vrot.slane %v3721_v23, 9  ;;  %v1088_v46 = vld [vmem:[#allocation2 + $0x80] sm:$0x1]  ;;  %v2594_v30 = vpop.permute.xlu0 %2593  ;;  %v2051_v17 = vpop.permute.xlu1 %2050 }
 0x110   : > { %vm12001_vm2 = vmand %vm14421_vm15, %vm14438_vm1  ;;  %v3855_v1 = vrot.slane %v3722_v15, 5  ;;  %v3858_v39 = vrot.slane %v3723_v56, 5  ;;  %2924 = vrot.lane.b32.xlu1 %v9753_v29, %s11108_s14  ;;  %v3431_v50 = vrot.slane %v3430_v27, 4  ;;  %v3852_v52 = vsel %vm11256_vm10, %v3850_v35, %v3851_v40  ;;  %v1089_v41 = vld [vmem:[#allocation2 + $0x84] sm:$0xf]  ;;  %2638 = vst.msk [vmem:[#allocation4 + $0x140] sm:$0xff] %vm2633_vm8, %v2594_v30 }
 0x111   : > { %v4314_v44 = vsel %vm12001_vm2, 0, %v4313_v26  ;;  %v1348_v31 = vshrl.u32 %v1086_v4, 16  ;;  %v3421_v53 = vrot.slane %v3420_v43, 4  ;;  %v9816_v55 = vcombine.low %v3849_v51, %v3852_v52  ;;  %v1090_v49 = vld [vmem:[#allocation2 + $0x88] sm:$0xf]  ;;  %2094 = vst.msk [vmem:[#allocation4 + $0x190] sm:$0xff] %vm2088_vm7, %v2051_v17 }
 0x112   : > { %4315 = vst [vmem:[#allocation3] sm:$0x1] %v4314_v44  ;;  %v3857_v32 = vrot.slane %v3855_v1, 4  ;;  %v12010_v45 = vpack.c.bf16 %v370_v7, %v370_v7  ;;  %v3436_v10 = vsel %vm11322_vm14, %v3431_v50, %v3435_v13  ;;  %v1351_v19 = vshll.u32 %v1086_v4, 16  ;;  %v1091_v37 = vld [vmem:[#allocation2 + $0x8c] sm:$0x1] }
 0x113   : > { %v1350_v22 = vrot.slane %v1348_v31, 4  ;;  %v1357_v5 = vshll.u32 %v1087_v47, 16  ;;  %v3426_v63 = vsel %vm11322_vm14, %v3421_v53, %v3425_v58  ;;  %3966 = vrot.lane.b32.xlu0 %v9816_v55, %s11109_s15  ;;  %v3856_v9 = vsel %vm11256_vm10, %v9801_v28, %v3855_v1  ;;  %v1634_v16 = vld [vmem:[#allocation2 + $0x78] sm:$0xe]  ;;  %v1635_v12 = vld [vmem:[#allocation2 + $0x7c] sm:$0xf]  ;;  %v2915_v8 = vpop.permute.xlu0 %2914 }
 0x114   : > { %v1361_v61 = vshrl.u32 %v1087_v47, 16  ;;  %v1367_v62 = vshll.u32 %v1088_v46, 16  ;;  %3102 = vrot.lane.b32.xlu1 %v10825_v48, %s11106_s12  ;;  %v9785_v29 = vcombine.low %v3426_v63, %v3436_v10  ;;  %v3859_v2 = vsel %vm11256_vm10, %v3857_v32, %v3858_v39  ;;  %v1636_v57 = vld [vmem:[#allocation2 + $0x80] sm:$0x1]  ;;  %v1637_v18 = vld [vmem:[#allocation2 + $0x84] sm:$0xe] }
 0x115   : > { %v1353_v11 = vrot.slane %v1351_v19, 5  ;;  %v1359_v15 = vrot.slane %v1357_v5, 5  ;;  %v1372_v58 = vshrl.u32 %v1089_v41, 16  ;;  %v1375_v26 = vshll.u32 %v1089_v41, 16  ;;  %v1638_v4 = vld [vmem:[#allocation2 + $0x88] sm:$0xf] }
 0x116   : > { %v1363_v20 = vrot.slane %v1361_v61, 4  ;;  %v1369_v24 = vrot.slane %v1367_v62, 5  ;;  %v1381_v51 = vshll.u32 %v1090_v49, 16  ;;  %v1385_v23 = vshrl.u32 %v1090_v49, 16  ;;  %2959 = vst.msk [vmem:[#allocation4 + $0x140] sm:$0xff] %vm2954_vm12, %v2915_v8 }
 0x117   : > { %v1354_v59 = vor.u32 %v1353_v11, %v1350_v22  ;;  %v1391_v56 = vshll.u32 %v1091_v37, 16  ;;  %v1374_v21 = vrot.slane %v1372_v58, 4  ;;  %v1377_v33 = vrot.slane %v1375_v26, 5  ;;  %v1639_v48 = vld [vmem:[#allocation2 + $0x8c] sm:$0x1]  ;;  %v3093_v53 = vpop.permute.xlu0 %3092  ;;  %v10842_v37 = vld [vmem:[#allocation2 + $0x60] sm:$0xff]  }
 0x118   : > { %v1364_v14 = vor.u32 %v1363_v20, %v1359_v15  ;;  %v9674_v35 = vrot.slane %v1634_v16, 9  ;;  %3647 = vrot.lane.b32.xlu1 %v9785_v29, %s11111_s17  ;;  %v9817_v13 = vcombine.low %v3856_v9, %v3859_v2  ;;  %v1383_v7 = vrot.slane %v1381_v51, 5  ;;  %v272_v31 = vld [vmem:[#allocation2 + $0x90] sm:$0x1]  ;;  %3137 = vst.msk [vmem:[#allocation4 + $0x140] sm:$0xff] %vm3132_vm13, %v3093_v53 }
 0x119   : > { %v10827_v27 = vld [vmem:[#allocation3] sm:$0xff]   ;;  %v1355_v40 = vrot.slane %v1354_v59, 4  ;;  %v1387_v43 = vrot.slane %v1385_v23, 4  ;;  %v1378_v1 = vor.u32 %v1377_v33, %v1374_v21  ;;  %v1393_v39 = vrot.slane %v1391_v56, 5  ;;  %v2135_v49 = vld [vmem:[#allocation2 + $0x84] sm:$0xf] }
 0x11a   : > { %v1365_v28 = vrot.slane %v1364_v14, 4  ;;  %v1775_v47 = vrot.slane %v1635_v12, 5  ;;  %5081 = vst [vmem:[#allocation4] sm:$0xff] %v10827_v27  ;;  %v1778_v44 = vrot.slane %v1636_v57, 5  ;;  %v9675_v46 = vrot.slane %v1637_v18, 9  ;;  %v10843_v20 = vld [vmem:[#allocation2 + $0x6c] sm:$0xff]  }
 0x11b   : > { %v1360_v50 = vsel %vm11322_vm14, %v1355_v40, %v1359_v15  ;;  %v1388_v52 = vor.u32 %v1387_v43, %v1383_v7  ;;  %v1379_v32 = vrot.slane %v1378_v1, 4  ;;  %v1782_v41 = vrot.slane %v1638_v4, 5  ;;  %v2136_v15 = vld [vmem:[#allocation2 + $0x88] sm:$0xf]  ;;  %v2137_v16 = vld [vmem:[#allocation2 + $0x8c] sm:$0x1] }
 0x11c   : > { %v1370_v55 = vsel %vm11322_vm14, %v1365_v28, %v1369_v24  ;;  %v1776_v10 = vsel %vm11256_vm10, %v9674_v35, %v1775_v47  ;;  %v1777_v22 = vrot.slane %v1775_v47, 4  ;;  %3968 = vrot.lane.b32.xlu1 %v9817_v13, %s11109_s15  ;;  %v1785_v30 = vrot.slane %v1639_v48, 5  ;;  %v328_v12 = vld [vmem:[#allocation2 + $0x98] sm:$0x1]  ;;  %v12048_v18 = vld [vmem:[#allocation2 + $0x84] sm:$0xe] }
 0x11d   : > { %v9658_v19 = vcombine.low %v1360_v50, %v1370_v55  ;;  %v1389_v5 = vrot.slane %v1388_v52, 4  ;;  %v1384_v63 = vsel %vm11322_vm14, %v1379_v32, %v1383_v7  ;;  %v273_v61 = vsel %vm11195_vm3, 0, %v272_v31  ;;  %v371_v59 = vld [vmem:[%s11225_s9 + $0xc8] sm:$0xff]  ;;  %v2681_v21 = vld [vmem:[#allocation2 + $0x88] sm:$0xf] }
 0x11e   : > { %v1779_v9 = vsel %vm11256_vm10, %v1777_v22, %v1778_v44  ;;  %v664_v62 = vshrl.u32 %v11964_v38, 16  ;;  %v1783_v2 = vsel %vm11256_vm10, %v9675_v46, %v1782_v41  ;;  %v1784_v11 = vrot.slane %v1782_v41, 4  ;;  %274 = vst [vmem:[#allocation2 + $0x90] sm:$0x1] %v273_v61  ;;  %v10828_v23 = vld [vmem:[#allocation2 + $0x84] sm:$0xff]   ;;  %v2596_v33 = vpop.permute.xlu1 %2595 }
 0x11f   : > { %1559 = vrot.lane.b32.xlu0 %v9658_v19, %s11107_s13  ;;  %v1394_v17 = vsel %vm11322_vm14, %v1389_v5, %v1393_v39  ;;  %v9690_v29 = vcombine.low %v1776_v10, %v1779_v9  ;;  %v667_v26 = vshll.u32 %v11964_v38, 16  ;;  %v672_v57 = vshrl.u32 %v11986_v60, 16  ;;  %2639 = vst.msk [vmem:[#allocation4 + $0x190] sm:$0xff] %vm2633_vm8, %v2596_v33  ;;  %v2682_v43 = vld [vmem:[#allocation2 + $0x8c] sm:$0x1] }
 0x120   : > { %v9659_v24 = vcombine.low %v1384_v63, %v1394_v17  ;;  %v666_v58 = vrot.slane %v664_v62, 7  ;;  %vm14441_vm1 = vcmask 31744   ;;  %v1786_v51 = vsel %vm11256_vm10, %v1784_v11, %v1785_v30  ;;  %v275_v47 = vld [vmem:[#allocation2 + $0x9c] sm:$0x1]  ;;  %v331_v53 = vld [vmem:[#allocation2 + $0xa4] sm:$0x1] }
 0x121   : > { %1048 = vst.msk [vmem:[#allocation4 + $0x280] sm:$0xff] %vm14441_vm1, %v10842_v37  ;;  %v675_v56 = vshll.u32 %v11986_v60, 16  ;;  %v2394_v8 = vshrl.u32 %v2135_v49, 16  ;;  %v2397_v14 = vshll.u32 %v2135_v49, 16  ;;  %vm14442_vm15 = vmmov %vm14441_vm1  ;;  %v9691_v38 = vcombine.low %v1783_v2, %v1786_v51  ;;  %v3638_v50 = vpop.permute.xlu0 %3637  ;;  %v278_v32 = vld [vmem:[#allocation2 + $0xa8] sm:$0x1] }
 0x122   : > { %1049 = vst.msk [vmem:[#allocation4 + $0x2d0] sm:$0xff] %vm14442_vm15, %v10843_v20  ;;  %1561 = vrot.lane.b32.xlu1 %v9659_v24, %s11107_s13  ;;  %v669_v35 = vor.u32 %v667_v26, %v666_v58  ;;  %v670_v4 = vrot.slane %v666_v58, 4  ;;  %v12057_v27 = vrot.slane %v672_v57, 7  ;;  %v2403_v60 = vshll.u32 %v2136_v15, 16  ;;  %v2917_v55 = vpop.permute.xlu1 %2916  ;;  %v372_v10 = vld [vmem:[%s11225_s9 + $0xd0] sm:$0xff] }
 0x123   : > { %1883 = vrot.lane.b32.xlu0 %v9690_v29, %s11105_s11  ;;  %v2396_v13 = vrot.slane %v2394_v8, 4  ;;  %v2399_v40 = vrot.slane %v2397_v14, 5  ;;  %v2407_v7 = vshrl.u32 %v2136_v15, 16  ;;  %v2413_v1 = vshll.u32 %v2137_v16, 16  ;;  %3682 = vst.msk [vmem:[#allocation4 + $0x140] sm:$0xff] %vm3677_vm4, %v3638_v50  ;;  %v10847_v8 = vld [vmem:[#allocation2 + $0x84] sm:$0xff]  }
 0x124   : > { %v677_v28 = vor.u32 %v675_v56, %v12057_v27  ;;  %v329_v39 = vsel %vm11229_vm5, 0, %v328_v12  ;;  %v10189_v48 = vpack.c.bf16 %v371_v59, %v371_v59  ;;  %v2405_v44 = vrot.slane %v2403_v60, 5  ;;  %2960 = vst.msk [vmem:[#allocation4 + $0x190] sm:$0xff] %vm2954_vm12, %v2917_v55  ;;  %v10846_v56 = vld [vmem:[#allocation2 + $0x78] sm:$0xff]  }
 0x125   : > { %v2400_v52 = vor.u32 %v2399_v40, %v2396_v13  ;;  %v2409_v46 = vrot.slane %v2407_v7, 4  ;;  %330 = vst [vmem:[#allocation2 + $0x98] sm:$0x1] %v329_v39  ;;  %v9738_v31 = vrot.slane %v12048_v18, 9  ;;  %v876_v19 = vld [vmem:[#allocation2 + $0x90] sm:$0xf]  ;;  %v12079_v29 = vpack.c.bf16 %v372_v10, %v372_v10  ;;  %v3959_v2 = vpop.permute.xlu0 %3958 }
 0x126   : > { %1885 = vrot.lane.b32.xlu1 %v9691_v38, %s11105_s11  ;;  %v678_v22 = vsel %vm11244_vm9, %v670_v4, %v677_v28  ;;  %v2415_v5 = vrot.slane %v2413_v1, 5  ;;  %v2818_v41 = vrot.slane %v2681_v21, 5  ;;  %v2821_v30 = vrot.slane %v2682_v43, 5  ;;  %v3095_v20 = vpop.permute.xlu1 %3094  ;;  %1050 = vst.msk [vmem:[#allocation4 + $0x320] sm:$0xff] %vm14441_vm1, %v10846_v56 }
 0x127   : > { %2060 = vrot.lane.b32.xlu0 %v10828_v23, %s11104_s10  ;;  %v877_v63 = vsel %vm11262_vm11, %v669_v35, %v876_v19  ;;  %879 = vst.msk [vmem:[#allocation2 + $0x94] sm:$0xf] %vm14422_vm0, %v678_v22  ;;  %v2401_v9 = vrot.slane %v2400_v52, 4  ;;  %v2410_v61 = vor.u32 %v2409_v46, %v2405_v44  ;;  %v276_v62 = vsel %vm11195_vm3, 0, %v275_v47  ;;  %v373_v46 = vld [vmem:[%s11225_s9 + $0xd8] sm:$0xff] }
 0x128   : > { %v679_v49 = vrot.slane %v12057_v27, 4  ;;  %878 = vst [vmem:[#allocation2 + $0x90] sm:$0xf] %v877_v63  ;;  %v2820_v37 = vrot.slane %v2818_v41, 4  ;;  %277 = vst [vmem:[#allocation2 + $0x9c] sm:$0x1] %v276_v62  ;;  %v2819_v24 = vsel %vm11256_vm10, %v9738_v31, %v2818_v41 }
 0x129   : > { %v681_v17 = vshrl.u32 %v12010_v45, 16  ;;  %v2406_v11 = vsel %vm11322_vm14, %v2401_v9, %v2405_v44  ;;  %v2411_v15 = vrot.slane %v2410_v61, 4  ;;  %v689_v16 = vshrl.u32 %v10189_v48, 16  ;;  %3138 = vst.msk [vmem:[#allocation4 + $0x190] sm:$0xff] %vm3132_vm13, %v3095_v20 }
 0x12a   : > { %v692_v12 = vshll.u32 %v10189_v48, 16  ;;  %vm14443_vm15 = vcmask 294144   ;;  %v332_v26 = vsel %vm11229_vm5, 0, %v331_v53  ;;  %v279_v57 = vsel %vm11195_vm3, 0, %v278_v32  ;;  %v3640_v13 = vpop.permute.xlu1 %3639 }
 0x12b   : > { %4003 = vst.msk [vmem:[#allocation4 + $0x140] sm:$0xff] %vm14443_vm15, %v3959_v2  ;;  %v683_v58 = vrot.slane %v681_v17, 7  ;;  %v2416_v18 = vsel %vm11322_vm14, %v2411_v15, %v2415_v5  ;;  %v2822_v59 = vsel %vm11256_vm10, %v2820_v37, %v2821_v30  ;;  %v684_v51 = vshll.u32 %v12010_v45, 16  ;;  %333 = vst [vmem:[#allocation2 + $0xa4] sm:$0x1] %v332_v26 }
 0x12c   : > { %v12096_v23 = vrot.slane %v689_v16, 7  ;;  %280 = vst [vmem:[#allocation2 + $0xa8] sm:$0x1] %v279_v57  ;;  %v9722_v14 = vcombine.low %v2406_v11, %v2416_v18  ;;  %v880_v21 = vld [vmem:[#allocation2 + $0x98] sm:$0x1]  ;;  %v698_v4 = vshrl.u32 %v12079_v29, 16  ;;  %vm14444_vm15 = vmmov %vm14441_vm1  ;;  %v9754_v40 = vcombine.low %v2819_v24, %v2822_v59 }
 0x12d   : > { %v687_v33 = vrot.slane %v683_v58, 4  ;;  %v881_v38 = vsel %vm11195_vm3, %v679_v49, %v880_v21  ;;  %v701_v27 = vshll.u32 %v12079_v29, 16  ;;  %1051 = vst.msk [vmem:[#allocation4 + $0x370] sm:$0xff] %vm14444_vm15, %v10847_v8  ;;  %v686_v1 = vor.u32 %v684_v51, %v683_v58 }
 0x12e   : > { %v694_v35 = vor.u32 %v692_v12, %v12096_v23  ;;  %2605 = vrot.lane.b32.xlu0 %v9722_v14, %s11110_s16  ;;  %882 = vst [vmem:[#allocation2 + $0x98] sm:$0x1] %v881_v38  ;;  %v2139_v45 = vld [vmem:[#allocation2 + $0x94] sm:$0xf]  ;;  %3683 = vst.msk [vmem:[#allocation4 + $0x190] sm:$0xff] %vm3677_vm4, %v3640_v13  ;;  %v696_v53 = vrot.slane %v12096_v23, 4  ;;  %v3961_v55 = vpop.permute.xlu1 %3960  ;;  %v12129_v58 = vpack.c.bf16 %v373_v46, %v373_v46 }
 0x12f   : > { %v12106_v60 = vld [vmem:[#allocation2 + $0x94] sm:$0xf]  ;;  %v2138_v43 = vld [vmem:[#allocation2 + $0x90] sm:$0xf]  ;;  %v2427_v28 = vshll.u32 %v2139_v45, 16  ;;  %v2431_v50 = vshrl.u32 %v2139_v45, 16  ;;  %v1552_v41 = vpop.permute.xlu0 %1551 }
 0x130   : > { %v10829_v7 = vld [vmem:[#allocation2 + $0x90] sm:$0xff]   ;;  %v695_v39 = vsel %vm11244_vm9, %v687_v33, %v694_v35  ;;  %v2418_v47 = vshrl.u32 %v2138_v43, 16  ;;  %v2421_v48 = vshll.u32 %v2138_v43, 16  ;;  %v2825_v44 = vrot.slane %v12106_v60, 5  ;;  %v883_v61 = vld [vmem:[#allocation2 + $0x9c] sm:$0xf] }
 0x131   : > { %v2683_v52 = vld [vmem:[#allocation2 + $0x90] sm:$0xe]  ;;  %886 = vst.msk [vmem:[#allocation2 + $0xa0] sm:$0xf] %vm14422_vm0, %v695_v39  ;;  %2062 = vrot.lane.b32.xlu1 %v10829_v7, %s11104_s10  ;;  %v12115_v31 = vrot.slane %v2427_v28, 5  ;;  %v2433_v22 = vrot.slane %v2431_v50, 4  ;;  %v884_v17 = vsel %vm11262_vm11, %v686_v1, %v883_v61 }
 0x132   : > { %v2420_v32 = vrot.slane %v2418_v47, 4  ;;  %v2423_v10 = vrot.slane %v2421_v48, 5  ;;  %2926 = vrot.lane.b32.xlu0 %v9754_v40, %s11108_s14  ;;  %v10832_v19 = vld [vmem:[#allocation2 + $0x90] sm:$0xff]   ;;  %v12119_v5 = vrot.slane %v698_v4, 7  ;;  %vm14445_vm1 = vcmask 294144   ;;  %v1554_v26 = vpop.permute.xlu1 %1553  ;;  %v374_v23 = vld [vmem:[%s11225_s9 + $0xe0] sm:$0xff] }
 0x133   : > { %4004 = vst.msk [vmem:[#allocation4 + $0x190] sm:$0xff] %vm14445_vm1, %v3961_v55  ;;  %v4019_v30 = vld [vmem:[#allocation4 + $0x140] sm:$0xff]  ;;  %v9739_v63 = vrot.slane %v2683_v52, 9  ;;  %v2827_v9 = vrot.slane %v2825_v44, 4  ;;  %vm14446_vm15 = vcmask 64544   ;;  %vm14447_vm0 = vcmask 293888   ;;  %v1876_v56 = vpop.permute.xlu0 %1875 }
 0x134   : > { %v3179_v62 = vld [vmem:[#allocation2 + $0x90] sm:$0xf]  ;;  %1594 = vst.msk [vmem:[#allocation4 + $0x1e0] sm:$0xff] %vm14446_vm15, %v1552_v41  ;;  %10710 = vmatprep.mubr.msk.bf16.mxu0 %vm14447_vm0, %v4019_v30  ;;  %v2424_v49 = vor.u32 %v2423_v10, %v2420_v32  ;;  %v2434_v37 = vor.u32 %v2433_v22, %v12115_v31  ;;  %v3180_v2 = vld [vmem:[#allocation2 + $0x94] sm:$0xf]  ;;  %vm14448_vm0 = vmmov %vm14446_vm15  ;;  %v12144_v52 = vpack.c.bf16 %v374_v23, %v374_v23  ;;  %vm14449_vm1 = vcmask 293888  }
 0x135   : > { %v3438_v11 = vshrl.u32 %v3179_v62, 16  ;;  %v887_v15 = vld [vmem:[#allocation2 + $0xa4] sm:$0x1]  ;;  %v2140_v16 = vld [vmem:[#allocation2 + $0x98] sm:$0x1]  ;;  %1595 = vst.msk [vmem:[#allocation4 + $0x230] sm:$0xff] %vm14448_vm0, %v1554_v26  ;;  %v2826_v4 = vsel %vm11256_vm10, %v9739_v63, %v2825_v44 }
 0x136   : > { %v2685_v12 = vld [vmem:[#allocation2 + $0x98] sm:$0x1]  ;;  %885 = vst [vmem:[#allocation2 + $0x9c] sm:$0xf] %v884_v17  ;;  %v888_v24 = vsel %vm11195_vm3, %v696_v53, %v887_v15  ;;  %v2425_v57 = vrot.slane %v2424_v49, 4  ;;  %v2435_v18 = vrot.slane %v2434_v37, 4  ;;  %3104 = vrot.lane.b32.xlu0 %v10832_v19, %s11106_s12  ;;  %v1878_v1 = vpop.permute.xlu1 %1877 }
 0x137   : > { %v3181_v20 = vld [vmem:[#allocation2 + $0x98] sm:$0x1]  ;;  %v2437_v59 = vshll.u32 %v2140_v16, 16  ;;  %v2828_v51 = vrot.slane %v2685_v12, 5  ;;  %889 = vst [vmem:[#allocation2 + $0xa4] sm:$0x1] %v888_v24  ;;  %v2053_v44 = vpop.permute.xlu0 %2052 }
 0x138   : > { %v3440_v8 = vrot.slane %v3438_v11, 4  ;;  %v3441_v14 = vshll.u32 %v3179_v62, 16  ;;  %v3447_v21 = vshll.u32 %v3180_v2, 16  ;;  %v3451_v33 = vshrl.u32 %v3180_v2, 16  ;;  %1918 = vst.msk [vmem:[#allocation4 + $0x1e0] sm:$0xff] %vm1911_vm6, %v1876_v56  ;;  %1919 = vst.msk [vmem:[#allocation4 + $0x230] sm:$0xff] %vm1911_vm6, %v1878_v1 }
 0x139   : > { %v2430_v38 = vsel %vm11322_vm14, %v2425_v57, %v12115_v31  ;;  %v2439_v35 = vrot.slane %v2437_v59, 5  ;;  %v3457_v13 = vshll.u32 %v3181_v20, 16  ;;  %v3183_v45 = vld [vmem:[#allocation2 + $0xa0] sm:$0xf]  ;;  %v2829_v40 = vsel %vm11256_vm10, %v2827_v9, %v2828_v51  ;;  %v3724_v28 = vld [vmem:[#allocation2 + $0x90] sm:$0xe] }
 0x13a   : > { %v3443_v60 = vrot.slane %v3441_v14, 5  ;;  %v3449_v7 = vrot.slane %v3447_v21, 5  ;;  %v3453_v43 = vrot.slane %v3451_v33, 4  ;;  %v4020_v39 = vld [vmem:[#allocation4 + $0x190] sm:$0xff]  ;;  %v3471_v48 = vshll.u32 %v3183_v45, 16  ;;  %2095 = vst.msk [vmem:[#allocation4 + $0x1e0] sm:$0xff] %vm2088_vm7, %v2053_v44 }
 0x13b   : > { %v2440_v47 = vsel %vm11322_vm14, %v2435_v18, %v2439_v35  ;;  %v3475_v50 = vshrl.u32 %v3183_v45, 16  ;;  %10711 = vmatmul.mubr.msk.bf16.gmra.mrb[8].mxu0 %vm14449_vm1, %v4020_v39  ;;  %v3459_v55 = vrot.slane %v3457_v13, 5  ;;  %v3725_v32 = vld [vmem:[#allocation2 + $0x94] sm:$0xf]  ;;  %v3726_v10 = vld [vmem:[#allocation2 + $0x98] sm:$0x1]  ;;  %v9755_v22 = vcombine.low %v2826_v4, %v2829_v40 }
 0x13c   : > { %v9723_v46 = vcombine.low %v2430_v38, %v2440_v47  ;;  %v3444_v31 = vor.u32 %v3443_v60, %v3440_v8  ;;  %v3454_v53 = vor.u32 %v3453_v43, %v3449_v7  ;;  %v12149_v41 = vrot.slane %v3471_v48, 5  ;;  %v3728_v63 = vld [vmem:[#allocation2 + $0xa0] sm:$0xf]  ;;  %v1092_v57 = vld [vmem:[#allocation2 + $0x90] sm:$0xf] }
 0x13d   : > { %v3182_v19 = vld [vmem:[#allocation2 + $0x9c] sm:$0xf]  ;;  %v9802_v30 = vrot.slane %v3724_v28, 9  ;;  %v12154_v9 = vor.u32 %v701_v27, %v12119_v5  ;;  %v3477_v2 = vrot.slane %v3475_v50, 4  ;;  %v3862_v15 = vrot.slane %v3725_v32, 5  ;;  %v2598_v56 = vpop.permute.xlu0 %2597  ;;  %v10848_v35 = vld [vmem:[#allocation2 + $0x90] sm:$0xff]  }
 0x13e   : > { %2607 = vrot.lane.b32.xlu1 %v9723_v46, %s11110_s16  ;;  %v3445_v61 = vrot.slane %v3444_v31, 4  ;;  %v3455_v62 = vrot.slane %v3454_v53, 4  ;;  %v3184_v49 = vld [vmem:[#allocation2 + $0xa4] sm:$0x1]  ;;  %v3462_v37 = vshrl.u32 %v3182_v19, 16  ;;  %v3465_v17 = vshll.u32 %v3182_v19, 16 }
 0x13f   : > { %v3481_v11 = vshll.u32 %v3184_v49, 16  ;;  %v3865_v16 = vrot.slane %v3726_v10, 5  ;;  %v3727_v12 = vld [vmem:[#allocation2 + $0x9c] sm:$0xe]  ;;  %v3729_v26 = vld [vmem:[#allocation2 + $0xa4] sm:$0x1]  ;;  %v3478_v59 = vor.u32 %v3477_v2, %v12149_v41  ;;  %v3863_v23 = vsel %vm11256_vm10, %v9802_v30, %v3862_v15 }
 0x140   : > { %v3450_v20 = vsel %vm11322_vm14, %v3445_v61, %v3449_v7  ;;  %v3460_v29 = vsel %vm11322_vm14, %v3455_v62, %v3459_v55  ;;  %v3464_v27 = vrot.slane %v3462_v37, 4  ;;  %v3467_v24 = vrot.slane %v3465_v17, 5  ;;  %v10833_v8 = vld [vmem:[#allocation2 + $0x9c] sm:$0xff]   ;;  %2640 = vst.msk [vmem:[#allocation4 + $0x1e0] sm:$0xff] %vm2633_vm8, %v2598_v56  ;;  %v1093_v45 = vld [vmem:[#allocation2 + $0x94] sm:$0xf]  ;;  %v2055_v7 = vpop.permute.xlu1 %2054 }
 0x141   : > { %v9786_v18 = vcombine.low %v3450_v20, %v3460_v29  ;;  %v3483_v51 = vrot.slane %v3481_v11, 5  ;;  %v3864_v21 = vrot.slane %v3862_v15, 4  ;;  %v9803_v33 = vrot.slane %v3727_v12, 9  ;;  %v1094_v47 = vld [vmem:[#allocation2 + $0x98] sm:$0x1]  ;;  %2096 = vst.msk [vmem:[#allocation4 + $0x230] sm:$0xff] %vm2088_vm7, %v2055_v7  ;;  %v2919_v32 = vpop.permute.xlu0 %2918 }
 0x142   : > { %2928 = vrot.lane.b32.xlu1 %v9755_v22, %s11108_s14  ;;  %v3468_v14 = vor.u32 %v3467_v24, %v3464_v27  ;;  %v3869_v38 = vrot.slane %v3728_v63, 5  ;;  %v3479_v4 = vrot.slane %v3478_v59, 4  ;;  %v3872_v13 = vrot.slane %v3729_v26, 5  ;;  %v1095_v48 = vld [vmem:[#allocation2 + $0x9c] sm:$0xf]  ;;  %2961 = vst.msk [vmem:[#allocation4 + $0x1e0] sm:$0xff] %vm2954_vm12, %v2919_v32 }
 0x143   : > { %3649 = vrot.lane.b32.xlu0 %v9786_v18, %s11111_s17  ;;  %v1396_v40 = vshrl.u32 %v1092_v57, 16  ;;  %v1399_v60 = vshll.u32 %v1092_v57, 16  ;;  %v3866_v28 = vsel %vm11256_vm10, %v3864_v21, %v3865_v16  ;;  %vm14450_vm15 = vcmask 31744   ;;  %v1096_v53 = vld [vmem:[#allocation2 + $0xa0] sm:$0xf] }
 0x144   : > { %v3469_v43 = vrot.slane %v3468_v14, 4  ;;  %v3870_v1 = vsel %vm11256_vm10, %v9803_v33, %v3869_v38  ;;  %v3871_v39 = vrot.slane %v3869_v38, 4  ;;  %1052 = vst.msk [vmem:[#allocation4 + $0x3c0] sm:$0xff] %vm14450_vm15, %v10848_v35  ;;  %v3484_v50 = vsel %vm11322_vm14, %v3479_v4, %v3483_v51  ;;  %v1097_v55 = vld [vmem:[#allocation2 + $0xa4] sm:$0x1]  ;;  %v10849_v2 = vld [vmem:[#allocation2 + $0x9c] sm:$0xff]   ;;  %vm14451_vm0 = vmmov %vm14450_vm15 }
 0x145   : > { %v9818_v44 = vcombine.low %v3863_v23, %v3866_v28  ;;  %v1398_v46 = vrot.slane %v1396_v40, 4  ;;  %v1401_v31 = vrot.slane %v1399_v60, 5  ;;  %v1405_v19 = vshll.u32 %v1093_v45, 16  ;;  %v1640_v37 = vld [vmem:[#allocation2 + $0x90] sm:$0xe]  ;;  %v3097_v57 = vpop.permute.xlu0 %3096  ;;  %1053 = vst.msk [vmem:[#allocation4 + $0x410] sm:$0xff] %vm14451_vm0, %v10849_v2 }
 0x146   : > { %3106 = vrot.lane.b32.xlu1 %v10833_v8, %s11106_s12  ;;  %v3474_v10 = vsel %vm11322_vm14, %v3469_v43, %v12149_v41  ;;  %v3873_v22 = vsel %vm11256_vm10, %v3871_v39, %v3872_v13  ;;  %v1409_v30 = vshrl.u32 %v1093_v45, 16  ;;  %v1415_v49 = vshll.u32 %v1094_v47, 16  ;;  %v1641_v17 = vld [vmem:[#allocation2 + $0x94] sm:$0xf]  ;;  %v1642_v12 = vld [vmem:[#allocation2 + $0x98] sm:$0x1] }
 0x147   : > { %v9787_v63 = vcombine.low %v3474_v10, %v3484_v50  ;;  %3970 = vrot.lane.b32.xlu0 %v9818_v44, %s11109_s15  ;;  %v9819_v61 = vcombine.low %v3870_v1, %v3873_v22  ;;  %v1402_v62 = vor.u32 %v1401_v31, %v1398_v46  ;;  %v1407_v11 = vrot.slane %v1405_v19, 5  ;;  %v1643_v26 = vld [vmem:[#allocation2 + $0x9c] sm:$0xe]  ;;  %v1644_v56 = vld [vmem:[#allocation2 + $0xa0] sm:$0xf]  ;;  %3139 = vst.msk [vmem:[#allocation4 + $0x1e0] sm:$0xff] %vm3132_vm13, %v3097_v57 }
 0x148   : > { %v1411_v15 = vrot.slane %v1409_v30, 4  ;;  %v1420_v16 = vshrl.u32 %v1095_v48, 16  ;;  %v1423_v41 = vshll.u32 %v1095_v48, 16  ;;  %v1417_v29 = vrot.slane %v1415_v49, 5  ;;  %v1645_v45 = vld [vmem:[#allocation2 + $0xa4] sm:$0x1] }
 0x149   : > { %v1403_v20 = vrot.slane %v1402_v62, 4  ;;  %v1429_v27 = vshll.u32 %v1096_v53, 16  ;;  %v1433_v24 = vshrl.u32 %v1096_v53, 16  ;;  %v1439_v23 = vshll.u32 %v1097_v55, 16  ;;  %v890_v28 = vld [vmem:[#allocation2 + $0xa8] sm:$0xf] }
 0x14a   : > { %3651 = vrot.lane.b32.xlu1 %v9787_v63, %s11111_s17  ;;  %v1412_v18 = vor.u32 %v1411_v15, %v1407_v11  ;;  %v1422_v59 = vrot.slane %v1420_v16, 4  ;;  %v1425_v51 = vrot.slane %v1423_v41, 5  ;;  %v9676_v33 = vrot.slane %v1640_v37, 9  ;;  %v2141_v1 = vld [vmem:[#allocation2 + $0x9c] sm:$0xf] }
 0x14b   : > { %v1408_v8 = vsel %vm11322_vm14, %v1403_v20, %v1407_v11  ;;  %v1431_v14 = vrot.slane %v1429_v27, 5  ;;  %v1435_v21 = vrot.slane %v1433_v24, 4  ;;  %v1441_v4 = vrot.slane %v1439_v23, 5  ;;  %v2142_v44 = vld [vmem:[#allocation2 + $0xa0] sm:$0xf]  ;;  %v2600_v22 = vpop.permute.xlu1 %2599 }
 0x14c   : > { %v1413_v38 = vrot.slane %v1412_v18, 4  ;;  %v1426_v35 = vor.u32 %v1425_v51, %v1422_v59  ;;  %v1789_v13 = vrot.slane %v1641_v17, 5  ;;  %v1792_v60 = vrot.slane %v1642_v12, 5  ;;  %v2143_v32 = vld [vmem:[#allocation2 + $0xa4] sm:$0x1]  ;;  %2641 = vst.msk [vmem:[#allocation4 + $0x230] sm:$0xff] %vm2633_vm8, %v2600_v22 }
 0x14d   : > { %v1436_v40 = vor.u32 %v1435_v21, %v1431_v14  ;;  %v9677_v7 = vrot.slane %v1643_v26, 9  ;;  %v1796_v43 = vrot.slane %v1644_v56, 5  ;;  %v334_v10 = vld [vmem:[#allocation2 + $0xb0] sm:$0x1]  ;;  %v1799_v63 = vrot.slane %v1645_v45, 5  ;;  %v3642_v27 = vpop.permute.xlu0 %3641  ;;  %v10834_v56 = vld [vmem:[#allocation2 + $0x9c] sm:$0xff]  }
 0x14e   : > { %3972 = vrot.lane.b32.xlu1 %v9819_v61, %s11109_s15  ;;  %v1418_v39 = vsel %vm11322_vm14, %v1413_v38, %v1417_v29  ;;  %v1427_v47 = vrot.slane %v1426_v35, 4  ;;  %v1790_v48 = vsel %vm11256_vm10, %v9676_v33, %v1789_v13  ;;  %v1791_v50 = vrot.slane %v1789_v13, 4  ;;  %v2686_v2 = vld [vmem:[#allocation2 + $0x9c] sm:$0xe]  ;;  %v2687_v11 = vld [vmem:[#allocation2 + $0xa0] sm:$0xf] }
 0x14f   : > { %v9660_v46 = vcombine.low %v1408_v8, %v1418_v39  ;;  %v1437_v31 = vrot.slane %v1436_v40, 4  ;;  %v1797_v53 = vsel %vm11256_vm10, %v9677_v7, %v1796_v43  ;;  %v1798_v55 = vrot.slane %v1796_v43, 4  ;;  %v2688_v12 = vld [vmem:[#allocation2 + $0xa4] sm:$0x1]  ;;  %v281_v20 = vld [vmem:[#allocation2 + $0xb4] sm:$0x1]  ;;  %v2921_v18 = vpop.permute.xlu1 %2920 }
 0x150   : > { %v1432_v19 = vsel %vm11322_vm14, %v1427_v47, %v1431_v14  ;;  %v1793_v30 = vsel %vm11256_vm10, %v1791_v50, %v1792_v60  ;;  %v704_v61 = vrot.slane %v12119_v5, 4  ;;  %v706_v37 = vshrl.u32 %v12129_v58, 16  ;;  %v375_v29 = vld [vmem:[%s11225_s9 + $0xe8] sm:$0xff]  ;;  %3684 = vst.msk [vmem:[#allocation4 + $0x1e0] sm:$0xff] %vm3677_vm4, %v3642_v27 }
 0x151   : > { %1563 = vrot.lane.b32.xlu0 %v9660_v46, %s11107_s13  ;;  %v1442_v62 = vsel %vm11322_vm14, %v1437_v31, %v1441_v4  ;;  %v9692_v49 = vcombine.low %v1790_v48, %v1793_v30  ;;  %v709_v17 = vshll.u32 %v12129_v58, 16  ;;  %v1800_v16 = vsel %vm11256_vm10, %v1798_v55, %v1799_v63  ;;  %2962 = vst.msk [vmem:[#allocation4 + $0x230] sm:$0xff] %vm2954_vm12, %v2921_v18  ;;  %v337_v30 = vld [vmem:[#allocation2 + $0xbc] sm:$0x1] }
 0x152   : > { %v9661_v15 = vcombine.low %v1432_v19, %v1442_v62  ;;  %v891_v5 = vsel %vm11262_vm11, %v12154_v9, %v890_v28  ;;  %v2442_v41 = vshrl.u32 %v2141_v1, 16  ;;  %v9693_v24 = vcombine.low %v1797_v53, %v1800_v16 }
 0x153   : > { %v708_v26 = vrot.slane %v706_v37, 7  ;;  %892 = vst [vmem:[#allocation2 + $0xa8] sm:$0xf] %v891_v5  ;;  %v2445_v57 = vshll.u32 %v2141_v1, 16  ;;  %v2451_v58 = vshll.u32 %v2142_v44, 16  ;;  %v2455_v51 = vshrl.u32 %v2142_v44, 16  ;;  %v3099_v43 = vpop.permute.xlu1 %3098  ;;  %v3963_v47 = vpop.permute.xlu0 %3962 }
 0x154   : > { %1565 = vrot.lane.b32.xlu1 %v9661_v15, %s11107_s13  ;;  %v2444_v59 = vrot.slane %v2442_v41, 4  ;;  %v2461_v23 = vshll.u32 %v2143_v32, 16  ;;  %v335_v9 = vsel %vm11229_vm5, 0, %v334_v10  ;;  %v12218_v33 = vpack.c.bf16 %v375_v29, %v375_v29  ;;  %3140 = vst.msk [vmem:[#allocation4 + $0x230] sm:$0xff] %vm3132_vm13, %v3099_v43 }
 0x155   : > { %1887 = vrot.lane.b32.xlu0 %v9692_v49, %s11105_s11  ;;  %v711_v8 = vor.u32 %v709_v17, %v708_v26  ;;  %v2447_v14 = vrot.slane %v2445_v57, 5  ;;  %v2453_v21 = vrot.slane %v2451_v58, 5  ;;  %336 = vst [vmem:[#allocation2 + $0xb0] sm:$0x1] %v335_v9  ;;  %v2457_v38 = vrot.slane %v2455_v51, 4 }
 0x156   : > { %v2463_v35 = vrot.slane %v2461_v23, 5  ;;  %v9740_v4 = vrot.slane %v2686_v2, 9  ;;  %v2832_v13 = vrot.slane %v2687_v11, 5  ;;  %v2835_v60 = vrot.slane %v2688_v12, 5 }
 0x157   : > { %v712_v45 = vsel %vm11244_vm9, %v704_v61, %v711_v8  ;;  %v2448_v40 = vor.u32 %v2447_v14, %v2444_v59  ;;  %v282_v7 = vsel %vm11195_vm3, 0, %v281_v20  ;;  %vm14452_vm1 = vcmask 27648   ;;  %v3644_v63 = vpop.permute.xlu1 %3643 }
 0x158   : > { %1889 = vrot.lane.b32.xlu1 %v9693_v24, %s11105_s11  ;;  %893 = vst.msk [vmem:[#allocation2 + $0xac] sm:$0xf] %vm14452_vm1, %v712_v45  ;;  %v2458_v28 = vor.u32 %v2457_v38, %v2453_v21  ;;  %v2834_v1 = vrot.slane %v2832_v13, 4  ;;  %283 = vst [vmem:[#allocation2 + $0xb4] sm:$0x1] %v282_v7  ;;  %v715_v39 = vshrl.u32 %v12144_v52, 16  ;;  %v2833_v19 = vsel %vm11256_vm10, %v9740_v4, %v2832_v13 }
 0x159   : > { %2064 = vrot.lane.b32.xlu0 %v10834_v56, %s11104_s10  ;;  %v713_v48 = vrot.slane %v708_v26, 4  ;;  %v2449_v50 = vrot.slane %v2448_v40, 4  ;;  %v718_v44 = vshll.u32 %v12144_v52, 16  ;;  %v723_v46 = vshrl.u32 %v12218_v33, 16  ;;  %3685 = vst.msk [vmem:[#allocation4 + $0x230] sm:$0xff] %vm3677_vm4, %v3644_v63 }
 0x15a   : > { %vm14453_vm15 = vcmask 294144   ;;  %v2459_v31 = vrot.slane %v2458_v28, 4  ;;  %v2144_v53 = vld [vmem:[#allocation2 + $0xa8] sm:$0xf]  ;;  %v717_v55 = vrot.slane %v715_v39, 7  ;;  %v2836_v62 = vsel %vm11256_vm10, %v2834_v1, %v2835_v60 }
 0x15b   : > { %4005 = vst.msk [vmem:[#allocation4 + $0x1e0] sm:$0xff] %vm14453_vm15, %v3963_v47  ;;  %v2454_v32 = vsel %vm11322_vm14, %v2449_v50, %v2453_v21  ;;  %v2466_v10 = vshrl.u32 %v2144_v53, 16  ;;  %v2469_v22 = vshll.u32 %v2144_v53, 16  ;;  %v726_v37 = vshll.u32 %v12218_v33, 16  ;;  %v3185_v17 = vld [vmem:[#allocation2 + $0xa8] sm:$0xf]  ;;  %v3965_v59 = vpop.permute.xlu1 %3964  ;;  %vm14454_vm0 = vmmov %vm14453_vm15 }
 0x15c   : > { %v2464_v52 = vsel %vm11322_vm14, %v2459_v31, %v2463_v35  ;;  %v894_v61 = vld [vmem:[#allocation2 + $0xb0] sm:$0x1]  ;;  %v720_v49 = vor.u32 %v718_v44, %v717_v55  ;;  %v2689_v5 = vld [vmem:[#allocation2 + $0xa8] sm:$0xe]  ;;  %v721_v41 = vrot.slane %v717_v55, 4  ;;  %v12244_v12 = vrot.slane %v723_v46, 7  ;;  %v1556_v35 = vpop.permute.xlu0 %1555 }
 0x15d   : > { %v9724_v2 = vcombine.low %v2454_v32, %v2464_v52  ;;  %v895_v11 = vsel %vm11195_vm3, %v713_v48, %v894_v61  ;;  %v2468_v15 = vrot.slane %v2466_v10, 4  ;;  %v2471_v16 = vrot.slane %v2469_v22, 5  ;;  %v12248_v27 = vld [vmem:[#allocation2 + $0xa8] sm:$0xe]  ;;  %4006 = vst.msk [vmem:[#allocation4 + $0x230] sm:$0xff] %vm14454_vm0, %v3965_v59 }
 0x15e   : > { %896 = vst [vmem:[#allocation2 + $0xb0] sm:$0x1] %v895_v11  ;;  %v3486_v20 = vshrl.u32 %v3185_v17, 16  ;;  %v338_v29 = vsel %vm11229_vm5, 0, %v337_v30  ;;  %v9756_v58 = vcombine.low %v2833_v19, %v2836_v62  ;;  %v3489_v18 = vshll.u32 %v3185_v17, 16  ;;  %v376_v31 = vld [vmem:[%s11225_s9 + $0xf0] sm:$0xff] }
 0x15f   : > { %v10835_v24 = vld [vmem:[#allocation2 + $0xa8] sm:$0xff]   ;;  %2609 = vrot.lane.b32.xlu0 %v9724_v2, %s11110_s16  ;;  %v2472_v57 = vor.u32 %v2471_v16, %v2468_v15  ;;  %339 = vst [vmem:[#allocation2 + $0xbc] sm:$0x1] %v338_v29  ;;  %v728_v56 = vor.u32 %v726_v37, %v12244_v12  ;;  %v9741_v14 = vrot.slane %v2689_v5, 9  ;;  %v897_v33 = vld [vmem:[#allocation2 + $0xb4] sm:$0xf]  ;;  %v1558_v53 = vpop.permute.xlu1 %1557 }
 0x160   : > { %v2145_v26 = vld [vmem:[#allocation2 + $0xac] sm:$0xf]  ;;  %2066 = vrot.lane.b32.xlu1 %v10835_v24, %s11104_s10  ;;  %v9804_v38 = vrot.slane %v12248_v27, 9  ;;  %v898_v60 = vsel %vm11262_vm11, %v720_v49, %v897_v33  ;;  %vm14455_vm1 = vcmask 64544   ;;  %v730_v43 = vrot.slane %v12244_v12, 4  ;;  %v1880_v30 = vpop.permute.xlu0 %1879 }
 0x161   : > { %v2475_v51 = vshll.u32 %v2145_v26, 16  ;;  %v2479_v23 = vshrl.u32 %v2145_v26, 16  ;;  %v2690_v9 = vld [vmem:[#allocation2 + $0xac] sm:$0xf]  ;;  %v12254_v8 = vrot.slane %v2472_v57, 4  ;;  %v729_v40 = vsel %vm11244_vm9, %v721_v41, %v728_v56  ;;  %1596 = vst.msk [vmem:[#allocation4 + $0x280] sm:$0xff] %vm14455_vm1, %v1556_v35 }
 0x162   : > { %v2839_v21 = vrot.slane %v2690_v9, 5  ;;  %v10838_v45 = vld [vmem:[#allocation2 + $0xa8] sm:$0xff]   ;;  %899 = vst [vmem:[#allocation2 + $0xb4] sm:$0xf] %v898_v60  ;;  %vm14456_vm15 = vcmask 27648   ;;  %v3488_v28 = vrot.slane %v3486_v20, 4 }
 0x163   : > { %v12257_v4 = vrot.slane %v2475_v51, 5  ;;  %v2481_v13 = vrot.slane %v2479_v23, 4  ;;  %v3186_v7 = vld [vmem:[#allocation2 + $0xac] sm:$0xf]  ;;  %2930 = vrot.lane.b32.xlu0 %v9756_v58, %s11108_s14  ;;  %900 = vst.msk [vmem:[#allocation2 + $0xb8] sm:$0xf] %vm14456_vm15, %v729_v40  ;;  %v1882_v24 = vpop.permute.xlu1 %1881 }
 0x164   : > { %v3491_v1 = vrot.slane %v3489_v18, 5  ;;  %v3731_v39 = vld [vmem:[#allocation2 + $0xac] sm:$0xf]  ;;  %v4021_v47 = vld [vmem:[#allocation4 + $0x1e0] sm:$0xff]  ;;  %v2841_v50 = vrot.slane %v2839_v21, 4  ;;  %v3495_v44 = vshll.u32 %v3186_v7, 16  ;;  %v12272_v10 = vsel %vm11256_vm10, %v9741_v14, %v2839_v21  ;;  %v2057_v59 = vpop.permute.xlu0 %2056 }
 0x165   : > { %v2482_v48 = vor.u32 %v2481_v13, %v12257_v4  ;;  %v3499_v46 = vshrl.u32 %v3186_v7, 16  ;;  %vm14457_vm0 = vcmask 293888   ;;  %v2146_v55 = vld [vmem:[#allocation2 + $0xb0] sm:$0x1]  ;;  %1597 = vst.msk [vmem:[#allocation4 + $0x2d0] sm:$0xff] %vm14455_vm1, %v1558_v53  ;;  %v4022_v16 = vld [vmem:[#allocation4 + $0x230] sm:$0xff]  ;;  %v2478_v5 = vsel %vm11322_vm14, %v12254_v8, %v12257_v4 }
 0x166   : > { %10714 = vmatprep.mubr.msk.bf16.mxu0 %vm14457_vm0, %v4021_v47  ;;  %v2691_v32 = vld [vmem:[#allocation2 + $0xb0] sm:$0x1]  ;;  %v3492_v19 = vor.u32 %v3491_v1, %v3488_v28  ;;  %v2485_v52 = vshll.u32 %v2146_v55, 16  ;;  %v3497_v62 = vrot.slane %v3495_v44, 5  ;;  %v901_v49 = vld [vmem:[#allocation2 + $0xbc] sm:$0x1]  ;;  %vm14458_vm15 = vmmov %vm14457_vm0  ;;  %v12286_v18 = vpack.c.bf16 %v376_v31, %v376_v31 }
 0x167   : > { %v3187_v22 = vld [vmem:[#allocation2 + $0xb0] sm:$0x1]  ;;  %v2483_v63 = vrot.slane %v2482_v48, 4  ;;  %v2842_v61 = vrot.slane %v2691_v32, 5  ;;  %1920 = vst.msk [vmem:[#allocation4 + $0x280] sm:$0xff] %vm1911_vm6, %v1880_v30  ;;  %3108 = vrot.lane.b32.xlu0 %v10838_v45, %s11106_s12  ;;  %v3501_v17 = vrot.slane %v3499_v46, 4  ;;  %v902_v11 = vsel %vm11195_vm3, %v730_v43, %v901_v49  ;;  %10715 = vmatmul.mubr.msk.bf16.gmra.mrb[12].mxu0 %vm14458_vm15, %v4022_v16 }
 0x168   : > { %v3493_v37 = vrot.slane %v3492_v19, 4  ;;  %v3505_v2 = vshll.u32 %v3187_v22, 16  ;;  %v3732_v15 = vld [vmem:[#allocation2 + $0xb0] sm:$0x1]  ;;  %v2487_v41 = vrot.slane %v2485_v52, 5  ;;  %v3876_v20 = vrot.slane %v3731_v39, 5 }
 0x169   : > { %v2843_v12 = vsel %vm11256_vm10, %v2841_v50, %v2842_v61  ;;  %903 = vst [vmem:[#allocation2 + $0xbc] sm:$0x1] %v902_v11  ;;  %v1098_v29 = vld [vmem:[#allocation2 + $0xa8] sm:$0xf]  ;;  %v3502_v26 = vor.u32 %v3501_v17, %v3497_v62  ;;  %v3879_v58 = vrot.slane %v3732_v15, 5  ;;  %1921 = vst.msk [vmem:[#allocation4 + $0x2d0] sm:$0xff] %vm1911_vm6, %v1882_v24 }
 0x16a   : > { %v3507_v57 = vrot.slane %v3505_v2, 5  ;;  %v2488_v51 = vsel %vm11322_vm14, %v2483_v63, %v2487_v41  ;;  %v9757_v23 = vcombine.low %v12272_v10, %v2843_v12  ;;  %v3498_v9 = vsel %vm11322_vm14, %v3493_v37, %v3497_v62  ;;  %v377_v8 = vld [vmem:[%s11225_s9 + $0xf8] sm:$0xff]  ;;  %2097 = vst.msk [vmem:[#allocation4 + $0x280] sm:$0xff] %vm2088_vm7, %v2057_v59  ;;  %v3189_v35 = vld [vmem:[#allocation2 + $0xb8] sm:$0xf]  ;;  %v10850_v62 = vld [vmem:[#allocation2 + $0xa8] sm:$0xff]  }
 0x16b   : > { %v3878_v56 = vrot.slane %v3876_v20, 4  ;;  %v9725_v14 = vcombine.low %v2478_v5, %v2488_v51  ;;  %v3503_v21 = vrot.slane %v3502_v26, 4  ;;  %v3188_v33 = vld [vmem:[#allocation2 + $0xb4] sm:$0xf]  ;;  %v3877_v4 = vsel %vm11256_vm10, %v9804_v38, %v3876_v20  ;;  %v3734_v39 = vld [vmem:[#allocation2 + $0xb8] sm:$0xf] }
 0x16c   : > { %v1444_v13 = vshrl.u32 %v1098_v29, 16  ;;  %v3510_v45 = vshrl.u32 %v3188_v33, 16  ;;  %v3513_v40 = vshll.u32 %v3188_v33, 16  ;;  %v3519_v60 = vshll.u32 %v3189_v35, 16  ;;  %v3733_v43 = vld [vmem:[#allocation2 + $0xb4] sm:$0xe] }
 0x16d   : > { %v3523_v7 = vshrl.u32 %v3189_v35, 16  ;;  %2611 = vrot.lane.b32.xlu1 %v9725_v14, %s11110_s16  ;;  %v3508_v28 = vsel %vm11322_vm14, %v3503_v21, %v3507_v57  ;;  %v3880_v1 = vsel %vm11256_vm10, %v3878_v56, %v3879_v58  ;;  %v9805_v47 = vrot.slane %v3733_v43, 9  ;;  %v1099_v46 = vld [vmem:[#allocation2 + $0xac] sm:$0xf]  ;;  %v1100_v52 = vld [vmem:[#allocation2 + $0xb0] sm:$0x1] }
 0x16e   : > { %v1446_v27 = vrot.slane %v1444_v13, 4  ;;  %v9788_v48 = vcombine.low %v3498_v9, %v3508_v28  ;;  %v3512_v50 = vrot.slane %v3510_v45, 4  ;;  %v3515_v38 = vrot.slane %v3513_v40, 5  ;;  %v10839_v49 = vld [vmem:[#allocation2 + $0xb4] sm:$0xff]   ;;  %v1646_v59 = vld [vmem:[#allocation2 + $0xa8] sm:$0xe] }
 0x16f   : > { %v3521_v44 = vrot.slane %v3519_v60, 5  ;;  %v3525_v53 = vrot.slane %v3523_v7, 4  ;;  %v9820_v55 = vcombine.low %v3877_v4, %v3880_v1  ;;  %v3883_v10 = vrot.slane %v3734_v39, 5  ;;  %v1101_v15 = vld [vmem:[#allocation2 + $0xb4] sm:$0xf] }
 0x170   : > { %v3190_v31 = vld [vmem:[#allocation2 + $0xbc] sm:$0x1]  ;;  %v12305_v22 = vpack.c.bf16 %v377_v8, %v377_v8  ;;  %3653 = vrot.lane.b32.xlu0 %v9788_v48, %s11111_s17  ;;  %v3516_v19 = vor.u32 %v3515_v38, %v3512_v50  ;;  %v1447_v61 = vshll.u32 %v1098_v29, 16  ;;  %v1453_v11 = vshll.u32 %v1099_v46, 16  ;;  %v1102_v20 = vld [vmem:[#allocation2 + $0xb8] sm:$0xf]  ;;  %v2602_v24 = vpop.permute.xlu0 %2601 }
 0x171   : > { %v3735_v32 = vld [vmem:[#allocation2 + $0xbc] sm:$0x1]  ;;  %v3529_v30 = vshll.u32 %v3190_v31, 16  ;;  %2932 = vrot.lane.b32.xlu1 %v9757_v23, %s11108_s14  ;;  %v3526_v37 = vor.u32 %v3525_v53, %v3521_v44  ;;  %v12311_v17 = vsel %vm11256_vm10, %v9805_v47, %v3883_v10  ;;  %v3885_v2 = vrot.slane %v3883_v10, 4  ;;  %2642 = vst.msk [vmem:[#allocation4 + $0x280] sm:$0xff] %vm2633_vm8, %v2602_v24  ;;  %v10851_v23 = vld [vmem:[#allocation2 + $0xb4] sm:$0xff]  }
 0x172   : > { %v3886_v63 = vrot.slane %v3735_v32, 5  ;;  %v3517_v16 = vrot.slane %v3516_v19, 4  ;;  %v1449_v41 = vrot.slane %v1447_v61, 5  ;;  %v1457_v12 = vshrl.u32 %v1099_v46, 16  ;;  %v1103_v21 = vld [vmem:[#allocation2 + $0xbc] sm:$0x1] }
 0x173   : > { %v3531_v5 = vrot.slane %v3529_v30, 5  ;;  %vm14459_vm0 = vcmask 31744   ;;  %v3527_v29 = vrot.slane %v3526_v37, 4  ;;  %v1455_v57 = vrot.slane %v1453_v11, 5  ;;  %v2059_v51 = vpop.permute.xlu1 %2058  ;;  %v1647_v45 = vld [vmem:[#allocation2 + $0xac] sm:$0xf] }
 0x174   : > { %1054 = vst.msk [vmem:[#allocation4 + $0x460] sm:$0xff] %vm14459_vm0, %v10850_v62  ;;  %v3887_v26 = vsel %vm11256_vm10, %v3885_v2, %v3886_v63  ;;  %v1463_v58 = vshll.u32 %v1100_v52, 16  ;;  %v3522_v9 = vsel %vm11322_vm14, %v3517_v16, %v3521_v44  ;;  %3974 = vrot.lane.b32.xlu0 %v9820_v55, %s11109_s15  ;;  %v1450_v8 = vor.u32 %v1449_v41, %v1446_v27  ;;  %vm14460_vm1 = vmmov %vm14459_vm0  ;;  %v1648_v28 = vld [vmem:[#allocation2 + $0xb0] sm:$0x1]  ;;  %v1649_v1 = vld [vmem:[#allocation2 + $0xb4] sm:$0xe]  ;;  %v2923_v39 = vpop.permute.xlu0 %2922 }
 0x175   : > { %v9821_v56 = vcombine.low %v12311_v17, %v3887_v26  ;;  %v1459_v14 = vrot.slane %v1457_v12, 4  ;;  %2098 = vst.msk [vmem:[#allocation4 + $0x2d0] sm:$0xff] %vm2088_vm7, %v2059_v51  ;;  %3110 = vrot.lane.b32.xlu1 %v10839_v49, %s11106_s12  ;;  %v3532_v33 = vsel %vm11322_vm14, %v3527_v29, %v3531_v5  ;;  %v1468_v4 = vshrl.u32 %v1101_v15, 16  ;;  %v1650_v38 = vld [vmem:[#allocation2 + $0xb8] sm:$0xf] }
 0x176   : > { %v1465_v35 = vrot.slane %v1463_v58, 5  ;;  %v1471_v13 = vshll.u32 %v1101_v15, 16  ;;  %1055 = vst.msk [vmem:[#allocation4 + $0x4b0] sm:$0xff] %vm14460_vm1, %v10851_v23  ;;  %v9789_v40 = vcombine.low %v3522_v9, %v3532_v33  ;;  %v1451_v60 = vrot.slane %v1450_v8, 4  ;;  %v1651_v55 = vld [vmem:[#allocation2 + $0xbc] sm:$0x1] }
 0x177   : > { %v1460_v7 = vor.u32 %v1459_v14, %v1455_v57  ;;  %v1477_v43 = vshll.u32 %v1102_v20, 16  ;;  %v1470_v47 = vrot.slane %v1468_v4, 4  ;;  %v1481_v48 = vshrl.u32 %v1102_v20, 16  ;;  %2963 = vst.msk [vmem:[#allocation4 + $0x280] sm:$0xff] %vm2954_vm12, %v2923_v39  ;;  %v284_v32 = vld [vmem:[#allocation2 + $0xc0] sm:$0x1] }
 0x178   : > { %v1473_v27 = vrot.slane %v1471_v13, 5  ;;  %v1487_v50 = vshll.u32 %v1103_v21, 16  ;;  %v1456_v44 = vsel %vm11322_vm14, %v1451_v60, %v1455_v57  ;;  %v9678_v53 = vrot.slane %v1646_v59, 9  ;;  %v3101_v37 = vpop.permute.xlu0 %3100  ;;  %v2147_v16 = vld [vmem:[#allocation2 + $0xb4] sm:$0xf] }
 0x179   : > { %v1461_v46 = vrot.slane %v1460_v7, 4  ;;  %v1479_v31 = vrot.slane %v1477_v43, 5  ;;  %3655 = vrot.lane.b32.xlu1 %v9789_v40, %s11111_s17  ;;  %v1483_v19 = vrot.slane %v1481_v48, 4  ;;  %v1803_v63 = vrot.slane %v1647_v45, 5  ;;  %3141 = vst.msk [vmem:[#allocation4 + $0x280] sm:$0xff] %vm3132_vm13, %v3101_v37 }
 0x17a   : > { %v1474_v10 = vor.u32 %v1473_v27, %v1470_v47  ;;  %v1489_v30 = vrot.slane %v1487_v50, 5  ;;  %v1806_v61 = vrot.slane %v1648_v28, 5  ;;  %v9679_v62 = vrot.slane %v1649_v1, 9  ;;  %v2148_v24 = vld [vmem:[#allocation2 + $0xb8] sm:$0xf] }
 0x17b   : > { %v1466_v52 = vsel %vm11322_vm14, %v1461_v46, %v1465_v35  ;;  %v1810_v49 = vrot.slane %v1650_v38, 5  ;;  %v1484_v11 = vor.u32 %v1483_v19, %v1479_v31  ;;  %v1804_v15 = vsel %vm11256_vm10, %v9678_v53, %v1803_v63  ;;  %v340_v8 = vld [vmem:[#allocation2 + $0xc8] sm:$0x1]  ;;  %v2693_v35 = vld [vmem:[#allocation2 + $0xb8] sm:$0xf] }
 0x17c   : > { %v9662_v17 = vcombine.low %v1456_v44, %v1466_v52  ;;  %v1475_v2 = vrot.slane %v1474_v10, 4  ;;  %v1805_v5 = vrot.slane %v1803_v63, 4  ;;  %v1813_v20 = vrot.slane %v1651_v55, 5  ;;  %v2692_v60 = vld [vmem:[#allocation2 + $0xb4] sm:$0xe] }
 0x17d   : > { %v1811_v41 = vsel %vm11256_vm10, %v9679_v62, %v1810_v49  ;;  %v1812_v12 = vrot.slane %v1810_v49, 4  ;;  %3976 = vrot.lane.b32.xlu1 %v9821_v56, %s11109_s15  ;;  %v1485_v26 = vrot.slane %v1484_v11, 4  ;;  %v285_v57 = vsel %vm11195_vm3, 0, %v284_v32  ;;  %v2149_v56 = vld [vmem:[#allocation2 + $0xbc] sm:$0x1]  ;;  %v10840_v28 = vld [vmem:[#allocation2 + $0xb4] sm:$0xff]  }
 0x17e   : > { %1567 = vrot.lane.b32.xlu0 %v9662_v17, %s11107_s13  ;;  %v1480_v29 = vsel %vm11322_vm14, %v1475_v2, %v1479_v31  ;;  %v732_v58 = vshrl.u32 %v12286_v18, 16  ;;  %v1807_v59 = vsel %vm11256_vm10, %v1805_v5, %v1806_v61  ;;  %286 = vst [vmem:[#allocation2 + $0xc0] sm:$0x1] %v285_v57  ;;  %v735_v23 = vshll.u32 %v12286_v18, 16  ;;  %v287_v7 = vld [vmem:[#allocation2 + $0xcc] sm:$0x1]  ;;  %v2604_v43 = vpop.permute.xlu1 %2603 }
 0x17f   : > { %v1814_v51 = vsel %vm11256_vm10, %v1812_v12, %v1813_v20  ;;  %v740_v9 = vshrl.u32 %v12305_v22, 16  ;;  %v1490_v14 = vsel %vm11322_vm14, %v1485_v26, %v1489_v30  ;;  %v9694_v21 = vcombine.low %v1804_v15, %v1807_v59  ;;  %2643 = vst.msk [vmem:[#allocation4 + $0x2d0] sm:$0xff] %vm2633_vm8, %v2604_v43  ;;  %v2694_v38 = vld [vmem:[#allocation2 + $0xbc] sm:$0x1]  ;;  %v343_v30 = vld [vmem:[#allocation2 + $0xd4] sm:$0x1] }
 0x180   : > { %v734_v33 = vrot.slane %v732_v58, 7  ;;  %v9663_v4 = vcombine.low %v1480_v29, %v1490_v14  ;;  %v743_v45 = vshll.u32 %v12305_v22, 16  ;;  %v2490_v40 = vshrl.u32 %v2147_v16, 16  ;;  %v12380_v57 = vld [vmem:[#allocation2 + $0xd0] sm:$0xf] }
 0x181   : > { %v12352_v13 = vrot.slane %v740_v9, 7  ;;  %v9695_v18 = vcombine.low %v1811_v41, %v1814_v51  ;;  %v2493_v39 = vshll.u32 %v2147_v16, 16  ;;  %v2499_v47 = vshll.u32 %v2148_v24, 16  ;;  %v3646_v55 = vpop.permute.xlu0 %3645  ;;  %v3195_v41 = vld [vmem:[#allocation2 + $0xd0] sm:$0xf] }
 0x182   : > { %1891 = vrot.lane.b32.xlu0 %v9694_v21, %s11105_s11  ;;  %v738_v1 = vrot.slane %v734_v33, 4  ;;  %1569 = vrot.lane.b32.xlu1 %v9663_v4, %s11107_s13  ;;  %v737_v27 = vor.u32 %v735_v23, %v734_v33  ;;  %v2492_v50 = vrot.slane %v2490_v40, 4  ;;  %v2503_v22 = vshrl.u32 %v2148_v24, 16  ;;  %v2925_v63 = vpop.permute.xlu1 %2924  ;;  %3686 = vst.msk [vmem:[#allocation4 + $0x280] sm:$0xff] %vm3677_vm4, %v3646_v55 }
 0x183   : > { %v745_v48 = vor.u32 %v743_v45, %v12352_v13  ;;  %v2495_v44 = vrot.slane %v2493_v39, 5  ;;  %v2501_v46 = vrot.slane %v2499_v47, 5  ;;  %v2509_v31 = vshll.u32 %v2149_v56, 16  ;;  %2964 = vst.msk [vmem:[#allocation4 + $0x2d0] sm:$0xff] %vm2954_vm12, %v2925_v63 }
 0x184   : > { %v341_v53 = vsel %vm11229_vm5, 0, %v340_v8  ;;  %v2505_v10 = vrot.slane %v2503_v22, 4  ;;  %v2846_v19 = vrot.slane %v2693_v35, 5  ;;  %vm14461_vm15 = vcmask 27648  }
 0x185   : > { %v746_v32 = vsel %vm11244_vm9, %v738_v1, %v745_v48  ;;  %342 = vst [vmem:[#allocation2 + $0xc8] sm:$0x1] %v341_v53  ;;  %v904_v52 = vld [vmem:[#allocation2 + $0xc0] sm:$0xf]  ;;  %v2496_v61 = vor.u32 %v2495_v44, %v2492_v50  ;;  %v2511_v62 = vrot.slane %v2509_v31, 5  ;;  %v9742_v49 = vrot.slane %v2692_v60, 9  ;;  %v3967_v12 = vpop.permute.xlu0 %3966 }
 0x186   : > { %2068 = vrot.lane.b32.xlu0 %v10840_v28, %s11104_s10  ;;  %907 = vst.msk [vmem:[#allocation2 + $0xc4] sm:$0xf] %vm14461_vm15, %v746_v32  ;;  %v288_v37 = vsel %vm11195_vm3, 0, %v287_v7  ;;  %1893 = vrot.lane.b32.xlu1 %v9695_v18, %s11105_s11  ;;  %v905_v17 = vsel %vm11262_vm11, %v737_v27, %v904_v52  ;;  %v2506_v2 = vor.u32 %v2505_v10, %v2501_v46  ;;  %v2848_v11 = vrot.slane %v2846_v19, 4  ;;  %v3103_v29 = vpop.permute.xlu1 %3102 }
 0x187   : > { %v2849_v15 = vrot.slane %v2694_v38, 5  ;;  %289 = vst [vmem:[#allocation2 + $0xcc] sm:$0x1] %v288_v37  ;;  %906 = vst [vmem:[#allocation2 + $0xc0] sm:$0xf] %v905_v17  ;;  %v2497_v16 = vrot.slane %v2496_v61, 4  ;;  %v2847_v26 = vsel %vm11256_vm10, %v9742_v49, %v2846_v19 }
 0x188   : > { %v344_v5 = vsel %vm11229_vm5, 0, %v343_v30  ;;  %v747_v20 = vrot.slane %v12352_v13, 4  ;;  %v2507_v24 = vrot.slane %v2506_v2, 4  ;;  %vm14462_vm0 = vcmask 294144   ;;  %3142 = vst.msk [vmem:[#allocation4 + $0x2d0] sm:$0xff] %vm3132_vm13, %v3103_v29 }
 0x189   : > { %345 = vst [vmem:[#allocation2 + $0xd4] sm:$0x1] %v344_v5  ;;  %4007 = vst.msk [vmem:[#allocation4 + $0x280] sm:$0xff] %vm14462_vm0, %v3967_v12  ;;  %v2502_v36 = vsel %vm11322_vm14, %v2497_v16, %v2501_v46  ;;  %v2850_v58 = vsel %vm11256_vm10, %v2848_v11, %v2849_v15  ;;  %v3567_v59 = vshll.u32 %v3195_v41, 16  ;;  %v3571_v51 = vshrl.u32 %v3195_v41, 16 }
 0x18a   : > { %v2512_v6 = vsel %vm11322_vm14, %v2507_v24, %v2511_v62  ;;  %v3648_v21 = vpop.permute.xlu1 %3647  ;;  %v9758_v4 = vcombine.low %v2847_v26, %v2850_v58  ;;  %v3897_v13 = vrot.slane %v12380_v57, 5  ;;  %vm14464_vm5 = vcmask 293888   ;;  %v10859_v57 = vld [vmem:[%s14411_s3 + $0x18] sm:$0xff]  }
 0x18b   : > { %v9726_v23 = vcombine.low %v2502_v36, %v2512_v6  ;;  %3687 = vst.msk [vmem:[#allocation4 + $0x2d0] sm:$0xff] %vm3677_vm4, %v3648_v21  ;;  %v12398_v39 = vrot.slane %v3567_v59, 5  ;;  %v12400_v47 = vrot.slane %v3571_v51, 4  ;;  %vm14465_vm11 = vcmask 64544   ;;  %vm14467_vm15 = vmmov %vm14464_vm5 }
 0x18c   : > { %v908_v9 = vld [vmem:[#allocation2 + $0xc8] sm:$0x1]  ;;  %vm14466_vm1 = vmmov %vm14465_vm11 }
 0x18d   : > { %v909_v56 = vsel %vm11195_vm3, %v747_v20, %v908_v9  ;;  %v2151_v8 = vld [vmem:[#allocation2 + $0xc4] sm:$0xf]  ;;  %2613 = vrot.lane.b32.xlu0 %v9726_v23, %s11110_s16  ;;  %vm14463_vm3 = vmmov %vm14462_vm0  ;;  %v3574_v17 = vor.u32 %v12400_v47, %v12398_v39  ;;  %v10852_v47 = vld [vmem:[%s14411_s3 + $0x40] sm:$0xff]   ;;  %vm14468_vm0 = vsmask.f32 7938 }
 0x18e   : > { %v12389_v14 = vld [vmem:[#allocation2 + $0xc4] sm:$0xf]  ;;  %910 = vst [vmem:[#allocation2 + $0xc8] sm:$0x1] %v909_v56  ;;  %v2523_v33 = vshll.u32 %v2151_v8, 16  ;;  %v2527_v35 = vshrl.u32 %v2151_v8, 16  ;;  %v3969_v27 = vpop.permute.xlu1 %3968  ;;  %10248 = vmatprep.subr.bf16.mxu0 %v10852_v47  ;;  %10734 = vmatprep.subr.bf16.mxu1 %v10852_v47 }
 0x18f   : > { %v10841_v45 = vld [vmem:[#allocation2 + $0xc0] sm:$0xff]   ;;  %v2853_v60 = vrot.slane %v12389_v14, 5  ;;  %4008 = vst.msk [vmem:[#allocation4 + $0x2d0] sm:$0xff] %vm14463_vm3, %v3969_v27  ;;  %v3194_v61 = vld [vmem:[#allocation2 + $0xcc] sm:$0xf]  ;;  %vm14469_vm3 = vcmask 1040384  }
 0x190   : > { %v2150_v40 = vld [vmem:[#allocation2 + $0xc0] sm:$0xf]  ;;  %v12395_v43 = vrot.slane %v2523_v33, 5  ;;  %v2529_v18 = vrot.slane %v2527_v35, 4  ;;  %2070 = vrot.lane.b32.xlu1 %v10841_v45, %s11104_s10  ;;  %v4023_v48 = vld [vmem:[#allocation4 + $0x280] sm:$0xff]  ;;  %v3558_v51 = vshrl.u32 %v3194_v61, 16 }
 0x191   : > { %v2514_v0 = vshrl.u32 %v2150_v40, 16  ;;  %v2517_v7 = vshll.u32 %v2150_v40, 16  ;;  %v2695_v28 = vld [vmem:[#allocation2 + $0xc0] sm:$0xe]  ;;  %2934 = vrot.lane.b32.xlu0 %v9758_v4, %s11108_s14  ;;  %10718 = vmatprep.mubr.msk.bf16.mxu0 %vm14464_vm5, %v4023_v48  ;;  %v2855_v31 = vrot.slane %v2853_v60, 4  ;;  %v1560_v10 = vpop.permute.xlu0 %1559  ;;  %v3561_v45 = vshll.u32 %v3194_v61, 16  ;;  %vm12448_vm5 = vmand %vm14469_vm3, %vm14468_vm0 }
 0x192   : > { %v10844_v1 = vld [vmem:[#allocation2 + $0xc0] sm:$0xff]   ;;  %v2530_v38 = vor.u32 %v2529_v18, %v12395_v43  ;;  %v9743_v46 = vrot.slane %v2695_v28, 9  ;;  %1598 = vst.msk [vmem:[#allocation4 + $0x320] sm:$0xff] %vm14465_vm11, %v1560_v10  ;;  %v3196_v5 = vld [vmem:[#allocation2 + $0xd4] sm:$0x1]  ;;  %v3560_v4 = vrot.slane %v3558_v51, 4 }
 0x193   : > { %v2516_v50 = vrot.slane %v2514_v0, 4  ;;  %v2519_v22 = vrot.slane %v2517_v7, 5  ;;  %v3191_v44 = vld [vmem:[#allocation2 + $0xc0] sm:$0xf]  ;;  %v3192_v53 = vld [vmem:[#allocation2 + $0xc4] sm:$0xf] }
 0x194   : > { %v3534_v55 = vshrl.u32 %v3191_v44, 16  ;;  %v3537_v32 = vshll.u32 %v3191_v44, 16  ;;  %v2531_v30 = vrot.slane %v2530_v38, 4  ;;  %v3543_v63 = vshll.u32 %v3192_v53, 16  ;;  %v1562_v41 = vpop.permute.xlu1 %1561  ;;  %v3736_v36 = vld [vmem:[#allocation2 + $0xc0] sm:$0xe] }
 0x195   : > { %v2520_v19 = vor.u32 %v2519_v22, %v2516_v50  ;;  %v3547_v52 = vshrl.u32 %v3192_v53, 16  ;;  %v2152_v62 = vld [vmem:[#allocation2 + $0xc8] sm:$0x1]  ;;  %3112 = vrot.lane.b32.xlu0 %v10844_v1, %s11106_s12  ;;  %1599 = vst.msk [vmem:[#allocation4 + $0x370] sm:$0xff] %vm14466_vm1, %v1562_v41  ;;  %v1884_v26 = vpop.permute.xlu0 %1883  ;;  %v2854_v59 = vsel %vm11256_vm10, %v9743_v46, %v2853_v60  ;;  %v3737_v23 = vld [vmem:[#allocation2 + $0xc4] sm:$0xf] }
 0x196   : > { %v2697_v49 = vld [vmem:[#allocation2 + $0xc8] sm:$0x1]  ;;  %v2533_v11 = vshll.u32 %v2152_v62, 16  ;;  %v3536_v16 = vrot.slane %v3534_v55, 4  ;;  %v3539_v12 = vrot.slane %v3537_v32, 5  ;;  %v3545_v20 = vrot.slane %v3543_v63, 5 }
 0x197   : > { %v3193_v37 = vld [vmem:[#allocation2 + $0xc8] sm:$0x1]  ;;  %v2521_v2 = vrot.slane %v2520_v19, 4  ;;  %v2856_v15 = vrot.slane %v2697_v49, 5  ;;  %v3549_v24 = vrot.slane %v3547_v52, 4  ;;  %1922 = vst.msk [vmem:[#allocation4 + $0x320] sm:$0xff] %vm1911_vm6, %v1884_v26 }
 0x198   : > { %v3553_v29 = vshll.u32 %v3193_v37, 16  ;;  %v2535_v58 = vrot.slane %v2533_v11, 5  ;;  %v3738_v9 = vld [vmem:[#allocation2 + $0xc8] sm:$0x1]  ;;  %v3540_v8 = vor.u32 %v3539_v12, %v3536_v16  ;;  %v4024_v33 = vld [vmem:[#allocation4 + $0x2d0] sm:$0xff]  ;;  %v3577_v40 = vshll.u32 %v3196_v5, 16  ;;  %v1886_v0 = vpop.permute.xlu1 %1885 }
 0x199   : > { %v2526_v6 = vsel %vm11322_vm14, %v2521_v2, %v12395_v43  ;;  %v2857_v56 = vsel %vm11256_vm10, %v2855_v31, %v2856_v15  ;;  %v3550_v14 = vor.u32 %v3549_v24, %v3545_v20  ;;  %10719 = vmatmul.mubr.msk.bf16.gmra.mrb[16].mxu0 %vm14467_vm15, %v4024_v33  ;;  %v9806_v18 = vrot.slane %v3736_v36, 9  ;;  %v12422_v28 = vld [vmem:[#allocation2 + $0xcc] sm:$0xe]  ;;  %1923 = vst.msk [vmem:[#allocation4 + $0x370] sm:$0xff] %vm1911_vm6, %v1886_v0  ;;  %v2061_v1 = vpop.permute.xlu0 %2060  ;;  %v3741_v38 = vld [vmem:[#allocation2 + $0xd4] sm:$0x1] }
 0x19a   : > { %v3555_v21 = vrot.slane %v3553_v29, 5  ;;  %v2536_v35 = vsel %vm11322_vm14, %v2531_v30, %v2535_v58  ;;  %v3541_v7 = vrot.slane %v3540_v8, 4  ;;  %v9759_v27 = vcombine.low %v2854_v59, %v2857_v56  ;;  %2099 = vst.msk [vmem:[#allocation4 + $0x320] sm:$0xff] %vm2088_vm7, %v2061_v1  ;;  %v10853_v44 = vld [vmem:[%s14411_s3] sm:$0xff]   ;;  %v10854_v63 = vld [vmem:[%s14411_s3 + $0x48] sm:$0xff]   ;;  %v10845_v52 = vld [vmem:[#allocation2 + $0xcc] sm:$0xff]  }
 0x19b   : > { %v9727_v60 = vcombine.low %v2526_v6, %v2536_v35  ;;  %v3551_v43 = vrot.slane %v3550_v14, 4  ;;  %v3563_v48 = vrot.slane %v3561_v45, 5  ;;  %v3575_v50 = vrot.slane %v3574_v17, 4  ;;  %10249 = vmatpush3.bf16.msra.mxu0 %v10853_v44  ;;  %v4319_v37 = vld [vmem:[#allocation3 + $0x18] sm:$0x1]  ;;  %10742 = vmatpush3.bf16.msra.mxu1 %v10853_v44  ;;  %v10855_v6 = vld [vmem:[%s14411_s3 + $0x8] sm:$0xff]  }
 0x19c   : > { %v3890_v22 = vrot.slane %v3737_v23, 5  ;;  %v3546_v46 = vsel %vm11322_vm14, %v3541_v7, %v3545_v20  ;;  %v3579_v53 = vrot.slane %v3577_v40, 5  ;;  %v3893_v55 = vrot.slane %v3738_v9, 5  ;;  %v4316_v5 = vld [vmem:[#allocation3 + $0xc] sm:$0x1]  ;;  %10250 = vmatprep.subr.bf16.mxu0 %v10854_v63  ;;  %10735 = vmatprep.subr.bf16.mxu1 %v10854_v63  ;;  %v10856_v58 = vld [vmem:[%s14411_s3 + $0x50] sm:$0xff]  }
 0x19d   : > { %2615 = vrot.lane.b32.xlu1 %v9727_v60, %s11110_s16  ;;  %v3556_v31 = vsel %vm11322_vm14, %v3551_v43, %v3555_v21  ;;  %v3564_v10 = vor.u32 %v3563_v48, %v3560_v4  ;;  %v9807_v62 = vrot.slane %v12422_v28, 9  ;;  %v3899_v49 = vrot.slane %v3897_v13, 4  ;;  %v4374_v41 = vld [vmem:[#allocation3 + $0x20] sm:$0x1]  ;;  %v4371_v26 = vld [vmem:[#allocation3 + $0x14] sm:$0x1] }
 0x19e   : > { %v9790_v32 = vcombine.low %v3546_v46, %v3556_v31  ;;  %v3891_v19 = vsel %vm11256_vm10, %v9806_v18, %v3890_v22  ;;  %v3892_v30 = vrot.slane %v3890_v22, 4  ;;  %v3580_v2 = vsel %vm11322_vm14, %v3575_v50, %v3579_v53  ;;  %v10857_v59 = vld [vmem:[%s14411_s3 + $0x10] sm:$0xff]   ;;  %v10858_v14 = vld [vmem:[%s14411_s3 + $0x58] sm:$0xff]   ;;  %v10860_v21 = vld [vmem:[%s14411_s3 + $0x60] sm:$0xff]   ;;  %s11112_s10 = smov [#allocation5]  }
 0x19f   : > { %v3565_v61 = vrot.slane %v3564_v10, 4  ;;  %v3900_v15 = vrot.slane %v3741_v38, 5  ;;  %v4320_v16 = vsel %vm12001_vm2, 0, %v4319_v37  ;;  %v4317_v29 = vsel %vm12001_vm2, 0, %v4316_v5  ;;  %10251 = vmatpush3.bf16.msra.mxu0 %v10855_v6  ;;  %10743 = vmatpush3.bf16.msra.mxu1 %v10855_v6  ;;  %v4325_v35 = vld [vmem:[#allocation3 + $0x30] sm:$0x1] }
 0x1a0   : > { %3657 = vrot.lane.b32.xlu0 %v9790_v32, %s11111_s17  ;;  %v3894_v11 = vsel %vm11256_vm10, %v3892_v30, %v3893_v55  ;;  %v2606_v24 = vpop.permute.xlu0 %2605  ;;  %4321 = vst [vmem:[#allocation3 + $0x18] sm:$0x1] %v4320_v16  ;;  %v4375_v36 = vsel %vm12448_vm5, 0, %v4374_v41  ;;  %4318 = vst [vmem:[#allocation3 + $0xc] sm:$0x1] %v4317_v29  ;;  %10252 = vmatprep.subr.bf16.mxu0 %v10856_v58  ;;  %v3898_v9 = vsel %vm11256_vm10, %v9807_v62, %v3897_v13  ;;  %v10861_v4 = vld [vmem:[%s14411_s3 + $0x20] sm:$0xff]  }
 0x1a1   : > { %2936 = vrot.lane.b32.xlu1 %v9759_v27, %s11108_s14  ;;  %v3570_v12 = vsel %vm11322_vm14, %v3565_v61, %v12398_v39  ;;  %v9822_v20 = vcombine.low %v3891_v19, %v3894_v11  ;;  %2644 = vst.msk [vmem:[#allocation4 + $0x320] sm:$0xff] %vm2633_vm8, %v2606_v24  ;;  %4376 = vst [vmem:[#allocation3 + $0x20] sm:$0x1] %v4375_v36  ;;  %v4372_v39 = vsel %vm12448_vm5, 0, %v4371_v26  ;;  %10736 = vmatprep.subr.bf16.mxu1 %v10856_v58  ;;  %v4322_v40 = vld [vmem:[#allocation3 + $0x24] sm:$0x1] }
 0x1a2   : > { %4373 = vst [vmem:[#allocation3 + $0x14] sm:$0x1] %v4372_v39  ;;  %v9791_v51 = vcombine.low %v3570_v12, %v3580_v2  ;;  %v3901_v56 = vsel %vm11256_vm10, %v3899_v49, %v3900_v15  ;;  %v4326_v45 = vsel %vm12001_vm2, 0, %v4325_v35  ;;  %v4380_v0 = vld [vmem:[#allocation3 + $0x38] sm:$0x1]  ;;  %v10862_v60 = vld [vmem:[%s14411_s3 + $0x68] sm:$0xff]  }
 0x1a3   : > { %v2063_v23 = vpop.permute.xlu1 %2062  ;;  %10253 = vmatpush3.bf16.msra.mxu0 %v10857_v59  ;;  %v9823_v13 = vcombine.low %v3898_v9, %v3901_v56  ;;  %10744 = vmatpush3.bf16.msra.mxu1 %v10857_v59  ;;  %4327 = vst [vmem:[#allocation3 + $0x30] sm:$0x1] %v4326_v45  ;;  %v4323_v7 = vsel %vm12001_vm2, 0, %v4322_v40  ;;  %v4381_v43 = vsel %vm12448_vm5, 0, %v4380_v0  ;;  %v4377_v18 = vld [vmem:[#allocation3 + $0x2c] sm:$0x1] }
 0x1a4   : > { %3978 = vrot.lane.b32.xlu0 %v9822_v20, %s11109_s15  ;;  %2100 = vst.msk [vmem:[#allocation4 + $0x370] sm:$0xff] %vm2088_vm7, %v2063_v23  ;;  %v2927_v8 = vpop.permute.xlu0 %2926  ;;  %10254 = vmatprep.subr.bf16.mxu0 %v10858_v14  ;;  %v10863_v28 = vld [vmem:[%s14411_s3 + $0x28] sm:$0xff]   ;;  %4324 = vst [vmem:[#allocation3 + $0x24] sm:$0x1] %v4323_v7  ;;  %v4378_v1 = vsel %vm12448_vm5, 0, %v4377_v18  ;;  %v10864_v48 = vld [vmem:[%s14411_s3 + $0x70] sm:$0xff]  }
 0x1a5   : > { %3114 = vrot.lane.b32.xlu1 %v10845_v52, %s11106_s12  ;;  %2965 = vst.msk [vmem:[#allocation4 + $0x320] sm:$0xff] %vm2954_vm12, %v2927_v8  ;;  %10737 = vmatprep.subr.bf16.mxu1 %v10858_v14  ;;  %4382 = vst [vmem:[#allocation3 + $0x38] sm:$0x1] %v4381_v43  ;;  %v4368_v47 = vld [vmem:[#allocation3 + $0x8] sm:$0x1]  ;;  %v10865_v63 = vld [vmem:[%s14411_s3 + $0x30] sm:$0xff]  }
 0x1a6   : > { %v5097_v27 = vld [vmem:[#allocation3] sm:$0xf]  ;;  %4379 = vst [vmem:[#allocation3 + $0x2c] sm:$0x1] %v4378_v1  ;;  %v4369_v50 = vsel %vm12448_vm5, 0, %v4368_v47  ;;  %v10866_v62 = vld [vmem:[%s14411_s3 + $0x78] sm:$0xff]  }
 0x1a7   : > { %10255 = vmatpush3.bf16.msra.mxu0 %v10859_v57  ;;  %10745 = vmatpush3.bf16.msra.mxu1 %v10859_v57  ;;  %v5098_v22 = vld [vmem:[#allocation3 + $0x4] sm:$0xf]  ;;  %v5146_v38 = vshrl.u32 %v5097_v27, 16  ;;  %v5149_v44 = vshll.u32 %v5097_v27, 16  ;;  %4370 = vst [vmem:[#allocation3 + $0x8] sm:$0x1] %v4369_v50 }
 0x1a8   : > { %v3105_v33 = vpop.permute.xlu0 %3104  ;;  %10256 = vmatprep.subr.bf16.mxu0 %v10860_v21  ;;  %10738 = vmatprep.subr.bf16.mxu1 %v10860_v21  ;;  %v5155_v46 = vshll.u32 %v5098_v22, 16  ;;  %v5159_v31 = vshrl.u32 %v5098_v22, 16  ;;  %v10867_v37 = vld [vmem:[%s14411_s3 + $0x38] sm:$0xff]   ;;  %vm14472_vm11 = vcmask 294144   ;;  %v4331_v26 = vld [vmem:[#allocation3 + $0x48] sm:$0x1] }
 0x1a9   : > { %3659 = vrot.lane.b32.xlu1 %v9791_v51, %s11111_s17  ;;  %3143 = vst.msk [vmem:[#allocation4 + $0x320] sm:$0xff] %vm3132_vm13, %v3105_v33  ;;  %v5148_v55 = vrot.slane %v5146_v38, 4  ;;  %v5151_v32 = vrot.slane %v5149_v44, 5  ;;  %v10870_v6 = vld [vmem:[%s14411_s3 + $0xc0] sm:$0xff]   ;;  %v4328_v39 = vld [vmem:[#allocation3 + $0x3c] sm:$0x1]  ;;  %vm14473_vm1 = vmmov %vm14472_vm11 }
 0x1aa   : > { %v5157_v10 = vrot.slane %v5155_v46, 5  ;;  %v5161_v19 = vrot.slane %v5159_v31, 4  ;;  %v4332_v59 = vsel %vm12001_vm2, 0, %v4331_v26  ;;  %v4329_v51 = vsel %vm12001_vm2, 0, %v4328_v39  ;;  %v4386_v23 = vld [vmem:[#allocation3 + $0x50] sm:$0x1] }
 0x1ab   : > { %10257 = vmatpush3.bf16.msra.mxu0 %v10861_v4  ;;  %10746 = vmatpush3.bf16.msra.mxu1 %v10861_v4  ;;  %v5152_v30 = vor.u32 %v5151_v32, %v5148_v55  ;;  %4333 = vst [vmem:[#allocation3 + $0x48] sm:$0x1] %v4332_v59  ;;  %4330 = vst [vmem:[#allocation3 + $0x3c] sm:$0x1] %v4329_v51  ;;  %v4387_v56 = vsel %vm12448_vm5, 0, %v4386_v23  ;;  %vm14474_vm0 = vcmask 64544  }
 0x1ac   : > { %10258 = vmatprep.subr.bf16.mxu0 %v10862_v60  ;;  %10739 = vmatprep.subr.bf16.mxu1 %v10862_v60  ;;  %v5162_v52 = vor.u32 %v5161_v19, %v5157_v10  ;;  %v4383_v8 = vld [vmem:[#allocation3 + $0x44] sm:$0x1]  ;;  %4388 = vst [vmem:[#allocation3 + $0x50] sm:$0x1] %v4387_v56  ;;  %vm14475_vm3 = vmmov %vm14474_vm0  ;;  %v4337_v45 = vld [vmem:[#allocation3 + $0x60] sm:$0x1] }
 0x1ad   : > { %3980 = vrot.lane.b32.xlu1 %v9823_v13, %s11109_s15  ;;  %v5153_v2 = vrot.slane %v5152_v30, 4  ;;  %v4384_v14 = vsel %vm12448_vm5, 0, %v4383_v8  ;;  %v4338_v0 = vsel %vm12001_vm2, 0, %v4337_v45  ;;  %v5609_v60 = vld [vmem:[#allocation3] sm:$0xe]  ;;  %s10228_s17 = sshll.u32 %s11165_s22, 12 }
 0x1ae   : > { %v5099_v11 = vld [vmem:[#allocation3 + $0x8] sm:$0x1]  ;;  %v5163_v15 = vrot.slane %v5162_v52, 4  ;;  %4385 = vst [vmem:[#allocation3 + $0x44] sm:$0x1] %v4384_v14  ;;  %v9908_v18 = vrot.slane %v5609_v60, 9  ;;  %s14358_s15 = scalar_lea.hbm %s14413_s5, %s10228_s17 }
 0x1af   : > { %10259 = vmatpush3.bf16.msra.mxu0 %v10863_v28  ;;  %10747 = vmatpush3.bf16.msra.mxu1 %v10863_v28  ;;  %v5165_v16 = vshll.u32 %v5099_v11, 16  ;;  %v5158_v12 = vsel %vm11322_vm14, %v5153_v2, %v5157_v10  ;;  %v5610_v7 = vld [vmem:[#allocation3 + $0x4] sm:$0xf]  ;;  %4339 = vst [vmem:[#allocation3 + $0x60] sm:$0x1] %v4338_v0  ;;  %s11043_s13 = sshll.u32 %s11112_s10, 4  ;;  %s11044_s13 = int_to_ptr.vmem [resolvable:$false] %s11043_s13 }
 0x1b0   : > { %v2608_v53 = vpop.permute.xlu1 %2607  ;;  %10260 = vmatprep.subr.bf16.mxu0 %v10864_v48  ;;  %10740 = vmatprep.subr.bf16.mxu1 %v10864_v48  ;;  %v5611_v43 = vld [vmem:[#allocation3 + $0x8] sm:$0x1]  ;;  %v5707_v28 = vrot.slane %v5610_v7, 5  ;;  %v12570_v22 = vld [vmem:[%s14410_s2] ss:$0 sm:$0xff]  ;;  %s11045_s12 = scalar_lea.vmem %s11044_s13, 8192 }
 0x1b1   : > { %2645 = vst.msk [vmem:[#allocation4 + $0x370] sm:$0xff] %vm2633_vm8, %v2608_v53  ;;  %v5167_v20 = vrot.slane %v5165_v16, 5  ;;  %v5710_v47 = vrot.slane %v5611_v43, 5  ;;  %v4334_v46 = vld [vmem:[#allocation3 + $0x54] sm:$0x1] }
 0x1b2   : > { %v5708_v27 = vsel %vm11256_vm10, %v9908_v18, %v5707_v28  ;;  %v5709_v48 = vrot.slane %v5707_v28, 4  ;;  %v4335_v53 = vsel %vm12001_vm2, 0, %v4334_v46  ;;  %v4392_v55 = vld [vmem:[#allocation3 + $0x68] sm:$0x1]  ;;  %v4389_v32 = vld [vmem:[#allocation3 + $0x5c] sm:$0x1] }
 0x1b3   : > { %10261 = vmatpush3.bf16.msra.mxu0 %v10865_v63  ;;  %10748 = vmatpush3.bf16.msra.mxu1 %v10865_v63  ;;  %v5168_v24 = vsel %vm11322_vm14, %v5163_v15, %v5167_v20  ;;  %4336 = vst [vmem:[#allocation3 + $0x54] sm:$0x1] %v4335_v53  ;;  %v4393_v63 = vsel %vm12448_vm5, 0, %v4392_v55  ;;  %v4390_v52 = vsel %vm12448_vm5, 0, %v4389_v32  ;;  %v4841_v60 = vld [vmem:[#allocation3 + $0xc] sm:$0xf] }
 0x1b4   : > { %v2929_v61 = vpop.permute.xlu1 %2928  ;;  %10262 = vmatprep.subr.bf16.mxu0 %v10866_v62  ;;  %10741 = vmatprep.subr.bf16.mxu1 %v10866_v62  ;;  %v9892_v36 = vcombine.low %v5158_v12, %v5168_v24  ;;  %v5711_v38 = vsel %vm11256_vm10, %v5709_v48, %v5710_v47  ;;  %4394 = vst [vmem:[#allocation3 + $0x68] sm:$0x1] %v4393_v63  ;;  %4391 = vst [vmem:[#allocation3 + $0x5c] sm:$0x1] %v4390_v52  ;;  %v4852_v47 = vld [vmem:[#allocation3 + $0x20] sm:$0x1] }
 0x1b5   : > { %2966 = vst.msk [vmem:[#allocation4 + $0x370] sm:$0xff] %vm2954_vm12, %v2929_v61  ;;  %v3650_v49 = vpop.permute.xlu0 %3649  ;;  %v9924_v44 = vcombine.low %v5708_v27, %v5711_v38  ;;  %v4845_v46 = vld [vmem:[#allocation3 + $0x14] sm:$0x1] }
 0x1b6   : > { %3688 = vst.msk [vmem:[#allocation4 + $0x320] sm:$0xff] %vm3677_vm4, %v3650_v49  ;;  %5593 = vst [vmem:[#allocation4 + $0x8] sm:$0xff] %v9892_v36 }
 0x1b7   : > { %10263 = vmatpush3.bf16.msra.mxu0 %v10867_v37  ;;  %10749 = vmatpush3.bf16.msra.mxu1 %v10867_v37  ;;  %5881 = vst [vmem:[#allocation4 + $0x10] sm:$0xff] %v9924_v44 }
 0x1b8   : > { %v3107_v5 = vpop.permute.xlu1 %3106  ;;  %10360 = vmatprep.subr.bf16.mxu0 %v10870_v6 }
 0x1b9   : > { %3144 = vst.msk [vmem:[#allocation4 + $0x370] sm:$0xff] %vm3132_vm13, %v3107_v5  ;;  %v3971_v41 = vpop.permute.xlu0 %3970 }
 0x1ba   : > { %4009 = vst.msk [vmem:[#allocation4 + $0x320] sm:$0xff] %vm14472_vm11, %v3971_v41  ;;  %vm14476_vm11 = vmmov %vm14467_vm15 }
 0x1bc   : > { %v3652_v29 = vpop.permute.xlu1 %3651 }
 0x1bd   : > { %3689 = vst.msk [vmem:[#allocation4 + $0x370] sm:$0xff] %vm3677_vm4, %v3652_v29 }
 0x1c0   : > { %v3973_v58 = vpop.permute.xlu1 %3972 }
 0x1c1   : > { %4010 = vst.msk [vmem:[#allocation4 + $0x370] sm:$0xff] %vm14473_vm1, %v3973_v58  ;;  %v4025_v9 = vld [vmem:[#allocation4 + $0x320] sm:$0xff]  ;;  %vm4839_vm1 = vcmask 1043456  }
 0x1c2   : > { %10722 = vmatprep.mubr.msk.bf16.mxu0 %vm14467_vm15, %v4025_v9  ;;  %vm14477_vm15 = vsmask.f32 7938 }
 0x1c3   : > { %v1564_v57 = vpop.permute.xlu0 %1563 }
 0x1c4   : > { %1600 = vst.msk [vmem:[#allocation4 + $0x3c0] sm:$0xff] %vm14474_vm0, %v1564_v57  ;;  %vm12588_vm0 = vmand %vm4839_vm1, %vm14477_vm15  ;;  %v4848_v57 = vld [vmem:[#allocation3 + $0x18] sm:$0xf]  ;;  %vm14482_vm15 = vcmask 64544  }
 0x1c6   : > { %v1566_v13 = vpop.permute.xlu1 %1565 }
 0x1c7   : > { %1601 = vst.msk [vmem:[#allocation4 + $0x410] sm:$0xff] %vm14475_vm3, %v1566_v13  ;;  %v1888_v21 = vpop.permute.xlu0 %1887  ;;  %vm14480_vm3 = vcmask 294144  }
 0x1c8   : > { %1924 = vst.msk [vmem:[#allocation4 + $0x3c0] sm:$0xff] %vm1911_vm6, %v1888_v21  ;;  %v4026_v33 = vld [vmem:[#allocation4 + $0x370] sm:$0xff]  ;;  %vm14481_vm1 = vmmov %vm14480_vm3 }
 0x1c9   : > { %10723 = vmatmul.mubr.msk.bf16.gmra.mrb[20].mxu0 %vm14476_vm11, %v4026_v33 }
 0x1ca   : > { %v1890_v35 = vpop.permute.xlu1 %1889 }
 0x1cb   : > { %1925 = vst.msk [vmem:[#allocation4 + $0x410] sm:$0xff] %vm1911_vm6, %v1890_v35  ;;  %v2065_v4 = vpop.permute.xlu0 %2064 }
 0x1cc   : > { %2101 = vst.msk [vmem:[#allocation4 + $0x3c0] sm:$0xff] %vm2088_vm7, %v2065_v4 }
 0x1d1   : > { %v2610_v40 = vpop.permute.xlu0 %2609 }
 0x1d2   : > { %2646 = vst.msk [vmem:[#allocation4 + $0x3c0] sm:$0xff] %vm2633_vm8, %v2610_v40  ;;  %v2067_v1 = vpop.permute.xlu1 %2066 }
 0x1d3   : > { %2102 = vst.msk [vmem:[#allocation4 + $0x410] sm:$0xff] %vm2088_vm7, %v2067_v1 }
 0x1d5   : > { %v2931_v50 = vpop.permute.xlu0 %2930  ;;  %v10704_v31 = vpop.f32.mrb[0].mxu0 }
 0x1d6   : > { %2967 = vst.msk [vmem:[#allocation4 + $0x3c0] sm:$0xff] %vm2954_vm12, %v2931_v50  ;;  %v4154_v19 = vadd.f32 %v10704_v31, %v12570_v22  ;;  %v4145_v30 = vpop.f32.mrb[1].mxu0 }
 0x1d7   : > { %v4146_v61 = vadd.f32 %v12570_v22, %v4145_v30  ;;  %v10705_v62 = vpop.f32.mrb[2].mxu0 }
 0x1d8   : > { %v4274_v49 = vmax.f32 %v4154_v19, 0.0  ;;  %v4157_v37 = vadd.f32 %v10705_v62, %v12570_v22  ;;  %v4148_v2 = vpop.f32.mrb[3].mxu0 }
 0x1d9   : > { %v3109_v10 = vpop.permute.xlu0 %3108  ;;  %v4272_v11 = vmax.f32 %v4146_v61, 0.0  ;;  %v4149_v15 = vadd.f32 %v12570_v22, %v4148_v2 }
 0x1da   : > { %3145 = vst.msk [vmem:[#allocation4 + $0x3c0] sm:$0xff] %vm3132_vm13, %v3109_v10  ;;  %v10198_v16 = vpack.c.bf16 %v4274_v49, %v4274_v49  ;;  %v4275_v5 = vmax.f32 %v4157_v37, 0.0 }
 0x1db   : > { %v10196_v41 = vpack.c.bf16 %v4272_v11, %v4272_v11  ;;  %v4273_v12 = vmax.f32 %v4149_v15, 0.0 }
 0x1dc   : > { %v4536_v24 = vshrl.u32 %v10198_v16, 16  ;;  %v10199_v29 = vpack.c.bf16 %v4275_v5, %v4275_v5  ;;  %v4539_v36 = vshll.u32 %v10198_v16, 16  ;;  %v4862_v5 = vld [vmem:[#allocation3 + $0x30] sm:$0xf] }
 0x1dd   : > { %v4519_v26 = vshrl.u32 %v10196_v41, 16  ;;  %v4522_v6 = vshll.u32 %v10196_v41, 16  ;;  %v10197_v39 = vpack.c.bf16 %v4273_v12, %v4273_v12  ;;  %v10708_v58 = vpop.f32.mrb[4].mxu0 }
 0x1de   : > { %v4538_v59 = vrot.slane %v4536_v24, 7  ;;  %v4544_v51 = vshrl.u32 %v10199_v29, 16  ;;  %v4547_v23 = vshll.u32 %v10199_v29, 16  ;;  %v4170_v9 = vadd.f32 %v10708_v58, %v12570_v22  ;;  %v4161_v56 = vpop.f32.mrb[5].mxu0  ;;  %v4855_v29 = vld [vmem:[#allocation3 + $0x24] sm:$0xf] }
 0x1df   : > { %v2612_v20 = vpop.permute.xlu1 %2611  ;;  %v4521_v13 = vrot.slane %v4519_v26, 7  ;;  %v4527_v21 = vshrl.u32 %v10197_v39, 16  ;;  %v4530_v33 = vshll.u32 %v10197_v39, 16  ;;  %v4162_v35 = vadd.f32 %v12570_v22, %v4161_v56  ;;  %v10709_v4 = vpop.f32.mrb[6].mxu0 }
 0x1e0   : > { %2647 = vst.msk [vmem:[#allocation4 + $0x410] sm:$0xff] %vm2633_vm8, %v2612_v20  ;;  %v4541_v40 = vor.u32 %v4539_v36, %v4538_v59  ;;  %v4542_v0 = vrot.slane %v4538_v59, 4  ;;  %v4546_v7 = vrot.slane %v4544_v51, 7  ;;  %v4278_v43 = vmax.f32 %v4170_v9, 0.0  ;;  %v4164_v18 = vpop.f32.mrb[7].mxu0 }
 0x1e1   : > { %v4524_v28 = vor.u32 %v4522_v6, %v4521_v13  ;;  %v4525_v1 = vrot.slane %v4521_v13, 4  ;;  %v4529_v27 = vrot.slane %v4527_v21, 7  ;;  %v4276_v48 = vmax.f32 %v4162_v35, 0.0  ;;  %v4866_v35 = vld [vmem:[#allocation3 + $0x38] sm:$0x1] }
 0x1e2   : > { %v3654_v8 = vpop.permute.xlu0 %3653  ;;  %v4849_v50 = vsel %vm12588_vm0, %v4541_v40, %v4848_v57  ;;  %v4549_v38 = vor.u32 %v4547_v23, %v4546_v7  ;;  %v4551_v44 = vrot.slane %v4546_v7, 4  ;;  %v10202_v31 = vpack.c.bf16 %v4278_v43, %v4278_v43 }
 0x1e3   : > { %v2933_v45 = vpop.permute.xlu1 %2932  ;;  %3690 = vst.msk [vmem:[#allocation4 + $0x3c0] sm:$0xff] %vm3677_vm4, %v3654_v8  ;;  %4850 = vst [vmem:[#allocation3 + $0x18] sm:$0xf] %v4849_v50  ;;  %v4842_v55 = vsel %vm12588_vm0, %v4524_v28, %v4841_v60  ;;  %v4532_v32 = vor.u32 %v4530_v33, %v4529_v27  ;;  %v4534_v10 = vrot.slane %v4529_v27, 4  ;;  %v10200_v19 = vpack.c.bf16 %v4276_v48, %v4276_v48 }
 0x1e4   : > { %2968 = vst.msk [vmem:[#allocation4 + $0x410] sm:$0xff] %vm2954_vm12, %v2933_v45  ;;  %4843 = vst [vmem:[#allocation3 + $0xc] sm:$0xf] %v4842_v55  ;;  %v4550_v63 = vsel %vm11244_vm9, %v4542_v0, %v4549_v38  ;;  %v4853_v52 = vsel %vm12001_vm2, %v4551_v44, %v4852_v47  ;;  %v4570_v61 = vshrl.u32 %v10202_v31, 16  ;;  %v4573_v11 = vshll.u32 %v10202_v31, 16 }
 0x1e5   : > { %4851 = vst [vmem:[#allocation3 + $0x1c] sm:$0xf] %v4550_v63  ;;  %4854 = vst [vmem:[#allocation3 + $0x20] sm:$0x1] %v4853_v52  ;;  %v4533_v62 = vsel %vm11244_vm9, %v4525_v1, %v4532_v32  ;;  %v4846_v49 = vsel %vm12001_vm2, %v4534_v10, %v4845_v46  ;;  %v4553_v37 = vshrl.u32 %v10200_v19, 16  ;;  %v4173_v15 = vadd.f32 %v10709_v4, %v12570_v22 }
 0x1e6   : > { %v3975_v53 = vpop.permute.xlu0 %3974  ;;  %4844 = vst [vmem:[#allocation3 + $0x10] sm:$0xf] %v4533_v62  ;;  %4847 = vst [vmem:[#allocation3 + $0x14] sm:$0x1] %v4846_v49  ;;  %v12609_v2 = vrot.slane %v4570_v61, 7  ;;  %v4165_v16 = vadd.f32 %v12570_v22, %v4164_v18  ;;  %v4556_v12 = vshll.u32 %v10200_v19, 16 }
 0x1e7   : > { %v3111_v30 = vpop.permute.xlu1 %3110  ;;  %4011 = vst.msk [vmem:[#allocation4 + $0x3c0] sm:$0xff] %vm14480_vm3, %v3975_v53  ;;  %v4555_v41 = vrot.slane %v4553_v37, 7  ;;  %v4279_v36 = vmax.f32 %v4173_v15, 0.0  ;;  %v4859_v18 = vld [vmem:[#allocation3 + $0x2c] sm:$0x1]  ;;  %vm14483_vm3 = vmmov %vm14482_vm15 }
 0x1e8   : > { %3146 = vst.msk [vmem:[#allocation4 + $0x410] sm:$0xff] %vm3132_vm13, %v3111_v30  ;;  %v4575_v24 = vor.u32 %v4573_v11, %v12609_v2  ;;  %v4277_v26 = vmax.f32 %v4165_v16, 0.0  ;;  %v4576_v33 = vrot.slane %v12609_v2, 4 }
 0x1e9   : > { %v4558_v6 = vor.u32 %v4556_v12, %v4555_v41  ;;  %v10203_v58 = vpack.c.bf16 %v4279_v36, %v4279_v36  ;;  %v4559_v38 = vrot.slane %v4555_v41, 4 }
 0x1ea   : > { %v4863_v39 = vsel %vm12588_vm0, %v4575_v24, %v4862_v5  ;;  %v10201_v59 = vpack.c.bf16 %v4277_v26, %v4277_v26  ;;  %v12617_v51 = vld [vmem:[#allocation3 + $0x18] sm:$0xf] }
 0x1eb   : > { %v3656_v20 = vpop.permute.xlu1 %3655  ;;  %4864 = vst [vmem:[#allocation3 + $0x30] sm:$0xf] %v4863_v39  ;;  %v4856_v9 = vsel %vm12588_vm0, %v4558_v6, %v4855_v29  ;;  %v5100_v56 = vld [vmem:[#allocation3 + $0xc] sm:$0xf]  ;;  %v4578_v13 = vshrl.u32 %v10203_v58, 16  ;;  %v5194_v40 = vshrl.u32 %v12617_v51, 16 }
 0x1ec   : > { %3691 = vst.msk [vmem:[#allocation4 + $0x410] sm:$0xff] %vm3677_vm4, %v3656_v20  ;;  %4857 = vst [vmem:[#allocation3 + $0x24] sm:$0xf] %v4856_v9  ;;  %v4561_v21 = vshrl.u32 %v10201_v59, 16  ;;  %v5170_v45 = vshrl.u32 %v5100_v56, 16  ;;  %v4581_v60 = vshll.u32 %v10203_v58, 16 }
 0x1ed   : > { %v5101_v4 = vld [vmem:[#allocation3 + $0x10] sm:$0xf]  ;;  %v4580_v0 = vrot.slane %v4578_v13, 7  ;;  %v4564_v43 = vshll.u32 %v10201_v59, 16  ;;  %v5102_v28 = vld [vmem:[#allocation3 + $0x14] sm:$0x1] }
 0x1ee   : > { %v4027_v23 = vld [vmem:[#allocation4 + $0x3c0] sm:$0xff]  ;;  %v4563_v7 = vrot.slane %v4561_v21, 7  ;;  %v5172_v1 = vrot.slane %v5170_v45, 4  ;;  %v5173_v47 = vshll.u32 %v5100_v56, 16  ;;  %v5179_v27 = vshll.u32 %v5101_v4, 16  ;;  %v12626_v53 = vld [vmem:[#allocation3 + $0xc] sm:$0xff]  }
 0x1ef   : > { %v3977_v8 = vpop.permute.xlu1 %3976  ;;  %10726 = vmatprep.mubr.msk.bf16.mxu0 %vm14476_vm11, %v4027_v23  ;;  %v5183_v48 = vshrl.u32 %v5101_v4, 16  ;;  %v4583_v44 = vor.u32 %v4581_v60, %v4580_v0  ;;  %v4585_v46 = vrot.slane %v4580_v0, 4  ;;  %v12628_v55 = vld [vmem:[#allocation3 + $0x18] sm:$0xff]   ;;  %v12632_v61 = vld [vmem:[#allocation3 + $0x10] sm:$0xf]  ;;  %v5189_v2 = vshll.u32 %v5102_v28, 16 }
 0x1f0   : > { %v1568_v57 = vpop.permute.xlu0 %1567  ;;  %4012 = vst.msk [vmem:[#allocation4 + $0x410] sm:$0xff] %vm14481_vm1, %v3977_v8  ;;  %v4566_v31 = vor.u32 %v4564_v43, %v4563_v7  ;;  %v4568_v10 = vrot.slane %v4563_v7, 4  ;;  %v5175_v19 = vrot.slane %v5173_v47, 5  ;;  %v5181_v30 = vrot.slane %v5179_v27, 5  ;;  %v5104_v52 = vld [vmem:[#allocation3 + $0x1c] sm:$0xf] }
 0x1f1   : > { %1602 = vst.msk [vmem:[#allocation4 + $0x460] sm:$0xff] %vm14482_vm15, %v1568_v57  ;;  %v5185_v63 = vrot.slane %v5183_v48, 4  ;;  %v4584_v62 = vsel %vm11244_vm9, %v4576_v33, %v4583_v44  ;;  %v4867_v49 = vsel %vm12001_vm2, %v4585_v46, %v4866_v35  ;;  %5082 = vst [vmem:[#allocation4 + $0x50] sm:$0xff] %v12626_v53  ;;  %v5105_v11 = vld [vmem:[#allocation3 + $0x20] sm:$0x1]  ;;  %v10886_v15 = vld [vmem:[#allocation3 + $0xc] sm:$0xff]  }
 0x1f2   : > { %v4567_v37 = vsel %vm11244_vm9, %v4559_v38, %v4566_v31  ;;  %5083 = vst [vmem:[#allocation4 + $0xa0] sm:$0xff] %v12628_v55  ;;  %4865 = vst [vmem:[#allocation3 + $0x34] sm:$0xf] %v4584_v62  ;;  %v4860_v16 = vsel %vm12001_vm2, %v4568_v10, %v4859_v18  ;;  %v5176_v5 = vor.u32 %v5175_v19, %v5172_v1  ;;  %v5196_v12 = vrot.slane %v5194_v40, 4  ;;  %v10889_v24 = vld [vmem:[#allocation3 + $0x18] sm:$0xff]  }
 0x1f3   : > { %4868 = vst [vmem:[#allocation3 + $0x38] sm:$0x1] %v4867_v49  ;;  %4858 = vst [vmem:[#allocation3 + $0x28] sm:$0xf] %v4567_v37  ;;  %v5186_v41 = vor.u32 %v5185_v63, %v5181_v30  ;;  %v5106_v20 = vld [vmem:[#allocation3 + $0x24] sm:$0xf] }
 0x1f4   : > { %v1892_v50 = vpop.permute.xlu0 %1891  ;;  %v1570_v32 = vpop.permute.xlu1 %1569  ;;  %4861 = vst [vmem:[#allocation3 + $0x2c] sm:$0x1] %v4860_v16  ;;  %v5191_v26 = vrot.slane %v5189_v2, 5  ;;  %v5197_v6 = vshll.u32 %v12617_v51, 16  ;;  %v5203_v39 = vshll.u32 %v5104_v52, 16  ;;  %v5207_v58 = vshrl.u32 %v5104_v52, 16 }
 0x1f5   : > { %1926 = vst.msk [vmem:[#allocation4 + $0x460] sm:$0xff] %vm1911_vm6, %v1892_v50  ;;  %6025 = vst [vmem:[#allocation4 + $0x18] sm:$0xff] %v10886_v15  ;;  %v10947_v59 = vld [vmem:[#allocation3 + $0x18] sm:$0xff]   ;;  %v5177_v9 = vrot.slane %v5176_v5, 4  ;;  %v5187_v56 = vrot.slane %v5186_v41, 4  ;;  %v5213_v8 = vshll.u32 %v5105_v11, 16 }
 0x1f6   : > { %1603 = vst.msk [vmem:[#allocation4 + $0x4b0] sm:$0xff] %vm14483_vm3, %v1570_v32  ;;  %v5218_v57 = vshrl.u32 %v5106_v20, 16  ;;  %v5109_v13 = vld [vmem:[#allocation3 + $0x30] sm:$0xf]  ;;  %6026 = vst [vmem:[#allocation4 + $0x68] sm:$0xff] %v10889_v24  ;;  %v5199_v21 = vrot.slane %v5197_v6, 5 }
 0x1f7   : > { %v4028_v29 = vld [vmem:[#allocation4 + $0x410] sm:$0xff]  ;;  %v5205_v33 = vrot.slane %v5203_v39, 5  ;;  %v5209_v51 = vrot.slane %v5207_v58, 4  ;;  %v5221_v35 = vshll.u32 %v5106_v20, 16  ;;  %6970 = vst [vmem:[#allocation4 + $0x30] sm:$0xff] %v10947_v59  ;;  %v6099_v4 = vshll.u32 %v12632_v61, 16 }
 0x1f8   : > { %v2069_v36 = vpop.permute.xlu0 %2068  ;;  %v1894_v23 = vpop.permute.xlu1 %1893  ;;  %10727 = vmatmul.mubr.msk.bf16.gmra.mrb[24].mxu0 %vm14476_vm11, %v4028_v29  ;;  %v5182_v45 = vsel %vm11322_vm14, %v5177_v9, %v5181_v30  ;;  %v5192_v40 = vsel %vm11322_vm14, %v5187_v56, %v5191_v26  ;;  %v5220_v0 = vrot.slane %v5218_v57, 4  ;;  %v5200_v7 = vor.u32 %v5199_v21, %v5196_v12  ;;  %v5612_v46 = vld [vmem:[#allocation3 + $0xc] sm:$0xe]  ;;  %v5613_v63 = vld [vmem:[#allocation3 + $0x10] sm:$0xf] }
 0x1f9   : > { %2103 = vst.msk [vmem:[#allocation4 + $0x460] sm:$0xff] %vm2088_vm7, %v2069_v36  ;;  %v12653_v60 = vcombine.low %v5182_v45, %v5192_v40  ;;  %v5210_v43 = vor.u32 %v5209_v51, %v5205_v33  ;;  %v5223_v18 = vrot.slane %v5221_v35, 5  ;;  %v6103_v28 = vshrl.u32 %v12632_v61, 16  ;;  %v5110_v11 = vld [vmem:[#allocation3 + $0x34] sm:$0xf] }
 0x1fa   : > { %1927 = vst.msk [vmem:[#allocation4 + $0x4b0] sm:$0xff] %vm1911_vm6, %v1894_v23  ;;  %v5215_v1 = vrot.slane %v5213_v8, 5  ;;  %v5242_v47 = vshrl.u32 %v5109_v13, 16  ;;  %v5245_v27 = vshll.u32 %v5109_v13, 16  ;;  %v5201_v48 = vrot.slane %v5200_v7, 4  ;;  %v12656_v19 = vld [vmem:[#allocation3 + $0x24] sm:$0xff]   ;;  %vm14484_vm6 = vmmov %vm14481_vm1 }
 0x1fb   : > { %v5211_v50 = vrot.slane %v5210_v43, 4  ;;  %v5107_v38 = vld [vmem:[#allocation3 + $0x28] sm:$0xf]  ;;  %v5224_v44 = vor.u32 %v5223_v18, %v5220_v0  ;;  %v5108_v31 = vld [vmem:[#allocation3 + $0x2c] sm:$0x1]  ;;  %5084 = vst [vmem:[#allocation4 + $0xf0] sm:$0xff] %v12656_v19 }
 0x1fc   : > { %v5227_v32 = vshll.u32 %v5107_v38, 16  ;;  %v5231_v10 = vshrl.u32 %v5107_v38, 16  ;;  %v5244_v30 = vrot.slane %v5242_v47, 4  ;;  %v5206_v62 = vsel %vm11322_vm14, %v5201_v48, %v5205_v33  ;;  %v5111_v15 = vld [vmem:[#allocation3 + $0x38] sm:$0x1]  ;;  %v10883_v24 = vld [vmem:[#allocation3 + $0x30] sm:$0xff]  }
 0x1fd   : > { %v5216_v49 = vsel %vm11322_vm14, %v5211_v50, %v5215_v1  ;;  %v5225_v37 = vrot.slane %v5224_v44, 4  ;;  %v5237_v2 = vshll.u32 %v5108_v31, 16  ;;  %v5614_v16 = vld [vmem:[#allocation3 + $0x14] sm:$0x1]  ;;  %v5247_v20 = vrot.slane %v5245_v27, 5  ;;  %5085 = vst [vmem:[#allocation4 + $0x140] sm:$0xff] %v10883_v24 }
 0x1fe   : > { %v12663_v5 = vcombine.low %v5206_v62, %v5216_v49  ;;  %v5229_v41 = vrot.slane %v5227_v32, 5  ;;  %v5233_v12 = vrot.slane %v5231_v10, 4  ;;  %v5251_v36 = vshll.u32 %v5110_v11, 16  ;;  %v10890_v9 = vld [vmem:[#allocation3 + $0x24] sm:$0xff]   ;;  %v5615_v56 = vld [vmem:[#allocation3 + $0x18] sm:$0xe] }
 0x1ff   : > { %v2614_v52 = vpop.permute.xlu0 %2613  ;;  %v5239_v29 = vrot.slane %v5237_v2, 5  ;;  %v5255_v26 = vshrl.u32 %v5110_v11, 16  ;;  %v5261_v6 = vshll.u32 %v5111_v15, 16  ;;  %v5248_v59 = vor.u32 %v5247_v20, %v5244_v30  ;;  %v5616_v51 = vld [vmem:[#allocation3 + $0x1c] sm:$0xf]  ;;  %6027 = vst [vmem:[#allocation4 + $0xb8] sm:$0xff] %v10890_v9 }
 0x200   : > { %2648 = vst.msk [vmem:[#allocation4 + $0x460] sm:$0xff] %vm2633_vm8, %v2614_v52  ;;  %v5234_v58 = vor.u32 %v5233_v12, %v5229_v41  ;;  %v9909_v23 = vrot.slane %v5612_v46, 9  ;;  %v5253_v57 = vrot.slane %v5251_v36, 5  ;;  %v5714_v33 = vrot.slane %v5613_v63, 5  ;;  %v5617_v0 = vld [vmem:[#allocation3 + $0x20] sm:$0x1] }
 0x201   : > { %v5257_v13 = vrot.slane %v5255_v26, 4  ;;  %v5263_v21 = vrot.slane %v5261_v6, 5  ;;  %v5249_v45 = vrot.slane %v5248_v59, 4  ;;  %v5717_v40 = vrot.slane %v5614_v16, 5  ;;  %v10892_v38 = vld [vmem:[#allocation3 + $0x30] sm:$0xff]   ;;  %v10949_v49 = vld [vmem:[#allocation3 + $0x24] sm:$0xff]  }
 0x202   : > { %v2071_v39 = vpop.permute.xlu1 %2070  ;;  %v5235_v35 = vrot.slane %v5234_v58, 4  ;;  %v9910_v7 = vrot.slane %v5615_v56, 9  ;;  %v5716_v18 = vrot.slane %v5714_v33, 4  ;;  %v5721_v1 = vrot.slane %v5616_v51, 5  ;;  %v5618_v44 = vld [vmem:[#allocation3 + $0x24] sm:$0xe] }
 0x203   : > { %2104 = vst.msk [vmem:[#allocation4 + $0x4b0] sm:$0xff] %vm2088_vm7, %v2071_v39  ;;  %v2935_v8 = vpop.permute.xlu0 %2934  ;;  %v5258_v43 = vor.u32 %v5257_v13, %v5253_v57  ;;  %v5230_v47 = vsel %vm11322_vm14, %v5225_v37, %v5229_v41  ;;  %v5715_v48 = vsel %vm11256_vm10, %v9909_v23, %v5714_v33  ;;  %v5724_v50 = vrot.slane %v5617_v0, 5  ;;  %v5619_v46 = vld [vmem:[#allocation3 + $0x28] sm:$0xf]  ;;  %v5620_v52 = vld [vmem:[#allocation3 + $0x2c] sm:$0x1]  ;;  %vm14486_vm7 = vmmov %vm14481_vm1 }
 0x204   : > { %2969 = vst.msk [vmem:[#allocation4 + $0x460] sm:$0xff] %vm2954_vm12, %v2935_v8  ;;  %v5240_v27 = vsel %vm11322_vm14, %v5235_v35, %v5239_v29  ;;  %v5254_v10 = vsel %vm11322_vm14, %v5249_v45, %v5253_v57  ;;  %v5718_v63 = vsel %vm11256_vm10, %v5716_v18, %v5717_v40  ;;  %v4343_v62 = vld [vmem:[#allocation3 + $0x78] sm:$0x1]  ;;  %v5723_v2 = vrot.slane %v5721_v1, 4  ;;  %6028 = vst [vmem:[#allocation4 + $0x108] sm:$0xff] %v10892_v38  ;;  %v10950_v41 = vld [vmem:[#allocation3 + $0x30] sm:$0xff]  }
 0x205   : > { %v12674_v32 = vcombine.low %v5230_v47, %v5240_v27  ;;  %v5259_v30 = vrot.slane %v5258_v43, 4  ;;  %v9925_v37 = vcombine.low %v5715_v48, %v5718_v63  ;;  %v9911_v11 = vrot.slane %v5618_v44, 9  ;;  %v5621_v16 = vld [vmem:[#allocation3 + $0x30] sm:$0xe]  ;;  %v5622_v36 = vld [vmem:[#allocation3 + $0x34] sm:$0xf] }
 0x206   : > { %v5728_v15 = vrot.slane %v5619_v46, 5  ;;  %v5722_v20 = vsel %vm11256_vm10, %v9910_v7, %v5721_v1  ;;  %v5731_v24 = vrot.slane %v5620_v52, 5  ;;  %v4344_v29 = vsel %vm12001_vm2, 0, %v4343_v62  ;;  %v5623_v26 = vld [vmem:[#allocation3 + $0x38] sm:$0x1]  ;;  %6971 = vst [vmem:[#allocation4 + $0x80] sm:$0xff] %v10949_v49 }
 0x207   : > { %v3113_v31 = vpop.permute.xlu0 %3112  ;;  %v5264_v12 = vsel %vm11322_vm14, %v5259_v30, %v5263_v21  ;;  %5882 = vst [vmem:[#allocation4 + $0x60] sm:$0xff] %v9925_v37  ;;  %v5725_v39 = vsel %vm11256_vm10, %v5723_v2, %v5724_v50  ;;  %4345 = vst [vmem:[#allocation3 + $0x78] sm:$0x1] %v4344_v29  ;;  %v4340_v23 = vld [vmem:[#allocation3 + $0x6c] sm:$0x1]  ;;  %v9912_v8 = vrot.slane %v5621_v16, 9 }
 0x208   : > { %3147 = vst.msk [vmem:[#allocation4 + $0x460] sm:$0xff] %vm3132_vm13, %v3113_v31  ;;  %v12687_v6 = vcombine.low %v5254_v10, %v5264_v12  ;;  %v5729_v58 = vsel %vm11256_vm10, %v9911_v11, %v5728_v15  ;;  %v5730_v59 = vrot.slane %v5728_v15, 4  ;;  %v4398_v9 = vld [vmem:[#allocation3 + $0x80] sm:$0x1]  ;;  %6972 = vst [vmem:[#allocation4 + $0xd0] sm:$0xff] %v10950_v41  ;;  %v9926_v56 = vcombine.low %v5722_v20, %v5725_v39 }
 0x209   : > { %v5735_v57 = vrot.slane %v5622_v36, 5  ;;  %v5738_v13 = vrot.slane %v5623_v26, 5  ;;  %v4395_v21 = vld [vmem:[#allocation3 + $0x74] sm:$0x1]  ;;  %v4341_v51 = vsel %vm12001_vm2, 0, %v4340_v23  ;;  %v4399_v35 = vsel %vm12448_vm5, 0, %v4398_v9 }
 0x20a   : > { %v5732_v33 = vsel %vm11256_vm10, %v5730_v59, %v5731_v24  ;;  %v4396_v45 = vsel %vm12448_vm5, 0, %v4395_v21  ;;  %v6986_v40 = vld [vmem:[#allocation3 + $0x18] sm:$0xf]  ;;  %5883 = vst [vmem:[#allocation4 + $0xb0] sm:$0xff] %v9926_v56  ;;  %4342 = vst [vmem:[#allocation3 + $0x6c] sm:$0x1] %v4341_v51 }
 0x20b   : > { %v9927_v0 = vcombine.low %v5729_v58, %v5732_v33  ;;  %v5737_v7 = vrot.slane %v5735_v57, 4  ;;  %4400 = vst [vmem:[#allocation3 + $0x80] sm:$0x1] %v4399_v35  ;;  %4397 = vst [vmem:[#allocation3 + $0x74] sm:$0x1] %v4396_v45  ;;  %v7035_v1 = vshrl.u32 %v6986_v40, 16  ;;  %v5736_v10 = vsel %vm11256_vm10, %v9912_v8, %v5735_v57 }
 0x20c   : > { %v6987_v43 = vld [vmem:[#allocation3 + $0x1c] sm:$0xf]  ;;  %v6988_v18 = vld [vmem:[#allocation3 + $0x20] sm:$0x1]  ;;  %v7038_v48 = vshll.u32 %v6986_v40, 16  ;;  %v12710_v16 = vrot.slane %v6103_v28, 4 }
 0x20d   : > { %v7044_v50 = vshll.u32 %v6987_v43, 16  ;;  %v7048_v38 = vshrl.u32 %v6987_v43, 16  ;;  %v7054_v44 = vshll.u32 %v6988_v18, 16  ;;  %5884 = vst [vmem:[#allocation4 + $0x100] sm:$0xff] %v9927_v0  ;;  %v5739_v30 = vsel %vm11256_vm10, %v5737_v7, %v5738_v13  ;;  %v6553_v11 = vld [vmem:[#allocation3 + $0xc] sm:$0xe] }
 0x20e   : > { %v10712_v27 = vpop.f32.mrb[8].mxu0  ;;  %v7037_v63 = vrot.slane %v7035_v1, 4  ;;  %v9928_v49 = vcombine.low %v5736_v10, %v5739_v30  ;;  %v7040_v37 = vrot.slane %v7038_v48, 5  ;;  %v6554_v29 = vld [vmem:[#allocation3 + $0x10] sm:$0xf]  ;;  %v9972_v56 = vrot.slane %v6553_v11, 9 }
 0x20f   : > { %v2616_v47 = vpop.permute.xlu1 %2615  ;;  %v4186_v46 = vadd.f32 %v10712_v27, %v12570_v22  ;;  %v4177_v31 = vpop.f32.mrb[9].mxu0  ;;  %v7046_v2 = vrot.slane %v7044_v50, 5  ;;  %v7050_v24 = vrot.slane %v7048_v38, 4  ;;  %v7056_v59 = vrot.slane %v7054_v44, 5  ;;  %v4869_v27 = vld [vmem:[#allocation3 + $0x3c] sm:$0xf] }
 0x210   : > { %2649 = vst.msk [vmem:[#allocation4 + $0x4b0] sm:$0xff] %vm2633_vm8, %v2616_v47  ;;  %v4178_v52 = vadd.f32 %v12570_v22, %v4177_v31  ;;  %v10713_v62 = vpop.f32.mrb[10].mxu0  ;;  %5885 = vst [vmem:[#allocation4 + $0x150] sm:$0xff] %v9928_v49  ;;  %v7041_v58 = vor.u32 %v7040_v37, %v7037_v63  ;;  %v6651_v21 = vrot.slane %v6554_v29, 5  ;;  %v6555_v63 = vld [vmem:[#allocation3 + $0x14] sm:$0x1] }
 0x211   : > { %v4282_v41 = vmax.f32 %v4186_v46, 0.0  ;;  %v4189_v12 = vadd.f32 %v10713_v62, %v12570_v22  ;;  %v4180_v20 = vpop.f32.mrb[11].mxu0  ;;  %v7051_v9 = vor.u32 %v7050_v24, %v7046_v2  ;;  %v4880_v46 = vld [vmem:[#allocation3 + $0x50] sm:$0x1] }
 0x212   : > { %v3658_v15 = vpop.permute.xlu0 %3657  ;;  %v4280_v26 = vmax.f32 %v4178_v52, 0.0  ;;  %v4181_v39 = vadd.f32 %v12570_v22, %v4180_v20  ;;  %v7042_v13 = vrot.slane %v7041_v58, 4  ;;  %v4876_v22 = vld [vmem:[#allocation3 + $0x48] sm:$0xf]  ;;  %v6041_v52 = vld [vmem:[#allocation3 + $0xc] sm:$0xf] }
 0x213   : > { %v2937_v36 = vpop.permute.xlu1 %2936  ;;  %3692 = vst.msk [vmem:[#allocation4 + $0x460] sm:$0xff] %vm3677_vm4, %v3658_v15  ;;  %v10206_v23 = vpack.c.bf16 %v4282_v41, %v4282_v41  ;;  %v4283_v28 = vmax.f32 %v4189_v12, 0.0  ;;  %v7052_v40 = vrot.slane %v7051_v9, 4  ;;  %v6653_v20 = vrot.slane %v6651_v21, 4 }
 0x214   : > { %2970 = vst.msk [vmem:[#allocation4 + $0x4b0] sm:$0xff] %vm2954_vm12, %v2937_v36  ;;  %v10204_v8 = vpack.c.bf16 %v4280_v26, %v4280_v26  ;;  %v4281_v57 = vmax.f32 %v4181_v39, 0.0  ;;  %v7047_v1 = vsel %vm11322_vm14, %v7042_v13, %v7046_v2  ;;  %v6652_v2 = vsel %vm11256_vm10, %v9972_v56, %v6651_v21  ;;  %v4873_v26 = vld [vmem:[#allocation3 + $0x44] sm:$0x1] }
 0x215   : > { %v4604_v51 = vshrl.u32 %v10206_v23, 16  ;;  %v4607_v35 = vshll.u32 %v10206_v23, 16  ;;  %v10207_v45 = vpack.c.bf16 %v4283_v28, %v4283_v28  ;;  %v7057_v38 = vsel %vm11322_vm14, %v7052_v40, %v7056_v59  ;;  %v6043_v28 = vld [vmem:[#allocation3 + $0x14] sm:$0x1]  ;;  %v6989_v56 = vld [vmem:[#allocation3 + $0x24] sm:$0xf] }
 0x216   : > { %v3979_v33 = vpop.permute.xlu0 %3978  ;;  %v4587_v7 = vshrl.u32 %v10204_v8, 16  ;;  %v4590_v43 = vshll.u32 %v10204_v8, 16  ;;  %v10205_v18 = vpack.c.bf16 %v4281_v57, %v4281_v57  ;;  %v10020_v30 = vcombine.low %v7047_v1, %v7057_v38 }
 0x217   : > { %v3115_v0 = vpop.permute.xlu1 %3114  ;;  %4013 = vst.msk [vmem:[#allocation4 + $0x460] sm:$0xff] %vm14484_vm6, %v3979_v33  ;;  %v4606_v47 = vrot.slane %v4604_v51, 7  ;;  %v4612_v48 = vshrl.u32 %v10207_v45, 16  ;;  %v4615_v50 = vshll.u32 %v10207_v45, 16  ;;  %v6654_v39 = vrot.slane %v6555_v63, 5 }
 0x218   : > { %3148 = vst.msk [vmem:[#allocation4 + $0x4b0] sm:$0xff] %vm3132_vm13, %v3115_v0  ;;  %v4589_v44 = vrot.slane %v4587_v7, 7  ;;  %v4595_v31 = vshrl.u32 %v10205_v18, 16  ;;  %v4598_v10 = vshll.u32 %v10205_v18, 16  ;;  %7482 = vst [vmem:[#allocation4 + $0x38] sm:$0xff] %v10020_v30  ;;  %v6090_v9 = vshrl.u32 %v6041_v52, 16 }
 0x219   : > { %v4609_v62 = vor.u32 %v4607_v35, %v4606_v47  ;;  %v4610_v49 = vrot.slane %v4606_v47, 4  ;;  %v4614_v37 = vrot.slane %v4612_v48, 7  ;;  %v6655_v21 = vsel %vm11256_vm10, %v6653_v20, %v6654_v39  ;;  %v6990_v51 = vld [vmem:[#allocation3 + $0x28] sm:$0xf]  ;;  %v12742_v7 = vld [vmem:[#allocation3 + $0x2c] sm:$0x1] }
 0x21a   : > { %v4592_v15 = vor.u32 %v4590_v43, %v4589_v44  ;;  %v4593_v41 = vrot.slane %v4589_v44, 4  ;;  %v4597_v12 = vrot.slane %v4595_v31, 7  ;;  %v6093_v33 = vshll.u32 %v6041_v52, 16  ;;  %v4349_v43 = vld [vmem:[#allocation3 + $0x90] sm:$0x1] }
 0x21b   : > { %v3660_v11 = vpop.permute.xlu1 %3659  ;;  %v4877_v24 = vsel %vm12588_vm0, %v4609_v62, %v4876_v22  ;;  %v4617_v29 = vor.u32 %v4615_v50, %v4614_v37  ;;  %v4619_v36 = vrot.slane %v4614_v37, 4  ;;  %v9988_v0 = vcombine.low %v6652_v2, %v6655_v21 }
 0x21c   : > { %3693 = vst.msk [vmem:[#allocation4 + $0x4b0] sm:$0xff] %vm3677_vm4, %v3660_v11  ;;  %4878 = vst [vmem:[#allocation3 + $0x48] sm:$0xf] %v4877_v24  ;;  %v4870_v58 = vsel %vm12588_vm0, %v4592_v15, %v4869_v27  ;;  %v4600_v59 = vor.u32 %v4598_v10, %v4597_v12  ;;  %v4602_v23 = vrot.slane %v4597_v12, 4  ;;  %v12740_v22 = vrot.slane %v6090_v9, 4 }
 0x21d   : > { %4871 = vst [vmem:[#allocation3 + $0x3c] sm:$0xf] %v4870_v58  ;;  %v4618_v57 = vsel %vm11244_vm9, %v4610_v49, %v4617_v29  ;;  %v4881_v13 = vsel %vm12001_vm2, %v4619_v36, %v4880_v46  ;;  %vm14485_vm4 = vmmov %vm14476_vm11  ;;  %v12745_v18 = vrot.slane %v6093_v33, 5  ;;  %v12749_v1 = vrot.slane %v6099_v4, 5 }
 0x21e   : > { %v4029_v8 = vld [vmem:[#allocation4 + $0x460] sm:$0xff]  ;;  %4879 = vst [vmem:[#allocation3 + $0x4c] sm:$0xf] %v4618_v57  ;;  %4882 = vst [vmem:[#allocation3 + $0x50] sm:$0x1] %v4881_v13  ;;  %v4601_v45 = vsel %vm11244_vm9, %v4593_v41, %v4600_v59  ;;  %v4874_v40 = vsel %vm12001_vm2, %v4602_v23, %v4873_v26  ;;  %v6109_v47 = vshll.u32 %v6043_v28, 16 }
 0x21f   : > { %v3981_v35 = vpop.permute.xlu1 %3980  ;;  %10730 = vmatprep.mubr.msk.bf16.mxu0 %vm14485_vm4, %v4029_v8  ;;  %4872 = vst [vmem:[#allocation3 + $0x40] sm:$0xf] %v4601_v45  ;;  %4875 = vst [vmem:[#allocation3 + $0x44] sm:$0x1] %v4874_v40  ;;  %v7059_v27 = vshrl.u32 %v6989_v56, 16  ;;  %v4350_v48 = vsel %vm12001_vm2, 0, %v4349_v43  ;;  %v6096_v29 = vor.u32 %v12745_v18, %v12740_v22  ;;  %v6106_v36 = vor.u32 %v12710_v16, %v12749_v1 }
 0x220   : > { %4014 = vst.msk [vmem:[#allocation4 + $0x4b0] sm:$0xff] %vm14486_vm7, %v3981_v35  ;;  %6825 = vst [vmem:[#allocation4 + $0x28] sm:$0xff] %v9988_v0  ;;  %v7062_v50 = vshll.u32 %v6989_v56, 16  ;;  %v7068_v38 = vshll.u32 %v6990_v51, 16  ;;  %v7072_v44 = vshrl.u32 %v6990_v51, 16  ;;  %v12753_v46 = vrot.slane %v6109_v47, 5 }
 0x221   : > { %4351 = vst [vmem:[#allocation3 + $0x90] sm:$0x1] %v4350_v48  ;;  %v12755_v31 = vrot.slane %v7059_v27, 4  ;;  %v7078_v4 = vshll.u32 %v12742_v7, 16  ;;  %vm14487_vm8 = vmmov %vm14485_vm4  ;;  %v10972_v23 = vld [vmem:[#allocation4 + $0x8] sm:$0xff]  ;;  %v7850_v40 = vld [vmem:[#allocation4] sm:$0xff] }
 0x222   : > { %v12757_v10 = vrot.slane %v7062_v50, 5  ;;  %v12759_v30 = vrot.slane %v7068_v38, 5  ;;  %v12761_v61 = vrot.slane %v7072_v44, 4  ;;  %v10871_v0 = vld [vmem:[%s14411_s3 + $0x80] sm:$0xff]   ;;  %v10872_v48 = vld [vmem:[%s14411_s3 + $0xc8] sm:$0xff]   ;;  %v10876_v16 = vld [vmem:[%s14411_s3 + $0xd8] sm:$0xff]  }
 0x223   : > { %v5115_v63 = vld [vmem:[#allocation3 + $0x48] sm:$0xf] }
 0x224   : > { %v5112_v52 = vld [vmem:[#allocation3 + $0x3c] sm:$0xf]  ;;  %v5290_v62 = vshrl.u32 %v5115_v63, 16  ;;  %v5293_v49 = vshll.u32 %v5115_v63, 16  ;;  %v7065_v63 = vor.u32 %v12757_v10, %v12755_v31  ;;  %v10904_v31 = vld [vmem:[%s14411_s3 + $0x140] sm:$0xff]   ;;  %v10873_v10 = vld [vmem:[%s14411_s3 + $0x88] sm:$0xff]  }
 0x225   : > { %v5266_v37 = vshrl.u32 %v5112_v52, 16  ;;  %v5269_v2 = vshll.u32 %v5112_v52, 16  ;;  %v5116_v11 = vld [vmem:[#allocation3 + $0x4c] sm:$0xf]  ;;  %v5117_v15 = vld [vmem:[#allocation3 + $0x50] sm:$0x1]  ;;  %10472 = vmatprep.subr.bf16.mxu1 %v10904_v31 }
 0x226   : > { %v5113_v12 = vld [vmem:[#allocation3 + $0x40] sm:$0xf]  ;;  %v5114_v20 = vld [vmem:[#allocation3 + $0x44] sm:$0x1]  ;;  %v5292_v24 = vrot.slane %v5290_v62, 4  ;;  %v5295_v56 = vrot.slane %v5293_v49, 5 }
 0x227   : > { %v4030_v41 = vld [vmem:[#allocation4 + $0x4b0] sm:$0xff]  ;;  %v5268_v26 = vrot.slane %v5266_v37, 4  ;;  %v5271_v39 = vrot.slane %v5269_v2, 5  ;;  %v5275_v58 = vshll.u32 %v5113_v12, 16  ;;  %v5279_v59 = vshrl.u32 %v5113_v12, 16  ;;  %v12769_v9 = vld [vmem:[#allocation3 + $0x3c] sm:$0xff]  }
 0x228   : > { %10731 = vmatmul.mubr.msk.bf16.gmra.mrb[28].mxu0 %vm14487_vm8, %v4030_v41  ;;  %v5285_v28 = vshll.u32 %v5114_v20, 16  ;;  %v5299_v8 = vshll.u32 %v5116_v11, 16  ;;  %v5303_v57 = vshrl.u32 %v5116_v11, 16  ;;  %v12771_v13 = vld [vmem:[#allocation3 + $0x48] sm:$0xff]   ;;  %v5309_v35 = vshll.u32 %v5117_v15, 16  ;;  %v12773_v45 = vld [vmem:[#allocation3 + $0x3c] sm:$0xff]  }
 0x229   : > { %8680 = vmatprep.mubr.bf16.mxu0 %v10972_v23  ;;  %v5272_v21 = vor.u32 %v5271_v39, %v5268_v26  ;;  %v5277_v33 = vrot.slane %v5275_v58, 5  ;;  %v5281_v51 = vrot.slane %v5279_v59, 4  ;;  %5086 = vst [vmem:[#allocation4 + $0x190] sm:$0xff] %v12769_v9  ;;  %v5296_v43 = vor.u32 %v5295_v56, %v5292_v24  ;;  %5087 = vst [vmem:[#allocation4 + $0x1e0] sm:$0xff] %v12771_v13  ;;  %v12780_v27 = vld [vmem:[#allocation3 + $0x48] sm:$0xff]   ;;  %v10874_v23 = vld [vmem:[%s14411_s3 + $0xd0] sm:$0xff]  }
 0x22a   : > { %v5287_v22 = vrot.slane %v5285_v28, 5  ;;  %v5301_v18 = vrot.slane %v5299_v8, 5  ;;  %v5305_v47 = vrot.slane %v5303_v57, 4  ;;  %v5311_v44 = vrot.slane %v5309_v35, 5  ;;  %v5624_v49 = vld [vmem:[#allocation3 + $0x3c] sm:$0xe] }
 0x22b   : > { %v5273_v50 = vrot.slane %v5272_v21, 4  ;;  %v5282_v38 = vor.u32 %v5281_v51, %v5277_v33  ;;  %v5297_v52 = vrot.slane %v5296_v43, 4  ;;  %v5625_v37 = vld [vmem:[#allocation3 + $0x40] sm:$0xf]  ;;  %v12787_v2 = vrot.slane %v6096_v29, 4 }
 0x22c   : > { %v5306_v62 = vor.u32 %v5305_v47, %v5301_v18  ;;  %v7075_v11 = vor.u32 %v12761_v61, %v12759_v30  ;;  %v5626_v12 = vld [vmem:[#allocation3 + $0x44] sm:$0x1]  ;;  %v9913_v20 = vrot.slane %v5624_v49, 9  ;;  %v5742_v24 = vrot.slane %v5625_v37, 5  ;;  %v5627_v39 = vld [vmem:[#allocation3 + $0x48] sm:$0xe] }
 0x22d   : > { %v5278_v15 = vsel %vm11322_vm14, %v5273_v50, %v5277_v33  ;;  %v5283_v41 = vrot.slane %v5282_v38, 4  ;;  %v5302_v29 = vsel %vm11322_vm14, %v5297_v52, %v5301_v18  ;;  %v5745_v61 = vrot.slane %v5626_v12, 5  ;;  %v5628_v58 = vld [vmem:[#allocation3 + $0x4c] sm:$0xf]  ;;  %v5629_v57 = vld [vmem:[#allocation3 + $0x50] sm:$0x1] }
 0x22e   : > { %v5307_v26 = vrot.slane %v5306_v62, 4  ;;  %v6102_v59 = vsel %vm11322_vm14, %v12787_v2, %v12749_v1  ;;  %v12812_v56 = vsel %vm11256_vm10, %v9913_v20, %v5742_v24  ;;  %v5744_v8 = vrot.slane %v5742_v24, 4  ;;  %v6556_v33 = vld [vmem:[#allocation3 + $0x18] sm:$0xe]  ;;  %v6557_v51 = vld [vmem:[#allocation3 + $0x1c] sm:$0xf] }
 0x22f   : > { %v5288_v28 = vsel %vm11322_vm14, %v5283_v41, %v5287_v22  ;;  %v9914_v21 = vrot.slane %v5627_v39, 9  ;;  %v12814_v35 = vld [vmem:[#allocation3 + $0x20] sm:$0x1]  ;;  %v5749_v22 = vrot.slane %v5628_v58, 5  ;;  %v5752_v18 = vrot.slane %v5629_v57, 5  ;;  %v10875_v12 = vld [vmem:[%s14411_s3 + $0x90] sm:$0xff]  }
 0x230   : > { %8681 = vmatmul.mubr.bf16.vlgmr.msra.gmra.mrb[32].mxu0 %v7850_v40  ;;  %v9897_v40 = vcombine.low %v5278_v15, %v5288_v28  ;;  %v5312_v43 = vsel %vm11322_vm14, %v5307_v26, %v5311_v44  ;;  %v4346_v47 = vld [vmem:[#allocation3 + $0x84] sm:$0x1]  ;;  %v4404_v50 = vld [vmem:[#allocation3 + $0x98] sm:$0x1]  ;;  %v12821_v52 = vsel %vm11256_vm10, %v5744_v8, %v5745_v61  ;;  %v10952_v49 = vld [vmem:[#allocation3 + $0x3c] sm:$0xff]   ;;  %v6107_v20 = vrot.slane %v6106_v36, 4 }
 0x231   : > { %8688 = vmatprep.mubr.bf16.mxu0 %v12653_v60  ;;  %10361 = vmatpush3.bf16.msra.mxu0 %v10871_v0  ;;  %v9898_v38 = vcombine.low %v5302_v29, %v5312_v43  ;;  %v4347_v62 = vsel %vm12001_vm2, 0, %v4346_v47  ;;  %v4405_v60 = vsel %vm12448_vm5, 0, %v4404_v50  ;;  %v4401_v0 = vld [vmem:[#allocation3 + $0x8c] sm:$0x1]  ;;  %v10905_v44 = vld [vmem:[%s14411_s3 + $0x100] sm:$0xff]   ;;  %v12834_v37 = vsel %vm11256_vm10, %v9914_v21, %v5749_v22  ;;  %6973 = vst [vmem:[#allocation4 + $0x120] sm:$0xff] %v10952_v49 }
 0x232   : > { %10362 = vmatprep.subr.bf16.mxu0 %v10872_v48  ;;  %8720 = vmatprep.mubr.bf16.mxu1 %v9897_v40  ;;  %v9929_v48 = vcombine.low %v12812_v56, %v12821_v52  ;;  %v5751_v2 = vrot.slane %v5749_v22, 4  ;;  %4348 = vst [vmem:[#allocation3 + $0x84] sm:$0x1] %v4347_v62  ;;  %4406 = vst [vmem:[#allocation3 + $0x98] sm:$0x1] %v4405_v60  ;;  %v4402_v15 = vsel %vm12448_vm5, 0, %v4401_v0 }
 0x233   : > { %v6044_v41 = vld [vmem:[#allocation3 + $0x18] sm:$0xf]  ;;  %8721 = vmatmul.mubr.bf16.vlgmr.msra.gmra.mrb[0].mxu1 %v12769_v9  ;;  %4403 = vst [vmem:[#allocation3 + $0x8c] sm:$0x1] %v4402_v15  ;;  %v7066_v24 = vrot.slane %v7065_v63, 4  ;;  %v7076_v31 = vrot.slane %v7075_v11, 4  ;;  %v6112_v1 = vsel %vm11322_vm14, %v6107_v20, %v12753_v46 }
 0x234   : > { %v7080_v29 = vrot.slane %v7078_v4, 5  ;;  %8728 = vmatprep.mubr.bf16.mxu1 %v9898_v38  ;;  %v12849_v26 = vsel %vm11256_vm10, %v5751_v2, %v5752_v18  ;;  %v9973_v61 = vrot.slane %v6556_v33, 9  ;;  %v6658_v39 = vrot.slane %v6557_v51, 5  ;;  %v6045_v58 = vld [vmem:[#allocation3 + $0x1c] sm:$0xf]  ;;  %v10954_v28 = vld [vmem:[#allocation3 + $0x48] sm:$0xff]   ;;  %10473 = vmatpush3.bf16.msra.mxu1 %v10905_v44 }
 0x235   : > { %10363 = vmatpush3.bf16.msra.mxu0 %v10873_v10  ;;  %v6661_v9 = vrot.slane %v12814_v35, 5  ;;  %v9930_v7 = vcombine.low %v12834_v37, %v12849_v26  ;;  %v7071_v4 = vsel %vm11322_vm14, %v7066_v24, %v12759_v30  ;;  %v6046_v36 = vld [vmem:[#allocation3 + $0x20] sm:$0x1]  ;;  %v6114_v63 = vshrl.u32 %v6044_v41, 16  ;;  %v6992_v11 = vld [vmem:[#allocation3 + $0x30] sm:$0xf] }
 0x236   : > { %10364 = vmatprep.subr.bf16.mxu0 %v10874_v23  ;;  %v9956_v10 = vcombine.low %v6102_v59, %v6112_v1  ;;  %v7081_v23 = vsel %vm11322_vm14, %v7076_v31, %v7080_v29  ;;  %v6659_v8 = vsel %vm11256_vm10, %v9973_v61, %v6658_v39  ;;  %v6660_v57 = vrot.slane %v6658_v39, 4  ;;  %v6993_v21 = vld [vmem:[#allocation3 + $0x34] sm:$0xf]  ;;  %v12867_v33 = vld [vmem:[#allocation3 + $0x38] sm:$0x1]  ;;  %6974 = vst [vmem:[#allocation4 + $0x170] sm:$0xff] %v10954_v28 }
 0x237   : > { %v10021_v46 = vcombine.low %v7071_v4, %v7081_v23  ;;  %v6116_v51 = vrot.slane %v6114_v63, 4  ;;  %v6117_v30 = vshll.u32 %v6044_v41, 16  ;;  %v6123_v35 = vshll.u32 %v6045_v58, 16  ;;  %v10877_v59 = vld [vmem:[%s14411_s3 + $0x98] sm:$0xff]   ;;  %v12879_v38 = vld [vmem:[#allocation3 + $0x24] sm:$0xe] }
 0x238   : > { %8689 = vmatmul.mubr.bf16.gmra.mrb[36].mxu0 %v12626_v53  ;;  %6537 = vst [vmem:[#allocation4 + $0x20] sm:$0xff] %v9956_v10  ;;  %v6662_v40 = vsel %vm11256_vm10, %v6660_v57, %v6661_v9  ;;  %v6127_v43 = vshrl.u32 %v6045_v58, 16  ;;  %v6133_v22 = vshll.u32 %v6046_v36, 16  ;;  %v7083_v18 = vshrl.u32 %v6992_v11, 16  ;;  %v10879_v53 = vld [vmem:[%s14411_s3 + $0xe0] sm:$0xff]   ;;  %v10881_v9 = vld [vmem:[%s14411_s3 + $0xe8] sm:$0xff]  }
 0x239   : > { %8696 = vmatprep.mubr.bf16.mxu0 %v12663_v5  ;;  %10365 = vmatpush3.bf16.msra.mxu0 %v10875_v12  ;;  %7483 = vst [vmem:[#allocation4 + $0x88] sm:$0xff] %v10021_v46  ;;  %v9989_v47 = vcombine.low %v6659_v8, %v6662_v40  ;;  %v6119_v5 = vrot.slane %v6117_v30, 5  ;;  %v6125_v50 = vrot.slane %v6123_v35, 5  ;;  %v7086_v44 = vshll.u32 %v6992_v11, 16  ;;  %v10880_v20 = vld [vmem:[%s14411_s3 + $0xa0] sm:$0xff]   ;;  %v10882_v46 = vld [vmem:[%s14411_s3 + $0xa8] sm:$0xff]  }
 0x23a   : > { %10366 = vmatprep.subr.bf16.mxu0 %v10876_v16  ;;  %v6129_v62 = vrot.slane %v6127_v43, 4  ;;  %v6135_v60 = vrot.slane %v6133_v22, 5  ;;  %v7085_v0 = vrot.slane %v7083_v18, 4  ;;  %v10716_v49 = vpop.f32.mrb[12].mxu0  ;;  %v7092_v15 = vshll.u32 %v6993_v21, 16 }
 0x23b   : > { %8729 = vmatmul.mubr.bf16.gmra.mrb[4].mxu1 %v12771_v13  ;;  %6826 = vst [vmem:[#allocation4 + $0x78] sm:$0xff] %v9989_v47  ;;  %v6120_v2 = vor.u32 %v6119_v5, %v6116_v51  ;;  %v7096_v41 = vshrl.u32 %v6993_v21, 16  ;;  %v7102_v12 = vshll.u32 %v12867_v33, 16  ;;  %v12889_v24 = vld [vmem:[%s14410_s2] ss:$0 sm:$0xff]  ;;  %v4193_v29 = vpop.f32.mrb[13].mxu0 }
 0x23c   : > { %v4202_v31 = vadd.f32 %v12889_v24, %v10716_v49  ;;  %v6130_v13 = vor.u32 %v6129_v62, %v6125_v50  ;;  %v7088_v61 = vrot.slane %v7086_v44, 5  ;;  %v9974_v39 = vrot.slane %v12879_v38, 9  ;;  %v10717_v28 = vpop.f32.mrb[14].mxu0  ;;  %v10884_v51 = vld [vmem:[%s14411_s3 + $0xf0] sm:$0xff]   ;;  %v6560_v18 = vld [vmem:[#allocation3 + $0x28] sm:$0xf] }
 0x23d   : > { %10367 = vmatpush3.bf16.msra.mxu0 %v10877_v59  ;;  %v4194_v58 = vadd.f32 %v12889_v24, %v4193_v29  ;;  %v6121_v16 = vrot.slane %v6120_v2, 4  ;;  %v7094_v1 = vrot.slane %v7092_v15, 5  ;;  %v7098_v4 = vrot.slane %v7096_v41, 4  ;;  %v4196_v11 = vpop.f32.mrb[15].mxu0  ;;  %v4890_v29 = vld [vmem:[#allocation3 + $0x60] sm:$0xf] }
 0x23e   : > { %10368 = vmatprep.subr.bf16.mxu0 %v10879_v53  ;;  %v4286_v36 = vmax.f32 %v4202_v31, 0.0  ;;  %v4205_v63 = vadd.f32 %v12889_v24, %v10717_v28  ;;  %v6131_v10 = vrot.slane %v6130_v13, 4  ;;  %v7089_v23 = vor.u32 %v7088_v61, %v7085_v0  ;;  %v10887_v31 = vld [vmem:[%s14411_s3 + $0xf8] sm:$0xff]  }
 0x23f   : > { %v4284_v8 = vmax.f32 %v4194_v58, 0.0  ;;  %v4197_v57 = vadd.f32 %v12889_v24, %v4196_v11  ;;  %v6126_v21 = vsel %vm11322_vm14, %v6121_v16, %v6125_v50  ;;  %v7099_v33 = vor.u32 %v7098_v4, %v7094_v1  ;;  %v10888_v58 = vld [vmem:[%s14411_s3 + $0xb8] sm:$0xff]  }
 0x240   : > { %8697 = vmatmul.mubr.bf16.gmra.mrb[40].mxu0 %v12628_v55  ;;  %v10210_v30 = vpack.c.bf16 %v4286_v36, %v4286_v36  ;;  %v4287_v55 = vmax.f32 %v4205_v63, 0.0  ;;  %v6136_v35 = vsel %vm11322_vm14, %v6131_v10, %v6135_v60  ;;  %v7090_v59 = vrot.slane %v7089_v23, 4  ;;  %v10885_v60 = vld [vmem:[%s14411_s3 + $0xb0] sm:$0xff]   ;;  %v6561_v63 = vld [vmem:[#allocation3 + $0x2c] sm:$0x1] }
 0x241   : > { %8704 = vmatprep.mubr.bf16.mxu0 %v12674_v32  ;;  %10369 = vmatpush3.bf16.msra.mxu0 %v10880_v20  ;;  %v10208_v40 = vpack.c.bf16 %v4284_v8, %v4284_v8  ;;  %v4285_v43 = vmax.f32 %v4197_v57, 0.0  ;;  %v9957_v22 = vcombine.low %v6126_v21, %v6136_v35  ;;  %v7100_v32 = vrot.slane %v7099_v33, 4  ;;  %v4894_v23 = vld [vmem:[#allocation3 + $0x68] sm:$0x1]  ;;  %v6047_v21 = vld [vmem:[#allocation3 + $0x24] sm:$0xf] }
 0x242   : > { %10370 = vmatprep.subr.bf16.mxu0 %v10881_v9  ;;  %v4638_v53 = vshrl.u32 %v10210_v30, 16  ;;  %v4641_v47 = vshll.u32 %v10210_v30, 16  ;;  %v10211_v5 = vpack.c.bf16 %v4287_v55, %v4287_v55  ;;  %v7095_v50 = vsel %vm11322_vm14, %v7090_v59, %v7094_v1  ;;  %v4883_v1 = vld [vmem:[#allocation3 + $0x54] sm:$0xf]  ;;  %v4887_v30 = vld [vmem:[#allocation3 + $0x5c] sm:$0x1] }
 0x243   : > { %v4621_v62 = vshrl.u32 %v10208_v40, 16  ;;  %v4624_v0 = vshll.u32 %v10208_v40, 16  ;;  %v10209_v44 = vpack.c.bf16 %v4285_v43, %v4285_v43  ;;  %6538 = vst [vmem:[#allocation4 + $0x70] sm:$0xff] %v9957_v22  ;;  %v7104_v49 = vrot.slane %v7102_v12, 5  ;;  %v6048_v55 = vld [vmem:[#allocation3 + $0x28] sm:$0xf] }
 0x244   : > { %v4640_v2 = vrot.slane %v4638_v53, 7  ;;  %v4646_v15 = vshrl.u32 %v10211_v5, 16  ;;  %v4649_v41 = vshll.u32 %v10211_v5, 16  ;;  %v6665_v20 = vrot.slane %v6560_v18, 5  ;;  %v6049_v43 = vld [vmem:[#allocation3 + $0x2c] sm:$0x1] }
 0x245   : > { %10371 = vmatpush3.bf16.msra.mxu0 %v10882_v46  ;;  %v4623_v13 = vrot.slane %v4621_v62, 7  ;;  %v4629_v61 = vshrl.u32 %v10209_v44, 16  ;;  %v4632_v9 = vshll.u32 %v10209_v44, 16  ;;  %v7105_v12 = vsel %vm11322_vm14, %v7100_v32, %v7104_v49  ;;  %v6995_v18 = vld [vmem:[#allocation3 + $0x3c] sm:$0xf] }
 0x246   : > { %10372 = vmatprep.subr.bf16.mxu0 %v10884_v51  ;;  %v4643_v28 = vor.u32 %v4641_v47, %v4640_v2  ;;  %v4644_v16 = vrot.slane %v4640_v2, 4  ;;  %v4648_v4 = vrot.slane %v4646_v15, 7  ;;  %v10022_v36 = vcombine.low %v7095_v50, %v7105_v12  ;;  %v12944_v62 = vld [vmem:[#allocation3 + $0x40] sm:$0xf] }
 0x247   : > { %v4626_v11 = vor.u32 %v4624_v0, %v4623_v13  ;;  %v4627_v10 = vrot.slane %v4623_v13, 4  ;;  %v4631_v8 = vrot.slane %v4629_v61, 7  ;;  %v6666_v57 = vsel %vm11256_vm10, %v9974_v39, %v6665_v20 }
 0x248   : > { %8705 = vmatmul.mubr.bf16.gmra.mrb[44].mxu0 %v12656_v19  ;;  %v4891_v33 = vsel %vm12588_vm0, %v4643_v28, %v4890_v29  ;;  %v4651_v46 = vor.u32 %v4649_v41, %v4648_v4  ;;  %v4653_v51 = vrot.slane %v4648_v4, 4  ;;  %7484 = vst [vmem:[#allocation4 + $0xd8] sm:$0xff] %v10022_v36  ;;  %v6667_v19 = vrot.slane %v6665_v20, 4  ;;  %v4355_v20 = vld [vmem:[#allocation3 + $0xa8] sm:$0x1] }
 0x249   : > { %8712 = vmatprep.mubr.bf16.mxu0 %v12687_v6  ;;  %10373 = vmatpush3.bf16.msra.mxu0 %v10885_v60  ;;  %4892 = vst [vmem:[#allocation3 + $0x60] sm:$0xf] %v4891_v33  ;;  %v4884_v38 = vsel %vm12588_vm0, %v4626_v11, %v4883_v1  ;;  %v4634_v35 = vor.u32 %v4632_v9, %v4631_v8  ;;  %v4636_v39 = vrot.slane %v4631_v8, 4  ;;  %v6668_v59 = vrot.slane %v6561_v63, 5  ;;  %v10974_v9 = vld [vmem:[#allocation4 + $0x140] sm:$0xff]  ;;  %v10975_v1 = vld [vmem:[#allocation4 + $0x18] sm:$0xff] }
 0x24a   : > { %10374 = vmatprep.subr.bf16.mxu0 %v10887_v31  ;;  %4885 = vst [vmem:[#allocation3 + $0x54] sm:$0xf] %v4884_v38  ;;  %v4652_v6 = vsel %vm11244_vm9, %v4644_v16, %v4651_v46  ;;  %v4895_v40 = vsel %vm12001_vm2, %v4653_v51, %v4894_v23  ;;  %v6138_v22 = vshrl.u32 %v6047_v21, 16  ;;  %v6141_v32 = vshll.u32 %v6047_v21, 16 }
 0x24b   : > { %4893 = vst [vmem:[#allocation3 + $0x64] sm:$0xf] %v4652_v6  ;;  %4896 = vst [vmem:[#allocation3 + $0x68] sm:$0x1] %v4895_v40  ;;  %v4635_v53 = vsel %vm11244_vm9, %v4627_v10, %v4634_v35  ;;  %v4888_v47 = vsel %vm12001_vm2, %v4636_v39, %v4887_v30  ;;  %v6669_v5 = vsel %vm11256_vm10, %v6667_v19, %v6668_v59  ;;  %v6147_v50 = vshll.u32 %v6048_v55, 16 }
 0x24c   : > { %4886 = vst [vmem:[#allocation3 + $0x58] sm:$0xf] %v4635_v53  ;;  %4889 = vst [vmem:[#allocation3 + $0x5c] sm:$0x1] %v4888_v47  ;;  %v9990_v0 = vcombine.low %v6666_v57, %v6669_v5  ;;  %v6140_v44 = vrot.slane %v6138_v22, 4  ;;  %v6151_v49 = vshrl.u32 %v6048_v55, 16 }
 0x24d   : > { %10375 = vmatpush3.bf16.msra.mxu0 %v10888_v58  ;;  %v6143_v60 = vrot.slane %v6141_v32, 5  ;;  %v6157_v2 = vshll.u32 %v6049_v43, 16  ;;  %v7107_v15 = vshrl.u32 %v6995_v18, 16  ;;  %v7110_v41 = vshll.u32 %v6995_v18, 16  ;;  %v10976_v18 = vld [vmem:[#allocation4 + $0x10] sm:$0xff] }
 0x24e   : > { %6827 = vst [vmem:[#allocation4 + $0xc8] sm:$0xff] %v9990_v0  ;;  %v12946_v31 = vrot.slane %v6147_v50, 5  ;;  %v12948_v29 = vrot.slane %v6151_v49, 4  ;;  %v7116_v13 = vshll.u32 %v12944_v62, 16  ;;  %v7120_v61 = vshrl.u32 %v12944_v62, 16  ;;  %v10977_v0 = vld [vmem:[#allocation4 + $0x68] sm:$0xff] }
 0x24f   : > { %v4356_v12 = vsel %vm12001_vm2, 0, %v4355_v20  ;;  %v12954_v58 = vrot.slane %v6157_v2, 5  ;;  %v12956_v28 = vrot.slane %v7107_v15, 4  ;;  %v12958_v16 = vrot.slane %v7110_v41, 5 }
 0x250   : > { %8713 = vmatmul.mubr.bf16.gmra.mrb[48].mxu0 %v10974_v9  ;;  %v5121_v4 = vld [vmem:[#allocation3 + $0x60] sm:$0xf]  ;;  %4357 = vst [vmem:[#allocation3 + $0xa8] sm:$0x1] %v4356_v12  ;;  %v6144_v33 = vor.u32 %v6143_v60, %v6140_v44 }
 0x251   : > { %8841 = vmatprep.mubr.bf16.mxu0 %v10975_v1  ;;  %v5118_v36 = vld [vmem:[#allocation3 + $0x54] sm:$0xf]  ;;  %v5338_v21 = vshrl.u32 %v5121_v4, 16  ;;  %v5341_v59 = vshll.u32 %v5121_v4, 16  ;;  %v7516_v54 = vld [vmem:[#allocation3 + $0x60] sm:$0xe] }
 0x252   : > { %v5314_v63 = vshrl.u32 %v5118_v36, 16  ;;  %v5317_v11 = vshll.u32 %v5118_v36, 16  ;;  %v5122_v10 = vld [vmem:[#allocation3 + $0x64] sm:$0xf]  ;;  %v5123_v23 = vld [vmem:[#allocation3 + $0x68] sm:$0x1]  ;;  %v6154_v36 = vor.u32 %v12948_v29, %v12946_v31 }
 0x253   : > { %v12960_v8 = vld [vmem:[#allocation3 + $0x54] sm:$0xff]   ;;  %v5120_v46 = vld [vmem:[#allocation3 + $0x5c] sm:$0x1]  ;;  %v5340_v39 = vrot.slane %v5338_v21, 4  ;;  %v5347_v22 = vshll.u32 %v5122_v10, 16  ;;  %v12964_v32 = vld [vmem:[#allocation3 + $0x60] sm:$0xff]  }
 0x254   : > { %v5119_v57 = vld [vmem:[#allocation3 + $0x58] sm:$0xf]  ;;  %v5316_v51 = vrot.slane %v5314_v63, 4  ;;  %v5319_v30 = vrot.slane %v5317_v11, 5  ;;  %v5333_v38 = vshll.u32 %v5120_v46, 16  ;;  %v5343_v47 = vrot.slane %v5341_v59, 5 }
 0x255   : > { %v5323_v19 = vshll.u32 %v5119_v57, 16  ;;  %v5327_v55 = vshrl.u32 %v5119_v57, 16  ;;  %v12962_v35 = vld [vmem:[#allocation3 + $0x54] sm:$0xff]   ;;  %v5351_v5 = vshrl.u32 %v5122_v10, 16  ;;  %v5357_v50 = vshll.u32 %v5123_v23, 16  ;;  %v12967_v2 = vld [vmem:[#allocation3 + $0x60] sm:$0xff]  }
 0x256   : > { %v5320_v6 = vor.u32 %v5319_v30, %v5316_v51  ;;  %v5335_v53 = vrot.slane %v5333_v38, 5  ;;  %5088 = vst [vmem:[#allocation4 + $0x230] sm:$0xff] %v12962_v35  ;;  %v5349_v60 = vrot.slane %v5347_v22, 5  ;;  %v5630_v15 = vld [vmem:[#allocation3 + $0x54] sm:$0xe]  ;;  %v12969_v41 = vrot.slane %v6144_v33, 4 }
 0x257   : > { %v5325_v40 = vrot.slane %v5323_v19, 5  ;;  %v5329_v43 = vrot.slane %v5327_v55, 4  ;;  %v5344_v20 = vor.u32 %v5343_v47, %v5340_v39  ;;  %v5353_v9 = vrot.slane %v5351_v5, 4  ;;  %v5631_v1 = vld [vmem:[#allocation3 + $0x58] sm:$0xf]  ;;  %5089 = vst [vmem:[#allocation4 + $0x280] sm:$0xff] %v12967_v2 }
 0x258   : > { %8842 = vmatmul.mubr.bf16.vlgmr.msra.gmra.mrb[52].mxu0 %v10976_v18  ;;  %v5321_v44 = vrot.slane %v5320_v6, 4  ;;  %v5359_v12 = vrot.slane %v5357_v50, 5  ;;  %v5632_v4 = vld [vmem:[#allocation3 + $0x5c] sm:$0x1]  ;;  %v9915_v11 = vrot.slane %v5630_v15, 9  ;;  %v5756_v10 = vrot.slane %v5631_v1, 5 }
 0x259   : > { %8849 = vmatprep.mubr.bf16.mxu0 %v10977_v0  ;;  %v5330_v49 = vor.u32 %v5329_v43, %v5325_v40  ;;  %v5633_v23 = vld [vmem:[#allocation3 + $0x60] sm:$0xe]  ;;  %v7113_v57 = vor.u32 %v12958_v16, %v12956_v28  ;;  %v10955_v21 = vld [vmem:[#allocation3 + $0x54] sm:$0xff]   ;;  %v5345_v46 = vrot.slane %v5344_v20, 4  ;;  %v5354_v51 = vor.u32 %v5353_v9, %v5349_v60  ;;  %v5634_v19 = vld [vmem:[#allocation3 + $0x64] sm:$0xf] }
 0x25a   : > { %v5326_v33 = vsel %vm11322_vm14, %v5321_v44, %v5325_v40  ;;  %v5759_v30 = vrot.slane %v5632_v4, 5  ;;  %v5635_v55 = vld [vmem:[#allocation3 + $0x68] sm:$0x1]  ;;  %v12982_v38 = vsel %vm11256_vm10, %v9915_v11, %v5756_v10  ;;  %v5758_v39 = vrot.slane %v5756_v10, 4  ;;  %v4352_v6 = vld [vmem:[#allocation3 + $0x9c] sm:$0x1] }
 0x25b   : > { %v5331_v63 = vrot.slane %v5330_v49, 4  ;;  %v9916_v59 = vrot.slane %v5633_v23, 9  ;;  %v6997_v28 = vld [vmem:[#allocation3 + $0x44] sm:$0x1]  ;;  %6975 = vst [vmem:[#allocation4 + $0x1c0] sm:$0xff] %v10955_v21  ;;  %v5350_v40 = vsel %vm11322_vm14, %v5345_v46, %v5349_v60  ;;  %v5355_v43 = vrot.slane %v5354_v51, 4 }
 0x25c   : > { %v5763_v22 = vrot.slane %v5634_v19, 5  ;;  %v4410_v18 = vld [vmem:[#allocation3 + $0xb0] sm:$0x1]  ;;  %v4407_v47 = vld [vmem:[#allocation3 + $0xa4] sm:$0x1]  ;;  %v5766_v5 = vrot.slane %v5635_v55, 5 }
 0x25d   : > { %v5336_v29 = vsel %vm11322_vm14, %v5331_v63, %v5335_v53  ;;  %v12988_v53 = vsel %vm11256_vm10, %v5758_v39, %v5759_v30  ;;  %v4353_v50 = vsel %vm12001_vm2, 0, %v4352_v6  ;;  %v4411_v0 = vsel %vm12448_vm5, 0, %v4410_v18  ;;  %v10908_v44 = vld [vmem:[%s14411_s3 + $0x148] sm:$0xff]   ;;  %v10978_v60 = vld [vmem:[#allocation4 + $0x60] sm:$0xff]  ;;  %v10911_v4 = vld [vmem:[%s14411_s3 + $0x150] sm:$0xff]  }
 0x25e   : > { %v9899_v16 = vcombine.low %v5326_v33, %v5336_v29  ;;  %v10909_v49 = vld [vmem:[%s14411_s3 + $0x108] sm:$0xff]   ;;  %v5360_v15 = vsel %vm11322_vm14, %v5355_v43, %v5359_v12  ;;  %v9931_v20 = vcombine.low %v12982_v38, %v12988_v53  ;;  %v13006_v9 = vsel %vm11256_vm10, %v9916_v59, %v5763_v22  ;;  %4354 = vst [vmem:[#allocation3 + $0x9c] sm:$0x1] %v4353_v50  ;;  %v6562_v63 = vld [vmem:[#allocation3 + $0x30] sm:$0xe]  ;;  %v10957_v51 = vld [vmem:[#allocation3 + $0x60] sm:$0xff]  }
 0x25f   : > { %v5765_v1 = vrot.slane %v5763_v22, 4  ;;  %4412 = vst [vmem:[#allocation3 + $0xb0] sm:$0x1] %v4411_v0  ;;  %v6563_v11 = vld [vmem:[#allocation3 + $0x34] sm:$0xf]  ;;  %v9900_v12 = vcombine.low %v5350_v40, %v5360_v15  ;;  %v4408_v23 = vsel %vm12448_vm5, 0, %v4407_v47  ;;  %10474 = vmatprep.subr.bf16.mxu1 %v10908_v44  ;;  %v6150_v39 = vsel %vm11322_vm14, %v12969_v41, %v12946_v31 }
 0x260   : > { %8850 = vmatmul.mubr.bf16.gmra.mrb[56].mxu0 %v10978_v60  ;;  %8736 = vmatprep.mubr.bf16.mxu1 %v9899_v16  ;;  %v10979_v10 = vld [vmem:[#allocation4 + $0xb8] sm:$0xff]  ;;  %v6155_v21 = vrot.slane %v6154_v36, 4  ;;  %v7114_v33 = vrot.slane %v7113_v57, 4  ;;  %v6564_v46 = vld [vmem:[#allocation3 + $0x38] sm:$0x1]  ;;  %v7118_v19 = vrot.slane %v7116_v13, 5 }
 0x261   : > { %8857 = vmatprep.mubr.bf16.mxu0 %v10979_v10  ;;  %8737 = vmatmul.mubr.bf16.gmra.mrb[8].mxu1 %v12962_v35  ;;  %v13016_v30 = vsel %vm11256_vm10, %v5765_v1, %v5766_v5  ;;  %4409 = vst [vmem:[#allocation3 + $0xa4] sm:$0x1] %v4408_v23  ;;  %v7122_v35 = vrot.slane %v7120_v61, 4  ;;  %v7126_v55 = vshll.u32 %v6997_v28, 16  ;;  %v6050_v29 = vld [vmem:[#allocation3 + $0x30] sm:$0xf] }
 0x262   : > { %8744 = vmatprep.mubr.bf16.mxu1 %v9900_v12  ;;  %v9932_v36 = vcombine.low %v13006_v9, %v13016_v30  ;;  %10475 = vmatpush3.bf16.msra.mxu1 %v10909_v49  ;;  %v10912_v57 = vld [vmem:[%s14411_s3 + $0x110] sm:$0xff]   ;;  %v6160_v62 = vsel %vm11322_vm14, %v6155_v21, %v12954_v58  ;;  %v6672_v13 = vrot.slane %v6563_v11, 5  ;;  %6976 = vst [vmem:[#allocation4 + $0x210] sm:$0xff] %v10957_v51  ;;  %v10914_v59 = vld [vmem:[%s14411_s3 + $0x158] sm:$0xff]   ;;  %v9975_v40 = vrot.slane %v6562_v63, 9  ;;  %v10980_v63 = vld [vmem:[#allocation4 + $0xb0] sm:$0xff] }
 0x263   : > { %v6051_v61 = vld [vmem:[#allocation3 + $0x34] sm:$0xf]  ;;  %10476 = vmatprep.subr.bf16.mxu1 %v10911_v4  ;;  %v9958_v6 = vcombine.low %v6150_v39, %v6160_v62  ;;  %v7119_v28 = vsel %vm11322_vm14, %v7114_v33, %v7118_v19  ;;  %v7123_v16 = vor.u32 %v7122_v35, %v7118_v19  ;;  %v6052_v43 = vld [vmem:[#allocation3 + $0x38] sm:$0x1]  ;;  %v7128_v31 = vrot.slane %v7126_v55, 5 }
 0x264   : > { %v6674_v41 = vrot.slane %v6672_v13, 4  ;;  %v6675_v22 = vrot.slane %v6564_v46, 5  ;;  %v6162_v18 = vshrl.u32 %v6050_v29, 16  ;;  %v6165_v47 = vshll.u32 %v6050_v29, 16  ;;  %v6998_v0 = vld [vmem:[#allocation3 + $0x48] sm:$0xf] }
 0x265   : > { %6539 = vst [vmem:[#allocation4 + $0xc0] sm:$0xff] %v9958_v6  ;;  %v7124_v58 = vrot.slane %v7123_v16, 4  ;;  %v6171_v5 = vshll.u32 %v6051_v61, 16  ;;  %v6175_v50 = vshrl.u32 %v6051_v61, 16  ;;  %v10915_v44 = vld [vmem:[%s14411_s3 + $0x118] sm:$0xff]   ;;  %v6673_v49 = vsel %vm11256_vm10, %v9975_v40, %v6672_v13  ;;  %v10981_v46 = vld [vmem:[#allocation4 + $0x108] sm:$0xff] }
 0x266   : > { %10477 = vmatpush3.bf16.msra.mxu1 %v10912_v57  ;;  %v6676_v60 = vsel %vm11256_vm10, %v6674_v41, %v6675_v22  ;;  %v6164_v15 = vrot.slane %v6162_v18, 4  ;;  %v6181_v1 = vshll.u32 %v6052_v43, 16  ;;  %v6999_v4 = vld [vmem:[#allocation3 + $0x4c] sm:$0xf]  ;;  %v6167_v12 = vrot.slane %v6165_v47, 5 }
 0x267   : > { %10478 = vmatprep.subr.bf16.mxu1 %v10914_v59  ;;  %v7129_v11 = vsel %vm11322_vm14, %v7124_v58, %v7128_v31  ;;  %v9991_v10 = vcombine.low %v6673_v49, %v6676_v60  ;;  %v6173_v23 = vrot.slane %v6171_v5, 5  ;;  %v7000_v21 = vld [vmem:[#allocation3 + $0x50] sm:$0x1]  ;;  %v6565_v33 = vld [vmem:[#allocation3 + $0x3c] sm:$0xe]  ;;  %v6177_v19 = vrot.slane %v6175_v50, 4 }
 0x268   : > { %8858 = vmatmul.mubr.bf16.gmra.mrb[60].mxu0 %v10980_v63  ;;  %v10023_v51 = vcombine.low %v7119_v28, %v7129_v11  ;;  %v6183_v35 = vrot.slane %v6181_v1, 5  ;;  %v7131_v55 = vshrl.u32 %v6998_v0, 16  ;;  %v6566_v29 = vld [vmem:[#allocation3 + $0x40] sm:$0xf]  ;;  %v6168_v57 = vor.u32 %v6167_v12, %v6164_v15  ;;  %v6567_v61 = vld [vmem:[#allocation3 + $0x44] sm:$0x1] }
 0x269   : > { %8865 = vmatprep.mubr.bf16.mxu0 %v10981_v46  ;;  %8745 = vmatmul.mubr.bf16.gmra.mrb[12].mxu1 %v12967_v2  ;;  %6828 = vst [vmem:[#allocation4 + $0x118] sm:$0xff] %v9991_v10  ;;  %v7134_v39 = vshll.u32 %v6998_v0, 16  ;;  %v7140_v62 = vshll.u32 %v6999_v4, 16  ;;  %v7144_v13 = vshrl.u32 %v6999_v4, 16  ;;  %v6178_v59 = vor.u32 %v6177_v19, %v6173_v23  ;;  %v10982_v11 = vld [vmem:[#allocation4 + $0x100] sm:$0xff] }
 0x26a   : > { %10479 = vmatpush3.bf16.msra.mxu1 %v10915_v44  ;;  %7485 = vst [vmem:[#allocation4 + $0x128] sm:$0xff] %v10023_v51  ;;  %v7133_v6 = vrot.slane %v7131_v55, 4  ;;  %v7150_v16 = vshll.u32 %v7000_v21, 16  ;;  %v9976_v40 = vrot.slane %v6565_v33, 9  ;;  %v6169_v43 = vrot.slane %v6168_v57, 4 }
 0x26b   : > { %v7136_v31 = vrot.slane %v7134_v39, 5  ;;  %v7142_v2 = vrot.slane %v7140_v62, 5  ;;  %v7146_v28 = vrot.slane %v7144_v13, 4  ;;  %v6179_v22 = vrot.slane %v6178_v59, 4  ;;  %v6053_v46 = vld [vmem:[#allocation3 + $0x3c] sm:$0xf] }
 0x26c   : > { %v10720_v41 = vpop.f32.mrb[16].mxu0  ;;  %v7152_v18 = vrot.slane %v7150_v16, 5  ;;  %v6679_v58 = vrot.slane %v6566_v29, 5  ;;  %v6682_v47 = vrot.slane %v6567_v61, 5  ;;  %v6174_v0 = vsel %vm11322_vm14, %v6169_v43, %v6173_v23  ;;  %v6054_v43 = vld [vmem:[#allocation3 + $0x40] sm:$0xf] }
 0x26d   : > { %v4218_v5 = vadd.f32 %v12889_v24, %v10720_v41  ;;  %v4209_v50 = vpop.f32.mrb[17].mxu0  ;;  %v7137_v44 = vor.u32 %v7136_v31, %v7133_v6  ;;  %v7147_v49 = vor.u32 %v7146_v28, %v7142_v2  ;;  %v6184_v1 = vsel %vm11322_vm14, %v6179_v22, %v6183_v35 }
 0x26e   : > { %v4210_v60 = vadd.f32 %v12889_v24, %v4209_v50  ;;  %v10721_v15 = vpop.f32.mrb[18].mxu0  ;;  %v6680_v4 = vsel %vm11256_vm10, %v9976_v40, %v6679_v58  ;;  %v6681_v63 = vrot.slane %v6679_v58, 4  ;;  %v9959_v33 = vcombine.low %v6174_v0, %v6184_v1 }
 0x26f   : > { %v4290_v10 = vmax.f32 %v4218_v5, 0.0  ;;  %v4221_v12 = vadd.f32 %v12889_v24, %v10721_v15  ;;  %v4212_v21 = vpop.f32.mrb[19].mxu0  ;;  %v7138_v23 = vrot.slane %v7137_v44, 4  ;;  %v7148_v55 = vrot.slane %v7147_v49, 4  ;;  %v4897_v44 = vld [vmem:[#allocation3 + $0x6c] sm:$0xf] }
 0x270   : > { %8866 = vmatmul.mubr.bf16.gmra.mrb[64].mxu0 %v10982_v11  ;;  %v4288_v51 = vmax.f32 %v4210_v60, 0.0  ;;  %v4213_v19 = vadd.f32 %v12889_v24, %v4212_v21  ;;  %v6683_v35 = vsel %vm11256_vm10, %v6681_v63, %v6682_v47  ;;  %6540 = vst [vmem:[#allocation4 + $0x110] sm:$0xff] %v9959_v33  ;;  %v4904_v47 = vld [vmem:[#allocation3 + $0x78] sm:$0xf]  ;;  %v6189_v50 = vshll.u32 %v6053_v46, 16 }
 0x271   : > { %8873 = vmatprep.mubr.bf16.mxu0 %v12773_v45  ;;  %v10214_v29 = vpack.c.bf16 %v4290_v10, %v4290_v10  ;;  %v4291_v57 = vmax.f32 %v4221_v12, 0.0  ;;  %v7143_v39 = vsel %vm11322_vm14, %v7138_v23, %v7142_v2  ;;  %v9992_v62 = vcombine.low %v6680_v4, %v6683_v35  ;;  %v10983_v4 = vld [vmem:[#allocation4 + $0x150] sm:$0xff]  ;;  %v4908_v11 = vld [vmem:[#allocation3 + $0x80] sm:$0x1]  ;;  %v6055_v23 = vld [vmem:[#allocation3 + $0x44] sm:$0x1] }
 0x272   : > { %v10212_v13 = vpack.c.bf16 %v4288_v51, %v4288_v51  ;;  %v4289_v61 = vmax.f32 %v4213_v19, 0.0  ;;  %v7153_v59 = vsel %vm11322_vm14, %v7148_v55, %v7152_v18  ;;  %v6186_v45 = vshrl.u32 %v6053_v46, 16  ;;  %v4901_v35 = vld [vmem:[#allocation3 + $0x74] sm:$0x1] }
 0x273   : > { %v4672_v6 = vshrl.u32 %v10214_v29, 16  ;;  %v4675_v16 = vshll.u32 %v10214_v29, 16  ;;  %v10215_v24 = vpack.c.bf16 %v4291_v57, %v4291_v57  ;;  %v10024_v40 = vcombine.low %v7143_v39, %v7153_v59  ;;  %6829 = vst [vmem:[#allocation4 + $0x168] sm:$0xff] %v9992_v62  ;;  %v7001_v57 = vld [vmem:[#allocation3 + $0x54] sm:$0xf] }
 0x274   : > { %v4655_v31 = vshrl.u32 %v10212_v13, 16  ;;  %v4658_v28 = vshll.u32 %v10212_v13, 16  ;;  %v10213_v41 = vpack.c.bf16 %v4289_v61, %v4289_v61  ;;  %v6188_v22 = vrot.slane %v6186_v45, 4  ;;  %v7002_v59 = vld [vmem:[#allocation3 + $0x58] sm:$0xf] }
 0x275   : > { %v4674_v58 = vrot.slane %v4672_v6, 7  ;;  %v4680_v2 = vshrl.u32 %v10215_v24, 16  ;;  %v4683_v5 = vshll.u32 %v10215_v24, 16  ;;  %7486 = vst [vmem:[#allocation4 + $0x178] sm:$0xff] %v10024_v40  ;;  %v6195_v60 = vshll.u32 %v6054_v43, 16 }
 0x276   : > { %v4657_v0 = vrot.slane %v4655_v31, 7  ;;  %v4663_v18 = vshrl.u32 %v10213_v41, 16  ;;  %v4666_v49 = vshll.u32 %v10213_v41, 16  ;;  %v6191_v10 = vrot.slane %v6189_v50, 5  ;;  %v13079_v31 = vld [vmem:[#allocation3 + $0x5c] sm:$0x1] }
 0x277   : > { %v4677_v15 = vor.u32 %v4675_v16, %v4674_v58  ;;  %v4678_v1 = vrot.slane %v4674_v58, 4  ;;  %v4682_v63 = vrot.slane %v4680_v2, 7  ;;  %v6197_v51 = vrot.slane %v6195_v60, 5  ;;  %v4361_v41 = vld [vmem:[#allocation3 + $0xc0] sm:$0x1] }
 0x278   : > { %8874 = vmatmul.mubr.bf16.gmra.mrb[68].mxu0 %v10983_v4  ;;  %v4660_v12 = vor.u32 %v4658_v28, %v4657_v0  ;;  %v4661_v21 = vrot.slane %v4657_v0, 4  ;;  %v4665_v33 = vrot.slane %v4663_v18, 7  ;;  %v6192_v29 = vor.u32 %v6191_v10, %v6188_v22  ;;  %v13081_v28 = vld [vmem:[#allocation3 + $0x48] sm:$0xe]  ;;  %v4358_v50 = vld [vmem:[#allocation3 + $0xb4] sm:$0x1] }
 0x279   : > { %8881 = vmatprep.mubr.bf16.mxu0 %v12780_v27  ;;  %v4905_v46 = vsel %vm12588_vm0, %v4677_v15, %v4904_v47  ;;  %v4685_v19 = vor.u32 %v4683_v5, %v4682_v63  ;;  %v4687_v55 = vrot.slane %v4682_v63, 4  ;;  %v6199_v61 = vshrl.u32 %v6054_v43, 16  ;;  %v4416_v60 = vld [vmem:[#allocation3 + $0xc8] sm:$0x1] }
 0x27a   : > { %4906 = vst [vmem:[#allocation3 + $0x78] sm:$0xf] %v4905_v46  ;;  %v4898_v39 = vsel %vm12588_vm0, %v4660_v12, %v4897_v44  ;;  %v4668_v62 = vor.u32 %v4666_v49, %v4665_v33  ;;  %v4670_v13 = vrot.slane %v4665_v33, 4  ;;  %v6205_v6 = vshll.u32 %v6055_v23, 16 }
 0x27b   : > { %4899 = vst [vmem:[#allocation3 + $0x6c] sm:$0xf] %v4898_v39  ;;  %v4686_v27 = vsel %vm11244_vm9, %v4678_v1, %v4685_v19  ;;  %v4909_v45 = vsel %vm12001_vm2, %v4687_v55, %v4908_v11  ;;  %v6201_v40 = vrot.slane %v6199_v61, 4  ;;  %v7155_v43 = vshrl.u32 %v7001_v57, 16 }
 0x27c   : > { %4907 = vst [vmem:[#allocation3 + $0x7c] sm:$0xf] %v4686_v27  ;;  %4910 = vst [vmem:[#allocation3 + $0x80] sm:$0x1] %v4909_v45  ;;  %v4669_v16 = vsel %vm11244_vm9, %v4661_v21, %v4668_v62  ;;  %v4902_v24 = vsel %vm12001_vm2, %v4670_v13, %v4901_v35  ;;  %v6193_v22 = vrot.slane %v6192_v29, 4  ;;  %v6207_v58 = vrot.slane %v6205_v6, 5 }
 0x27d   : > { %4900 = vst [vmem:[#allocation3 + $0x70] sm:$0xf] %v4669_v16  ;;  %4903 = vst [vmem:[#allocation3 + $0x74] sm:$0x1] %v4902_v24  ;;  %v7158_v47 = vshll.u32 %v7001_v57, 16  ;;  %v7164_v2 = vshll.u32 %v7002_v59, 16  ;;  %v6202_v0 = vor.u32 %v6201_v40, %v6197_v51 }
 0x27e   : > { %v4362_v5 = vsel %vm12001_vm2, 0, %v4361_v41  ;;  %v13085_v44 = vrot.slane %v7155_v43, 4  ;;  %v7168_v18 = vshrl.u32 %v7002_v59, 16  ;;  %v4359_v49 = vsel %vm12001_vm2, 0, %v4358_v50 }
 0x27f   : > { %4363 = vst [vmem:[#allocation3 + $0xc0] sm:$0x1] %v4362_v5  ;;  %v13092_v15 = vrot.slane %v7158_v47, 5  ;;  %v13094_v1 = vrot.slane %v7164_v2, 5  ;;  %v7174_v4 = vshll.u32 %v13079_v31, 16  ;;  %v4417_v63 = vsel %vm12448_vm5, 0, %v4416_v60 }
 0x280   : > { %8882 = vmatmul.mubr.bf16.gmra.mrb[72].mxu0 %v9929_v48  ;;  %4360 = vst [vmem:[#allocation3 + $0xb4] sm:$0x1] %v4359_v49  ;;  %v6203_v11 = vrot.slane %v6202_v0, 4  ;;  %v13100_v56 = vrot.slane %v7168_v18, 4  ;;  %v9977_v52 = vrot.slane %v13081_v28, 9  ;;  %v6198_v21 = vsel %vm11322_vm14, %v6193_v22, %v6197_v51  ;;  %v10927_v31 = vld [vmem:[%s14411_s3 + $0x188] sm:$0xff]  }
 0x281   : > { %8889 = vmatprep.mubr.bf16.mxu0 %v12960_v8  ;;  %v5127_v48 = vld [vmem:[#allocation3 + $0x78] sm:$0xf]  ;;  %4418 = vst [vmem:[#allocation3 + $0xc8] sm:$0x1] %v4417_v63  ;;  %v7161_v2 = vor.u32 %v13092_v15, %v13085_v44 }
 0x282   : > { %v5124_v10 = vld [vmem:[#allocation3 + $0x6c] sm:$0xf]  ;;  %v6208_v33 = vsel %vm11322_vm14, %v6203_v11, %v6207_v58  ;;  %v5386_v57 = vshrl.u32 %v5127_v48, 16  ;;  %v7171_v37 = vor.u32 %v13100_v56, %v13094_v1  ;;  %v5389_v18 = vshll.u32 %v5127_v48, 16  ;;  %v5639_v63 = vld [vmem:[#allocation3 + $0x78] sm:$0xe] }
 0x283   : > { %v5636_v12 = vld [vmem:[#allocation3 + $0x6c] sm:$0xe]  ;;  %v13107_v8 = vld [vmem:[#allocation3 + $0x78] sm:$0xff]   ;;  %v5362_v23 = vshrl.u32 %v5124_v10, 16  ;;  %v5365_v46 = vshll.u32 %v5124_v10, 16  ;;  %v9960_v55 = vcombine.low %v6198_v21, %v6208_v33 }
 0x284   : > { %v9917_v19 = vrot.slane %v5636_v12, 9  ;;  %v13109_v35 = vld [vmem:[#allocation3 + $0x6c] sm:$0xff]   ;;  %v5126_v39 = vld [vmem:[#allocation3 + $0x74] sm:$0x1]  ;;  %v13116_v41 = vld [vmem:[#allocation3 + $0x78] sm:$0xff]   ;;  %v5391_v33 = vrot.slane %v5389_v18, 5 }
 0x285   : > { %v5125_v29 = vld [vmem:[#allocation3 + $0x70] sm:$0xf]  ;;  %v5364_v62 = vrot.slane %v5362_v23, 4  ;;  %v5367_v13 = vrot.slane %v5365_v46, 5  ;;  %6541 = vst [vmem:[#allocation4 + $0x160] sm:$0xff] %v9960_v55  ;;  %v5381_v51 = vshll.u32 %v5126_v39, 16 }
 0x286   : > { %v5371_v61 = vshll.u32 %v5125_v29, 16  ;;  %v5375_v59 = vshrl.u32 %v5125_v29, 16  ;;  %v5637_v27 = vld [vmem:[#allocation3 + $0x70] sm:$0xf]  ;;  %v5638_v45 = vld [vmem:[#allocation3 + $0x74] sm:$0x1] }
 0x287   : > { %v13111_v6 = vld [vmem:[#allocation3 + $0x6c] sm:$0xff]   ;;  %v5368_v16 = vor.u32 %v5367_v13, %v5364_v62  ;;  %v5770_v43 = vrot.slane %v5637_v27, 5  ;;  %v5383_v22 = vrot.slane %v5381_v51, 5  ;;  %v5773_v58 = vrot.slane %v5638_v45, 5  ;;  %v5128_v47 = vld [vmem:[#allocation3 + $0x7c] sm:$0xf] }
 0x288   : > { %8890 = vmatmul.mubr.bf16.gmra.mrb[76].mxu0 %v9930_v7  ;;  %v5373_v24 = vrot.slane %v5371_v61, 5  ;;  %v5377_v40 = vrot.slane %v5375_v59, 4  ;;  %5090 = vst [vmem:[#allocation4 + $0x2d0] sm:$0xff] %v13111_v6  ;;  %v5129_v0 = vld [vmem:[#allocation3 + $0x80] sm:$0x1]  ;;  %5091 = vst [vmem:[#allocation4 + $0x320] sm:$0xff] %v13116_v41 }
 0x289   : > { %8897 = vmatprep.mubr.bf16.mxu0 %v12964_v32  ;;  %v5369_v26 = vrot.slane %v5368_v16, 4  ;;  %v13126_v5 = vsel %vm11256_vm10, %v9917_v19, %v5770_v43  ;;  %v5772_v50 = vrot.slane %v5770_v43, 4  ;;  %v5388_v32 = vrot.slane %v5386_v57, 4  ;;  %v5640_v10 = vld [vmem:[#allocation3 + $0x7c] sm:$0xf]  ;;  %v10918_v19 = vld [vmem:[%s14411_s3 + $0x160] sm:$0xff]  }
 0x28a   : > { %v5378_v7 = vor.u32 %v5377_v40, %v5373_v24  ;;  %v5395_v49 = vshll.u32 %v5128_v47, 16  ;;  %v5399_v60 = vshrl.u32 %v5128_v47, 16  ;;  %v5405_v56 = vshll.u32 %v5129_v0, 16  ;;  %v5641_v12 = vld [vmem:[#allocation3 + $0x80] sm:$0x1]  ;;  %10480 = vmatprep.subr.bf16.mxu1 %v10918_v19  ;;  %v10921_v27 = vld [vmem:[%s14411_s3 + $0x168] sm:$0xff]  }
 0x28b   : > { %v5374_v44 = vsel %vm11322_vm14, %v5369_v26, %v5373_v24  ;;  %v13133_v11 = vsel %vm11256_vm10, %v5772_v50, %v5773_v58  ;;  %v4413_v46 = vld [vmem:[#allocation3 + $0xbc] sm:$0x1]  ;;  %v9918_v57 = vrot.slane %v5639_v63, 9  ;;  %v5777_v39 = vrot.slane %v5640_v10, 5  ;;  %v10919_v62 = vld [vmem:[%s14411_s3 + $0x120] sm:$0xff]   ;;  %v10922_v43 = vld [vmem:[%s14411_s3 + $0x128] sm:$0xff]  }
 0x28c   : > { %v5379_v15 = vrot.slane %v5378_v7, 4  ;;  %v9933_v21 = vcombine.low %v13126_v5, %v13133_v11  ;;  %v5397_v23 = vrot.slane %v5395_v49, 5  ;;  %v5401_v48 = vrot.slane %v5399_v60, 4  ;;  %v6569_v45 = vld [vmem:[#allocation3 + $0x4c] sm:$0xf]  ;;  %10481 = vmatpush3.bf16.msra.mxu1 %v10919_v62  ;;  %v10925_v58 = vld [vmem:[%s14411_s3 + $0x180] sm:$0xff]  }
 0x28d   : > { %v5407_v29 = vrot.slane %v5405_v56, 5  ;;  %v5392_v61 = vor.u32 %v5391_v33, %v5388_v32  ;;  %v5780_v51 = vrot.slane %v5641_v12, 5  ;;  %v6570_v16 = vld [vmem:[#allocation3 + $0x50] sm:$0x1]  ;;  %v5779_v24 = vrot.slane %v5777_v39, 4  ;;  %v10926_v26 = vld [vmem:[%s14411_s3 + $0x1c8] sm:$0xff]   ;;  %10482 = vmatprep.subr.bf16.mxu1 %v10921_v27 }
 0x28e   : > { %v5384_v55 = vsel %vm11322_vm14, %v5379_v15, %v5383_v22  ;;  %v5402_v59 = vor.u32 %v5401_v48, %v5397_v23  ;;  %v4414_v40 = vsel %vm12448_vm5, 0, %v4413_v46  ;;  %v10923_v22 = vld [vmem:[%s14411_s3 + $0x1c0] sm:$0xff]   ;;  %v7162_v47 = vrot.slane %v7161_v2, 4  ;;  %v6056_v50 = vld [vmem:[#allocation3 + $0x48] sm:$0xf] }
 0x28f   : > { %v9901_v13 = vcombine.low %v5374_v44, %v5384_v55  ;;  %v5393_v38 = vrot.slane %v5392_v61, 4  ;;  %4415 = vst [vmem:[#allocation3 + $0xbc] sm:$0x1] %v4414_v40  ;;  %v7172_v7 = vrot.slane %v7171_v37, 4  ;;  %v13173_v2 = vsel %vm11256_vm10, %v5779_v24, %v5780_v51  ;;  %v6057_v18 = vld [vmem:[#allocation3 + $0x4c] sm:$0xf]  ;;  %10584 = vmatprep.subr.bf16.mxu0 %v10923_v22 }
 0x290   : > { %8898 = vmatmul.mubr.bf16.gmra.mrb[80].mxu0 %v9931_v20  ;;  %v5403_v53 = vrot.slane %v5402_v59, 4  ;;  %v13165_v20 = vsel %vm11256_vm10, %v9918_v57, %v5777_v39  ;;  %v7167_v0 = vsel %vm11322_vm14, %v7162_v47, %v13094_v1  ;;  %v7176_v32 = vrot.slane %v7174_v4, 5  ;;  %v6058_v44 = vld [vmem:[#allocation3 + $0x50] sm:$0x1]  ;;  %v7004_v15 = vld [vmem:[#allocation3 + $0x60] sm:$0xf]  ;;  %10483 = vmatpush3.bf16.msra.mxu1 %v10922_v43 }
 0x291   : > { %8905 = vmatprep.mubr.bf16.mxu0 %v13109_v35  ;;  %8752 = vmatprep.mubr.bf16.mxu1 %v9901_v13  ;;  %v10930_v35 = vld [vmem:[%s14411_s3 + $0x170] sm:$0xff]   ;;  %v6686_v37 = vrot.slane %v6569_v45, 5  ;;  %v9934_v60 = vcombine.low %v13165_v20, %v13173_v2  ;;  %v6689_v63 = vrot.slane %v6570_v16, 5  ;;  %v7005_v33 = vld [vmem:[#allocation3 + $0x64] sm:$0xf]  ;;  %v6210_v46 = vshrl.u32 %v6056_v50, 16 }
 0x292   : > { %8753 = vmatmul.mubr.bf16.gmra.mrb[16].mxu1 %v13111_v6  ;;  %v5398_v6 = vsel %vm11322_vm14, %v5393_v38, %v5397_v23  ;;  %v5408_v49 = vsel %vm11322_vm14, %v5403_v53, %v5407_v29  ;;  %10585 = vmatpush3.bf16.msra.mxu0 %v10925_v58  ;;  %v10931_v1 = vld [vmem:[%s14411_s3 + $0x130] sm:$0xff]   ;;  %v7177_v4 = vsel %vm11322_vm14, %v7172_v7, %v7176_v32  ;;  %v6213_v19 = vshll.u32 %v6056_v50, 16  ;;  %v7006_v29 = vld [vmem:[#allocation3 + $0x68] sm:$0x1]  ;;  %v10939_v61 = vld [vmem:[%s14411_s3 + $0x178] sm:$0xff]  }
 0x293   : > { %v9902_v56 = vcombine.low %v5398_v6, %v5408_v49  ;;  %v6687_v10 = vsel %vm11256_vm10, %v9977_v52, %v6686_v37  ;;  %v6688_v12 = vrot.slane %v6686_v37, 4  ;;  %10586 = vmatprep.subr.bf16.mxu0 %v10926_v26  ;;  %v10928_v23 = vld [vmem:[%s14411_s3 + $0x1d0] sm:$0xff]   ;;  %10484 = vmatprep.subr.bf16.mxu1 %v10930_v35  ;;  %v10025_v48 = vcombine.low %v7167_v0, %v7177_v4  ;;  %v6572_v16 = vld [vmem:[#allocation3 + $0x58] sm:$0xf]  ;;  %v6573_v7 = vld [vmem:[#allocation3 + $0x5c] sm:$0x1] }
 0x294   : > { %v6219_v55 = vshll.u32 %v6057_v18, 16  ;;  %v6571_v57 = vld [vmem:[#allocation3 + $0x54] sm:$0xe]  ;;  %v6223_v39 = vshrl.u32 %v6057_v18, 16  ;;  %v6229_v52 = vshll.u32 %v6058_v44, 16  ;;  %v7179_v62 = vshrl.u32 %v7004_v15, 16  ;;  %10485 = vmatpush3.bf16.msra.mxu1 %v10931_v1 }
 0x295   : > { %8760 = vmatprep.mubr.bf16.mxu1 %v9902_v56  ;;  %v6690_v28 = vsel %vm11256_vm10, %v6688_v12, %v6689_v63  ;;  %v10958_v13 = vld [vmem:[#allocation3 + $0x6c] sm:$0xff]   ;;  %7487 = vst [vmem:[#allocation4 + $0x1c8] sm:$0xff] %v10025_v48  ;;  %v6212_v51 = vrot.slane %v6210_v46, 4  ;;  %v6215_v27 = vrot.slane %v6213_v19, 5  ;;  %v10941_v24 = vld [vmem:[%s14411_s3 + $0x138] sm:$0xff]   ;;  %v7182_v9 = vshll.u32 %v7004_v15, 16  ;;  %10486 = vmatprep.subr.bf16.mxu1 %v10939_v61 }
 0x296   : > { %v9993_v59 = vcombine.low %v6687_v10, %v6690_v28  ;;  %v6221_v45 = vrot.slane %v6219_v55, 5  ;;  %v6225_v40 = vrot.slane %v6223_v39, 4  ;;  %v6231_v43 = vrot.slane %v6229_v52, 5  ;;  %6977 = vst [vmem:[#allocation4 + $0x260] sm:$0xff] %v10958_v13  ;;  %10587 = vmatpush3.bf16.msra.mxu0 %v10927_v31  ;;  %v10929_v58 = vld [vmem:[%s14411_s3 + $0x190] sm:$0xff]   ;;  %v10960_v38 = vld [vmem:[#allocation3 + $0x78] sm:$0xff]  }
 0x297   : > { %v7181_v22 = vrot.slane %v7179_v62, 4  ;;  %v6216_v47 = vor.u32 %v6215_v27, %v6212_v51  ;;  %v7188_v30 = vshll.u32 %v7005_v33, 16  ;;  %10588 = vmatprep.subr.bf16.mxu0 %v10928_v23  ;;  %v10932_v53 = vld [vmem:[%s14411_s3 + $0x1d8] sm:$0xff]   ;;  %v9978_v50 = vrot.slane %v6571_v57, 9  ;;  %v6059_v6 = vld [vmem:[#allocation3 + $0x54] sm:$0xf] }
 0x298   : > { %8906 = vmatmul.mubr.bf16.gmra.mrb[84].mxu0 %v9932_v36  ;;  %6830 = vst [vmem:[#allocation4 + $0x1b8] sm:$0xff] %v9993_v59  ;;  %v7192_v36 = vshrl.u32 %v7005_v33, 16  ;;  %v6226_v26 = vor.u32 %v6225_v40, %v6221_v45  ;;  %v6693_v35 = vrot.slane %v6572_v16, 5  ;;  %v7184_v32 = vrot.slane %v7182_v9, 5  ;;  %6978 = vst [vmem:[#allocation4 + $0x2b0] sm:$0xff] %v10960_v38  ;;  %10487 = vmatpush3.bf16.msra.mxu1 %v10941_v24  ;;  %v10933_v56 = vld [vmem:[%s14411_s3 + $0x198] sm:$0xff]  }
 0x299   : > { %8913 = vmatprep.mubr.bf16.mxu0 %v13107_v8  ;;  %v7198_v8 = vshll.u32 %v7006_v29, 16  ;;  %v6217_v0 = vrot.slane %v6216_v47, 4  ;;  %v7190_v37 = vrot.slane %v7188_v30, 5  ;;  %9292 = vmatprep.subr.bf16.mxu1 %v11103_v3  ;;  %v6696_v10 = vrot.slane %v6573_v7, 5  ;;  %v13234_v12 = vld [vmem:[%s14410_s2] ss:$0 sm:$0xff] }
 0x29a   : > { %8761 = vmatmul.mubr.bf16.gmra.mrb[20].mxu1 %v13116_v41  ;;  %v7194_v18 = vrot.slane %v7192_v36, 4  ;;  %v6227_v49 = vrot.slane %v6226_v26, 4  ;;  %v6694_v63 = vsel %vm11256_vm10, %v9978_v50, %v6693_v35  ;;  %v6695_v44 = vrot.slane %v6693_v35, 4  ;;  %10589 = vmatpush3.bf16.msra.mxu0 %v10929_v58  ;;  %v10935_v48 = vld [vmem:[%s14411_s3 + $0x1e0] sm:$0xff]   ;;  %v6060_v51 = vld [vmem:[#allocation3 + $0x58] sm:$0xf] }
 0x29b   : > { %v7200_v41 = vrot.slane %v7198_v8, 5  ;;  %v6222_v31 = vsel %vm11322_vm14, %v6217_v0, %v6221_v45  ;;  %v7185_v1 = vor.u32 %v7184_v32, %v7181_v22  ;;  %10590 = vmatprep.subr.bf16.mxu0 %v10932_v53  ;;  %v6234_v19 = vshrl.u32 %v6059_v6, 16  ;;  %v10937_v24 = vld [vmem:[%s14411_s3 + $0x1a0] sm:$0xff]   ;;  %v4918_v7 = vld [vmem:[#allocation3 + $0x90] sm:$0xf]  ;;  %v10940_v0 = vld [vmem:[%s14411_s3 + $0x1a8] sm:$0xff]  }
 0x29c   : > { %v10724_v15 = vpop.f32.mrb[20].mxu0  ;;  %v7195_v4 = vor.u32 %v7194_v18, %v7190_v37  ;;  %v6232_v46 = vsel %vm11322_vm14, %v6227_v49, %v6231_v43  ;;  %v6237_v55 = vshll.u32 %v6059_v6, 16  ;;  %v6697_v59 = vsel %vm11256_vm10, %v6695_v44, %v6696_v10  ;;  %v10938_v43 = vld [vmem:[%s14411_s3 + $0x1e8] sm:$0xff]   ;;  %v4911_v6 = vld [vmem:[#allocation3 + $0x84] sm:$0xf] }
 0x29d   : > { %v4234_v33 = vadd.f32 %v13234_v12, %v10724_v15  ;;  %v4225_v23 = vpop.f32.mrb[21].mxu0  ;;  %v9961_v28 = vcombine.low %v6222_v31, %v6232_v46  ;;  %v7186_v39 = vrot.slane %v7185_v1, 4  ;;  %v6236_v27 = vrot.slane %v6234_v19, 4 }
 0x29e   : > { %v4226_v29 = vadd.f32 %v13234_v12, %v4225_v23  ;;  %v10725_v57 = vpop.f32.mrb[22].mxu0  ;;  %v7196_v52 = vrot.slane %v7195_v4, 4  ;;  %10591 = vmatpush3.bf16.msra.mxu0 %v10933_v56  ;;  %v9994_v58 = vcombine.low %v6694_v63, %v6697_v59  ;;  %v6239_v30 = vrot.slane %v6237_v55, 5  ;;  %v4922_v56 = vld [vmem:[#allocation3 + $0x98] sm:$0x1] }
 0x29f   : > { %v4294_v62 = vmax.f32 %v4234_v33, 0.0  ;;  %v4237_v13 = vadd.f32 %v13234_v12, %v10725_v57  ;;  %v4228_v61 = vpop.f32.mrb[23].mxu0  ;;  %6542 = vst [vmem:[#allocation4 + $0x1b0] sm:$0xff] %v9961_v28  ;;  %v7191_v40 = vsel %vm11322_vm14, %v7186_v39, %v7190_v37  ;;  %10592 = vmatprep.subr.bf16.mxu0 %v10935_v48  ;;  %v6243_v36 = vshll.u32 %v6060_v51, 16  ;;  %v6061_v33 = vld [vmem:[#allocation3 + $0x5c] sm:$0x1] }
 0x2a0   : > { %8914 = vmatmul.mubr.bf16.gmra.mrb[88].mxu0 %v9933_v21  ;;  %v4292_v45 = vmax.f32 %v4226_v29, 0.0  ;;  %v4229_v16 = vadd.f32 %v13234_v12, %v4228_v61  ;;  %v7201_v5 = vsel %vm11322_vm14, %v7196_v52, %v7200_v41  ;;  %6831 = vst [vmem:[#allocation4 + $0x208] sm:$0xff] %v9994_v58  ;;  %v6247_v26 = vshrl.u32 %v6060_v51, 16  ;;  %v10942_v41 = vld [vmem:[%s14411_s3 + $0x1f0] sm:$0xff]   ;;  %v7007_v28 = vld [vmem:[#allocation3 + $0x6c] sm:$0xf] }
 0x2a1   : > { %v10218_v11 = vpack.c.bf16 %v4294_v62, %v4294_v62  ;;  %v4295_v21 = vmax.f32 %v4237_v13, 0.0  ;;  %v10026_v22 = vcombine.low %v7191_v40, %v7201_v5  ;;  %v6240_v32 = vor.u32 %v6239_v30, %v6236_v27  ;;  %v10944_v57 = vld [vmem:[%s14411_s3 + $0x1b0] sm:$0xff]   ;;  %v4915_v13 = vld [vmem:[#allocation3 + $0x8c] sm:$0x1]  ;;  %v10945_v61 = vld [vmem:[%s14411_s3 + $0x1f8] sm:$0xff]  }
 0x2a2   : > { %v10216_v47 = vpack.c.bf16 %v4292_v45, %v4292_v45  ;;  %v4293_v9 = vmax.f32 %v4229_v16, 0.0  ;;  %10593 = vmatpush3.bf16.msra.mxu0 %v10937_v24  ;;  %v6245_v63 = vrot.slane %v6243_v36, 5  ;;  %v6249_v48 = vrot.slane %v6247_v26, 4  ;;  %v7008_v24 = vld [vmem:[#allocation3 + $0x70] sm:$0xf] }
 0x2a3   : > { %v4706_v38 = vshrl.u32 %v10218_v11, 16  ;;  %v10219_v53 = vpack.c.bf16 %v4295_v21, %v4295_v21  ;;  %7488 = vst [vmem:[#allocation4 + $0x218] sm:$0xff] %v10026_v22  ;;  %v4709_v8 = vshll.u32 %v10218_v11, 16  ;;  %10594 = vmatprep.subr.bf16.mxu0 %v10938_v43  ;;  %v6241_v23 = vrot.slane %v6240_v32, 4  ;;  %v7009_v40 = vld [vmem:[#allocation3 + $0x74] sm:$0x1] }
 0x2a4   : > { %v4689_v50 = vshrl.u32 %v10216_v47, 16  ;;  %v10217_v35 = vpack.c.bf16 %v4293_v9, %v4293_v9  ;;  %v4692_v18 = vshll.u32 %v10216_v47, 16  ;;  %v6250_v59 = vor.u32 %v6249_v48, %v6245_v63  ;;  %v6575_v22 = vld [vmem:[#allocation3 + $0x64] sm:$0xf]  ;;  %v10946_v9 = vld [vmem:[%s14411_s3 + $0x1b8] sm:$0xff]  }
 0x2a5   : > { %v4708_v37 = vrot.slane %v4706_v38, 7  ;;  %v4714_v49 = vshrl.u32 %v10219_v53, 16  ;;  %v4717_v15 = vshll.u32 %v10219_v53, 16  ;;  %v6253_v16 = vshll.u32 %v6061_v33, 16  ;;  %v6574_v38 = vld [vmem:[#allocation3 + $0x60] sm:$0xe] }
 0x2a6   : > { %v4691_v44 = vrot.slane %v4689_v50, 7  ;;  %v4697_v31 = vshrl.u32 %v10217_v35, 16  ;;  %v4700_v1 = vshll.u32 %v10217_v35, 16  ;;  %10595 = vmatpush3.bf16.msra.mxu0 %v10940_v0  ;;  %v6251_v21 = vrot.slane %v6250_v59, 4 }
 0x2a7   : > { %v4711_v4 = vor.u32 %v4709_v8, %v4708_v37  ;;  %v4716_v10 = vrot.slane %v4714_v49, 7  ;;  %v4712_v46 = vrot.slane %v4708_v37, 4  ;;  %10596 = vmatprep.subr.bf16.mxu0 %v10942_v41  ;;  %v7203_v43 = vshrl.u32 %v7007_v28, 16 }
 0x2a8   : > { %v4694_v19 = vor.u32 %v4692_v18, %v4691_v44  ;;  %v4695_v55 = vrot.slane %v4691_v44, 4  ;;  %v4699_v29 = vrot.slane %v4697_v31, 7  ;;  %v6255_v30 = vrot.slane %v6253_v16, 5 }
 0x2a9   : > { %v4919_v39 = vsel %vm12588_vm0, %v4711_v4, %v4918_v7  ;;  %v4719_v52 = vor.u32 %v4717_v15, %v4716_v10  ;;  %v4721_v62 = vrot.slane %v4716_v10, 4  ;;  %v7206_v36 = vshll.u32 %v7007_v28, 16  ;;  %v6576_v7 = vld [vmem:[#allocation3 + $0x68] sm:$0x1] }
 0x2aa   : > { %4920 = vst [vmem:[#allocation3 + $0x90] sm:$0xf] %v4919_v39  ;;  %v4912_v51 = vsel %vm12588_vm0, %v4694_v19, %v4911_v6  ;;  %v4702_v27 = vor.u32 %v4700_v1, %v4699_v29  ;;  %v4704_v45 = vrot.slane %v4699_v29, 4  ;;  %10597 = vmatpush3.bf16.msra.mxu0 %v10944_v57  ;;  %v7212_v53 = vshll.u32 %v7008_v24, 16 }
 0x2ab   : > { %4913 = vst [vmem:[#allocation3 + $0x84] sm:$0xf] %v4912_v51  ;;  %v4720_v5 = vsel %vm11244_vm9, %v4712_v46, %v4719_v52  ;;  %v4923_v11 = vsel %vm12001_vm2, %v4721_v62, %v4922_v56  ;;  %10598 = vmatprep.subr.bf16.mxu0 %v10945_v61  ;;  %v7216_v26 = vshrl.u32 %v7008_v24, 16  ;;  %v7222_v8 = vshll.u32 %v7009_v40, 16 }
 0x2ac   : > { %4921 = vst [vmem:[#allocation3 + $0x94] sm:$0xf] %v4720_v5  ;;  %4924 = vst [vmem:[#allocation3 + $0x98] sm:$0x1] %v4923_v11  ;;  %v4703_v58 = vsel %vm11244_vm9, %v4695_v55, %v4702_v27  ;;  %v4916_v47 = vsel %vm12001_vm2, %v4704_v45, %v4915_v13  ;;  %v6246_v50 = vsel %vm11322_vm14, %v6241_v23, %v6245_v63  ;;  %v13291_v0 = vrot.slane %v7203_v43, 4 }
 0x2ad   : > { %4914 = vst [vmem:[#allocation3 + $0x88] sm:$0xf] %v4703_v58  ;;  %4917 = vst [vmem:[#allocation3 + $0x8c] sm:$0x1] %v4916_v47  ;;  %v6256_v35 = vsel %vm11322_vm14, %v6251_v21, %v6255_v30  ;;  %v6700_v32 = vrot.slane %v6575_v22, 5  ;;  %v13293_v18 = vrot.slane %v7206_v36, 5 }
 0x2ae   : > { %v9962_v37 = vcombine.low %v6246_v50, %v6256_v35  ;;  %v13295_v6 = vrot.slane %v7212_v53, 5  ;;  %v9979_v49 = vrot.slane %v6574_v38, 9  ;;  %10599 = vmatpush3.bf16.msra.mxu0 %v10946_v9  ;;  %v13297_v41 = vrot.slane %v7216_v26, 4 }
 0x2af   : > { %v13299_v44 = vrot.slane %v7222_v8, 5  ;;  %v6702_v15 = vrot.slane %v6700_v32, 4  ;;  %v6703_v56 = vrot.slane %v6576_v7, 5  ;;  %v7209_v22 = vor.u32 %v13293_v18, %v13291_v0 }
 0x2b0   : > { %6543 = vst [vmem:[#allocation4 + $0x200] sm:$0xff] %v9962_v37  ;;  %v6701_v4 = vsel %vm11256_vm10, %v9979_v49, %v6700_v32  ;;  %v7219_v58 = vor.u32 %v13297_v41, %v13295_v6 }
 0x2b1   : > { %v5133_v63 = vld [vmem:[#allocation3 + $0x90] sm:$0xf]  ;;  %v6704_v10 = vsel %vm11256_vm10, %v6702_v15, %v6703_v56 }
 0x2b2   : > { %v5130_v31 = vld [vmem:[#allocation3 + $0x84] sm:$0xf]  ;;  %v9995_v19 = vcombine.low %v6701_v4, %v6704_v10  ;;  %v5434_v57 = vshrl.u32 %v5133_v63, 16  ;;  %v5437_v36 = vshll.u32 %v5133_v63, 16  ;;  %v5645_v26 = vld [vmem:[#allocation3 + $0x90] sm:$0xe] }
 0x2b3   : > { %v5642_v1 = vld [vmem:[#allocation3 + $0x84] sm:$0xe]  ;;  %v10907_v33 = vld [vmem:[#allocation3 + $0x90] sm:$0xff]   ;;  %v5410_v23 = vshrl.u32 %v5130_v31, 16  ;;  %v5413_v48 = vshll.u32 %v5130_v31, 16  ;;  %v9920_v63 = vrot.slane %v5645_v26, 9 }
 0x2b4   : > { %v9919_v46 = vrot.slane %v5642_v1, 9  ;;  %v10906_v55 = vld [vmem:[#allocation3 + $0x84] sm:$0xff]   ;;  %v5132_v28 = vld [vmem:[#allocation3 + $0x8c] sm:$0x1]  ;;  %6832 = vst [vmem:[#allocation4 + $0x258] sm:$0xff] %v9995_v19  ;;  %v13308_v5 = vld [vmem:[#allocation3 + $0x90] sm:$0xff]  }
 0x2b5   : > { %v5131_v29 = vld [vmem:[#allocation3 + $0x88] sm:$0xf]  ;;  %v5412_v39 = vrot.slane %v5410_v23, 4  ;;  %v5415_v52 = vrot.slane %v5413_v48, 5  ;;  %8921 = vmatprep.mubr.bf16.mxu0 %v10906_v55  ;;  %v5429_v61 = vshll.u32 %v5132_v28, 16  ;;  %5093 = vst [vmem:[#allocation4 + $0x3c0] sm:$0xff] %v13308_v5 }
 0x2b6   : > { %v5419_v62 = vshll.u32 %v5131_v29, 16  ;;  %v5423_v13 = vshrl.u32 %v5131_v29, 16  ;;  %v5643_v59 = vld [vmem:[#allocation3 + $0x88] sm:$0xf]  ;;  %v5644_v51 = vld [vmem:[#allocation3 + $0x8c] sm:$0x1]  ;;  %8922 = vmatmul.mubr.bf16.gmra.mrb[92].mxu0 %v9934_v60 }
 0x2b7   : > { %v10910_v27 = vld [vmem:[#allocation3 + $0x84] sm:$0xff]   ;;  %v5416_v45 = vor.u32 %v5415_v52, %v5412_v39  ;;  %v5784_v40 = vrot.slane %v5643_v59, 5  ;;  %8929 = vmatprep.mubr.bf16.mxu0 %v10907_v33  ;;  %v5431_v11 = vrot.slane %v5429_v61, 5  ;;  %v5787_v21 = vrot.slane %v5644_v51, 5  ;;  %v5134_v43 = vld [vmem:[#allocation3 + $0x94] sm:$0xf] }
 0x2b8   : > { %v5421_v16 = vrot.slane %v5419_v62, 5  ;;  %v5425_v24 = vrot.slane %v5423_v13, 4  ;;  %5092 = vst [vmem:[#allocation4 + $0x370] sm:$0xff] %v10910_v27  ;;  %v5135_v9 = vld [vmem:[#allocation3 + $0x98] sm:$0x1]  ;;  %v5436_v30 = vrot.slane %v5434_v57, 4 }
 0x2b9   : > { %v5417_v47 = vrot.slane %v5416_v45, 4  ;;  %v5785_v2 = vsel %vm11256_vm10, %v9919_v46, %v5784_v40  ;;  %v5786_v60 = vrot.slane %v5784_v40, 4  ;;  %v5443_v38 = vshll.u32 %v5134_v43, 16  ;;  %v5646_v0 = vld [vmem:[#allocation3 + $0x94] sm:$0xf]  ;;  %v10961_v4 = vld [vmem:[#allocation3 + $0x84] sm:$0xff]  }
 0x2ba   : > { %v5426_v20 = vor.u32 %v5425_v24, %v5421_v16  ;;  %v5447_v53 = vshrl.u32 %v5134_v43, 16  ;;  %v5453_v35 = vshll.u32 %v5135_v9, 16  ;;  %v5647_v32 = vld [vmem:[#allocation3 + $0x98] sm:$0x1]  ;;  %v5439_v18 = vrot.slane %v5437_v36, 5  ;;  %v10963_v19 = vld [vmem:[#allocation3 + $0x90] sm:$0xff]  }
 0x2bb   : > { %v5422_v8 = vsel %vm11322_vm14, %v5417_v47, %v5421_v16  ;;  %v5788_v50 = vsel %vm11256_vm10, %v5786_v60, %v5787_v21  ;;  %v5445_v49 = vrot.slane %v5443_v38, 5  ;;  %v5791_v31 = vrot.slane %v5646_v0, 5  ;;  %v6062_v1 = vld [vmem:[#allocation3 + $0x60] sm:$0xf]  ;;  %v6063_v46 = vld [vmem:[#allocation3 + $0x64] sm:$0xf] }
 0x2bc   : > { %v5427_v7 = vrot.slane %v5426_v20, 4  ;;  %v9935_v37 = vcombine.low %v5785_v2, %v5788_v50  ;;  %v5449_v41 = vrot.slane %v5447_v53, 4  ;;  %v5455_v56 = vrot.slane %v5453_v35, 5  ;;  %6979 = vst [vmem:[#allocation4 + $0x300] sm:$0xff] %v10961_v4  ;;  %6980 = vst [vmem:[#allocation4 + $0x350] sm:$0xff] %v10963_v19 }
 0x2bd   : > { %v5440_v33 = vor.u32 %v5439_v18, %v5436_v30  ;;  %v5794_v48 = vrot.slane %v5647_v32, 5  ;;  %v13325_v55 = vsel %vm11256_vm10, %v9920_v63, %v5791_v31  ;;  %v5793_v29 = vrot.slane %v5791_v31, 4  ;;  %v6064_v45 = vld [vmem:[#allocation3 + $0x68] sm:$0x1]  ;;  %v7010_v24 = vld [vmem:[#allocation3 + $0x78] sm:$0xf] }
 0x2be   : > { %v5432_v15 = vsel %vm11322_vm14, %v5427_v7, %v5431_v11  ;;  %v5450_v23 = vor.u32 %v5449_v41, %v5445_v49  ;;  %8930 = vmatmul.mubr.bf16.gmra.mrb[96].mxu0 %v9935_v37  ;;  %v7210_v57 = vrot.slane %v7209_v22, 4  ;;  %v7220_v28 = vrot.slane %v7219_v58, 4  ;;  %v7011_v43 = vld [vmem:[#allocation3 + $0x7c] sm:$0xf]  ;;  %v7012_v22 = vld [vmem:[#allocation3 + $0x80] sm:$0x1] }
 0x2bf   : > { %v9903_v10 = vcombine.low %v5422_v8, %v5432_v15  ;;  %v5441_v39 = vrot.slane %v5440_v33, 4  ;;  %v6258_v62 = vshrl.u32 %v6062_v1, 16  ;;  %v6261_v13 = vshll.u32 %v6062_v1, 16  ;;  %v6578_v2 = vld [vmem:[#allocation3 + $0x70] sm:$0xf] }
 0x2c0   : > { %v5451_v52 = vrot.slane %v5450_v23, 4  ;;  %v13329_v61 = vsel %vm11256_vm10, %v5793_v29, %v5794_v48  ;;  %v7215_v59 = vsel %vm11322_vm14, %v7210_v57, %v13295_v6  ;;  %v7225_v51 = vsel %vm11322_vm14, %v7220_v28, %v13299_v44  ;;  %v6577_v44 = vld [vmem:[#allocation3 + $0x6c] sm:$0xe]  ;;  %v6579_v38 = vld [vmem:[#allocation3 + $0x74] sm:$0x1] }
 0x2c1   : > { %8768 = vmatprep.mubr.bf16.mxu1 %v9903_v10  ;;  %v6267_v16 = vshll.u32 %v6063_v46, 16  ;;  %v5446_v40 = vsel %vm11322_vm14, %v5441_v39, %v5445_v49  ;;  %v9936_v11 = vcombine.low %v13325_v55, %v13329_v61  ;;  %v10027_v21 = vcombine.low %v7215_v59, %v7225_v51  ;;  %v6065_v37 = vld [vmem:[#allocation3 + $0x6c] sm:$0xf]  ;;  %v6066_v4 = vld [vmem:[#allocation3 + $0x70] sm:$0xf] }
 0x2c2   : > { %8769 = vmatmul.mubr.bf16.gmra.mrb[24].mxu1 %v10910_v27  ;;  %v5456_v27 = vsel %vm11322_vm14, %v5451_v52, %v5455_v56  ;;  %v6260_v58 = vrot.slane %v6258_v62, 4  ;;  %v6263_v47 = vrot.slane %v6261_v13, 5  ;;  %v6271_v60 = vshrl.u32 %v6063_v46, 16  ;;  %v6588_v25 = vld [vmem:[#allocation3 + $0x98] sm:$0x1] }
 0x2c3   : > { %v9904_v6 = vcombine.low %v5446_v40, %v5456_v27  ;;  %v6269_v20 = vrot.slane %v6267_v16, 5  ;;  %7489 = vst [vmem:[#allocation4 + $0x268] sm:$0xff] %v10027_v21  ;;  %v6277_v9 = vshll.u32 %v6064_v45, 16  ;;  %v7227_v30 = vshrl.u32 %v7010_v24, 16 }
 0x2c4   : > { %v7230_v36 = vshll.u32 %v7010_v24, 16  ;;  %v6264_v53 = vor.u32 %v6263_v47, %v6260_v58  ;;  %v7236_v26 = vshll.u32 %v7011_v43, 16  ;;  %v7240_v8 = vshrl.u32 %v7011_v43, 16 }
 0x2c5   : > { %8776 = vmatprep.mubr.bf16.mxu1 %v9904_v6  ;;  %v7246_v7 = vshll.u32 %v7012_v22, 16  ;;  %v6273_v50 = vrot.slane %v6271_v60, 4  ;;  %v6279_v35 = vrot.slane %v6277_v9, 5  ;;  %v7229_v0 = vrot.slane %v7227_v30, 4 }
 0x2c6   : > { %v7232_v32 = vrot.slane %v7230_v36, 5  ;;  %v6265_v18 = vrot.slane %v6264_v53, 4  ;;  %v7238_v49 = vrot.slane %v7236_v26, 5  ;;  %v7242_v41 = vrot.slane %v7240_v8, 4  ;;  %v13360_v36 = vld [vmem:[#allocation3 + $0x84] sm:$0xf] }
 0x2c7   : > { %v7248_v15 = vrot.slane %v7246_v7, 5  ;;  %v6274_v56 = vor.u32 %v6273_v50, %v6269_v20  ;;  %v9980_v31 = vrot.slane %v6577_v44, 9  ;;  %v6707_v1 = vrot.slane %v6578_v2, 5 }
 0x2c8   : > { %v7233_v63 = vor.u32 %v7232_v32, %v7229_v0  ;;  %v6270_v10 = vsel %vm11322_vm14, %v6265_v18, %v6269_v20  ;;  %v7243_v33 = vor.u32 %v7242_v41, %v7238_v49  ;;  %v6710_v23 = vrot.slane %v6579_v38, 5  ;;  %v6067_v20 = vld [vmem:[#allocation3 + $0x74] sm:$0x1] }
 0x2c9   : > { %v6282_v48 = vshrl.u32 %v6065_v37, 16  ;;  %v6275_v46 = vrot.slane %v6274_v56, 4  ;;  %v6708_v29 = vsel %vm11256_vm10, %v9980_v31, %v6707_v1  ;;  %v6709_v57 = vrot.slane %v6707_v1, 4 }
 0x2ca   : > { %8777 = vmatmul.mubr.bf16.gmra.mrb[28].mxu1 %v13308_v5  ;;  %v7234_v19 = vrot.slane %v7233_v63, 4  ;;  %v7244_v39 = vrot.slane %v7243_v33, 4  ;;  %v6285_v62 = vshll.u32 %v6065_v37, 16  ;;  %v6291_v13 = vshll.u32 %v6066_v4, 16  ;;  %v4932_v63 = vld [vmem:[#allocation3 + $0xa8] sm:$0xf] }
 0x2cb   : > { %v10728_v28 = vpop.f32.mrb[24].mxu0  ;;  %v6284_v52 = vrot.slane %v6282_v48, 4  ;;  %v6280_v51 = vsel %vm11322_vm14, %v6275_v46, %v6279_v35  ;;  %v6711_v16 = vsel %vm11256_vm10, %v6709_v57, %v6710_v23  ;;  %v6295_v30 = vshrl.u32 %v6066_v4, 16  ;;  %v4925_v33 = vld [vmem:[#allocation3 + $0x9c] sm:$0xf] }
 0x2cc   : > { %v4250_v59 = vadd.f32 %v13234_v12, %v10728_v28  ;;  %v4241_v5 = vpop.f32.mrb[25].mxu0  ;;  %v7239_v45 = vsel %vm11322_vm14, %v7234_v19, %v7238_v49  ;;  %v9963_v27 = vcombine.low %v6270_v10, %v6280_v51  ;;  %v7249_v21 = vsel %vm11322_vm14, %v7244_v39, %v7248_v15  ;;  %v4936_v57 = vld [vmem:[#allocation3 + $0xb0] sm:$0x1] }
 0x2cd   : > { %v4242_v24 = vadd.f32 %v13234_v12, %v4241_v5  ;;  %v10729_v40 = vpop.f32.mrb[26].mxu0  ;;  %v9996_v43 = vcombine.low %v6708_v29, %v6711_v16  ;;  %v10028_v47 = vcombine.low %v7239_v45, %v7249_v21  ;;  %v6287_v44 = vrot.slane %v6285_v62, 5  ;;  %v7014_v5 = vld [vmem:[#allocation3 + $0x88] sm:$0xf] }
 0x2ce   : > { %v4298_v22 = vmax.f32 %v4250_v59, 0.0  ;;  %v4253_v6 = vadd.f32 %v13234_v12, %v10729_v40  ;;  %v4244_v58 = vpop.f32.mrb[27].mxu0  ;;  %6544 = vst [vmem:[#allocation4 + $0x250] sm:$0xff] %v9963_v27  ;;  %v6293_v9 = vrot.slane %v6291_v13, 5  ;;  %v6297_v50 = vrot.slane %v6295_v30, 4 }
 0x2cf   : > { %v4296_v2 = vmax.f32 %v4242_v24, 0.0  ;;  %v4245_v60 = vadd.f32 %v13234_v12, %v4244_v58  ;;  %6833 = vst [vmem:[#allocation4 + $0x2a8] sm:$0xff] %v9996_v43  ;;  %7490 = vst [vmem:[#allocation4 + $0x2b8] sm:$0xff] %v10028_v47  ;;  %v6288_v26 = vor.u32 %v6287_v44, %v6284_v52  ;;  %v6301_v35 = vshll.u32 %v6067_v20, 16  ;;  %v4929_v24 = vld [vmem:[#allocation3 + $0xa4] sm:$0x1] }
 0x2d0   : > { %v10222_v38 = vpack.c.bf16 %v4298_v22, %v4298_v22  ;;  %v4299_v53 = vmax.f32 %v4253_v6, 0.0  ;;  %v7251_v18 = vshrl.u32 %v13360_v36, 16  ;;  %v6298_v15 = vor.u32 %v6297_v50, %v6293_v9  ;;  %v7015_v27 = vld [vmem:[#allocation3 + $0x8c] sm:$0x1]  ;;  %v6581_v58 = vld [vmem:[#allocation3 + $0x7c] sm:$0xf] }
 0x2d1   : > { %v10220_v8 = vpack.c.bf16 %v4296_v2, %v4296_v2  ;;  %v4297_v7 = vmax.f32 %v4245_v60, 0.0  ;;  %v6289_v37 = vrot.slane %v6288_v26, 4  ;;  %v6303_v39 = vrot.slane %v6301_v35, 5  ;;  %v6580_v60 = vld [vmem:[#allocation3 + $0x78] sm:$0xe] }
 0x2d2   : > { %v4740_v0 = vshrl.u32 %v10222_v38, 16  ;;  %v10223_v32 = vpack.c.bf16 %v4299_v53, %v4299_v53  ;;  %v4743_v12 = vshll.u32 %v10222_v38, 16  ;;  %v6299_v46 = vrot.slane %v6298_v15, 4  ;;  %v13384_v50 = vld [vmem:[#allocation3 + $0x7c] sm:$0xf] }
 0x2d3   : > { %v4723_v49 = vshrl.u32 %v10220_v8, 16  ;;  %v10221_v41 = vpack.c.bf16 %v4297_v7, %v4297_v7  ;;  %v4726_v31 = vshll.u32 %v10220_v8, 16  ;;  %v6294_v48 = vsel %vm11322_vm14, %v6289_v37, %v6293_v9  ;;  %v13376_v9 = vld [vmem:[#allocation3 + $0x78] sm:$0xf]  ;;  %v6582_v8 = vld [vmem:[#allocation3 + $0x80] sm:$0x1] }
 0x2d4   : > { %v4742_v56 = vrot.slane %v4740_v0, 7  ;;  %v4748_v1 = vshrl.u32 %v10223_v32, 16  ;;  %v4751_v4 = vshll.u32 %v10223_v32, 16  ;;  %v6304_v40 = vsel %vm11322_vm14, %v6299_v46, %v6303_v39 }
 0x2d5   : > { %v4725_v10 = vrot.slane %v4723_v49, 7  ;;  %v4731_v23 = vshrl.u32 %v10221_v41, 16  ;;  %v4734_v28 = vshll.u32 %v10221_v41, 16  ;;  %v9964_v6 = vcombine.low %v6294_v48, %v6304_v40 }
 0x2d6   : > { %v4745_v19 = vor.u32 %v4743_v12, %v4742_v56  ;;  %v4750_v29 = vrot.slane %v4748_v1, 7  ;;  %v4746_v52 = vrot.slane %v4742_v56, 4  ;;  %v7254_v44 = vshll.u32 %v13360_v36, 16 }
 0x2d7   : > { %v4728_v62 = vor.u32 %v4726_v31, %v4725_v10  ;;  %v4729_v13 = vrot.slane %v4725_v10, 4  ;;  %v4733_v59 = vrot.slane %v4731_v23, 7  ;;  %v7260_v2 = vshll.u32 %v7014_v5, 16  ;;  %6545 = vst [vmem:[#allocation4 + $0x2a0] sm:$0xff] %v9964_v6 }
 0x2d8   : > { %v4933_v51 = vsel %vm12588_vm0, %v4745_v19, %v4932_v63  ;;  %v4753_v45 = vor.u32 %v4751_v4, %v4750_v29  ;;  %v4755_v16 = vrot.slane %v4750_v29, 4  ;;  %v7264_v53 = vshrl.u32 %v7014_v5, 16 }
 0x2d9   : > { %4934 = vst [vmem:[#allocation3 + $0xa8] sm:$0xf] %v4933_v51  ;;  %v4926_v21 = vsel %vm12588_vm0, %v4728_v62, %v4925_v33  ;;  %v4736_v43 = vor.u32 %v4734_v28, %v4733_v59  ;;  %v4738_v22 = vrot.slane %v4733_v59, 4  ;;  %v7270_v26 = vshll.u32 %v7015_v27, 16 }
 0x2da   : > { %4927 = vst [vmem:[#allocation3 + $0x9c] sm:$0xf] %v4926_v21  ;;  %v4754_v47 = vsel %vm11244_vm9, %v4746_v52, %v4753_v45  ;;  %v4937_v20 = vsel %vm12001_vm2, %v4755_v16, %v4936_v57  ;;  %v13382_v7 = vrot.slane %v7251_v18, 4  ;;  %v6714_v36 = vrot.slane %v6581_v58, 5 }
 0x2db   : > { %4935 = vst [vmem:[#allocation3 + $0xac] sm:$0xf] %v4754_v47  ;;  %4938 = vst [vmem:[#allocation3 + $0xb0] sm:$0x1] %v4937_v20  ;;  %v4737_v30 = vsel %vm11244_vm9, %v4729_v13, %v4736_v43  ;;  %v4930_v38 = vsel %vm12001_vm2, %v4738_v22, %v4929_v24  ;;  %v13386_v35 = vrot.slane %v7254_v44, 5  ;;  %v13388_v0 = vrot.slane %v7260_v2, 5 }
 0x2dc   : > { %4928 = vst [vmem:[#allocation3 + $0xa0] sm:$0xf] %v4737_v30  ;;  %4931 = vst [vmem:[#allocation3 + $0xa4] sm:$0x1] %v4930_v38  ;;  %v9981_v32 = vrot.slane %v6580_v60, 9  ;;  %v6306_v37 = vshrl.u32 %v13376_v9, 16 }
 0x2dd   : > { %v13391_v12 = vrot.slane %v7264_v53, 4  ;;  %v13393_v49 = vrot.slane %v7270_v26, 5  ;;  %v6716_v41 = vrot.slane %v6714_v36, 4  ;;  %v6717_v15 = vrot.slane %v6582_v8, 5 }
 0x2de   : > { %v13395_v56 = vrot.slane %v6306_v37, 4  ;;  %v6309_v18 = vshll.u32 %v13376_v9, 16  ;;  %v6315_v63 = vshll.u32 %v13384_v50, 16  ;;  %v6319_v31 = vshrl.u32 %v13384_v50, 16 }
 0x2df   : > { %v6715_v4 = vsel %vm11256_vm10, %v9981_v32, %v6714_v36  ;;  %v6718_v10 = vsel %vm11256_vm10, %v6716_v41, %v6717_v15  ;;  %v7257_v44 = vor.u32 %v13386_v35, %v13382_v7  ;;  %v7267_v2 = vor.u32 %v13391_v12, %v13388_v0 }
 0x2e0   : > { %v5139_v1 = vld [vmem:[#allocation3 + $0xa8] sm:$0xf]  ;;  %v9997_v48 = vcombine.low %v6715_v4, %v6718_v10  ;;  %v6321_v9 = vrot.slane %v6319_v31, 4 }
 0x2e1   : > { %v5136_v33 = vld [vmem:[#allocation3 + $0x9c] sm:$0xf]  ;;  %v5482_v52 = vshrl.u32 %v5139_v1, 16  ;;  %v5485_v53 = vshll.u32 %v5139_v1, 16  ;;  %v5651_v36 = vld [vmem:[#allocation3 + $0xa8] sm:$0xe] }
 0x2e2   : > { %v5648_v23 = vld [vmem:[#allocation3 + $0x9c] sm:$0xe]  ;;  %v10917_v46 = vld [vmem:[#allocation3 + $0xa8] sm:$0xff]   ;;  %v5458_v19 = vshrl.u32 %v5136_v33, 16  ;;  %v5461_v29 = vshll.u32 %v5136_v33, 16  ;;  %6834 = vst [vmem:[#allocation4 + $0x2f8] sm:$0xff] %v9997_v48 }
 0x2e3   : > { %v9921_v57 = vrot.slane %v5648_v23, 9  ;;  %v10916_v28 = vld [vmem:[#allocation3 + $0x9c] sm:$0xff]   ;;  %v5138_v62 = vld [vmem:[#allocation3 + $0xa4] sm:$0x1]  ;;  %v13407_v6 = vld [vmem:[#allocation3 + $0xa8] sm:$0xff]   ;;  %v5484_v38 = vrot.slane %v5482_v52, 4 }
 0x2e4   : > { %v5137_v39 = vld [vmem:[#allocation3 + $0xa0] sm:$0xf]  ;;  %v5460_v13 = vrot.slane %v5458_v19, 4  ;;  %v5463_v59 = vrot.slane %v5461_v29, 5  ;;  %8937 = vmatprep.mubr.bf16.mxu0 %v10916_v28  ;;  %v5477_v45 = vshll.u32 %v5138_v62, 16  ;;  %5095 = vst [vmem:[#allocation4 + $0x460] sm:$0xff] %v13407_v6 }
 0x2e5   : > { %v5467_v5 = vshll.u32 %v5137_v39, 16  ;;  %v5471_v51 = vshrl.u32 %v5137_v39, 16  ;;  %v5649_v16 = vld [vmem:[#allocation3 + $0xa0] sm:$0xf]  ;;  %v5650_v24 = vld [vmem:[#allocation3 + $0xa4] sm:$0x1]  ;;  %8938 = vmatmul.mubr.bf16.gmra.mrb[100].mxu0 %v9936_v11 }
 0x2e6   : > { %v10920_v40 = vld [vmem:[#allocation3 + $0x9c] sm:$0xff]   ;;  %v5464_v27 = vor.u32 %v5463_v59, %v5460_v13  ;;  %v5798_v22 = vrot.slane %v5649_v16, 5  ;;  %8945 = vmatprep.mubr.bf16.mxu0 %v10917_v46  ;;  %v5479_v58 = vrot.slane %v5477_v45, 5  ;;  %v5801_v47 = vrot.slane %v5650_v24, 5  ;;  %v5140_v20 = vld [vmem:[#allocation3 + $0xac] sm:$0xf] }
 0x2e7   : > { %v5469_v21 = vrot.slane %v5467_v5, 5  ;;  %v5473_v43 = vrot.slane %v5471_v51, 4  ;;  %5094 = vst [vmem:[#allocation4 + $0x410] sm:$0xff] %v10920_v40  ;;  %v5141_v30 = vld [vmem:[#allocation3 + $0xb0] sm:$0x1]  ;;  %v5491_v26 = vshll.u32 %v5140_v20, 16 }
 0x2e8   : > { %v5465_v60 = vrot.slane %v5464_v27, 4  ;;  %v5799_v61 = vsel %vm11256_vm10, %v9921_v57, %v5798_v22  ;;  %v5800_v11 = vrot.slane %v5798_v22, 4  ;;  %v5495_v8 = vshrl.u32 %v5140_v20, 16  ;;  %v5652_v12 = vld [vmem:[#allocation3 + $0xac] sm:$0xf]  ;;  %v10965_v19 = vld [vmem:[#allocation3 + $0x9c] sm:$0xff]  }
 0x2e9   : > { %v5474_v55 = vor.u32 %v5473_v43, %v5469_v21  ;;  %v5501_v37 = vshll.u32 %v5141_v30, 16  ;;  %v5653_v41 = vld [vmem:[#allocation3 + $0xb0] sm:$0x1]  ;;  %v5487_v4 = vrot.slane %v5485_v53, 5  ;;  %v5493_v10 = vrot.slane %v5491_v26, 5  ;;  %v10966_v52 = vld [vmem:[#allocation3 + $0xa8] sm:$0xff]  }
 0x2ea   : > { %v5470_v7 = vsel %vm11322_vm14, %v5465_v60, %v5469_v21  ;;  %v5802_v32 = vsel %vm11256_vm10, %v5800_v11, %v5801_v47  ;;  %v5497_v33 = vrot.slane %v5495_v8, 4  ;;  %v9922_v48 = vrot.slane %v5651_v36, 9  ;;  %6981 = vst [vmem:[#allocation4 + $0x3a0] sm:$0xff] %v10965_v19  ;;  %v6070_v16 = vld [vmem:[#allocation3 + $0x80] sm:$0x1]  ;;  %6982 = vst [vmem:[#allocation4 + $0x3f0] sm:$0xff] %v10966_v52 }
 0x2eb   : > { %v5475_v35 = vrot.slane %v5474_v55, 4  ;;  %v9937_v15 = vcombine.low %v5799_v61, %v5802_v32  ;;  %v5503_v23 = vrot.slane %v5501_v37, 5  ;;  %v5805_v46 = vrot.slane %v5652_v12, 5  ;;  %v6584_v31 = vld [vmem:[#allocation3 + $0x88] sm:$0xf] }
 0x2ec   : > { %v5488_v57 = vor.u32 %v5487_v4, %v5484_v38  ;;  %v5498_v28 = vor.u32 %v5497_v33, %v5493_v10  ;;  %v5808_v39 = vrot.slane %v5653_v41, 5  ;;  %v7258_v59 = vrot.slane %v7257_v44, 4  ;;  %v6583_v44 = vld [vmem:[#allocation3 + $0x84] sm:$0xe]  ;;  %v6585_v38 = vld [vmem:[#allocation3 + $0x8c] sm:$0x1] }
 0x2ed   : > { %v5480_v1 = vsel %vm11322_vm14, %v5475_v35, %v5479_v58  ;;  %8946 = vmatmul.mubr.bf16.gmra.mrb[104].mxu0 %v9937_v15  ;;  %v13424_v62 = vsel %vm11256_vm10, %v9922_v48, %v5805_v46  ;;  %v5807_v13 = vrot.slane %v5805_v46, 4  ;;  %v7268_v5 = vrot.slane %v7267_v2, 4  ;;  %v7017_v58 = vld [vmem:[#allocation3 + $0x94] sm:$0xf] }
 0x2ee   : > { %v9905_v29 = vcombine.low %v5470_v7, %v5480_v1  ;;  %v5489_v51 = vrot.slane %v5488_v57, 4  ;;  %v5499_v45 = vrot.slane %v5498_v28, 4  ;;  %v6311_v24 = vrot.slane %v6309_v18, 5  ;;  %v7016_v18 = vld [vmem:[#allocation3 + $0x90] sm:$0xf] }
 0x2ef   : > { %v6317_v27 = vrot.slane %v6315_v63, 5  ;;  %v13432_v21 = vsel %vm11256_vm10, %v5807_v13, %v5808_v39  ;;  %v7263_v43 = vsel %vm11322_vm14, %v7258_v59, %v13388_v0  ;;  %v7273_v22 = vsel %vm11322_vm14, %v7268_v5, %v13393_v49  ;;  %v7018_v0 = vld [vmem:[#allocation3 + $0x98] sm:$0x1]  ;;  %v6071_v7 = vld [vmem:[#allocation3 + $0x84] sm:$0xf] }
 0x2f0   : > { %8784 = vmatprep.mubr.bf16.mxu1 %v9905_v29  ;;  %v5494_v63 = vsel %vm11322_vm14, %v5489_v51, %v5493_v10  ;;  %v9938_v47 = vcombine.low %v13424_v62, %v13432_v21  ;;  %v10029_v20 = vcombine.low %v7263_v43, %v7273_v22  ;;  %v6312_v49 = vor.u32 %v6311_v24, %v13395_v56  ;;  %v6072_v56 = vld [vmem:[#allocation3 + $0x88] sm:$0xf]  ;;  %v6073_v59 = vld [vmem:[#allocation3 + $0x8c] sm:$0x1] }
 0x2f1   : > { %8785 = vmatmul.mubr.bf16.gmra.mrb[32].mxu1 %v10920_v40  ;;  %v5504_v40 = vsel %vm11322_vm14, %v5499_v45, %v5503_v23  ;;  %v6322_v60 = vor.u32 %v6321_v9, %v6317_v27  ;;  %v6325_v50 = vshll.u32 %v6070_v16, 16  ;;  %v7275_v55 = vshrl.u32 %v7016_v18, 16 }
 0x2f2   : > { %v9906_v2 = vcombine.low %v5494_v63, %v5504_v40  ;;  %7491 = vst [vmem:[#allocation4 + $0x308] sm:$0xff] %v10029_v20  ;;  %v7278_v61 = vshll.u32 %v7016_v18, 16  ;;  %v7284_v11 = vshll.u32 %v7017_v58, 16  ;;  %v7288_v30 = vshrl.u32 %v7017_v58, 16  ;;  %v13465_v58 = vld [vmem:[#allocation3 + $0x9c] sm:$0xf] }
 0x2f3   : > { %v6313_v53 = vrot.slane %v6312_v49, 4  ;;  %v6323_v26 = vrot.slane %v6322_v60, 4  ;;  %v6327_v8 = vrot.slane %v6325_v50, 5  ;;  %v7294_v36 = vshll.u32 %v7018_v0, 16 }
 0x2f4   : > { %8792 = vmatprep.mubr.bf16.mxu1 %v9906_v2  ;;  %v7277_v35 = vrot.slane %v7275_v55, 4  ;;  %v7280_v32 = vrot.slane %v7278_v61, 5  ;;  %v7286_v37 = vrot.slane %v7284_v11, 5  ;;  %v7290_v12 = vrot.slane %v7288_v30, 4 }
 0x2f5   : > { %v6318_v41 = vsel %vm11322_vm14, %v6313_v53, %v6317_v27  ;;  %v6328_v15 = vsel %vm11322_vm14, %v6323_v26, %v6327_v8  ;;  %v7296_v4 = vrot.slane %v7294_v36, 5  ;;  %v9982_v10 = vrot.slane %v6583_v44, 9 }
 0x2f6   : > { %v9965_v33 = vcombine.low %v6318_v41, %v6328_v15  ;;  %v7281_v1 = vor.u32 %v7280_v32, %v7277_v35  ;;  %v7291_v23 = vor.u32 %v7290_v12, %v7286_v37  ;;  %v6721_v48 = vrot.slane %v6584_v31, 5 }
 0x2f7   : > { %v6724_v46 = vrot.slane %v6585_v38, 5  ;;  %v6330_v19 = vshrl.u32 %v6071_v7, 16  ;;  %v6333_v29 = vshll.u32 %v6071_v7, 16  ;;  %v6339_v57 = vshll.u32 %v6072_v56, 16 }
 0x2f8   : > { %6546 = vst [vmem:[#allocation4 + $0x2f0] sm:$0xff] %v9965_v33  ;;  %v7282_v28 = vrot.slane %v7281_v1, 4  ;;  %v7292_v39 = vrot.slane %v7291_v23, 4  ;;  %v6722_v52 = vsel %vm11256_vm10, %v9982_v10, %v6721_v48  ;;  %v6723_v13 = vrot.slane %v6721_v48, 4 }
 0x2f9   : > { %8793 = vmatmul.mubr.bf16.gmra.mrb[36].mxu1 %v13407_v6  ;;  %v6332_v51 = vrot.slane %v6330_v19, 4  ;;  %v6335_v45 = vrot.slane %v6333_v29, 5  ;;  %v6341_v16 = vrot.slane %v6339_v57, 5  ;;  %v6343_v24 = vshrl.u32 %v6072_v56, 16  ;;  %v10985_v6 = vld [vmem:[%s14410_s2] ss:$0 sm:$0xff] }
 0x2fa   : > { %v7287_v22 = vsel %vm11322_vm14, %v7282_v28, %v7286_v37  ;;  %v7297_v9 = vsel %vm11322_vm14, %v7292_v39, %v7296_v4  ;;  %v6725_v18 = vsel %vm11256_vm10, %v6723_v13, %v6724_v46  ;;  %v6349_v31 = vshll.u32 %v6073_v59, 16  ;;  %v4946_v29 = vld [vmem:[#allocation3 + $0xc0] sm:$0xf] }
 0x2fb   : > { %v10732_v5 = vpop.f32.mrb[28].mxu0  ;;  %v10030_v20 = vcombine.low %v7287_v22, %v7297_v9  ;;  %v9998_v0 = vcombine.low %v6722_v52, %v6725_v18  ;;  %v6336_v44 = vor.u32 %v6335_v45, %v6332_v51  ;;  %v6345_v50 = vrot.slane %v6343_v24, 4  ;;  %v4950_v22 = vld [vmem:[#allocation3 + $0xc8] sm:$0x1] }
 0x2fc   : > { %v4266_v27 = vadd.f32 %v10985_v6, %v10732_v5  ;;  %v4257_v43 = vpop.f32.mrb[29].mxu0  ;;  %v7299_v30 = vshrl.u32 %v13465_v58, 16  ;;  %v6351_v35 = vrot.slane %v6349_v31, 5  ;;  %v7302_v19 = vshll.u32 %v13465_v58, 16  ;;  %v4939_v5 = vld [vmem:[#allocation3 + $0xb4] sm:$0xf] }
 0x2fd   : > { %v4258_v63 = vadd.f32 %v10985_v6, %v4257_v43  ;;  %v10733_v40 = vpop.f32.mrb[30].mxu0  ;;  %7492 = vst [vmem:[#allocation4 + $0x358] sm:$0xff] %v10030_v20  ;;  %6835 = vst [vmem:[#allocation4 + $0x348] sm:$0xff] %v9998_v0  ;;  %v6337_v11 = vrot.slane %v6336_v44, 4  ;;  %v6346_v26 = vor.u32 %v6345_v50, %v6341_v16  ;;  %v4943_v20 = vld [vmem:[#allocation3 + $0xbc] sm:$0x1] }
 0x2fe   : > { %v4302_v2 = vmax.f32 %v4266_v27, 0.0  ;;  %v4269_v49 = vadd.f32 %v10985_v6, %v10733_v40  ;;  %v4260_v60 = vpop.f32.mrb[31].mxu0  ;;  %v13470_v56 = vrot.slane %v7299_v30, 4 }
 0x2ff   : > { %v4300_v55 = vmax.f32 %v4258_v63, 0.0  ;;  %v4261_v61 = vadd.f32 %v10985_v6, %v4260_v60  ;;  %v6342_v7 = vsel %vm11322_vm14, %v6337_v11, %v6341_v16  ;;  %v6347_v12 = vrot.slane %v6346_v26, 4  ;;  %v6587_v26 = vld [vmem:[#allocation3 + $0x94] sm:$0xf] }
 0x300   : > { %v10226_v38 = vpack.c.bf16 %v4302_v2, %v4302_v2  ;;  %v4303_v53 = vmax.f32 %v4269_v49, 0.0 }
 0x301   : > { %v10224_v8 = vpack.c.bf16 %v4300_v55, %v4300_v55  ;;  %v4301_v36 = vmax.f32 %v4261_v61, 0.0  ;;  %v6352_v46 = vsel %vm11322_vm14, %v6347_v12, %v6351_v35  ;;  %v7020_v55 = vld [vmem:[#allocation3 + $0xa0] sm:$0xf]  ;;  %v13491_v35 = vld [vmem:[#allocation3 + $0x1c] sm:$0xf] }
 0x302   : > { %v4774_v32 = vshrl.u32 %v10226_v38, 16  ;;  %v10227_v37 = vpack.c.bf16 %v4303_v53, %v4303_v53  ;;  %v4777_v41 = vshll.u32 %v10226_v38, 16  ;;  %v9966_v24 = vcombine.low %v6342_v7, %v6352_v46  ;;  %v7021_v38 = vld [vmem:[#allocation3 + $0xa4] sm:$0x1] }
 0x303   : > { %v4757_v15 = vshrl.u32 %v10224_v8, 16  ;;  %v4760_v4 = vshll.u32 %v10224_v8, 16  ;;  %v10225_v10 = vpack.c.bf16 %v4301_v36, %v4301_v36  ;;  %v10264_v33 = vpop.f32.mrb[32].mxu0  ;;  %v7304_v53 = vrot.slane %v7302_v19, 5 }
 0x304   : > { %v4776_v1 = vrot.slane %v4774_v32, 7  ;;  %v4782_v23 = vshrl.u32 %v10227_v37, 16  ;;  %v10265_v48 = vpop.f32.mrb[33].mxu0  ;;  %v4785_v28 = vshll.u32 %v10227_v37, 16  ;;  %6547 = vst [vmem:[#allocation4 + $0x340] sm:$0xff] %v9966_v24  ;;  %v7308_v12 = vshll.u32 %v7020_v55, 16 }
 0x305   : > { %v4759_v57 = vrot.slane %v4757_v15, 7  ;;  %v4765_v39 = vshrl.u32 %v10225_v10, 16  ;;  %v13475_v52 = vadd.f32 %v10265_v48, %v10264_v33  ;;  %v10267_v13 = vpop.f32.mrb[34].mxu0  ;;  %v4768_v45 = vshll.u32 %v10225_v10, 16 }
 0x306   : > { %v4779_v59 = vor.u32 %v4777_v41, %v4776_v1  ;;  %v4784_v51 = vrot.slane %v4782_v23, 7  ;;  %v10268_v16 = vpop.f32.mrb[35].mxu0  ;;  %v4780_v6 = vrot.slane %v4776_v1, 4  ;;  %v10294_v18 = vpop.f32.mrb[0].mxu1  ;;  %v7305_v37 = vor.u32 %v7304_v53, %v13470_v56  ;;  %v6586_v41 = vld [vmem:[#allocation3 + $0x90] sm:$0xe] }
 0x307   : > { %v4762_v27 = vor.u32 %v4760_v4, %v4759_v57  ;;  %v4763_v43 = vrot.slane %v4759_v57, 4  ;;  %v4767_v9 = vrot.slane %v4765_v39, 7  ;;  %v10269_v0 = vadd.f32 %v10268_v16, %v10267_v13  ;;  %v10295_v44 = vpop.f32.mrb[1].mxu1  ;;  %v13500_v56 = vld [vmem:[%s14412_s4] ss:$0 sm:$0xff] }
 0x308   : > { %v4947_v58 = vsel %vm12588_vm0, %v4779_v59, %v4946_v29  ;;  %v4787_v63 = vor.u32 %v4785_v28, %v4784_v51  ;;  %v4789_v40 = vrot.slane %v4784_v51, 4  ;;  %v13481_v50 = vadd.f32 %v10295_v44, %v10294_v18  ;;  %v10297_v31 = vpop.f32.mrb[2].mxu1  ;;  %v13514_v18 = vld [vmem:[#allocation3 + $0x90] sm:$0xf] }
 0x309   : > { %4948 = vst [vmem:[#allocation3 + $0xc0] sm:$0xf] %v4947_v58  ;;  %v4940_v2 = vsel %vm12588_vm0, %v4762_v27, %v4939_v5  ;;  %v4770_v49 = vor.u32 %v4768_v45, %v4767_v9  ;;  %v4772_v60 = vrot.slane %v4767_v9, 4  ;;  %v10298_v30 = vpop.f32.mrb[3].mxu1  ;;  %v7312_v10 = vshrl.u32 %v7020_v55, 16 }
 0x30a   : > { %4941 = vst [vmem:[#allocation3 + $0xb4] sm:$0xf] %v4940_v2  ;;  %v4788_v61 = vsel %vm11244_vm9, %v4780_v6, %v4787_v63  ;;  %v4951_v11 = vsel %vm12001_vm2, %v4789_v40, %v4950_v22  ;;  %v10299_v7 = vadd.f32 %v10298_v30, %v10297_v31  ;;  %v7318_v33 = vshll.u32 %v7021_v38, 16 }
 0x30b   : > { %4949 = vst [vmem:[#allocation3 + $0xc4] sm:$0xf] %v4788_v61  ;;  %4952 = vst [vmem:[#allocation3 + $0xc8] sm:$0x1] %v4951_v11  ;;  %v4771_v14 = vsel %vm11244_vm9, %v4763_v43, %v4770_v49  ;;  %v4944_v8 = vsel %vm12001_vm2, %v4772_v60, %v4943_v20  ;;  %v10270_v36 = vpop.f32.mrb[36].mxu0  ;;  %v6728_v1 = vrot.slane %v6587_v26, 5  ;;  %v13518_v58 = vadd.f32 %v13475_v52, %v13500_v56 }
 0x30c   : > { %4942 = vst [vmem:[#allocation3 + $0xb8] sm:$0xf] %v4771_v14  ;;  %4945 = vst [vmem:[#allocation3 + $0xbc] sm:$0x1] %v4944_v8  ;;  %v10271_v32 = vpop.f32.mrb[37].mxu0  ;;  %v7596_v48 = vrot.slane %v13491_v35, 5  ;;  %v13521_v40 = vadd.f32 %v10269_v0, %v13500_v56  ;;  %v13527_v52 = vadd.f32 %v13481_v50, %v13500_v56  ;;  %v13530_v0 = vadd.f32 %v10299_v7, %v13500_v56 }
 0x30d   : > { %v10272_v15 = vadd.f32 %v10271_v32, %v10270_v36  ;;  %v10273_v4 = vpop.f32.mrb[38].mxu0  ;;  %v9983_v29 = vrot.slane %v6586_v41, 9  ;;  %v6730_v57 = vrot.slane %v6728_v1, 4  ;;  %v13502_v39 = vrot.slane %v7305_v37, 4 }
 0x30e   : > { %v10274_v23 = vpop.f32.mrb[39].mxu0  ;;  %v10300_v19 = vpop.f32.mrb[4].mxu1  ;;  %v13504_v13 = vrot.slane %v7308_v12, 5  ;;  %v6731_v59 = vrot.slane %v6588_v25, 5  ;;  %v7314_v45 = vrot.slane %v7312_v10, 4  ;;  %v13508_v16 = vrot.slane %v7318_v33, 5 }
 0x30f   : > { %v13495_v46 = vadd.f32 %v10274_v23, %v10273_v4  ;;  %v10301_v28 = vpop.f32.mrb[5].mxu1  ;;  %v6729_v22 = vsel %vm11256_vm10, %v9983_v29, %v6728_v1  ;;  %v13537_v12 = vadd.f32 %v10272_v15, %v13500_v56  ;;  %v6354_v10 = vshrl.u32 %v13514_v18, 16 }
 0x310   : > { %v13506_v51 = vadd.f32 %v10301_v28, %v10300_v19  ;;  %v6732_v9 = vsel %vm11256_vm10, %v6730_v57, %v6731_v59  ;;  %v7315_v26 = vor.u32 %v7314_v45, %v13504_v13  ;;  %v10303_v4 = vpop.f32.mrb[6].mxu1  ;;  %v7311_v15 = vsel %vm11322_vm14, %v13502_v39, %v13504_v13  ;;  %v6075_v57 = vld [vmem:[#allocation3 + $0x94] sm:$0xf] }
 0x311   : > { %v5142_v5 = vld [vmem:[#allocation3 + $0xb4] sm:$0xf]  ;;  %v9999_v2 = vcombine.low %v6729_v22, %v6732_v9  ;;  %v10304_v1 = vpop.f32.mrb[7].mxu1  ;;  %v6356_v13 = vrot.slane %v6354_v10, 4  ;;  %v7022_v22 = vld [vmem:[#allocation3 + $0xa8] sm:$0xf] }
 0x312   : > { %v10936_v24 = vld [vmem:[#allocation3 + $0xc0] sm:$0xff]   ;;  %v5506_v6 = vshrl.u32 %v5142_v5, 16  ;;  %v5509_v27 = vshll.u32 %v5142_v5, 16  ;;  %v5654_v43 = vld [vmem:[#allocation3 + $0xb4] sm:$0xe]  ;;  %v13543_v19 = vadd.f32 %v10304_v1, %v10303_v4  ;;  %v7316_v29 = vrot.slane %v7315_v26, 4 }
 0x313   : > { %v10934_v63 = vld [vmem:[#allocation3 + $0xb4] sm:$0xff]   ;;  %v10276_v44 = vpop.f32.mrb[40].mxu0  ;;  %v5144_v49 = vld [vmem:[#allocation3 + $0xbc] sm:$0x1]  ;;  %6836 = vst [vmem:[#allocation4 + $0x398] sm:$0xff] %v9999_v2  ;;  %v9923_v50 = vrot.slane %v5654_v43, 9 }
 0x314   : > { %v5143_v20 = vld [vmem:[#allocation3 + $0xb8] sm:$0xf]  ;;  %v5508_v60 = vrot.slane %v5506_v6, 4  ;;  %v5511_v31 = vrot.slane %v5509_v27, 5  ;;  %8953 = vmatprep.mubr.bf16.mxu0 %v10934_v63  ;;  %v5525_v11 = vshll.u32 %v5144_v49, 16  ;;  %v10277_v37 = vpop.f32.mrb[41].mxu0  ;;  %v7321_v39 = vsel %vm11322_vm14, %v7316_v29, %v13508_v16 }
 0x315   : > { %v5515_v55 = vshll.u32 %v5143_v20, 16  ;;  %v5519_v61 = vshrl.u32 %v5143_v20, 16  ;;  %v5655_v30 = vld [vmem:[#allocation3 + $0xb8] sm:$0xf]  ;;  %v5656_v38 = vld [vmem:[#allocation3 + $0xbc] sm:$0x1]  ;;  %8954 = vmatmul.mubr.bf16.gmra.mrb[108].mxu0 %v9938_v47  ;;  %v13540_v7 = vadd.f32 %v10277_v37, %v10276_v44  ;;  %v10031_v44 = vcombine.low %v7311_v15, %v7321_v39 }
 0x316   : > { %v13523_v53 = vld [vmem:[#allocation3 + $0xb4] sm:$0xff]   ;;  %v5512_v14 = vor.u32 %v5511_v31, %v5508_v60  ;;  %v5812_v32 = vrot.slane %v5655_v30, 5  ;;  %8961 = vmatprep.mubr.bf16.mxu0 %v10936_v24  ;;  %v10279_v41 = vpop.f32.mrb[42].mxu0  ;;  %v5815_v33 = vrot.slane %v5656_v38, 5  ;;  %v5527_v5 = vrot.slane %v5525_v11, 5  ;;  %v10969_v9 = vld [vmem:[#allocation3 + $0xc0] sm:$0xff]  }
 0x317   : > { %v5517_v8 = vrot.slane %v5515_v55, 5  ;;  %v5521_v36 = vrot.slane %v5519_v61, 4  ;;  %5096 = vst [vmem:[#allocation4 + $0x4b0] sm:$0xff] %v13523_v53  ;;  %v10280_v25 = vpop.f32.mrb[43].mxu0  ;;  %v10968_v28 = vld [vmem:[#allocation3 + $0xb4] sm:$0xff]   ;;  %v6357_v49 = vshll.u32 %v13514_v18, 16  ;;  %v13563_v31 = vadd.f32 %v13495_v46, %v13500_v56 }
 0x318   : > { %v5513_v62 = vrot.slane %v5512_v14, 4  ;;  %v5814_v47 = vrot.slane %v5812_v32, 4  ;;  %v10281_v23 = vadd.f32 %v10280_v25, %v10279_v41  ;;  %v5813_v45 = vsel %vm11256_vm10, %v9923_v50, %v5812_v32  ;;  %6983 = vst [vmem:[#allocation4 + $0x440] sm:$0xff] %v10968_v28  ;;  %v6076_v2 = vld [vmem:[#allocation3 + $0x98] sm:$0x1]  ;;  %6984 = vst [vmem:[#allocation4 + $0x490] sm:$0xff] %v10969_v9 }
 0x319   : > { %v5522_v21 = vor.u32 %v5521_v36, %v5517_v8  ;;  %v6363_v60 = vshll.u32 %v6075_v57, 16  ;;  %v6367_v11 = vshrl.u32 %v6075_v57, 16  ;;  %v7023_v30 = vld [vmem:[#allocation3 + $0xac] sm:$0xf]  ;;  %v7024_v38 = vld [vmem:[#allocation3 + $0xb0] sm:$0x1]  ;;  %v13571_v37 = vadd.f32 %v13506_v51, %v13500_v56 }
 0x31a   : > { %v5816_v24 = vsel %vm11256_vm10, %v5814_v47, %v5815_v33  ;;  %v5518_v6 = vsel %vm11322_vm14, %v5513_v62, %v5517_v8  ;;  %7493 = vst [vmem:[#allocation4 + $0x3a8] sm:$0xff] %v10031_v44  ;;  %v6359_v14 = vrot.slane %v6357_v49, 5  ;;  %v7323_v36 = vshrl.u32 %v7022_v22, 16  ;;  %v10986_v32 = vld [vmem:[#allocation4 + $0x38] sm:$0xff]  ;;  %v6589_v4 = vld [vmem:[#allocation3 + $0x9c] sm:$0xe] }
 0x31b   : > { %v5523_v59 = vrot.slane %v5522_v21, 4  ;;  %v9939_v27 = vcombine.low %v5813_v45, %v5816_v24  ;;  %v10282_v43 = vpop.f32.mrb[44].mxu0  ;;  %v6365_v8 = vrot.slane %v6363_v60, 5  ;;  %v7326_v18 = vshll.u32 %v7022_v22, 16  ;;  %v6590_v10 = vld [vmem:[#allocation3 + $0xa0] sm:$0xf] }
 0x31c   : > { %v10283_v20 = vpop.f32.mrb[45].mxu0  ;;  %v6369_v50 = vrot.slane %v6367_v11, 4  ;;  %v6373_v41 = vshll.u32 %v6076_v2, 16  ;;  %v6360_v62 = vor.u32 %v6359_v14, %v6356_v13  ;;  %v7325_v21 = vrot.slane %v7323_v36, 4  ;;  %v10987_v1 = vld [vmem:[#allocation4 + $0x28] sm:$0xff]  ;;  %v10988_v11 = vld [vmem:[#allocation4 + $0x30] sm:$0xff] }
 0x31d   : > { %v5528_v63 = vsel %vm11322_vm14, %v5523_v59, %v5527_v5  ;;  %v13565_v61 = vadd.f32 %v10283_v20, %v10282_v43  ;;  %v10285_v16 = vpop.f32.mrb[46].mxu0  ;;  %8962 = vmatmul.mubr.bf16.gmra.mrb[112].mxu0 %v9939_v27  ;;  %v7328_v47 = vrot.slane %v7326_v18, 5  ;;  %v7332_v33 = vshll.u32 %v7023_v30, 16  ;;  %v6077_v57 = vld [vmem:[#allocation3 + $0x9c] sm:$0xf]  ;;  %v10989_v36 = vld [vmem:[#allocation4 + $0x88] sm:$0xff] }
 0x31e   : > { %v9907_v55 = vcombine.low %v5518_v6, %v5528_v63  ;;  %v10286_v26 = vpop.f32.mrb[47].mxu0  ;;  %9163 = vmatprep.mubr.bf16.mxu0 %v10986_v32  ;;  %v13576_v25 = vadd.f32 %v13540_v7, %v13500_v56  ;;  %v6370_v15 = vor.u32 %v6369_v50, %v6365_v8  ;;  %v7336_v29 = vshrl.u32 %v7023_v30, 16  ;;  %v6591_v45 = vld [vmem:[#allocation3 + $0xa4] sm:$0x1] }
 0x31f   : > { %v13567_v46 = vadd.f32 %v10286_v26, %v10285_v16  ;;  %v7342_v51 = vshll.u32 %v7024_v38, 16  ;;  %v13579_v28 = vadd.f32 %v10281_v23, %v13500_v56  ;;  %v6361_v59 = vrot.slane %v6360_v62, 4  ;;  %v10948_v7 = vld [vmem:[%s14411_s3 + $0x200] sm:$0xff]  }
 0x320   : > { %8800 = vmatprep.mubr.bf16.mxu1 %v9907_v55  ;;  %v7329_v5 = vor.u32 %v7328_v47, %v7325_v21  ;;  %v6371_v6 = vrot.slane %v6370_v15, 4  ;;  %v6375_v27 = vrot.slane %v6373_v41, 5  ;;  %v7338_v43 = vrot.slane %v7336_v29, 4  ;;  %v6078_v55 = vld [vmem:[#allocation3 + $0xa0] sm:$0xf]  ;;  %v10991_v15 = vld [vmem:[#allocation4 + $0x78] sm:$0xff] }
 0x321   : > { %8801 = vmatmul.mubr.bf16.gmra.mrb[40].mxu1 %v13523_v53  ;;  %v7334_v53 = vrot.slane %v7332_v33, 5  ;;  %v6735_v39 = vrot.slane %v6590_v10, 5  ;;  %v6366_v22 = vsel %vm11322_vm14, %v6361_v59, %v6365_v8  ;;  %v7344_v9 = vrot.slane %v7342_v51, 5  ;;  %v6079_v16 = vld [vmem:[#allocation3 + $0xa4] sm:$0x1]  ;;  %v10990_v10 = vld [vmem:[#allocation4 + $0x20] sm:$0xff] }
 0x322   : > { %9002 = vmatprep.mubr.bf16.mxu1 %v10987_v1  ;;  %v9984_v23 = vrot.slane %v6589_v4, 9  ;;  %v6378_v63 = vshrl.u32 %v6077_v57, 16  ;;  %v6376_v2 = vsel %vm11322_vm14, %v6371_v6, %v6375_v27  ;;  %v7330_v49 = vrot.slane %v7329_v5, 4  ;;  %v7025_v4 = vld [vmem:[#allocation3 + $0xb4] sm:$0xf]  ;;  %v10951_v29 = vld [vmem:[%s14411_s3 + $0x208] sm:$0xff]  }
 0x323   : > { %v10288_v24 = vpop.f32.mrb[48].mxu0  ;;  %v7339_v60 = vor.u32 %v7338_v43, %v7334_v53  ;;  %v9967_v38 = vcombine.low %v6366_v22, %v6376_v2  ;;  %v6737_v14 = vrot.slane %v6735_v39, 4  ;;  %v6738_v8 = vrot.slane %v6591_v45, 5  ;;  %v7026_v1 = vld [vmem:[#allocation3 + $0xb8] sm:$0xf] }
 0x324   : > { %v10289_v13 = vpop.f32.mrb[49].mxu0  ;;  %v6736_v26 = vsel %vm11256_vm10, %v9984_v23, %v6735_v39  ;;  %v6380_v50 = vrot.slane %v6378_v63, 4  ;;  %v6381_v41 = vshll.u32 %v6077_v57, 16  ;;  %v6387_v21 = vshll.u32 %v6078_v55, 16  ;;  %v7027_v45 = vld [vmem:[#allocation3 + $0xbc] sm:$0x1] }
 0x325   : > { %v13586_v20 = vadd.f32 %v10289_v13, %v10288_v24  ;;  %v10291_v44 = vpop.f32.mrb[50].mxu0  ;;  %9164 = vmatmul.mubr.bf16.vlgmr.msra.gmra.mrb[116].mxu0 %v10988_v11  ;;  %v7340_v32 = vrot.slane %v7339_v60, 4  ;;  %6548 = vst [vmem:[#allocation4 + $0x390] sm:$0xff] %v9967_v38  ;;  %v6739_v62 = vsel %vm11256_vm10, %v6737_v14, %v6738_v8  ;;  %v6391_v47 = vshrl.u32 %v6078_v55, 16  ;;  %v6592_v23 = vld [vmem:[#allocation3 + $0xa8] sm:$0xe] }
 0x326   : > { %v10292_v30 = vpop.f32.mrb[51].mxu0  ;;  %9171 = vmatprep.mubr.bf16.mxu0 %v10989_v36  ;;  %v6397_v33 = vshll.u32 %v6079_v16, 16  ;;  %v7335_v51 = vsel %vm11322_vm14, %v7330_v49, %v7334_v53  ;;  %v10000_v59 = vcombine.low %v6736_v26, %v6739_v62  ;;  %v6383_v5 = vrot.slane %v6381_v41, 5  ;;  %v10953_v53 = vld [vmem:[%s14411_s3 + $0x210] sm:$0xff]   ;;  %v6593_v60 = vld [vmem:[#allocation3 + $0xac] sm:$0xf] }
 0x327   : > { %v13592_v18 = vadd.f32 %v10292_v30, %v10291_v44  ;;  %v7345_v57 = vsel %vm11322_vm14, %v7340_v32, %v7344_v9  ;;  %v13606_v24 = vadd.f32 %v13565_v61, %v13500_v56  ;;  %v6389_v27 = vrot.slane %v6387_v21, 5  ;;  %v6080_v26 = vld [vmem:[#allocation3 + $0xa8] sm:$0xf]  ;;  %v10992_v14 = vld [vmem:[#allocation4 + $0x80] sm:$0xff] }
 0x328   : > { %v13608_v6 = vcombine.low %v7335_v51, %v7345_v57  ;;  %v6393_v43 = vrot.slane %v6391_v47, 4  ;;  %6837 = vst [vmem:[#allocation4 + $0x3e8] sm:$0xff] %v10000_v59  ;;  %v7347_v13 = vshrl.u32 %v7025_v4, 16  ;;  %v7350_v22 = vshll.u32 %v7025_v4, 16  ;;  %v10993_v4 = vld [vmem:[#allocation4 + $0xd8] sm:$0xff] }
 0x329   : > { %9003 = vmatmul.mubr.bf16.vlgmr.msra.gmra.mrb[44].mxu1 %v10990_v10  ;;  %v7356_v9 = vshll.u32 %v7026_v1, 16  ;;  %v6399_v2 = vrot.slane %v6397_v33, 5  ;;  %v7360_v61 = vshrl.u32 %v7026_v1, 16  ;;  %v7366_v49 = vshll.u32 %v7027_v45, 16  ;;  %v6594_v33 = vld [vmem:[#allocation3 + $0xb0] sm:$0x1] }
 0x32a   : > { %9293 = vmatpush1.bf16.msra.mxu1 %v10948_v7  ;;  %9010 = vmatprep.mubr.bf16.mxu1 %v10991_v15  ;;  %v6384_v7 = vor.u32 %v6383_v5, %v6380_v50  ;;  %v6394_v44 = vor.u32 %v6393_v43, %v6389_v27  ;;  %v7349_v30 = vrot.slane %v7347_v13, 4  ;;  %v7352_v38 = vrot.slane %v7350_v22, 5  ;;  %v10994_v1 = vld [vmem:[#allocation4 + $0x70] sm:$0xff]  ;;  %v10995_v5 = vld [vmem:[#allocation4 + $0xc8] sm:$0xff]  ;;  %v10956_v45 = vld [vmem:[%s14411_s3 + $0x218] sm:$0xff]  }
 0x32b   : > { %9294 = vmatprep.subr.bf16.mxu1 %v11103_v3  ;;  %v10376_v39 = vpop.f32.mrb[52].mxu0  ;;  %v7358_v32 = vrot.slane %v7356_v9, 5  ;;  %v7362_v50 = vrot.slane %v7360_v61, 4  ;;  %v9985_v41 = vrot.slane %v6592_v23, 9  ;;  %v7368_v47 = vrot.slane %v7366_v49, 5 }
 0x32c   : > { %v10377_v63 = vpop.f32.mrb[53].mxu0  ;;  %v6385_v11 = vrot.slane %v6384_v7, 4  ;;  %v6395_v36 = vrot.slane %v6394_v44, 4  ;;  %v7353_v21 = vor.u32 %v7352_v38, %v7349_v30  ;;  %v6742_v57 = vrot.slane %v6593_v60, 5  ;;  %v6081_v59 = vld [vmem:[#allocation3 + $0xac] sm:$0xf] }
 0x32d   : > { %v10378_v55 = vadd.f32 %v10377_v63, %v10376_v39  ;;  %v10379_v16 = vpop.f32.mrb[54].mxu0  ;;  %9172 = vmatmul.mubr.bf16.gmra.mrb[120].mxu0 %v10992_v14  ;;  %v7363_v51 = vor.u32 %v7362_v50, %v7358_v32  ;;  %v6745_v22 = vrot.slane %v6594_v33, 5  ;;  %v6405_v9 = vshll.u32 %v6080_v26, 16  ;;  %v7028_v30 = vld [vmem:[#allocation3 + $0xc0] sm:$0xf] }
 0x32e   : > { %9295 = vmatpush1.bf16.msra.mxu1 %v10951_v29  ;;  %v10380_v8 = vpop.f32.mrb[55].mxu0  ;;  %9179 = vmatprep.mubr.bf16.mxu0 %v10993_v4  ;;  %v6390_v15 = vsel %vm11322_vm14, %v6385_v11, %v6389_v27  ;;  %v6400_v29 = vsel %vm11322_vm14, %v6395_v36, %v6399_v2  ;;  %v7354_v39 = vrot.slane %v7353_v21, 4  ;;  %v6402_v27 = vshrl.u32 %v6080_v26, 16  ;;  %v10959_v14 = vld [vmem:[%s14411_s3 + $0x220] sm:$0xff]  }
 0x32f   : > { %9296 = vmatprep.subr.bf16.mxu1 %v11103_v3  ;;  %v13615_v10 = vadd.f32 %v10378_v55, %v13518_v58  ;;  %v10381_v62 = vadd.f32 %v10380_v8, %v10379_v16  ;;  %v13627_v43 = vcombine.low %v6390_v15, %v6400_v29  ;;  %v7364_v7 = vrot.slane %v7363_v51, 4  ;;  %v7029_v15 = vld [vmem:[#allocation3 + $0xc4] sm:$0xf] }
 0x330   : > { %v6744_v13 = vrot.slane %v6742_v57, 4  ;;  %v6404_v63 = vrot.slane %v6402_v27, 4  ;;  %v6411_v44 = vshll.u32 %v6081_v59, 16  ;;  %v6415_v2 = vshrl.u32 %v6081_v59, 16  ;;  %v10997_v29 = vld [vmem:[#allocation4 + $0x128] sm:$0xff] }
 0x331   : > { %14488 = vst [vmem:[#allocation8_spill] sm:$0xff] %v13615_v10  ;;  %9011 = vmatmul.mubr.bf16.gmra.mrb[48].mxu1 %v10994_v1  ;;  %v13622_v58 = vadd.f32 %v10381_v62, %v13521_v40  ;;  %v6082_v40 = vld [vmem:[#allocation3 + $0xb0] sm:$0x1]  ;;  %v7359_v60 = vsel %vm11322_vm14, %v7354_v39, %v7358_v32  ;;  %v7369_v55 = vsel %vm11322_vm14, %v7364_v7, %v7368_v47  ;;  %v6407_v11 = vrot.slane %v6405_v9, 5  ;;  %v10998_v39 = vld [vmem:[#allocation4 + $0xc0] sm:$0xff]  ;;  %v11027_v10 = vld [vmem:[#allocation4 + $0x2f0] sm:$0xff] }
 0x332   : > { %9018 = vmatprep.mubr.bf16.mxu1 %v10995_v5  ;;  %9297 = vmatpush1.bf16.msra.mxu1 %v10953_v53  ;;  %v13632_v53 = vsel %vm11256_vm10, %v9985_v41, %v6742_v57  ;;  %v13640_v16 = vsel %vm11256_vm10, %v6744_v13, %v6745_v22  ;;  %v13645_v36 = vcombine.low %v7359_v60, %v7369_v55  ;;  %v6413_v50 = vrot.slane %v6411_v44, 5  ;;  %v10996_v41 = vld [vmem:[#allocation4 + $0xd0] sm:$0xff] }
 0x333   : > { %14489 = vst [vmem:[#allocation9_spill] sm:$0xff] %v13622_v58  ;;  %9298 = vmatprep.subr.bf16.mxu1 %v11103_v3  ;;  %v10382_v23 = vpop.f32.mrb[56].mxu0  ;;  %v6408_v47 = vor.u32 %v6407_v11, %v6404_v63  ;;  %v6417_v33 = vrot.slane %v6415_v2, 4  ;;  %v6421_v1 = vshll.u32 %v6082_v40, 16  ;;  %v7371_v5 = vshrl.u32 %v7028_v30, 16  ;;  %v10999_v40 = vld [vmem:[#allocation4 + $0x118] sm:$0xff] }
 0x334   : > { %v10383_v61 = vpop.f32.mrb[57].mxu0  ;;  %v10306_v49 = vpop.f32.mrb[8].mxu1  ;;  %v13657_v27 = vadd.f32 %v13567_v46, %v13500_v56  ;;  %v7030_v9 = vld [vmem:[#allocation3 + $0xc8] sm:$0x1]  ;;  %v7380_v46 = vshll.u32 %v7029_v15, 16  ;;  %v7384_v11 = vshrl.u32 %v7029_v15, 16 }
 0x335   : > { %v10384_v38 = vadd.f32 %v10383_v61, %v10382_v23  ;;  %v10385_v26 = vpop.f32.mrb[58].mxu0  ;;  %v10307_v8 = vpop.f32.mrb[9].mxu1  ;;  %9180 = vmatmul.mubr.bf16.gmra.mrb[124].mxu0 %v10996_v41  ;;  %v6409_v13 = vrot.slane %v6408_v47, 4  ;;  %v6418_v22 = vor.u32 %v6417_v33, %v6413_v50  ;;  %v6595_v23 = vld [vmem:[#allocation3 + $0xb4] sm:$0xe]  ;;  %v10962_v63 = vld [vmem:[%s14411_s3 + $0x228] sm:$0xff]  }
 0x336   : > { %9299 = vmatpush1.bf16.msra.mxu1 %v10956_v45  ;;  %v10386_v4 = vpop.f32.mrb[59].mxu0  ;;  %v13650_v62 = vadd.f32 %v10307_v8, %v10306_v49  ;;  %v10309_v21 = vpop.f32.mrb[10].mxu1  ;;  %9187 = vmatprep.mubr.bf16.mxu0 %v10997_v29  ;;  %v7374_v45 = vshll.u32 %v7028_v30, 16  ;;  %v7373_v44 = vrot.slane %v7371_v5, 4  ;;  %v6596_v61 = vld [vmem:[#allocation3 + $0xb8] sm:$0xf]  ;;  %v13669_v49 = vadd.f32 %v13586_v20, %v13500_v56 }
 0x337   : > { %9300 = vmatprep.subr.bf16.mxu1 %v11103_v3  ;;  %v13653_v51 = vadd.f32 %v10384_v38, %v13537_v12  ;;  %v10387_v57 = vadd.f32 %v10386_v4, %v10385_v26  ;;  %v10310_v59 = vpop.f32.mrb[11].mxu1  ;;  %v6419_v60 = vrot.slane %v6418_v22, 4  ;;  %v6423_v55 = vrot.slane %v6421_v1, 5  ;;  %v10964_v26 = vld [vmem:[%s14411_s3 + $0x230] sm:$0xff]   ;;  %v11000_v22 = vld [vmem:[#allocation4 + $0x120] sm:$0xff] }
 0x338   : > { %v13659_v7 = vadd.f32 %v10310_v59, %v10309_v21  ;;  %v7376_v2 = vrot.slane %v7374_v45, 5  ;;  %v13674_v30 = vadd.f32 %v13592_v18, %v13500_v56  ;;  %v7382_v8 = vrot.slane %v7380_v46, 5  ;;  %v6083_v18 = vld [vmem:[#allocation3 + $0xb4] sm:$0xf]  ;;  %v6085_v46 = vld [vmem:[#allocation3 + $0xbc] sm:$0x1] }
 0x339   : > { %14490 = vst [vmem:[#allocation10_spill] sm:$0xff] %v13653_v51  ;;  %9019 = vmatmul.mubr.bf16.gmra.mrb[52].mxu1 %v10998_v39  ;;  %v13662_v12 = vadd.f32 %v10387_v57, %v13563_v31  ;;  %v6597_v31 = vld [vmem:[#allocation3 + $0xbc] sm:$0x1]  ;;  %v7390_v41 = vshll.u32 %v7030_v9, 16  ;;  %v6414_v21 = vsel %vm11322_vm14, %v6409_v13, %v6413_v50  ;;  %v6424_v47 = vsel %vm11322_vm14, %v6419_v60, %v6423_v55  ;;  %v6084_v39 = vld [vmem:[#allocation3 + $0xb8] sm:$0xf] }
 0x33a   : > { %9026 = vmatprep.mubr.bf16.mxu1 %v10999_v40  ;;  %9301 = vmatpush1.bf16.msra.mxu1 %v10959_v14  ;;  %v7377_v14 = vor.u32 %v7376_v2, %v7373_v44  ;;  %v7386_v33 = vrot.slane %v7384_v11, 4  ;;  %v6749_v1 = vrot.slane %v6596_v61, 5  ;;  %v13683_v59 = vcombine.low %v6414_v21, %v6424_v47  ;;  %v11001_v61 = vld [vmem:[#allocation4 + $0x178] sm:$0xff]  ;;  %v6600_v47 = vld [vmem:[#allocation3 + $0xc8] sm:$0x1]  ;;  %v7805_v58 = vld [vmem:[%s11225_s9 + $0x98] sm:$0xff] }
 0x33b   : > { %14491 = vst [vmem:[#allocation11_spill] sm:$0xff] %v13662_v12  ;;  %9302 = vmatprep.subr.bf16.mxu1 %v11103_v3  ;;  %v10388_v38 = vpop.f32.mrb[60].mxu0  ;;  %v9986_v5 = vrot.slane %v6595_v23, 9  ;;  %v6752_v45 = vrot.slane %v6597_v31, 5  ;;  %v7392_v55 = vrot.slane %v7390_v41, 5  ;;  %v6426_v11 = vshrl.u32 %v6083_v18, 16 }
 0x33c   : > { %v10389_v20 = vpop.f32.mrb[61].mxu0  ;;  %v10312_v4 = vpop.f32.mrb[12].mxu1  ;;  %v7378_v13 = vrot.slane %v7377_v14, 4  ;;  %v7387_v44 = vor.u32 %v7386_v33, %v7382_v8  ;;  %v6751_v2 = vrot.slane %v6749_v1, 4  ;;  %v6598_v31 = vld [vmem:[#allocation3 + $0xc0] sm:$0xe] }
 0x33d   : > { %v10390_v15 = vadd.f32 %v10389_v20, %v10388_v38  ;;  %v10391_v29 = vpop.f32.mrb[62].mxu0  ;;  %v10313_v57 = vpop.f32.mrb[13].mxu1  ;;  %9188 = vmatmul.mubr.bf16.gmra.mrb[128].mxu0 %v11000_v22  ;;  %v11002_v38 = vld [vmem:[#allocation4 + $0x110] sm:$0xff]  ;;  %v13695_v14 = vsel %vm11256_vm10, %v9986_v5, %v6749_v1  ;;  %v11003_v33 = vld [vmem:[#allocation4 + $0x168] sm:$0xff]  ;;  %v6439_v22 = vshrl.u32 %v6084_v39, 16  ;;  %vm14494_vm9 = vcmask 1041408  }
 0x33e   : > { %9303 = vmatpush1.bf16.msra.mxu1 %v10962_v63  ;;  %v10392_v9 = vpop.f32.mrb[63].mxu0  ;;  %v13685_v40 = vadd.f32 %v10313_v57, %v10312_v4  ;;  %v10315_v50 = vpop.f32.mrb[14].mxu1  ;;  %9195 = vmatprep.mubr.bf16.mxu0 %v11001_v61  ;;  %v7388_v4 = vrot.slane %v7387_v44, 4  ;;  %v13699_v21 = vsel %vm11256_vm10, %v6751_v2, %v6752_v45  ;;  %v6429_v57 = vshll.u32 %v6083_v18, 16  ;;  %v6086_v61 = vld [vmem:[#allocation3 + $0xc0] sm:$0xf] }
 0x33f   : > { %9304 = vmatprep.subr.bf16.mxu1 %v11103_v3  ;;  %v13689_v63 = vadd.f32 %v10390_v15, %v13576_v25  ;;  %v10393_v23 = vadd.f32 %v10392_v9, %v10391_v29  ;;  %v10316_v60 = vpop.f32.mrb[15].mxu1  ;;  %v6599_v25 = vld [vmem:[#allocation3 + $0xc4] sm:$0xf]  ;;  %v10967_v15 = vld [vmem:[%s14411_s3 + $0x238] sm:$0xff]   ;;  %v6428_v29 = vrot.slane %v6426_v11, 4  ;;  %v6435_v45 = vshll.u32 %v6084_v39, 16 }
 0x340   : > { %v13691_v20 = vadd.f32 %v10316_v60, %v10315_v50  ;;  %v10970_v5 = vld [vmem:[%s14411_s3 + $0x240] ss:$0 sps:$4 sm:$0x33]   ;;  %v6431_v44 = vrot.slane %v6429_v57, 5  ;;  %v6445_v2 = vshll.u32 %v6085_v46, 16  ;;  %v9987_v18 = vrot.slane %v6598_v31, 9 }
 0x341   : > { %14492 = vst [vmem:[#allocation12_spill] sm:$0xff] %v13689_v63  ;;  %9027 = vmatmul.mubr.bf16.gmra.mrb[56].mxu1 %v11002_v38  ;;  %v13702_v41 = vadd.f32 %v10393_v23, %v13579_v28  ;;  %v7383_v28 = vsel %vm11322_vm14, %v7378_v13, %v7382_v8  ;;  %v6437_v60 = vrot.slane %v6435_v45, 5  ;;  %v6441_v11 = vrot.slane %v6439_v22, 4  ;;  %v6087_v39 = vld [vmem:[#allocation3 + $0xc4] sm:$0xf]  ;;  %v11026_v12 = vld [vmem:[#allocation4 + $0x358] sm:$0xff] }
 0x342   : > { %9034 = vmatprep.mubr.bf16.mxu1 %v11003_v33  ;;  %9305 = vmatpush1.bf16.msra.mxu1 %v10964_v26  ;;  %v7393_v26 = vsel %vm11322_vm14, %v7388_v4, %v7392_v55  ;;  %v6756_v38 = vrot.slane %v6599_v25, 5  ;;  %v6759_v33 = vrot.slane %v6600_v47, 5  ;;  %v6432_v8 = vor.u32 %v6431_v44, %v6428_v29  ;;  %v11004_v4 = vld [vmem:[#allocation4 + $0x170] sm:$0xff]  ;;  %v11005_v47 = vld [vmem:[#allocation4 + $0x1c8] sm:$0xff] }
 0x343   : > { %14493 = vst [vmem:[#allocation13_spill] sm:$0xff] %v13702_v41  ;;  %9306 = vmatprep.subr.bf16.mxu1 %v11103_v3  ;;  %v10394_v9 = vpop.f32.mrb[64].mxu0  ;;  %v13717_v50 = vcombine.low %v7383_v28, %v7393_v26  ;;  %v6447_v13 = vrot.slane %v6445_v2, 5  ;;  %v8646_v55 = vsel %vm14494_vm9, %v10970_v5, 0  ;;  %v6442_v57 = vor.u32 %v6441_v11, %v6437_v60  ;;  %v6088_v26 = vld [vmem:[#allocation3 + $0xc8] sm:$0x1] }
 0x344   : > { %v10395_v23 = vpop.f32.mrb[65].mxu0  ;;  %v13722_v46 = vsel %vm11256_vm10, %v9987_v18, %v6756_v38  ;;  %v6758_v31 = vrot.slane %v6756_v38, 4  ;;  %v6450_v25 = vshrl.u32 %v6086_v61, 16  ;;  %v6433_v5 = vrot.slane %v6432_v8, 4  ;;  %v4364_v22 = vld [vmem:[#allocation3 + $0xcc] sm:$0x1] }
 0x345   : > { %v10396_v1 = vadd.f32 %v10395_v23, %v10394_v9  ;;  %v10397_v32 = vpop.f32.mrb[66].mxu0  ;;  %9196 = vmatmul.mubr.bf16.gmra.mrb[132].mxu0 %v11004_v4  ;;  %v6453_v45 = vshll.u32 %v6086_v61, 16  ;;  %v11006_v9 = vld [vmem:[#allocation4 + $0x160] sm:$0xff]  ;;  %v6443_v44 = vrot.slane %v6442_v57, 4  ;;  %v4419_v23 = vld [vmem:[#allocation3 + $0xd4] sm:$0x1] }
 0x346   : > { %9307 = vmatpush1.bf16.msra.mxu1 %v10967_v15  ;;  %v10398_v28 = vpop.f32.mrb[67].mxu0  ;;  %9203 = vmatprep.mubr.bf16.mxu0 %v11005_v47  ;;  %v13730_v2 = vsel %vm11256_vm10, %v6758_v31, %v6759_v33  ;;  %v6452_v18 = vrot.slane %v6450_v25, 4  ;;  %v11007_v11 = vld [vmem:[#allocation4 + $0x1b8] sm:$0xff]  ;;  %v7498_v33 = vld [vmem:[#allocation3 + $0x18] sm:$0xe]  ;;  %v6469_v57 = vshll.u32 %v6088_v26, 16 }
 0x347   : > { %9308 = vmatprep.subr.bf16.mxu1 %v11103_v3  ;;  %v13726_v15 = vadd.f32 %v10396_v1, %v13606_v24  ;;  %v10399_v29 = vadd.f32 %v10398_v28, %v10397_v32  ;;  %v6459_v3 = vshll.u32 %v6087_v39, 16  ;;  %v6438_v32 = vsel %vm11322_vm14, %v6433_v5, %v6437_v60  ;;  %v7032_v38 = vld [vmem:[#allocation3 + $0xd0] sm:$0xf]  ;;  %v7786_v31 = vld [vmem:[%s11225_s9] sm:$0xff] }
 0x348   : > { %v6455_v61 = vrot.slane %v6453_v45, 5  ;;  %v6448_v8 = vsel %vm11322_vm14, %v6443_v44, %v6447_v13  ;;  %v6463_v28 = vshrl.u32 %v6087_v39, 16  ;;  %v7500_v5 = vld [vmem:[#allocation3 + $0x20] sm:$0x1]  ;;  %v7404_v39 = vshll.u32 %v7032_v38, 16 }
 0x349   : > { %14495 = vst [vmem:[#allocation14_spill] sm:$0xff] %v13726_v15  ;;  %9035 = vmatmul.mubr.bf16.gmra.mrb[60].mxu1 %v11006_v9  ;;  %v13733_v24 = vadd.f32 %v10399_v29, %v13657_v27  ;;  %v13741_v4 = vrot.slane %v6459_v3, 5  ;;  %v7787_v27 = vld [vmem:[%s11225_s9 + $0x8] sm:$0xff]  ;;  %v13745_v47 = vcombine.low %v6438_v32, %v6448_v8  ;;  %v4365_v29 = vsel %vm12001_vm2, 0, %v4364_v22  ;;  %v13751_v44 = vld [vmem:[#allocation3 + $0x24] sm:$0xe] }
 0x34a   : > { %9042 = vmatprep.mubr.bf16.mxu1 %v11007_v11  ;;  %9309 = vmatpush1.bf16.msra.mxu1 %v8646_v55  ;;  %v6456_v60 = vor.u32 %v6455_v61, %v6452_v18  ;;  %v4420_v55 = vsel %vm12448_vm5, 0, %v4419_v23  ;;  %v6465_v45 = vrot.slane %v6463_v28, 4  ;;  %v6471_v9 = vrot.slane %v6469_v57, 5  ;;  %4366 = vst [vmem:[#allocation3 + $0xcc] sm:$0x1] %v4365_v29  ;;  %v7788_v23 = vld [vmem:[%s11225_s9 + $0x10] sm:$0xff] }
 0x34b   : > { %14496 = vst [vmem:[#allocation15_spill] sm:$0xff] %v13733_v24  ;;  %v10400_v25 = vpop.f32.mrb[68].mxu0  ;;  %4421 = vst [vmem:[#allocation3 + $0xd4] sm:$0x1] %v4420_v55  ;;  %v7408_v26 = vshrl.u32 %v7032_v38, 16  ;;  %v7818_v11 = vpack.c.bf16 %v7787_v27, %v7786_v31  ;;  %v10036_v17 = vrot.slane %v7498_v33, 9 }
 0x34c   : > { %v10401_v13 = vpop.f32.mrb[69].mxu0  ;;  %v13753_v3 = vld [vmem:[#allocation3 + $0x28] sm:$0xf]  ;;  %v6457_v22 = vrot.slane %v6456_v60, 4  ;;  %v7789_v32 = vld [vmem:[%s11225_s9 + $0x18] sm:$0xff]  ;;  %v6466_v28 = vor.u32 %v6465_v45, %v13741_v4  ;;  %v13758_v57 = vrot.slane %v7404_v39, 5 }
 0x34d   : > { %v10402_v18 = vadd.f32 %v10401_v13, %v10400_v25  ;;  %v10403_v42 = vpop.f32.mrb[70].mxu0  ;;  %v11008_v61 = vld [vmem:[#allocation4 + $0x1c0] sm:$0xff]  ;;  %v7410_v38 = vrot.slane %v7408_v26, 4  ;;  %v7598_v29 = vrot.slane %v7596_v48, 4  ;;  %v13762_v25 = vld [vmem:[#allocation3 + $0x2c] sm:$0x1]  ;;  %v13775_v55 = vsel %vm11256_vm10, %v10036_v17, %v7596_v48 }
 0x34e   : > { %9204 = vmatmul.mubr.bf16.gmra.mrb[136].mxu0 %v11008_v61  ;;  %v10404_v8 = vpop.f32.mrb[71].mxu0  ;;  %v11009_v31 = vld [vmem:[#allocation4 + $0x218] sm:$0xff]  ;;  %v6462_v60 = vsel %vm11322_vm14, %v6457_v22, %v13741_v4  ;;  %vm14498_vm2 = vcmask 31744   ;;  %v7790_v13 = vld [vmem:[%s11225_s9 + $0x20] sm:$0xff]  ;;  %v7791_v45 = vld [vmem:[%s11225_s9 + $0x28] sm:$0xff]  ;;  %v10037_v48 = vrot.slane %v13751_v44, 9 }
 0x34f   : > { %9211 = vmatprep.mubr.bf16.mxu0 %v11009_v31  ;;  %v13765_v33 = vadd.f32 %v10402_v18, %v13669_v49  ;;  %v10405_v27 = vadd.f32 %v10404_v8, %v10403_v42  ;;  %7834 = vst.msk [vmem:[#allocation4 + $0x48] sm:$0xff] %vm14498_vm2, %v7818_v11  ;;  %v11010_v39 = vld [vmem:[#allocation4 + $0x1b0] sm:$0xff]  ;;  %v6467_v49 = vrot.slane %v6466_v28, 4  ;;  %v7411_v26 = vor.u32 %v7410_v38, %v13758_v57  ;;  %v7792_v4 = vld [vmem:[%s11225_s9 + $0x30] sm:$0xff]  ;;  %v7793_v22 = vld [vmem:[%s11225_s9 + $0x38] sm:$0xff] }
 0x350   : > { %v7599_v18 = vrot.slane %v7500_v5, 5  ;;  %v7819_v42 = vpack.c.bf16 %v7789_v32, %v7788_v23  ;;  %v11011_v11 = vld [vmem:[#allocation4 + $0x208] sm:$0xff]  ;;  %v7603_v17 = vrot.slane %v13753_v3, 5  ;;  %v7606_v61 = vrot.slane %v13762_v25, 5  ;;  %v7504_v8 = vld [vmem:[#allocation3 + $0x30] sm:$0xe]  ;;  %vm14500_vm12 = vmmov %vm14498_vm2 }
 0x351   : > { %14497 = vst [vmem:[#allocation16_spill] sm:$0xff] %v13765_v33  ;;  %9043 = vmatmul.mubr.bf16.gmra.mrb[64].mxu1 %v11010_v39  ;;  %v13783_v35 = vadd.f32 %v10405_v27, %v13674_v30  ;;  %v7794_v31 = vld [vmem:[%s11225_s9 + $0x40] sm:$0xff]  ;;  %v7795_v28 = vld [vmem:[%s11225_s9 + $0x48] sm:$0xff]  ;;  %v6472_v5 = vsel %vm11322_vm14, %v6467_v49, %v6471_v9  ;;  %v13792_v23 = vrot.slane %v7411_v26, 4  ;;  %v7820_v30 = vpack.c.bf16 %v7791_v45, %v7790_v13  ;;  %v7505_v44 = vld [vmem:[#allocation3 + $0x34] sm:$0xf] }
 0x352   : > { %9050 = vmatprep.mubr.bf16.mxu1 %v11011_v11  ;;  %v13796_v32 = vsel %vm11256_vm10, %v7598_v29, %v7599_v18  ;;  %7835 = vst.msk [vmem:[#allocation4 + $0x98] sm:$0xff] %vm14500_vm12, %v7819_v42  ;;  %v7506_v38 = vld [vmem:[#allocation3 + $0x38] sm:$0x1]  ;;  %v13801_v3 = vadd.f32 %v13543_v19, %v13500_v56  ;;  %v13803_v27 = vcombine.low %v6462_v60, %v6472_v5  ;;  %v7031_v39 = vld [vmem:[#allocation3 + $0xcc] sm:$0xf]  ;;  %vm14501_vm13 = vmmov %vm14498_vm2  ;;  %v7605_v5 = vrot.slane %v7603_v17, 4 }
 0x353   : > { %14499 = vst [vmem:[#allocation17_spill] sm:$0xff] %v13783_v35  ;;  %v10406_v25 = vpop.f32.mrb[72].mxu0  ;;  %v7033_v9 = vld [vmem:[#allocation3 + $0xd4] sm:$0x1]  ;;  %v13805_v49 = vld [vmem:[#allocation3 + $0xcc] sm:$0xff]   ;;  %v7821_v26 = vpack.c.bf16 %v7793_v22, %v7792_v4  ;;  %v7395_v42 = vshrl.u32 %v7031_v39, 16  ;;  %v7822_v56 = vpack.c.bf16 %v7795_v28, %v7794_v31  ;;  %v13812_v60 = vsel %vm11256_vm10, %v10037_v48, %v7603_v17  ;;  %vm14502_vm5 = vmmov %vm14498_vm2 }
 0x354   : > { %v10407_v18 = vpop.f32.mrb[73].mxu0  ;;  %v7398_v13 = vshll.u32 %v7031_v39, 16  ;;  %v7414_v45 = vshll.u32 %v7033_v9, 16  ;;  %7836 = vst.msk [vmem:[#allocation4 + $0xe8] sm:$0xff] %vm14501_vm13, %v7820_v30  ;;  %v7507_v11 = vld [vmem:[#allocation3 + $0x3c] sm:$0xe]  ;;  %vm14503_vm0 = vmmov %vm14498_vm2  ;;  %v13821_v17 = vsel %vm11256_vm10, %v7605_v5, %v7606_v61 }
 0x355   : > { %v10408_v19 = vadd.f32 %v10407_v18, %v10406_v25  ;;  %v10409_v1 = vpop.f32.mrb[74].mxu0  ;;  %v7610_v35 = vrot.slane %v7505_v44, 5  ;;  %7837 = vst.msk [vmem:[#allocation4 + $0x138] sm:$0xff] %vm14502_vm5, %v7821_v26  ;;  %v7508_v29 = vld [vmem:[#allocation3 + $0x40] sm:$0xf]  ;;  %v11012_v4 = vld [vmem:[#allocation4 + $0x210] sm:$0xff]  ;;  %vm14509_vm1 = vmmov %vm14503_vm0 }
 0x356   : > { %9212 = vmatmul.mubr.bf16.gmra.mrb[140].mxu0 %v11012_v4  ;;  %v10410_v22 = vpop.f32.mrb[75].mxu0  ;;  %v7397_v39 = vrot.slane %v7395_v42, 4  ;;  %v7400_v9 = vrot.slane %v7398_v13, 5  ;;  %v7416_v33 = vrot.slane %v7414_v45, 5  ;;  %v10038_v30 = vrot.slane %v7504_v8, 9  ;;  %7838 = vst.msk [vmem:[#allocation4 + $0x188] sm:$0xff] %vm14503_vm0, %v7822_v56  ;;  %vm14510_vm15 = vmmov %vm14503_vm0 }
 0x357   : > { %v11013_v31 = vld [vmem:[#allocation4 + $0x268] sm:$0xff]  ;;  %v13817_v28 = vadd.f32 %v10408_v19, %v13527_v52  ;;  %v10411_v48 = vadd.f32 %v10410_v22, %v10409_v1  ;;  %v7613_v44 = vrot.slane %v7506_v38, 5  ;;  %v7511_v26 = vld [vmem:[#allocation3 + $0x4c] sm:$0xf]  ;;  %v11014_v18 = vld [vmem:[#allocation4 + $0x200] sm:$0xff]  ;;  %v7612_v1 = vrot.slane %v7610_v35, 4 }
 0x358   : > { %9219 = vmatprep.mubr.bf16.mxu0 %v11013_v31  ;;  %v7509_v25 = vld [vmem:[#allocation3 + $0x44] sm:$0x1]  ;;  %v7401_v8 = vor.u32 %v7400_v9, %v7397_v39  ;;  %v13827_v52 = vsel %vm11256_vm10, %v10038_v30, %v7610_v35  ;;  %v7510_v13 = vld [vmem:[#allocation3 + $0x48] sm:$0xe]  ;;  %v7512_v45 = vld [vmem:[#allocation3 + $0x50] sm:$0x1]  ;;  %v7417_v56 = vsel %vm11322_vm14, %v13792_v23, %v7416_v33 }
 0x359   : > { %14504 = vst [vmem:[#allocation18_spill] sm:$0xff] %v13817_v28  ;;  %9051 = vmatmul.mubr.bf16.gmra.mrb[68].mxu1 %v11014_v18  ;;  %v11015_v61 = vld [vmem:[#allocation4 + $0x258] sm:$0xff]  ;;  %v13830_v38 = vadd.f32 %v10411_v48, %v13530_v0  ;;  %v10039_v19 = vrot.slane %v7507_v11, 9  ;;  %v7617_v5 = vrot.slane %v7508_v29, 5  ;;  %v7797_v22 = vld [vmem:[%s11225_s9 + $0x58] sm:$0xff]  ;;  %v13839_v35 = vsel %vm11256_vm10, %v7612_v1, %v7613_v44  ;;  %v7799_v42 = vld [vmem:[%s11225_s9 + $0x68] sm:$0xff] }
 0x35a   : > { %9058 = vmatprep.mubr.bf16.mxu1 %v11015_v61  ;;  %v7796_v4 = vld [vmem:[%s11225_s9 + $0x50] sm:$0xff]  ;;  %v7402_v9 = vrot.slane %v7401_v8, 4  ;;  %v7620_v30 = vrot.slane %v7509_v25, 5  ;;  %v7624_v31 = vrot.slane %v7511_v26, 5  ;;  %v7514_v0 = vld [vmem:[#allocation3 + $0x58] sm:$0xf]  ;;  %vm14511_vm3 = vmmov %vm14503_vm0  ;;  %v14530_v34 = vcombine.low %v13827_v52, %v13839_v35 }
 0x35b   : > { %14505 = vst [vmem:[#allocation19_spill] sm:$0xff] %v13830_v38  ;;  %v7513_v39 = vld [vmem:[#allocation3 + $0x54] sm:$0xe]  ;;  %v10412_v48 = vpop.f32.mrb[76].mxu0  ;;  %v13845_v33 = vsel %vm11256_vm10, %v10039_v19, %v7617_v5  ;;  %v7619_v23 = vrot.slane %v7617_v5, 4  ;;  %v10040_v29 = vrot.slane %v7510_v13, 9  ;;  %v7823_v26 = vpack.c.bf16 %v7797_v22, %v7796_v4  ;;  %vm14515_vm11 = vmmov %vm14503_vm0 }
 0x35c   : > { %v7515_v11 = vld [vmem:[#allocation3 + $0x5c] sm:$0x1]  ;;  %v10413_v8 = vpop.f32.mrb[77].mxu0  ;;  %v7407_v44 = vsel %vm11322_vm14, %v7402_v9, %v13758_v57  ;;  %v7626_v1 = vrot.slane %v7624_v31, 4  ;;  %v7627_v25 = vrot.slane %v7512_v45, 5  ;;  %v7798_v61 = vld [vmem:[%s11225_s9 + $0x60] sm:$0xff]  ;;  %vm14506_vm14 = vmmov %vm14503_vm0 }
 0x35d   : > { %v10414_v38 = vadd.f32 %v10413_v8, %v10412_v48  ;;  %v10415_v18 = vpop.f32.mrb[78].mxu0  ;;  %v13852_v28 = vcombine.low %v7407_v44, %v7417_v56  ;;  %v13856_v13 = vsel %vm11256_vm10, %v7619_v23, %v7620_v30  ;;  %v13860_v19 = vsel %vm11256_vm10, %v10040_v29, %v7624_v31  ;;  %v7517_v57 = vld [vmem:[#allocation3 + $0x64] sm:$0xf]  ;;  %v11016_v45 = vld [vmem:[#allocation4 + $0x260] sm:$0xff]  ;;  %7839 = vst.msk [vmem:[#allocation4 + $0x1d8] sm:$0xff] %vm14506_vm14, %v7823_v26  ;;  %v7800_v30 = vld [vmem:[%s11225_s9 + $0x70] sm:$0xff] }
 0x35e   : > { %9220 = vmatmul.mubr.bf16.gmra.mrb[144].mxu0 %v11016_v45  ;;  %v10416_v5 = vpop.f32.mrb[79].mxu0  ;;  %v13866_v56 = vsel %vm11256_vm10, %v7626_v1, %v7627_v25  ;;  %v10041_v22 = vrot.slane %v7513_v39, 9  ;;  %v7631_v9 = vrot.slane %v7514_v0, 5  ;;  %v7801_v48 = vld [vmem:[%s11225_s9 + $0x78] sm:$0xff]  ;;  %v11017_v31 = vld [vmem:[#allocation4 + $0x2b8] sm:$0xff]  ;;  %v7824_v44 = vpack.c.bf16 %v7799_v42, %v7798_v61  ;;  %v11018_v26 = vld [vmem:[#allocation4 + $0x250] sm:$0xff] }
 0x35f   : > { %9227 = vmatprep.mubr.bf16.mxu0 %v11017_v31  ;;  %v13872_v23 = vadd.f32 %v10414_v38, %v13571_v37  ;;  %v10417_v29 = vadd.f32 %v10416_v5, %v10415_v18  ;;  %v7518_v1 = vld [vmem:[#allocation3 + $0x68] sm:$0x1]  ;;  %v7519_v25 = vld [vmem:[#allocation3 + $0x6c] sm:$0xe]  ;;  %v7520_v45 = vld [vmem:[#allocation3 + $0x70] sm:$0xf]  ;;  %v7825_v4 = vpack.c.bf16 %v7801_v48, %v7800_v30  ;;  %v14532_v52 = vcombine.low %v13845_v33, %v13856_v13 }
 0x360   : > { %v13879_v39 = vld [vmem:[%s14412_s4] ss:$0 sm:$0xff]  ;;  %v7633_v37 = vrot.slane %v7631_v9, 4  ;;  %v7634_v38 = vrot.slane %v7515_v11, 5  ;;  %v7638_v18 = vrot.slane %v7517_v57, 5  ;;  %v7803_v31 = vld [vmem:[%s11225_s9 + $0x88] sm:$0xff]  ;;  %v13890_v61 = vsel %vm11256_vm10, %v10041_v22, %v7631_v9  ;;  %vm14516_vm6 = vmmov %vm14503_vm0 }
 0x361   : > { %14507 = vst [vmem:[#allocation20_spill] sm:$0xff] %v13872_v23  ;;  %9059 = vmatmul.mubr.bf16.gmra.mrb[72].mxu1 %v11018_v26  ;;  %v8739_v0 = vadd.f32 %v13879_v39, %v13650_v62  ;;  %v7802_v5 = vld [vmem:[%s11225_s9 + $0x80] sm:$0xff]  ;;  %v13886_v42 = vadd.f32 %v10417_v29, %v13801_v3  ;;  %7840 = vst.msk [vmem:[#allocation4 + $0x228] sm:$0xff] %vm14509_vm1, %v7824_v44  ;;  %v10042_v26 = vrot.slane %v7516_v54, 9  ;;  %v7521_v23 = vld [vmem:[#allocation3 + $0x74] sm:$0x1] }
 0x362   : > { %v11020_v8 = vld [vmem:[#allocation4 + $0x2a8] sm:$0xff]  ;;  %v7523_v62 = vld [vmem:[#allocation3 + $0x7c] sm:$0xf]  ;;  %v13895_v11 = vsel %vm11256_vm10, %v7633_v37, %v7634_v38  ;;  %v7640_v57 = vrot.slane %v7638_v18, 4  ;;  %v7641_v24 = vrot.slane %v7518_v1, 5  ;;  %7841 = vst.msk [vmem:[#allocation4 + $0x278] sm:$0xff] %vm14510_vm15, %v7825_v4  ;;  %v7826_v9 = vpack.c.bf16 %v7803_v31, %v7802_v5  ;;  %vm14517_vm4 = vmmov %vm14503_vm0 }
 0x363   : > { %9066 = vmatprep.mubr.bf16.mxu1 %v11020_v8  ;;  %14508 = vst [vmem:[#allocation21_spill] sm:$0xff] %v13886_v42  ;;  %v7645_v8 = vrot.slane %v7520_v45, 5  ;;  %v7522_v15 = vld [vmem:[#allocation3 + $0x78] sm:$0xe]  ;;  %v10418_v3 = vpop.f32.mrb[80].mxu0  ;;  %v13901_v22 = vsel %vm11256_vm10, %v10042_v26, %v7638_v18  ;;  %v10043_v54 = vrot.slane %v7519_v25, 9  ;;  %v8742_v38 = vadd.f32 %v13879_v39, %v13659_v7  ;;  %vm14519_vm7 = vmmov %vm14503_vm0 }
 0x364   : > { %v7524_v30 = vld [vmem:[#allocation3 + $0x80] sm:$0x1]  ;;  %v10419_v48 = vpop.f32.mrb[81].mxu0  ;;  %v13906_v44 = vsel %vm11256_vm10, %v7640_v57, %v7641_v24  ;;  %v7648_v45 = vrot.slane %v7521_v23, 5  ;;  %v7652_v37 = vrot.slane %v7523_v62, 5  ;;  %7842 = vst.msk [vmem:[#allocation4 + $0x2c8] sm:$0xff] %vm14511_vm3, %v7826_v9  ;;  %vm14521_vm8 = vmmov %vm14503_vm0 }
 0x365   : > { %v7647_v1 = vrot.slane %v7645_v8, 4  ;;  %v10420_v29 = vadd.f32 %v10419_v48, %v10418_v3  ;;  %v10421_v42 = vpop.f32.mrb[82].mxu0  ;;  %v10318_v18 = vpop.f32.mrb[16].mxu1  ;;  %v10044_v25 = vrot.slane %v7522_v15, 9  ;;  %v11021_v5 = vld [vmem:[#allocation4 + $0x2b0] sm:$0xff]  ;;  %v13915_v23 = vsel %vm11256_vm10, %v10043_v54, %v7645_v8  ;;  %v11022_v57 = vld [vmem:[#allocation4 + $0x308] sm:$0xff]  ;;  %vm14523_vm9 = vmmov %vm14503_vm0 }
 0x366   : > { %9228 = vmatmul.mubr.bf16.gmra.mrb[148].mxu0 %v11021_v5  ;;  %v10422_v31 = vpop.f32.mrb[83].mxu0  ;;  %v10319_v24 = vpop.f32.mrb[17].mxu1  ;;  %v7654_v26 = vrot.slane %v7652_v37, 4  ;;  %v7655_v62 = vrot.slane %v7524_v30, 5  ;;  %v11023_v4 = vld [vmem:[#allocation4 + $0x2a0] sm:$0xff]  ;;  %vm14524_vm2 = vmmov %vm14503_vm0 }
 0x367   : > { %v13919_v7 = vsel %vm11256_vm10, %v7647_v1, %v7648_v45  ;;  %9235 = vmatprep.mubr.bf16.mxu0 %v11022_v57  ;;  %v13921_v3 = vadd.f32 %v10420_v29, %v8739_v0  ;;  %v10423_v9 = vadd.f32 %v10422_v31, %v10421_v42  ;;  %v13923_v15 = vadd.f32 %v10319_v24, %v10318_v18  ;;  %v10321_v48 = vpop.f32.mrb[18].mxu1  ;;  %v11024_v0 = vld [vmem:[#allocation4 + $0x2f8] sm:$0xff]  ;;  %v7525_v45 = vld [vmem:[#allocation3 + $0x84] sm:$0xe]  ;;  %v7526_v24 = vld [vmem:[#allocation3 + $0x88] sm:$0xf] }
 0x368   : > { %v10322_v8 = vpop.f32.mrb[19].mxu1  ;;  %v13929_v54 = vsel %vm11256_vm10, %v10044_v25, %v7652_v37  ;;  %v13933_v30 = vsel %vm11256_vm10, %v7654_v26, %v7655_v62  ;;  %v7529_v18 = vld [vmem:[#allocation3 + $0x94] sm:$0xf]  ;;  %v7527_v37 = vld [vmem:[#allocation3 + $0x8c] sm:$0x1]  ;;  %v7659_v57 = vrot.slane %v7526_v24, 5  ;;  %v8747_v62 = vadd.f32 %v13879_v39, %v13685_v40  ;;  %vm14525_vm12 = vmmov %vm14503_vm0 }
 0x369   : > { %14512 = vst [vmem:[#allocation22_spill] sm:$0xff] %v13921_v3  ;;  %9067 = vmatmul.mubr.bf16.gmra.mrb[76].mxu1 %v11023_v4  ;;  %14513 = vst [vmem:[#allocation23_spill] sm:$0xff] %v13933_v30  ;;  %v13935_v42 = vadd.f32 %v10423_v9, %v8742_v38  ;;  %v13937_v29 = vadd.f32 %v10322_v8, %v10321_v48  ;;  %v7530_v4 = vld [vmem:[#allocation3 + $0x98] sm:$0x1]  ;;  %v7528_v5 = vld [vmem:[#allocation3 + $0x90] sm:$0xe]  ;;  %v8750_v38 = vadd.f32 %v13879_v39, %v13691_v20 }
 0x36a   : > { %9074 = vmatprep.mubr.bf16.mxu1 %v11024_v0  ;;  %v7666_v26 = vrot.slane %v7529_v18, 5  ;;  %v10045_v0 = vrot.slane %v7525_v45, 9  ;;  %v11025_v1 = vld [vmem:[#allocation4 + $0x300] sm:$0xff]  ;;  %v7661_v41 = vrot.slane %v7659_v57, 4  ;;  %v7662_v24 = vrot.slane %v7527_v37, 5  ;;  %vm14527_vm13 = vmmov %vm14503_vm0 }
 0x36b   : > { %14514 = vst [vmem:[#allocation24_spill] sm:$0xff] %v13935_v42  ;;  %v10424_v31 = vpop.f32.mrb[84].mxu0  ;;  %v7669_v18 = vrot.slane %v7530_v4, 5  ;;  %v10046_v45 = vrot.slane %v7528_v5, 9  ;;  %vm14529_vm5 = vmmov %vm14503_vm0 }
 0x36c   : > { %v10425_v25 = vpop.f32.mrb[85].mxu0  ;;  %v7668_v63 = vrot.slane %v7666_v26, 4  ;;  %v13953_v37 = vsel %vm11256_vm10, %v10045_v0, %v7659_v57  ;;  %v7806_v0 = vld [vmem:[%s11225_s9 + $0xa0] sm:$0xff]  ;;  %vm14534_vm14 = vmmov %vm14503_vm0 }
 0x36d   : > { %v10426_v9 = vadd.f32 %v10425_v25, %v10424_v31  ;;  %v10427_v48 = vpop.f32.mrb[86].mxu0  ;;  %v10324_v8 = vpop.f32.mrb[20].mxu1  ;;  %v7804_v25 = vld [vmem:[%s11225_s9 + $0x90] sm:$0xff]  ;;  %vm14536_vm1 = vmmov %vm14503_vm0 }
 0x36e   : > { %9236 = vmatmul.mubr.bf16.gmra.mrb[152].mxu0 %v11025_v1  ;;  %v10428_v42 = vpop.f32.mrb[87].mxu0  ;;  %v10325_v3 = vpop.f32.mrb[21].mxu1  ;;  %v7827_v30 = vpack.c.bf16 %v7805_v58, %v7804_v25  ;;  %v13971_v58 = vsel %vm11256_vm10, %v10046_v45, %v7666_v26  ;;  %v11031_v26 = vld [vmem:[#allocation4 + $0x340] sm:$0xff]  ;;  %v11034_v25 = vld [vmem:[#allocation4 + $0x390] sm:$0xff]  ;;  %v11035_v45 = vld [vmem:[#allocation4 + $0x3e8] sm:$0xff] }
 0x36f   : > { %9243 = vmatprep.mubr.bf16.mxu0 %v11026_v12  ;;  %v13945_v40 = vadd.f32 %v10426_v9, %v8747_v62  ;;  %v10429_v51 = vadd.f32 %v10428_v42, %v10427_v48  ;;  %v13947_v20 = vadd.f32 %v10325_v3, %v10324_v8  ;;  %v10327_v31 = vpop.f32.mrb[22].mxu1  ;;  %v13957_v12 = vsel %vm11256_vm10, %v7661_v41, %v7662_v24  ;;  %v11028_v42 = vld [vmem:[#allocation4 + $0x348] sm:$0xff]  ;;  %v7807_v24 = vld [vmem:[%s11225_s9 + $0xa8] sm:$0xff]  ;;  %vm14538_vm15 = vmmov %vm14503_vm0 }
 0x370   : > { %v10328_v1 = vpop.f32.mrb[23].mxu1  ;;  %v13961_v3 = vsel %vm11256_vm10, %v7668_v63, %v7669_v18  ;;  %7843 = vst.msk [vmem:[#allocation4 + $0x318] sm:$0xff] %vm14515_vm11, %v7827_v30  ;;  %v11030_v48 = vld [vmem:[#allocation4 + $0x3a8] sm:$0xff]  ;;  %v11032_v30 = vld [vmem:[#allocation4 + $0x398] sm:$0xff]  ;;  %v7828_v18 = vpack.c.bf16 %v7807_v24, %v7806_v0  ;;  %v11036_v0 = vld [vmem:[#allocation4 + $0x3f0] sm:$0xff] }
 0x371   : > { %9075 = vmatmul.mubr.bf16.gmra.mrb[80].mxu1 %v11027_v10  ;;  %v13963_v4 = vadd.f32 %v10429_v51, %v8750_v38  ;;  %v13965_v5 = vadd.f32 %v10328_v1, %v10327_v31  ;;  %v10061_v10 = vcombine.low %v13953_v37, %v13957_v12  ;;  %v10062_v63 = vcombine.low %v13971_v58, %v13961_v3  ;;  %v11029_v38 = vld [vmem:[#allocation4 + $0x350] sm:$0xff]  ;;  %v11033_v31 = vld [vmem:[#allocation4 + $0x3a0] sm:$0xff]  ;;  %v7808_v1 = vld [vmem:[%s11225_s9 + $0xb0] sm:$0xff] }
 0x372   : > { %9082 = vmatprep.mubr.bf16.mxu1 %v11028_v42  ;;  %7844 = vst.msk [vmem:[#allocation4 + $0x368] sm:$0xff] %vm14516_vm6, %v7828_v18  ;;  %v7809_v42 = vld [vmem:[%s11225_s9 + $0xb8] sm:$0xff]  ;;  %vm14540_vm3 = vmmov %vm14503_vm0 }
 0x373   : > { %v10430_v41 = vpop.f32.mrb[88].mxu0  ;;  %vm14543_vm11 = vmmov %vm14503_vm0 }
 0x374   : > { %v10431_v57 = vpop.f32.mrb[89].mxu0  ;;  %vm14544_vm6 = vmmov %vm14503_vm0 }
 0x375   : > { %v13976_v51 = vadd.f32 %v10431_v57, %v10430_v41  ;;  %v10433_v62 = vpop.f32.mrb[90].mxu0  ;;  %v7829_v41 = vpack.c.bf16 %v7809_v42, %v7808_v1  ;;  %v7531_v57 = vld [vmem:[#allocation3 + $0x9c] sm:$0xe]  ;;  %v7535_v1 = vld [vmem:[#allocation3 + $0xac] sm:$0xf] }
 0x376   : > { %9244 = vmatmul.mubr.bf16.gmra.mrb[156].mxu0 %v11029_v38  ;;  %v10434_v9 = vpop.f32.mrb[91].mxu0  ;;  %v7533_v38 = vld [vmem:[#allocation3 + $0xa4] sm:$0x1] }
 0x377   : > { %9251 = vmatprep.mubr.bf16.mxu0 %v11030_v48  ;;  %v13978_v8 = vadd.f32 %v10434_v9, %v10433_v62  ;;  %v7532_v62 = vld [vmem:[#allocation3 + $0xa0] sm:$0xf]  ;;  %7845 = vst.msk [vmem:[#allocation4 + $0x3b8] sm:$0xff] %vm14517_vm4, %v7829_v41  ;;  %v10047_v48 = vrot.slane %v7531_v57, 9  ;;  %v7536_v41 = vld [vmem:[#allocation3 + $0xb0] sm:$0x1]  ;;  %vm14545_vm4 = vmmov %vm14503_vm0 }
 0x378   : > { %v7673_v9 = vrot.slane %v7532_v62, 5  ;;  %v7680_v57 = vrot.slane %v7535_v1, 5 }
 0x379   : > { %9083 = vmatmul.mubr.bf16.gmra.mrb[84].mxu1 %v11031_v26 }
 0x37a   : > { %9090 = vmatprep.mubr.bf16.mxu1 %v11032_v30  ;;  %v7675_v26 = vrot.slane %v7673_v9, 4  ;;  %v7676_v30 = vrot.slane %v7533_v38, 5 }
 0x37c   : > { %v13994_v24 = vsel %vm11256_vm10, %v7675_v26, %v7676_v30  ;;  %v8763_v26 = vadd.f32 %v13879_v39, %v13947_v20  ;;  %v8766_v20 = vadd.f32 %v13879_v39, %v13965_v5  ;;  %v7539_v5 = vld [vmem:[#allocation3 + $0xbc] sm:$0x1] }
 0x37e   : > { %9252 = vmatmul.mubr.bf16.gmra.mrb[160].mxu0 %v11033_v31  ;;  %v7534_v31 = vld [vmem:[#allocation3 + $0xa8] sm:$0xe] }
 0x37f   : > { %9259 = vmatprep.mubr.bf16.mxu0 %v13608_v6  ;;  %v13990_v6 = vsel %vm11256_vm10, %v10047_v48, %v7673_v9  ;;  %v10048_v9 = vrot.slane %v7534_v31, 9  ;;  %v7683_v48 = vrot.slane %v7536_v41, 5 }
 0x380   : > { %v10063_v18 = vcombine.low %v13990_v6, %v13994_v24 }
 0x381   : > { %9091 = vmatmul.mubr.bf16.gmra.mrb[88].mxu1 %v11034_v25  ;;  %v14518_v25 = vcombine.low %v13632_v53, %v13640_v16  ;;  %v11037_v16 = vld [vmem:[#allocation4 + $0x440] sm:$0xff] }
 0x382   : > { %9098 = vmatprep.mubr.bf16.mxu1 %v11035_v45  ;;  %v7810_v45 = vld [vmem:[%s11225_s9 + $0xc0] sm:$0xff] }
 0x386   : > { %9260 = vmatmul.mubr.bf16.gmra.mrb[164].mxu0 %v11036_v0 }
 0x387   : > { %9267 = vmatprep.mubr.bf16.mxu0 %v13645_v36  ;;  %v7811_v36 = vld [vmem:[%s11225_s9 + $0xc8] sm:$0xff] }
 0x388   : > { %v7830_v42 = vpack.c.bf16 %v7811_v36, %v7810_v45 }
 0x389   : > { %9099 = vmatmul.mubr.bf16.gmra.mrb[92].mxu1 %v13627_v43  ;;  %v10436_v62 = vpop.f32.mrb[92].mxu0  ;;  %v7682_v43 = vrot.slane %v7680_v57, 4 }
 0x38a   : > { %9106 = vmatprep.mubr.bf16.mxu1 %v14518_v25  ;;  %v10437_v38 = vpop.f32.mrb[93].mxu0  ;;  %7846 = vst.msk [vmem:[#allocation4 + $0x408] sm:$0xff] %vm14519_vm7, %v7830_v42  ;;  %v14009_v25 = vsel %vm11256_vm10, %v10048_v9, %v7680_v57  ;;  %v14520_v42 = vcombine.low %v13695_v14, %v13699_v21  ;;  %v7812_v57 = vld [vmem:[%s11225_s9 + $0xd0] sm:$0xff]  ;;  %v7538_v9 = vld [vmem:[#allocation3 + $0xb8] sm:$0xf]  ;;  %v7690_v21 = vrot.slane %v7539_v5, 5  ;;  %vm14548_vm7 = vmmov %vm14503_vm0 }
 0x38b   : > { %v10438_v30 = vadd.f32 %v10437_v38, %v10436_v62  ;;  %v10439_v53 = vpop.f32.mrb[94].mxu0  ;;  %v14013_v45 = vsel %vm11256_vm10, %v7682_v43, %v7683_v48  ;;  %v7813_v62 = vld [vmem:[%s11225_s9 + $0xd8] sm:$0xff]  ;;  %v7537_v38 = vld [vmem:[#allocation3 + $0xb4] sm:$0xe]  ;;  %v7687_v48 = vrot.slane %v7538_v9, 5 }
 0x38c   : > { %v10440_v0 = vpop.f32.mrb[95].mxu0 }
 0x38d   : > { %v14018_v31 = vadd.f32 %v10438_v30, %v8763_v26  ;;  %v10441_v36 = vadd.f32 %v10440_v0, %v10439_v53  ;;  %v7689_v14 = vrot.slane %v7687_v48, 4  ;;  %v11038_v0 = vld [vmem:[#allocation4 + $0x490] sm:$0xff] }
 0x38e   : > { %9268 = vmatmul.mubr.bf16.gmra.mrb[168].mxu0 %v11037_v16  ;;  %v10049_v16 = vrot.slane %v7537_v38, 9 }
 0x38f   : > { %9275 = vmatprep.mubr.bf16.mxu0 %v13717_v50  ;;  %v14026_v41 = vadd.f32 %v10441_v36, %v8766_v20  ;;  %v7831_v50 = vpack.c.bf16 %v7813_v62, %v7812_v57  ;;  %v14044_v38 = vsel %vm11256_vm10, %v7689_v14, %v7690_v21 }
 0x391   : > { %9107 = vmatmul.mubr.bf16.gmra.mrb[96].mxu1 %v13683_v59  ;;  %v10442_v43 = vpop.f32.mrb[96].mxu0  ;;  %7847 = vst.msk [vmem:[#allocation4 + $0x458] sm:$0xff] %vm14521_vm8, %v7831_v50  ;;  %v14040_v50 = vsel %vm11256_vm10, %v10049_v16, %v7687_v48  ;;  %v7541_v16 = vld [vmem:[#allocation3 + $0xc4] sm:$0xf]  ;;  %vm14552_vm8 = vmmov %vm14503_vm0 }
 0x392   : > { %9114 = vmatprep.mubr.bf16.mxu1 %v14520_v42  ;;  %v10443_v26 = vpop.f32.mrb[97].mxu0  ;;  %v7694_v14 = vrot.slane %v7541_v16, 5  ;;  %v7817_v16 = vld [vmem:[%s11225_s9 + $0xf8] sm:$0xff]  ;;  %v7979_v58 = vld [vmem:[#allocation4 + $0x408] sm:$0xff] }
 0x393   : > { %v14031_v53 = vadd.f32 %v10443_v26, %v10442_v43  ;;  %v10445_v59 = vpop.f32.mrb[98].mxu0  ;;  %v7814_v26 = vld [vmem:[%s11225_s9 + $0xe0] sm:$0xff] }
 0x394   : > { %v10446_v36 = vpop.f32.mrb[99].mxu0 }
 0x395   : > { %v10330_v30 = vpop.f32.mrb[24].mxu1  ;;  %v14036_v62 = vadd.f32 %v10446_v36, %v10445_v59  ;;  %v7540_v59 = vld [vmem:[#allocation3 + $0xc0] sm:$0xe] }
 0x396   : > { %9276 = vmatmul.mubr.bf16.gmra.mrb[172].mxu0 %v11038_v0  ;;  %v10331_v20 = vpop.f32.mrb[25].mxu1  ;;  %v7542_v0 = vld [vmem:[#allocation3 + $0xc8] sm:$0x1]  ;;  %v10050_v21 = vrot.slane %v7540_v59, 9  ;;  %v7816_v59 = vld [vmem:[%s11225_s9 + $0xf0] sm:$0xff] }
 0x397   : > { %9283 = vmatprep.mubr.bf16.mxu0 %v13852_v28  ;;  %v14034_v42 = vadd.f32 %v10331_v20, %v10330_v30  ;;  %v10333_v57 = vpop.f32.mrb[26].mxu1  ;;  %v14522_v28 = vcombine.low %v13722_v46, %v13730_v2  ;;  %v7815_v30 = vld [vmem:[%s11225_s9 + $0xe8] sm:$0xff]  ;;  %v7696_v20 = vrot.slane %v7694_v14, 4  ;;  %v7697_v36 = vrot.slane %v7542_v0, 5  ;;  %v7859_v46 = vld [vmem:[#allocation4 + $0x48] sm:$0xff]  ;;  %s215_s9 = sand.u32 1, %s11093_s19  }
 0x398   : > { %v10334_v9 = vpop.f32.mrb[27].mxu1  ;;  %v7832_v48 = vpack.c.bf16 %v7815_v30, %v7814_v26  ;;  %v7543_v0 = vld [vmem:[#allocation3 + $0xcc] sm:$0xe]  ;;  %v7989_v24 = vld [vmem:[#allocation4 + $0x458] sm:$0xff]  ;;  %s9597_s14 = sshll.u32 %s215_s9, 8  ;;  %s14366_s22 = scalar_lea.sflag [#allocation6], %s215_s9 }
 0x399   : > { %9115 = vmatmul.mubr.bf16.gmra.mrb[100].mxu1 %v13745_v47  ;;  %v14052_v43 = vadd.f32 %v10334_v9, %v10333_v57  ;;  %v14064_v26 = vsel %vm11256_vm10, %v7696_v20, %v7697_v36  ;;  %v7869_v36 = vld [vmem:[#allocation4 + $0x98] sm:$0xff]  ;;  %s14291_s16 = scalar_lea.vmem [#allocation5], %s9597_s14 }
 0x39a   : > { %9122 = vmatprep.mubr.bf16.mxu1 %v14522_v28  ;;  %7848 = vst.msk [vmem:[#allocation4 + $0x4a8] sm:$0xff] %vm14523_vm9, %v7832_v48  ;;  %v14060_v28 = vsel %vm11256_vm10, %v10050_v21, %v7694_v14  ;;  %v7545_v14 = vld [vmem:[#allocation3 + $0xd4] sm:$0x1]  ;;  %v10051_v21 = vrot.slane %v7543_v0, 9  ;;  %vm14556_vm9 = vmmov %vm14503_vm0  ;;  %s9531_s30 = sshll.u32 %s14291_s16, 4  ;;  %s14361_s30 = int_to_ptr.vmem [resolvable:$true] %s9531_s30 }
 0x39b   : > { %v10066_v48 = vcombine.low %v14060_v28, %v14064_v26  ;;  %v7704_v1 = vrot.slane %v7545_v14, 5  ;;  %v14560_v26 = vld [vmem:[#allocation16_spill] sm:$0xff]  ;;  %s11039_s8 = scalar_lea.vmem %s14361_s30, 4096  ;;  %p11046_p0 = scmp.lt.s32.totalorder %s14361_s30, %s11044_s13 }
 0x39c   : > { %p11040_p11 = scmp.ne.s32.totalorder %s14361_s30, %s11039_s8  ;;  %p11047_p1 = scmp.lt.s32.totalorder %s11045_s12, %s11039_s8 }
 0x39d   : > { %v10336_v47 = vpop.f32.mrb[28].mxu1 }
 0x39e   : > { %9284 = vmatmul.mubr.bf16.gmra.mrb[176].mxu0 %v13805_v49  ;;  %v10337_v2 = vpop.f32.mrb[29].mxu1  ;;  %p11041_p12 = pnand %p11040_p11, %p11182_p5  ;;  %p11048_p2 = por %p11047_p1, %p11046_p0 }
 0x39f   : > { %v10338_v57 = vadd.f32 %v10337_v2, %v10336_v47  ;;  %v10339_v9 = vpop.f32.mrb[30].mxu1  ;;  %v7833_v47 = vpack.c.bf16 %v7817_v16, %v7816_v59  ;;  %v7544_v2 = vld [vmem:[#allocation3 + $0xd0] sm:$0xf]  ;;  %v7879_v59 = vld [vmem:[#allocation4 + $0xe8] sm:$0xff]  ;;  %v14528_v16 = vcombine.low %v13812_v60, %v13821_v17 }
 0x3a0   : > { %v10340_v30 = vpop.f32.mrb[31].mxu1  ;;  %v7701_v5 = vrot.slane %v7544_v2, 5  ;;  %v7899_v60 = vld [vmem:[#allocation4 + $0x188] sm:$0xff]  ;;  %p11042_p13 = pneg %p11041_p12 }
 0x3a1   : > { %9123 = vmatmul.mubr.bf16.gmra.mrb[104].mxu1 %v13803_v27  ;;  %v10341_v49 = vadd.f32 %v10340_v30, %v10339_v9  ;;  %7849 = vst.msk [vmem:[#allocation4 + $0x4f8] sm:$0xff] %vm14525_vm12, %v7833_v47  ;;  %v14526_v9 = vcombine.low %v13775_v55, %v13796_v32 }
 0x3a2   : > { %10142 = vmatprep.mubr.msk.bf16.mxu1 %vm14524_vm2, %v7859_v46  ;;  %v14075_v27 = vsel %vm11256_vm10, %v10051_v21, %v7701_v5  ;;  %v7703_v20 = vrot.slane %v7701_v5, 4  ;;  %v7889_v5 = vld [vmem:[#allocation4 + $0x138] sm:$0xff]  ;;  %vm14559_vm2 = vmmov %vm14503_vm0  ;;  %p11049_p3 = pnand %p11048_p2, %p11042_p13 }
 0x3a3   : > { %v8782_v14 = vadd.f32 %v13879_v39, %v10341_v49 }
 0x3a4   : > { %v14079_v46 = vsel %vm11256_vm10, %v7703_v20, %v7704_v1  ;;  %vm14531_vm10 = vmmov %vm14503_vm0  ;;  %v8779_v1 = vadd.f32 %v13879_v39, %v10338_v57  ;;  %v8755_v20 = vadd.f32 %v13879_v39, %v13923_v15 }
 0x3a5   : > { %v10067_v30 = vcombine.low %v14075_v27, %v14079_v46 }
 0x3a9   : > { %9325 = vmatmul.mubr.bf16.vlgmr.msra.gmra.mrb[108].mxu1 %v14526_v9  ;;  %v14110_v9 = vadd.f32 %v13976_v51, %v8755_v20  ;;  %v8771_v20 = vadd.f32 %v13879_v39, %v14034_v42  ;;  %v14537_v42 = vcombine.low %v13901_v22, %v13906_v44  ;;  %v14541_v22 = vld [vmem:[#allocation23_spill] sm:$0xff] }
 0x3aa   : > { %10143 = vmatprep.mubr.msk.bf16.mxu1 %vm14527_vm13, %v7869_v36  ;;  %v8758_v36 = vadd.f32 %v13879_v39, %v13937_v29  ;;  %v14533_v29 = vcombine.low %v13860_v19, %v13866_v56  ;;  %v8774_v19 = vadd.f32 %v13879_v39, %v14052_v43  ;;  %v14542_v44 = vcombine.low %v13929_v54, %v14541_v22 }
 0x3ab   : > { %v14128_v56 = vadd.f32 %v14031_v53, %v8771_v20 }
 0x3b1   : > { %9333 = vmatmul.mubr.bf16.gmra.mrb[112].mxu1 %v14528_v16 }
 0x3b2   : > { %10144 = vmatprep.mubr.msk.bf16.mxu1 %vm14529_vm5, %v7879_v59 }
 0x3b8   : > { %v10448_v55 = vpop.f32.mrb[100].mxu0 }
 0x3b9   : > { %9341 = vmatmul.mubr.bf16.gmra.mrb[116].mxu1 %v14530_v34  ;;  %v10449_v32 = vpop.f32.mrb[101].mxu0 }
 0x3ba   : > { %10145 = vmatprep.mubr.msk.bf16.mxu1 %vm14531_vm10, %v7889_v5  ;;  %v10450_v0 = vadd.f32 %v10449_v32, %v10448_v55  ;;  %v10451_v47 = vpop.f32.mrb[102].mxu0  ;;  %v7909_v55 = vld [vmem:[#allocation4 + $0x1d8] sm:$0xff] }
 0x3bb   : > { %v10452_v2 = vpop.f32.mrb[103].mxu0 }
 0x3bc   : > { %v14097_v17 = vadd.f32 %v10450_v0, %v8779_v1  ;;  %v10453_v21 = vadd.f32 %v10452_v2, %v10451_v47  ;;  %v14113_v0 = vadd.f32 %v13978_v8, %v8758_v36  ;;  %v14535_v8 = vcombine.low %v13890_v61, %v13895_v11  ;;  %v7929_v36 = vld [vmem:[#allocation4 + $0x278] sm:$0xff]  ;;  %v7939_v61 = vld [vmem:[#allocation4 + $0x2c8] sm:$0xff] }
 0x3be   : > { %v14104_v35 = vadd.f32 %v10453_v21, %v8782_v14  ;;  %v7919_v14 = vld [vmem:[#allocation4 + $0x228] sm:$0xff] }
 0x3c0   : > { %v10454_v57 = vpop.f32.mrb[104].mxu0 }
 0x3c1   : > { %9349 = vmatmul.mubr.bf16.gmra.mrb[120].mxu1 %v14532_v52  ;;  %v10455_v49 = vpop.f32.mrb[105].mxu0 }
 0x3c2   : > { %10146 = vmatprep.mubr.msk.bf16.mxu1 %vm14503_vm0, %v7899_v60  ;;  %v10456_v16 = vadd.f32 %v10455_v49, %v10454_v57  ;;  %v10457_v5 = vpop.f32.mrb[106].mxu0  ;;  %v14131_v49 = vadd.f32 %v14036_v62, %v8774_v19  ;;  %v7949_v62 = vld [vmem:[#allocation4 + $0x318] sm:$0xff] }
 0x3c3   : > { %v10458_v34 = vpop.f32.mrb[107].mxu0  ;;  %v7969_v19 = vld [vmem:[#allocation4 + $0x3b8] sm:$0xff] }
 0x3c4   : > { %v10342_v59 = vpop.f32.mrb[32].mxu1  ;;  %v10459_v32 = vadd.f32 %v10458_v34, %v10457_v5 }
 0x3c5   : > { %v10343_v15 = vpop.f32.mrb[33].mxu1 }
 0x3c6   : > { %v10344_v33 = vadd.f32 %v10343_v15, %v10342_v59  ;;  %v10345_v13 = vpop.f32.mrb[34].mxu1  ;;  %v14539_v59 = vcombine.low %v13915_v23, %v13919_v7 }
 0x3c7   : > { %v10346_v1 = vpop.f32.mrb[35].mxu1 }
 0x3c8   : > { %v10347_v47 = vadd.f32 %v10346_v1, %v10345_v13  ;;  %v8787_v11 = vadd.f32 %v13879_v39, %v10344_v33 }
 0x3c9   : > { %9357 = vmatmul.mubr.bf16.gmra.mrb[124].mxu1 %v14533_v29 }
 0x3ca   : > { %10147 = vmatprep.mubr.msk.bf16.mxu1 %vm14534_vm14, %v7909_v55  ;;  %v8790_v53 = vadd.f32 %v13879_v39, %v10347_v47  ;;  %v14143_v43 = vadd.f32 %v10456_v16, %v8787_v11 }
 0x3cc   : > { %v10348_v51 = vpop.f32.mrb[36].mxu1  ;;  %v14145_v5 = vadd.f32 %v10459_v32, %v8790_v53  ;;  %v7959_v32 = vld [vmem:[#allocation4 + $0x368] sm:$0xff] }
 0x3cd   : > { %v10349_v2 = vpop.f32.mrb[37].mxu1 }
 0x3ce   : > { %v10350_v60 = vadd.f32 %v10349_v2, %v10348_v51  ;;  %v10351_v21 = vpop.f32.mrb[38].mxu1 }
 0x3cf   : > { %v10352_v52 = vpop.f32.mrb[39].mxu1 }
 0x3d0   : > { %v10353_v57 = vadd.f32 %v10352_v52, %v10351_v21  ;;  %v8795_v23 = vadd.f32 %v13879_v39, %v10350_v60 }
 0x3d1   : > { %9365 = vmatmul.mubr.bf16.gmra.mrb[128].mxu1 %v14535_v8 }
 0x3d2   : > { %10148 = vmatprep.mubr.msk.bf16.mxu1 %vm14536_vm1, %v7919_v14  ;;  %v8798_v13 = vadd.f32 %v13879_v39, %v10353_v57 }
 0x3d9   : > { %9373 = vmatmul.mubr.bf16.gmra.mrb[132].mxu1 %v14537_v42 }
 0x3da   : > { %10149 = vmatprep.mubr.msk.bf16.mxu1 %vm14538_vm15, %v7929_v36 }
 0x3e1   : > { %9381 = vmatmul.mubr.bf16.gmra.mrb[136].mxu1 %v14539_v59 }
 0x3e2   : > { %10150 = vmatprep.mubr.msk.bf16.mxu1 %vm14540_vm3, %v7939_v61 }
 0x3e8   : > { %v10460_v15 = vpop.f32.mrb[108].mxu0 }
 0x3e9   : > { %9389 = vmatmul.mubr.bf16.gmra.mrb[140].mxu1 %v14542_v44  ;;  %v10461_v34 = vpop.f32.mrb[109].mxu0 }
 0x3ea   : > { %10151 = vmatprep.mubr.msk.bf16.mxu1 %vm14543_vm11, %v7949_v62  ;;  %v10462_v7 = vadd.f32 %v10461_v34, %v10460_v15  ;;  %v10463_v55 = vpop.f32.mrb[110].mxu0 }
 0x3eb   : > { %v10464_v33 = vpop.f32.mrb[111].mxu0 }
 0x3ec   : > { %v14153_v16 = vadd.f32 %v10462_v7, %v8795_v23  ;;  %v10465_v1 = vadd.f32 %v10464_v33, %v10463_v55  ;;  %v14547_v55 = vld [vmem:[#allocation9_spill] sm:$0xff] }
 0x3ee   : > { %v14155_v29 = vadd.f32 %v10465_v1, %v8798_v13 }
 0x3f0   : > { %v10466_v54 = vpop.f32.mrb[112].mxu0 }
 0x3f1   : > { %9397 = vmatmul.mubr.bf16.gmra.mrb[144].mxu1 %v10061_v10  ;;  %v10467_v47 = vpop.f32.mrb[113].mxu0 }
 0x3f2   : > { %10152 = vmatprep.mubr.msk.bf16.mxu1 %vm14544_vm6, %v7959_v32  ;;  %v10468_v2 = vadd.f32 %v10467_v47, %v10466_v54  ;;  %v10469_v14 = vpop.f32.mrb[114].mxu0 }
 0x3f3   : > { %v10470_v21 = vpop.f32.mrb[115].mxu0 }
 0x3f4   : > { %v10354_v51 = vpop.f32.mrb[40].mxu1  ;;  %v10471_v8 = vadd.f32 %v10470_v21, %v10469_v14 }
 0x3f5   : > { %v10355_v60 = vpop.f32.mrb[41].mxu1 }
 0x3f6   : > { %v10356_v20 = vadd.f32 %v10355_v60, %v10354_v51  ;;  %v10357_v52 = vpop.f32.mrb[42].mxu1 }
 0x3f7   : > { %v10358_v57 = vpop.f32.mrb[43].mxu1 }
 0x3f8   : > { %v8803_v36 = vadd.f32 %v13879_v39, %v10356_v20  ;;  %v10359_v42 = vadd.f32 %v10358_v57, %v10357_v52  ;;  %v10600_v12 = vpop.f32.mrb[116].mxu0 }
 0x3f9   : > { %9405 = vmatmul.mubr.bf16.gmra.mrb[148].mxu1 %v10062_v63  ;;  %v10601_v61 = vpop.f32.mrb[117].mxu0  ;;  %v14546_v63 = vld [vmem:[#allocation8_spill] sm:$0xff] }
 0x3fa   : > { %v8806_v37 = vadd.f32 %v13879_v39, %v10359_v42  ;;  %10153 = vmatprep.mubr.msk.bf16.mxu1 %vm14545_vm4, %v7969_v19  ;;  %v14167_v10 = vadd.f32 %v10468_v2, %v8803_v36  ;;  %v10602_v59 = vadd.f32 %v10601_v61, %v10600_v12  ;;  %v10603_v53 = vpop.f32.mrb[118].mxu0  ;;  %v14550_v19 = vcombine.low %v14009_v25, %v14013_v45  ;;  %v14551_v36 = vld [vmem:[#allocation11_spill] sm:$0xff]  ;;  %v7999_v45 = vld [vmem:[#allocation4 + $0x4a8] sm:$0xff] }
 0x3fb   : > { %v10604_v44 = vpop.f32.mrb[119].mxu0 }
 0x3fc   : > { %v10488_v11 = vpop.f32.mrb[44].mxu1  ;;  %v14169_v62 = vadd.f32 %v10471_v8, %v8806_v37  ;;  %v10605_v23 = vadd.f32 %v10604_v44, %v10603_v53 }
 0x3fd   : > { %v10489_v22 = vpop.f32.mrb[45].mxu1 }
 0x3fe   : > { %v10490_v15 = vadd.f32 %v10489_v22, %v10488_v11  ;;  %v10491_v34 = vpop.f32.mrb[46].mxu1 }
 0x3ff   : > { %v10492_v3 = vpop.f32.mrb[47].mxu1 }
 0x400   : > { %v9005_v39 = vadd.f32 %v10490_v15, %v14546_v63  ;;  %v10493_v7 = vadd.f32 %v10492_v3, %v10491_v34  ;;  %v10606_v13 = vpop.f32.mrb[120].mxu0 }
 0x401   : > { %9413 = vmatmul.mubr.bf16.gmra.mrb[152].mxu1 %v10063_v18  ;;  %v10607_v32 = vpop.f32.mrb[121].mxu0  ;;  %v14549_v18 = vld [vmem:[#allocation10_spill] sm:$0xff] }
 0x402   : > { %v9008_v33 = vadd.f32 %v10493_v7, %v14547_v55  ;;  %10154 = vmatprep.mubr.msk.bf16.mxu1 %vm14548_vm7, %v7979_v58  ;;  %v14177_v1 = vadd.f32 %v10602_v59, %v9005_v39  ;;  %v10608_v47 = vadd.f32 %v10607_v32, %v10606_v13  ;;  %v10609_v51 = vpop.f32.mrb[122].mxu0  ;;  %v14553_v58 = vld [vmem:[#allocation12_spill] sm:$0xff]  ;;  %v14554_v7 = vcombine.low %v14040_v50, %v14044_v38  ;;  %v14555_v55 = vld [vmem:[#allocation13_spill] sm:$0xff]  ;;  %v8009_v38 = vld [vmem:[#allocation4 + $0x4f8] sm:$0xff] }
 0x403   : > { %v10610_v60 = vpop.f32.mrb[123].mxu0 }
 0x404   : > { %v10494_v54 = vpop.f32.mrb[48].mxu1  ;;  %v14179_v2 = vadd.f32 %v10605_v23, %v9008_v33  ;;  %v10611_v52 = vadd.f32 %v10610_v60, %v10609_v51 }
 0x405   : > { %v10495_v14 = vpop.f32.mrb[49].mxu1 }
 0x406   : > { %v10496_v21 = vadd.f32 %v10495_v14, %v10494_v54  ;;  %v10497_v20 = vpop.f32.mrb[50].mxu1 }
 0x407   : > { %v10498_v6 = vpop.f32.mrb[51].mxu1 }
 0x408   : > { %v9013_v8 = vadd.f32 %v10496_v21, %v14549_v18  ;;  %v10499_v57 = vadd.f32 %v10498_v6, %v10497_v20  ;;  %v10612_v37 = vpop.f32.mrb[124].mxu0  ;;  %v14557_v18 = vld [vmem:[#allocation14_spill] sm:$0xff] }
 0x409   : > { %9421 = vmatmul.mubr.bf16.gmra.mrb[156].mxu1 %v14550_v19  ;;  %v10613_v61 = vpop.f32.mrb[125].mxu0  ;;  %v14558_v19 = vld [vmem:[#allocation15_spill] sm:$0xff] }
 0x40a   : > { %v9016_v42 = vadd.f32 %v10499_v57, %v14551_v36  ;;  %10155 = vmatprep.mubr.msk.bf16.mxu1 %vm14552_vm8, %v7989_v24  ;;  %v14187_v12 = vadd.f32 %v10608_v47, %v9013_v8  ;;  %v10614_v59 = vadd.f32 %v10613_v61, %v10612_v37  ;;  %v10615_v53 = vpop.f32.mrb[126].mxu0 }
 0x40b   : > { %v10616_v15 = vpop.f32.mrb[127].mxu0 }
 0x40c   : > { %v10500_v11 = vpop.f32.mrb[52].mxu1  ;;  %v14189_v22 = vadd.f32 %v10611_v52, %v9016_v42  ;;  %v10617_v3 = vadd.f32 %v10616_v15, %v10615_v53 }
 0x40d   : > { %v10501_v44 = vpop.f32.mrb[53].mxu1 }
 0x40e   : > { %v10502_v34 = vadd.f32 %v10501_v44, %v10500_v11  ;;  %v10503_v23 = vpop.f32.mrb[54].mxu1 }
 0x40f   : > { %v10504_v25 = vpop.f32.mrb[55].mxu1 }
 0x410   : > { %v9021_v63 = vadd.f32 %v10502_v34, %v14553_v58  ;;  %v10505_v39 = vadd.f32 %v10504_v25, %v10503_v23  ;;  %v10618_v13 = vpop.f32.mrb[128].mxu0  ;;  %v14561_v58 = vld [vmem:[#allocation17_spill] sm:$0xff] }
 0x411   : > { %9429 = vmatmul.mubr.bf16.gmra.mrb[160].mxu1 %v14554_v7  ;;  %v10619_v54 = vpop.f32.mrb[129].mxu0 }
 0x412   : > { %v9024_v33 = vadd.f32 %v10505_v39, %v14555_v55  ;;  %10156 = vmatprep.mubr.msk.bf16.mxu1 %vm14556_vm9, %v7999_v45  ;;  %v14197_v32 = vadd.f32 %v10614_v59, %v9021_v63  ;;  %v10620_v51 = vadd.f32 %v10619_v54, %v10618_v13  ;;  %v10621_v14 = vpop.f32.mrb[130].mxu0 }
 0x413   : > { %v10622_v20 = vpop.f32.mrb[131].mxu0 }
 0x414   : > { %v10506_v47 = vpop.f32.mrb[56].mxu1  ;;  %v14199_v60 = vadd.f32 %v10617_v3, %v9024_v33  ;;  %v10623_v24 = vadd.f32 %v10622_v20, %v10621_v14 }
 0x415   : > { %v10507_v21 = vpop.f32.mrb[57].mxu1 }
 0x416   : > { %v10508_v52 = vadd.f32 %v10507_v21, %v10506_v47  ;;  %v10509_v6 = vpop.f32.mrb[58].mxu1 }
 0x417   : > { %v10510_v50 = vpop.f32.mrb[59].mxu1 }
 0x418   : > { %v9029_v8 = vadd.f32 %v10508_v52, %v14557_v18  ;;  %v10511_v57 = vadd.f32 %v10510_v50, %v10509_v6  ;;  %v10624_v42 = vpop.f32.mrb[132].mxu0 }
 0x419   : > { %9437 = vmatmul.mubr.bf16.gmra.mrb[164].mxu1 %v10066_v48  ;;  %v10625_v61 = vpop.f32.mrb[133].mxu0 }
 0x41a   : > { %v9032_v36 = vadd.f32 %v10511_v57, %v14558_v19  ;;  %10157 = vmatprep.mubr.msk.bf16.mxu1 %vm14559_vm2, %v8009_v38  ;;  %v14207_v37 = vadd.f32 %v10620_v51, %v9029_v8  ;;  %v10626_v59 = vadd.f32 %v10625_v61, %v10624_v42  ;;  %v10627_v53 = vpop.f32.mrb[134].mxu0 }
 0x41b   : > { %v10628_v34 = vpop.f32.mrb[135].mxu0 }
 0x41c   : > { %v10512_v11 = vpop.f32.mrb[60].mxu1  ;;  %v14209_v44 = vadd.f32 %v10623_v24, %v9032_v36  ;;  %v10629_v25 = vadd.f32 %v10628_v34, %v10627_v53  ;;  %v14562_v24 = vld [vmem:[#allocation18_spill] sm:$0xff] }
 0x41d   : > { %v10513_v15 = vpop.f32.mrb[61].mxu1 }
 0x41e   : > { %v10514_v23 = vadd.f32 %v10513_v15, %v10512_v11  ;;  %v10515_v3 = vpop.f32.mrb[62].mxu1 }
 0x41f   : > { %v10516_v28 = vpop.f32.mrb[63].mxu1 }
 0x420   : > { %v9037_v48 = vadd.f32 %v10514_v23, %v14560_v26  ;;  %v10517_v45 = vadd.f32 %v10516_v28, %v10515_v3  ;;  %v14564_v23 = vld [vmem:[#allocation20_spill] sm:$0xff]  ;;  %v14565_v28 = vld [vmem:[#allocation21_spill] sm:$0xff] }
 0x421   : > { %9445 = vmatmul.mubr.bf16.gmra.mrb[168].mxu1 %v10067_v30  ;;  %v10630_v39 = vpop.f32.mrb[136].mxu0  ;;  %v14563_v30 = vld [vmem:[#allocation19_spill] sm:$0xff] }
 0x422   : > { %v9040_v63 = vadd.f32 %v10517_v45, %v14561_v58  ;;  %v14216_v7 = vadd.f32 %v10626_v59, %v9037_v48  ;;  %v10631_v55 = vpop.f32.mrb[137].mxu0 }
 0x423   : > { %v10632_v13 = vadd.f32 %v10631_v55, %v10630_v39  ;;  %v10633_v54 = vpop.f32.mrb[138].mxu0 }
 0x424   : > { %v10518_v33 = vpop.f32.mrb[64].mxu1  ;;  %v14218_v47 = vadd.f32 %v10629_v25, %v9040_v63  ;;  %v10634_v14 = vpop.f32.mrb[139].mxu0 }
 0x425   : > { %v10519_v51 = vpop.f32.mrb[65].mxu1  ;;  %v10635_v52 = vadd.f32 %v10634_v14, %v10633_v54 }
 0x426   : > { %v10520_v21 = vadd.f32 %v10519_v51, %v10518_v33  ;;  %v10521_v20 = vpop.f32.mrb[66].mxu1 }
 0x427   : > { %v10522_v6 = vpop.f32.mrb[67].mxu1 }
 0x428   : > { %v9045_v27 = vadd.f32 %v10520_v21, %v14562_v24  ;;  %v10523_v46 = vadd.f32 %v10522_v6, %v10521_v20 }
 0x429   : > { %v10636_v38 = vpop.f32.mrb[140].mxu0 }
 0x42a   : > { %v9048_v50 = vadd.f32 %v10523_v46, %v14563_v30  ;;  %v14222_v18 = vadd.f32 %v10632_v13, %v9045_v27  ;;  %v10637_v8 = vpop.f32.mrb[141].mxu0  ;;  %v14567_v27 = vld [vmem:[#allocation24_spill] sm:$0xff] }
 0x42b   : > { %v10638_v19 = vadd.f32 %v10637_v8, %v10636_v38  ;;  %v10639_v36 = vpop.f32.mrb[142].mxu0 }
 0x42c   : > { %v10524_v57 = vpop.f32.mrb[68].mxu1  ;;  %v14224_v42 = vadd.f32 %v10635_v52, %v9048_v50  ;;  %v10640_v11 = vpop.f32.mrb[143].mxu0  ;;  %v14566_v52 = vld [vmem:[#allocation22_spill] sm:$0xff] }
 0x42d   : > { %v10525_v61 = vpop.f32.mrb[69].mxu1  ;;  %v10641_v15 = vadd.f32 %v10640_v11, %v10639_v36 }
 0x42e   : > { %v10526_v59 = vadd.f32 %v10525_v61, %v10524_v57  ;;  %v10527_v53 = vpop.f32.mrb[70].mxu1 }
 0x42f   : > { %v10528_v34 = vpop.f32.mrb[71].mxu1 }
 0x430   : > { %v9053_v3 = vadd.f32 %v10526_v59, %v14564_v23  ;;  %v10529_v25 = vadd.f32 %v10528_v34, %v10527_v53 }
 0x431   : > { %v10642_v48 = vpop.f32.mrb[144].mxu0 }
 0x432   : > { %v9056_v26 = vadd.f32 %v10529_v25, %v14565_v28  ;;  %v14228_v45 = vadd.f32 %v10638_v19, %v9053_v3  ;;  %v10643_v58 = vpop.f32.mrb[145].mxu0 }
 0x433   : > { %v10644_v39 = vadd.f32 %v10643_v58, %v10642_v48  ;;  %v10645_v55 = vpop.f32.mrb[146].mxu0 }
 0x434   : > { %v10530_v63 = vpop.f32.mrb[72].mxu1  ;;  %v14230_v33 = vadd.f32 %v10641_v15, %v9056_v26  ;;  %v10646_v54 = vpop.f32.mrb[147].mxu0 }
 0x435   : > { %v10531_v13 = vpop.f32.mrb[73].mxu1  ;;  %v10647_v21 = vadd.f32 %v10646_v54, %v10645_v55 }
 0x436   : > { %v10532_v51 = vadd.f32 %v10531_v13, %v10530_v63  ;;  %v10533_v14 = vpop.f32.mrb[74].mxu1 }
 0x437   : > { %v10534_v20 = vpop.f32.mrb[75].mxu1 }
 0x438   : > { %v9061_v6 = vadd.f32 %v10532_v51, %v14566_v52  ;;  %v10535_v24 = vadd.f32 %v10534_v20, %v10533_v14 }
 0x439   : > { %v10648_v30 = vpop.f32.mrb[148].mxu0 }
 0x43a   : > { %v9064_v46 = vadd.f32 %v10535_v24, %v14567_v27  ;;  %v14234_v50 = vadd.f32 %v10644_v39, %v9061_v6  ;;  %v10649_v38 = vpop.f32.mrb[149].mxu0 }
 0x43b   : > { %v10650_v57 = vadd.f32 %v10649_v38, %v10648_v30  ;;  %v10651_v19 = vpop.f32.mrb[150].mxu0 }
 0x43c   : > { %v10536_v8 = vpop.f32.mrb[76].mxu1  ;;  %v14236_v36 = vadd.f32 %v10647_v21, %v9064_v46  ;;  %v10652_v11 = vpop.f32.mrb[151].mxu0 }
 0x43d   : > { %v10537_v61 = vpop.f32.mrb[77].mxu1  ;;  %v10653_v15 = vadd.f32 %v10652_v11, %v10651_v19 }
 0x43e   : > { %v10538_v59 = vadd.f32 %v10537_v61, %v10536_v8  ;;  %v10539_v53 = vpop.f32.mrb[78].mxu1 }
 0x43f   : > { %v10540_v34 = vpop.f32.mrb[79].mxu1 }
 0x440   : > { %v9069_v23 = vadd.f32 %v10538_v59, %v13945_v40  ;;  %v10541_v3 = vadd.f32 %v10540_v34, %v10539_v53 }
 0x441   : > { %v10654_v28 = vpop.f32.mrb[152].mxu0 }
 0x442   : > { %v9072_v25 = vadd.f32 %v10541_v3, %v13963_v4  ;;  %v14240_v26 = vadd.f32 %v10650_v57, %v9069_v23  ;;  %v10655_v48 = vpop.f32.mrb[153].mxu0 }
 0x443   : > { %v10656_v63 = vadd.f32 %v10655_v48, %v10654_v28  ;;  %v10657_v39 = vpop.f32.mrb[154].mxu0 }
 0x444   : > { %v10542_v58 = vpop.f32.mrb[80].mxu1  ;;  %v14242_v55 = vadd.f32 %v10653_v15, %v9072_v25  ;;  %v10658_v54 = vpop.f32.mrb[155].mxu0 }
 0x445   : > { %v10543_v13 = vpop.f32.mrb[81].mxu1  ;;  %v10659_v21 = vadd.f32 %v10658_v54, %v10657_v39 }
 0x446   : > { %v10544_v51 = vadd.f32 %v10543_v13, %v10542_v58  ;;  %v10545_v14 = vpop.f32.mrb[82].mxu1 }
 0x447   : > { %v10546_v20 = vpop.f32.mrb[83].mxu1 }
 0x448   : > { %v9077_v40 = vadd.f32 %v10544_v51, %v14110_v9  ;;  %v10547_v52 = vadd.f32 %v10546_v20, %v10545_v14 }
 0x449   : > { %v10660_v6 = vpop.f32.mrb[156].mxu0 }
 0x44a   : > { %v9080_v4 = vadd.f32 %v10547_v52, %v14113_v0  ;;  %v14246_v24 = vadd.f32 %v10656_v63, %v9077_v40  ;;  %v10661_v27 = vpop.f32.mrb[157].mxu0 }
 0x44b   : > { %v10662_v30 = vadd.f32 %v10661_v27, %v10660_v6  ;;  %v10663_v38 = vpop.f32.mrb[158].mxu0 }
 0x44c   : > { %v10548_v46 = vpop.f32.mrb[84].mxu1  ;;  %v14248_v8 = vadd.f32 %v10659_v21, %v9080_v4  ;;  %v10664_v19 = vpop.f32.mrb[159].mxu0 }
 0x44d   : > { %v10549_v57 = vpop.f32.mrb[85].mxu1  ;;  %v10665_v59 = vadd.f32 %v10664_v19, %v10663_v38 }
 0x44e   : > { %v10550_v61 = vadd.f32 %v10549_v57, %v10548_v46  ;;  %v10551_v11 = vpop.f32.mrb[86].mxu1 }
 0x44f   : > { %v10552_v53 = vpop.f32.mrb[87].mxu1 }
 0x450   : > { %v9085_v9 = vadd.f32 %v10550_v61, %v14018_v31  ;;  %v10553_v15 = vadd.f32 %v10552_v53, %v10551_v11 }
 0x451   : > { %v10666_v34 = vpop.f32.mrb[160].mxu0 }
 0x452   : > { %v9088_v0 = vadd.f32 %v10553_v15, %v14026_v41  ;;  %v14252_v23 = vadd.f32 %v10662_v30, %v9085_v9  ;;  %v10667_v3 = vpop.f32.mrb[161].mxu0 }
 0x453   : > { %v10668_v28 = vadd.f32 %v10667_v3, %v10666_v34  ;;  %v10669_v48 = vpop.f32.mrb[162].mxu0 }
 0x454   : > { %v10554_v25 = vpop.f32.mrb[88].mxu1  ;;  %v14254_v58 = vadd.f32 %v10665_v59, %v9088_v0  ;;  %v10670_v39 = vpop.f32.mrb[163].mxu0 }
 0x455   : > { %v10555_v63 = vpop.f32.mrb[89].mxu1  ;;  %v10671_v51 = vadd.f32 %v10670_v39, %v10669_v48 }
 0x456   : > { %v10556_v13 = vadd.f32 %v10555_v63, %v10554_v25  ;;  %v10557_v54 = vpop.f32.mrb[90].mxu1 }
 0x457   : > { %v10558_v14 = vpop.f32.mrb[91].mxu1 }
 0x458   : > { %v9093_v31 = vadd.f32 %v10556_v13, %v14128_v56  ;;  %v10559_v21 = vadd.f32 %v10558_v14, %v10557_v54 }
 0x459   : > { %v10672_v20 = vpop.f32.mrb[164].mxu0 }
 0x45a   : > { %v9096_v41 = vadd.f32 %v10559_v21, %v14131_v49  ;;  %v14258_v40 = vadd.f32 %v10668_v28, %v9093_v31  ;;  %v10673_v52 = vpop.f32.mrb[165].mxu0 }
 0x45b   : > { %v10674_v6 = vadd.f32 %v10673_v52, %v10672_v20  ;;  %v10675_v27 = vpop.f32.mrb[166].mxu0 }
 0x45c   : > { %v10560_v4 = vpop.f32.mrb[92].mxu1  ;;  %v14260_v46 = vadd.f32 %v10671_v51, %v9096_v41  ;;  %v10676_v38 = vpop.f32.mrb[167].mxu0 }
 0x45d   : > { %v10561_v30 = vpop.f32.mrb[93].mxu1  ;;  %v10677_v61 = vadd.f32 %v10676_v38, %v10675_v27 }
 0x45e   : > { %v10562_v57 = vadd.f32 %v10561_v30, %v10560_v4  ;;  %v10563_v19 = vpop.f32.mrb[94].mxu1 }
 0x45f   : > { %v10564_v11 = vpop.f32.mrb[95].mxu1 }
 0x460   : > { %v9101_v56 = vadd.f32 %v10562_v57, %v14097_v17  ;;  %v10565_v59 = vadd.f32 %v10564_v11, %v10563_v19 }
 0x461   : > { %v10678_v53 = vpop.f32.mrb[168].mxu0 }
 0x462   : > { %v9104_v49 = vadd.f32 %v10565_v59, %v14104_v35  ;;  %v14264_v9 = vadd.f32 %v10674_v6, %v9101_v56  ;;  %v10679_v15 = vpop.f32.mrb[169].mxu0 }
 0x463   : > { %v10680_v34 = vadd.f32 %v10679_v15, %v10678_v53  ;;  %v10681_v3 = vpop.f32.mrb[170].mxu0 }
 0x464   : > { %v10566_v0 = vpop.f32.mrb[96].mxu1  ;;  %v14266_v25 = vadd.f32 %v10677_v61, %v9104_v49  ;;  %v10682_v48 = vpop.f32.mrb[171].mxu0 }
 0x465   : > { %v10567_v28 = vpop.f32.mrb[97].mxu1  ;;  %v10683_v13 = vadd.f32 %v10682_v48, %v10681_v3 }
 0x466   : > { %v10568_v63 = vadd.f32 %v10567_v28, %v10566_v0  ;;  %v10569_v39 = vpop.f32.mrb[98].mxu1 }
 0x467   : > { %v10570_v54 = vpop.f32.mrb[99].mxu1 }
 0x468   : > { %v9109_v17 = vadd.f32 %v10568_v63, %v14143_v43  ;;  %v10571_v51 = vadd.f32 %v10570_v54, %v10569_v39 }
 0x469   : > { %v10684_v14 = vpop.f32.mrb[172].mxu0 }
 0x46a   : > { %v9112_v35 = vadd.f32 %v10571_v51, %v14145_v5  ;;  %v14270_v31 = vadd.f32 %v10680_v34, %v9109_v17  ;;  %v10685_v21 = vpop.f32.mrb[173].mxu0 }
 0x46b   : > { %v10686_v20 = vadd.f32 %v10685_v21, %v10684_v14  ;;  %v10687_v52 = vpop.f32.mrb[174].mxu0 }
 0x46c   : > { %v10572_v41 = vpop.f32.mrb[100].mxu1  ;;  %v14272_v4 = vadd.f32 %v10683_v13, %v9112_v35  ;;  %v10688_v27 = vpop.f32.mrb[175].mxu0 }
 0x46d   : > { %v10573_v6 = vpop.f32.mrb[101].mxu1  ;;  %v10689_v57 = vadd.f32 %v10688_v27, %v10687_v52 }
 0x46e   : > { %v10574_v30 = vadd.f32 %v10573_v6, %v10572_v41  ;;  %v10575_v38 = vpop.f32.mrb[102].mxu1 }
 0x46f   : > { %v10576_v19 = vpop.f32.mrb[103].mxu1 }
 0x470   : > { %v9117_v43 = vadd.f32 %v10574_v30, %v14153_v16  ;;  %v10577_v61 = vadd.f32 %v10576_v19, %v10575_v38 }
 0x471   : > { %v10690_v11 = vpop.f32.mrb[176].mxu0 }
 0x472   : > { %v9120_v5 = vadd.f32 %v10577_v61, %v14155_v29  ;;  %v14276_v56 = vadd.f32 %v10686_v20, %v9117_v43  ;;  %v10691_v59 = vpop.f32.mrb[177].mxu0 }
 0x473   : > { %v10692_v53 = vadd.f32 %v10691_v59, %v10690_v11  ;;  %v10693_v15 = vpop.f32.mrb[178].mxu0 }
 0x474   : > { %v10578_v49 = vpop.f32.mrb[104].mxu1  ;;  %v14278_v0 = vadd.f32 %v10689_v57, %v9120_v5  ;;  %v10694_v3 = vpop.f32.mrb[179].mxu0 }
 0x475   : > { %v10579_v34 = vpop.f32.mrb[105].mxu1  ;;  %v10695_v63 = vadd.f32 %v10694_v3, %v10693_v15 }
 0x476   : > { %v10580_v28 = vadd.f32 %v10579_v34, %v10578_v49  ;;  %v10581_v48 = vpop.f32.mrb[106].mxu1 }
 0x477   : > { %v10582_v16 = vpop.f32.mrb[107].mxu1 }
 0x478   : > { %v9125_v39 = vadd.f32 %v10580_v28, %v14167_v10  ;;  %v10583_v29 = vadd.f32 %v10582_v16, %v10581_v48 }
 0x47a   : > { %v9128_v13 = vadd.f32 %v10583_v29, %v14169_v62  ;;  %v14283_v54 = vadd.f32 %v10692_v53, %v9125_v39 }
 0x47c   : > { %v9326_v17 = vpop.f32.mrb[108].mxu1  ;;  %v14287_v51 = vadd.f32 %v10695_v63, %v9128_v13 }
 0x47d   : > { %v9327_v35 = vadd.f32 %v9326_v17, %v14177_v1  ;;  %v9328_v14 = vpop.f32.mrb[109].mxu1 }
 0x47e   : > { %v9329_v21 = vpop.f32.mrb[110].mxu1 }
 0x47f   : > { %v9453_v41 = vmax.f32 %v9327_v35, 0.0  ;;  %v9330_v20 = vadd.f32 %v9329_v21, %v14179_v2  ;;  %v9331_v52 = vpop.f32.mrb[111].mxu1 }
 0x481   : > { %9485 = vst [vmem:[%s14291_s16] sm:$0xff] %v9453_v41  ;;  %v9454_v10 = vmax.f32 %v9330_v20, 0.0 }
 0x483   : > { %9486 = vst [vmem:[%s14291_s16 + $0x8] sm:$0xff] %v9454_v10 }
 0x484   : > { %v9334_v62 = vpop.f32.mrb[112].mxu1 }
 0x485   : > { %v9335_v6 = vadd.f32 %v9334_v62, %v14187_v12  ;;  %v9336_v1 = vpop.f32.mrb[113].mxu1 }
 0x486   : > { %v9337_v27 = vpop.f32.mrb[114].mxu1 }
 0x487   : > { %v9455_v30 = vmax.f32 %v9335_v6, 0.0  ;;  %v9338_v2 = vadd.f32 %v9337_v27, %v14189_v22  ;;  %v9339_v38 = vpop.f32.mrb[115].mxu1 }
 0x489   : > { %9487 = vst [vmem:[%s14291_s16 + $0x10] sm:$0xff] %v9455_v30  ;;  %v9456_v57 = vmax.f32 %v9338_v2, 0.0 }
 0x48b   : > { %9488 = vst [vmem:[%s14291_s16 + $0x18] sm:$0xff] %v9456_v57 }
 0x48c   : > { %v9342_v19 = vpop.f32.mrb[116].mxu1 }
 0x48d   : > { %v9343_v43 = vadd.f32 %v9342_v19, %v14197_v32  ;;  %v9344_v61 = vpop.f32.mrb[117].mxu1 }
 0x48e   : > { %v9345_v5 = vpop.f32.mrb[118].mxu1 }
 0x48f   : > { %v9457_v11 = vmax.f32 %v9343_v43, 0.0  ;;  %v9346_v12 = vadd.f32 %v9345_v5, %v14199_v60  ;;  %v9347_v59 = vpop.f32.mrb[119].mxu1 }
 0x491   : > { %9489 = vst [vmem:[%s14291_s16 + $0x20] sm:$0xff] %v9457_v11  ;;  %v9458_v49 = vmax.f32 %v9346_v12, 0.0 }
 0x493   : > { %9490 = vst [vmem:[%s14291_s16 + $0x28] sm:$0xff] %v9458_v49 }
 0x494   : > { %v9350_v53 = vpop.f32.mrb[120].mxu1 }
 0x495   : > { %v9351_v22 = vadd.f32 %v9350_v53, %v14207_v37  ;;  %v9352_v15 = vpop.f32.mrb[121].mxu1 }
 0x496   : > { %v9353_v34 = vpop.f32.mrb[122].mxu1 }
 0x497   : > { %v9459_v3 = vmax.f32 %v9351_v22, 0.0  ;;  %v9354_v32 = vadd.f32 %v9353_v34, %v14209_v44  ;;  %v9355_v28 = vpop.f32.mrb[123].mxu1 }
 0x499   : > { %9491 = vst [vmem:[%s14291_s16 + $0x30] sm:$0xff] %v9459_v3  ;;  %v9460_v48 = vmax.f32 %v9354_v32, 0.0 }
 0x49b   : > { %9492 = vst [vmem:[%s14291_s16 + $0x38] sm:$0xff] %v9460_v48 }
 0x49c   : > { %v9358_v63 = vpop.f32.mrb[124].mxu1 }
 0x49d   : > { %v9359_v60 = vadd.f32 %v9358_v63, %v14216_v7  ;;  %v9360_v16 = vpop.f32.mrb[125].mxu1 }
 0x49e   : > { %v9361_v39 = vpop.f32.mrb[126].mxu1 }
 0x49f   : > { %v9461_v29 = vmax.f32 %v9359_v60, 0.0  ;;  %v9362_v37 = vadd.f32 %v9361_v39, %v14218_v47  ;;  %v9363_v13 = vpop.f32.mrb[127].mxu1 }
 0x4a1   : > { %9493 = vst [vmem:[%s14291_s16 + $0x40] sm:$0xff] %v9461_v29  ;;  %v9462_v17 = vmax.f32 %v9362_v37, 0.0 }
 0x4a3   : > { %9494 = vst [vmem:[%s14291_s16 + $0x48] sm:$0xff] %v9462_v17 }
 0x4a4   : > { %v9366_v35 = vpop.f32.mrb[128].mxu1 }
 0x4a5   : > { %v9367_v44 = vadd.f32 %v9366_v35, %v14222_v18  ;;  %v9368_v14 = vpop.f32.mrb[129].mxu1 }
 0x4a6   : > { %v9369_v21 = vpop.f32.mrb[130].mxu1 }
 0x4a7   : > { %v9463_v41 = vmax.f32 %v9367_v44, 0.0  ;;  %v9370_v7 = vadd.f32 %v9369_v21, %v14224_v42  ;;  %v9371_v20 = vpop.f32.mrb[131].mxu1 }
 0x4a9   : > { %9495 = vst [vmem:[%s14291_s16 + $0x50] sm:$0xff] %v9463_v41  ;;  %v9464_v52 = vmax.f32 %v9370_v7, 0.0 }
 0x4ab   : > { %9496 = vst [vmem:[%s14291_s16 + $0x58] sm:$0xff] %v9464_v52 }
 0x4ac   : > { %v9374_v10 = vpop.f32.mrb[132].mxu1 }
 0x4ad   : > { %v9375_v47 = vadd.f32 %v9374_v10, %v14228_v45  ;;  %v9376_v62 = vpop.f32.mrb[133].mxu1 }
 0x4ae   : > { %v9377_v6 = vpop.f32.mrb[134].mxu1 }
 0x4af   : > { %v9465_v1 = vmax.f32 %v9375_v47, 0.0  ;;  %v9378_v18 = vadd.f32 %v9377_v6, %v14230_v33  ;;  %v9379_v27 = vpop.f32.mrb[135].mxu1 }
 0x4b1   : > { %9497 = vst [vmem:[%s14291_s16 + $0x60] sm:$0xff] %v9465_v1  ;;  %v9466_v30 = vmax.f32 %v9378_v18, 0.0 }
 0x4b3   : > { %9498 = vst [vmem:[%s14291_s16 + $0x68] sm:$0xff] %v9466_v30 }
 0x4b4   : > { %v9382_v2 = vpop.f32.mrb[136].mxu1 }
 0x4b5   : > { %v9383_v42 = vadd.f32 %v9382_v2, %v14234_v50  ;;  %v9384_v38 = vpop.f32.mrb[137].mxu1 }
 0x4b6   : > { %v9385_v57 = vpop.f32.mrb[138].mxu1 }
 0x4b7   : > { %v9467_v19 = vmax.f32 %v9383_v42, 0.0  ;;  %v9386_v45 = vadd.f32 %v9385_v57, %v14236_v36  ;;  %v9387_v43 = vpop.f32.mrb[139].mxu1 }
 0x4b9   : > { %9499 = vst [vmem:[%s14291_s16 + $0x70] sm:$0xff] %v9467_v19  ;;  %v9468_v61 = vmax.f32 %v9386_v45, 0.0 }
 0x4bb   : > { %9500 = vst [vmem:[%s14291_s16 + $0x78] sm:$0xff] %v9468_v61 }
 0x4bc   : > { %v9390_v5 = vpop.f32.mrb[140].mxu1 }
 0x4bd   : > { %v9391_v33 = vadd.f32 %v9390_v5, %v14240_v26  ;;  %v9392_v11 = vpop.f32.mrb[141].mxu1 }
 0x4be   : > { %v9393_v12 = vpop.f32.mrb[142].mxu1 }
 0x4bf   : > { %v9469_v59 = vmax.f32 %v9391_v33, 0.0  ;;  %v9394_v50 = vadd.f32 %v9393_v12, %v14242_v55  ;;  %v9395_v49 = vpop.f32.mrb[143].mxu1 }
 0x4c1   : > { %9501 = vst [vmem:[%s14291_s16 + $0x80] sm:$0xff] %v9469_v59  ;;  %v9470_v53 = vmax.f32 %v9394_v50, 0.0 }
 0x4c3   : > { %9502 = vst [vmem:[%s14291_s16 + $0x88] sm:$0xff] %v9470_v53 }
 0x4c4   : > { %v9398_v22 = vpop.f32.mrb[144].mxu1 }
 0x4c5   : > { %v9399_v36 = vadd.f32 %v9398_v22, %v14246_v24  ;;  %v9400_v15 = vpop.f32.mrb[145].mxu1 }
 0x4c6   : > { %v9401_v34 = vpop.f32.mrb[146].mxu1 }
 0x4c7   : > { %v9471_v3 = vmax.f32 %v9399_v36, 0.0  ;;  %v9402_v26 = vadd.f32 %v9401_v34, %v14248_v8  ;;  %v9403_v32 = vpop.f32.mrb[147].mxu1 }
 0x4c9   : > { %9503 = vst [vmem:[%s14291_s16 + $0x90] sm:$0xff] %v9471_v3  ;;  %v9472_v28 = vmax.f32 %v9402_v26, 0.0 }
 0x4cb   : > { %9504 = vst [vmem:[%s14291_s16 + $0x98] sm:$0xff] %v9472_v28 }
 0x4cc   : > { %v9406_v48 = vpop.f32.mrb[148].mxu1 }
 0x4cd   : > { %v9407_v55 = vadd.f32 %v9406_v48, %v14252_v23  ;;  %v9408_v63 = vpop.f32.mrb[149].mxu1 }
 0x4ce   : > { %v9409_v60 = vpop.f32.mrb[150].mxu1 }
 0x4cf   : > { %v9473_v16 = vmax.f32 %v9407_v55, 0.0  ;;  %v9410_v24 = vadd.f32 %v9409_v60, %v14254_v58  ;;  %v9411_v39 = vpop.f32.mrb[151].mxu1 }
 0x4d1   : > { %9505 = vst [vmem:[%s14291_s16 + $0xa0] sm:$0xff] %v9473_v16  ;;  %v9474_v29 = vmax.f32 %v9410_v24, 0.0 }
 0x4d3   : > { %9506 = vst [vmem:[%s14291_s16 + $0xa8] sm:$0xff] %v9474_v29 }
 0x4d4   : > { %v9414_v37 = vpop.f32.mrb[152].mxu1 }
 0x4d5   : > { %v9415_v8 = vadd.f32 %v9414_v37, %v14258_v40  ;;  %v9416_v13 = vpop.f32.mrb[153].mxu1 }
 0x4d6   : > { %v9417_v17 = vpop.f32.mrb[154].mxu1 }
 0x4d7   : > { %v9475_v35 = vmax.f32 %v9415_v8, 0.0  ;;  %v9418_v23 = vadd.f32 %v9417_v17, %v14260_v46  ;;  %v9419_v44 = vpop.f32.mrb[155].mxu1 }
 0x4d9   : > { %9507 = vst [vmem:[%s14291_s16 + $0xb0] sm:$0xff] %v9475_v35  ;;  %v9476_v14 = vmax.f32 %v9418_v23, 0.0 }
 0x4db   : > { %9508 = vst [vmem:[%s14291_s16 + $0xb8] sm:$0xff] %v9476_v14 }
 0x4dc   : > { %v9422_v21 = vpop.f32.mrb[156].mxu1 }
 0x4dd   : > { %v9423_v58 = vadd.f32 %v9422_v21, %v14264_v9  ;;  %v9424_v41 = vpop.f32.mrb[157].mxu1 }
 0x4de   : > { %v9425_v7 = vpop.f32.mrb[158].mxu1 }
 0x4df   : > { %v9477_v20 = vmax.f32 %v9423_v58, 0.0  ;;  %v9426_v40 = vadd.f32 %v9425_v7, %v14266_v25  ;;  %v9427_v52 = vpop.f32.mrb[159].mxu1 }
 0x4e1   : > { %9509 = vst [vmem:[%s14291_s16 + $0xc0] sm:$0xff] %v9477_v20  ;;  %v9478_v10 = vmax.f32 %v9426_v40, 0.0 }
 0x4e3   : > { %9510 = vst [vmem:[%s14291_s16 + $0xc8] sm:$0xff] %v9478_v10 }
 0x4e4   : > { %v9430_v47 = vpop.f32.mrb[160].mxu1 }
 0x4e5   : > { %v9431_v46 = vadd.f32 %v9430_v47, %v14270_v31  ;;  %v9432_v62 = vpop.f32.mrb[161].mxu1 }
 0x4e6   : > { %v9433_v6 = vpop.f32.mrb[162].mxu1 }
 0x4e7   : > { %v9479_v1 = vmax.f32 %v9431_v46, 0.0  ;;  %v9434_v9 = vadd.f32 %v9433_v6, %v14272_v4  ;;  %v9435_v18 = vpop.f32.mrb[163].mxu1 }
 0x4e9   : > { %9511 = vst [vmem:[%s14291_s16 + $0xd0] sm:$0xff] %v9479_v1  ;;  %v9480_v27 = vmax.f32 %v9434_v9, 0.0 }
 0x4eb   : > { %9512 = vst [vmem:[%s14291_s16 + $0xd8] sm:$0xff] %v9480_v27 }
 0x4ec   : > { %v9438_v25 = vpop.f32.mrb[164].mxu1 }
 0x4ed   : > { %v9439_v30 = vadd.f32 %v9438_v25, %v14276_v56  ;;  %v9440_v2 = vpop.f32.mrb[165].mxu1 }
 0x4ee   : > { %v9441_v42 = vpop.f32.mrb[166].mxu1 }
 0x4ef   : > { %v9481_v38 = vmax.f32 %v9439_v30, 0.0  ;;  %v9442_v31 = vadd.f32 %v9441_v42, %v14278_v0  ;;  %v9443_v57 = vpop.f32.mrb[167].mxu1 }
 0x4f1   : > { %9513 = vst [vmem:[%s14291_s16 + $0xe0] sm:$0xff] %v9481_v38  ;;  %v9482_v19 = vmax.f32 %v9442_v31, 0.0 }
 0x4f3   : > { %9514 = vst [vmem:[%s14291_s16 + $0xe8] sm:$0xff] %v9482_v19 }
 0x4f4   : > { %v9446_v4 = vpop.f32.mrb[168].mxu1 }
 0x4f5   : > { %v9447_v45 = vadd.f32 %v9446_v4, %v14283_v54  ;;  %v9448_v43 = vpop.f32.mrb[169].mxu1 }
 0x4f6   : > { %v9449_v61 = vpop.f32.mrb[170].mxu1 }
 0x4f7   : > { %v9483_v56 = vmax.f32 %v9447_v45, 0.0  ;;  %v9450_v5 = vadd.f32 %v9449_v61, %v14287_v51  ;;  %v9451_v33 = vpop.f32.mrb[171].mxu1 }
 0x4f9   : > { %9515 = vst [vmem:[%s14291_s16 + $0xf0] sm:$0xff] %v9483_v56  ;;  %v9484_v0 = vmax.f32 %v9450_v5, 0.0 }
 0x4fb   : > { %9516 = vst [vmem:[%s14291_s16 + $0xf8] sm:$0xff] %v9484_v0 }
 0x4fc   : > { %11052 = shalt.err (!%p11049_p3)
}
 0x4fd   : > { %s11053_s23 = scalar_lea.hbm %s14358_s15, 4096  ;;  %s11057_s9 = scalar_lea.hbm %s14413_s5, 8192 }
 0x4fe   : > { %p11054_p4 = scmp.ne.s32.totalorder %s14358_s15, %s11053_s23  ;;  %p11058_p9 = scmp.lt.u32.totalorder %s14358_s15, %s14413_s5 }
 0x4ff   : > { %p11059_p10 = scmp.lt.u32.totalorder %s11057_s9, %s11053_s23  ;;  %p11061_p12 = scmp.lt.u32.totalorder %s11053_s23, %s14358_s15 }
 0x500   : > { %p11055_p7 = pnand %p11054_p4, %p11182_p5 }
 0x501   : > { %p11060_p11 = por %p11059_p10, %p11058_p9 }
 0x502   : > { %p11056_p8 = pneg %p11055_p7 }
 0x503   : > { %p11062_p13 = por %p11061_p12, %p11060_p11 }
 0x505   : > { %p11063_p0 = pnand %p11062_p13, %p11056_p8 }
 0x507   : > { %11066 = shalt.err (!%p11063_p0)
}
 0x508   : > { %s11113_s17 = smov 128  }
 0x509   : > { %10751 = dma.vmem_to_hbm [thread:$0]  (%p11182_p5), %s14361_s30, 4096, %s14358_s15, %s14366_s22, %s11113_s17, %s11113_s17, %s11105_s11  }
 0x50a PF: > { %p10757_p1 = scmp.ge.s32.totalorder %s11101_s21, 2  ;;  %s9546_s6 = sand.u32 1, %s11089_s18  }
 0x50b   : > { %s9547_s7 = scalar_lea.sflag [#allocation6], %s9546_s6 }
 0x50c   : > { %p10754_p2 = pnand %p10757_p1, %p11186_p6 }
 0x50e   : > { %11084 = dma.done.wait (!%p10754_p2), %s9547_s7, 4096  }
 0x50f   : > { %11086 = vsyncadd (!%p10754_p2), %s9547_s7, 4294963200  ;;  %p15_p3 = scmp.ge.s32.totalorder %s11169_s24, 4   ;;  %s14568_s18 = smov %s11093_s19 }
 0x510   : > { %s14569_s19 = smov %s11097_s20  ;;  %s14570_s20 = smov %s11180_s27 }
 0x511   : > { %s14571_s21 = smov %s11169_s24  ;;  %17 = sbr.rel (!%p15_p3) target bundleno = 3 (0x3), region = 81 }
 0x518   :  { %9552 = vsyncpa [#allocation6], 1 }
 0x519   :  { %9554 = vsyncpa [#allocation6 + $0x1], 1 }

</bundles_post_ra>
